<compile_context>
chip_gen: v7x
topology: tpu7x:2x2x1
jax: 0.10.0
libtpu: 0.0.40
codegen_flags: <defaults>
</compile_context>

<pallas_src>
import numpy as np
import jax
import jax.numpy as jnp
from jax.experimental import pallas as pl
from jax.experimental.pallas import tpu as pltpu

NUM_FEATURES = 14
EMBED_DIM = 16
PROJECT_DIM = 4
FMB_UNITS = (40, 40, 40)
FMB_DIM = 40
COMPRESSED_DIM = 40
D = NUM_FEATURES * EMBED_DIM          # 224
FP = NUM_FEATURES * PROJECT_DIM       # 56
LN_EPS = 1e-5


# ---------------------------------------------------------------------------
# Host-side structured matrices that turn the per-sample FM contractions into
# large flat matmuls (batch folded into the MXU M dimension):
#   projected[b, p*E+e] = sum_f x[b, f*E+e] * proj[f, p]            ->  x @ W1
#   rep_p[b, f*E+e]     = projected[b, p*E+e]                       ->  projected @ T[p]
#   fm[b, f*P+p]        = sum_e x[b, f*E+e] * rep_p[b, f*E+e]       ->  (x * rep_p) @ S[p]
# which reproduces torch's  x_fm @ (x_fm^T @ proj)  (flattened f-major, p-minor).
# ---------------------------------------------------------------------------
def _build_T():
    t = np.zeros((PROJECT_DIM, PROJECT_DIM * EMBED_DIM, D), np.float32)
    eye = np.eye(EMBED_DIM, dtype=np.float32)
    for p in range(PROJECT_DIM):
        for f in range(NUM_FEATURES):
            t[p, p * EMBED_DIM:(p + 1) * EMBED_DIM,
              f * EMBED_DIM:(f + 1) * EMBED_DIM] = eye
    return t


def _build_S():
    s = np.zeros((PROJECT_DIM, D, FP), np.float32)
    for p in range(PROJECT_DIM):
        for f in range(NUM_FEATURES):
            for e in range(EMBED_DIM):
                s[p, f * EMBED_DIM + e, f * PROJECT_DIM + p] = 1.0
    return s


_T_NP = _build_T()
_S_NP = _build_S()


def _layer_norm(x, gamma, beta):
    mean = jnp.mean(x, axis=-1, keepdims=True)
    c = x - mean
    var = jnp.mean(c * c, axis=-1, keepdims=True)
    return c * jax.lax.rsqrt(var + LN_EPS) * gamma + beta


def wukong_kernel(x_ref, w1_ref, t_ref, s_ref, wmlp_ref, wl_ref, wt_ref,
                  bvec_ref, o_ref):
    f32 = jnp.float32
    cdt = x_ref.dtype                     # MXU input dtype (bf16 or f32)
    U = FMB_DIM                           # 40

    x_c = x_ref[...]                      # (tb, 224) compute dtype
    x32 = x_c.astype(f32)                 # f32 copy for VPU / LN / residual

    bv = bvec_ref[...]                    # (10, 224) f32, zero-padded rows
    ln1_g, ln1_b = bv[0:1, :FP], bv[1:2, :FP]
    b0, b1 = bv[2:3, :U], bv[3:4, :U]
    b2, b3 = bv[4:5, :U], bv[5:6, :U]
    bl = bv[6:7, :U]
    bt, ln2_g, ln2_b = bv[7:8, :], bv[8:9, :], bv[9:10, :]

    # ---- FactorizationMachineBlock: x_fm @ (x_fm^T @ proj), as flat matmuls ----
    projected = jnp.dot(x_c, w1_ref[...], preferred_element_type=f32)     # (tb, P*E)
    projected_c = projected.astype(cdt)
    fm = jnp.zeros((x_c.shape[0], FP), f32)
    for p in range(PROJECT_DIM):
        rep = jnp.dot(projected_c, t_ref[p], preferred_element_type=f32)  # (tb, 224)
        prod = (x32 * rep).astype(cdt)                                    # f32 VPU mul
        fm = fm + jnp.dot(prod, s_ref[p], preferred_element_type=f32)     # (tb, 56)

    # ---- FMB: LayerNorm + MLP + ReLU ----
    wm = wmlp_ref[...]                    # (4, 56, 40) packed MLP weights
    h = _layer_norm(fm, ln1_g, ln1_b)
    h = jnp.maximum(jnp.dot(h.astype(cdt), wm[0], preferred_element_type=f32) + b0, 0.0)
    h = jnp.maximum(jnp.dot(h.astype(cdt), wm[1, :U], preferred_element_type=f32) + b1, 0.0)
    h = jnp.maximum(jnp.dot(h.astype(cdt), wm[2, :U], preferred_element_type=f32) + b2, 0.0)
    h = jnp.dot(h.astype(cdt), wm[3, :U], preferred_element_type=f32) + b3
    fmb = jnp.maximum(h, 0.0)             # (tb, 40)

    # ---- LCB (Linear + Dropout) ----
    # TODO(synk): nn.Dropout is an inference-mode identity here (no in-kernel RNG mask).
    lcb = jnp.dot(x_c, wl_ref[...], preferred_element_type=f32) + bl      # (tb, 40)

    # ---- transform(cat([fmb, lcb])): packed (80, 224) weight, split in-kernel ----
    wt = wt_ref[...]
    t = (jnp.dot(fmb.astype(cdt), wt[:U], preferred_element_type=f32)
         + jnp.dot(lcb.astype(cdt), wt[U:], preferred_element_type=f32) + bt)

    # ---- residual add + LayerNorm ----
    o_ref[...] = _layer_norm(t + x32, ln2_g, ln2_b).astype(o_ref.dtype)


def _pack_params(params, cdt):
    prm = params
    F, E, P = NUM_FEATURES, EMBED_DIM, PROJECT_DIM

    # W1[(f*E+e), (p*E+e)] = proj[f, p]  (zero elsewhere)
    eye = jnp.eye(E, dtype=jnp.float32)
    w1 = (prm['proj'].astype(jnp.float32)[:, None, :, None]
          * eye[None, :, None, :]).reshape(F * E, P * E)

    def pad_rows(w, rows):
        return jnp.pad(w, ((0, rows - w.shape[0]), (0, 0)))

    wmlp = jnp.stack([pad_rows(prm['w0'], FP), pad_rows(prm['w1'], FP),
                      pad_rows(prm['w2'], FP), pad_rows(prm['w3'], FP)])

    wt = jnp.concatenate([prm['wt_f'], prm['wt_l']], axis=0)          # (80, 224)

    def row(v):
        v = jnp.reshape(v, (-1,)).astype(jnp.float32)
        return jnp.pad(v, (0, D - v.shape[0]))

    bvec = jnp.stack([row(prm['ln1_g']), row(prm['ln1_b']),
                      row(prm['b0']), row(prm['b1']), row(prm['b2']), row(prm['b3']),
                      row(prm['bl']), row(prm['bt']),
                      row(prm['ln2_g']), row(prm['ln2_b'])])          # (10, 224) f32

    return (w1.astype(cdt),
            jnp.asarray(_T_NP, dtype=cdt),
            jnp.asarray(_S_NP, dtype=cdt),
            wmlp.astype(cdt),
            prm['wl'].astype(cdt),
            wt.astype(cdt),
            bvec)  # biases / LayerNorm params stay f32


def wukong_layer(x, params, *, tb=256, use_bf16=True):
    """Fused WuKongLayer forward.  x: (B, NUM_FEATURES*EMBED_DIM) float32 -> float32."""
    B, Din = x.shape
    assert Din == D
    cdt = jnp.bfloat16 if use_bf16 else jnp.float32

    # Batch tile: multiple of 8, capped by the (padded) batch; pad ragged batches.
    tbe = min(tb, -(-B // 8) * 8)
    tbe = max(8, (tbe // 8) * 8)
    Bp = -(-B // tbe) * tbe
    xp = x if Bp == B else jnp.pad(x, ((0, Bp - B), (0, 0)))
    xp = xp.astype(cdt)

    packed = _pack_params(params, cdt)

    def const_spec(a):
        return pl.BlockSpec(a.shape, lambda i, nd=a.ndim: (0,) * nd)

    out = pl.pallas_call(
        wukong_kernel,
        out_shape=jax.ShapeDtypeStruct((Bp, D), jnp.float32),
        grid=(Bp // tbe,),
        in_specs=[pl.BlockSpec((tbe, D), lambda i: (i, 0))]
                 + [const_spec(a) for a in packed],
        out_specs=pl.BlockSpec((tbe, D), lambda i: (i, 0)),
        compiler_params=pltpu.CompilerParams(dimension_semantics=("parallel",)),
    )(xp, *packed)
    return out[:B]


def init_params(key):
    F, E, P = NUM_FEATURES, EMBED_DIM, PROJECT_DIM
    ks = iter(jax.random.split(key, 8))

    def dense(k, fi, fo):
        return jax.random.normal(k, (fi, fo), jnp.float32) / jnp.sqrt(float(fi))

    return dict(
        proj=jax.random.normal(next(ks), (F, P), jnp.float32),
        ln1_g=jnp.ones((1, F * P), jnp.float32),
        ln1_b=jnp.zeros((1, F * P), jnp.float32),
        w0=dense(next(ks), F * P, FMB_UNITS[0]),
        b0=jnp.zeros((1, FMB_UNITS[0]), jnp.float32),
        w1=dense(next(ks), FMB_UNITS[0], FMB_UNITS[1]),
        b1=jnp.zeros((1, FMB_UNITS[1]), jnp.float32),
        w2=dense(next(ks), FMB_UNITS[1], FMB_UNITS[2]),
        b2=jnp.zeros((1, FMB_UNITS[2]), jnp.float32),
        w3=dense(next(ks), FMB_UNITS[2], FMB_DIM),
        b3=jnp.zeros((1, FMB_DIM), jnp.float32),
        wl=dense(next(ks), F * E, COMPRESSED_DIM),
        bl=jnp.zeros((1, COMPRESSED_DIM), jnp.float32),
        wt_f=dense(next(ks), FMB_DIM, F * E),
        wt_l=dense(next(ks), COMPRESSED_DIM, F * E),
        bt=jnp.zeros((1, F * E), jnp.float32),
        ln2_g=jnp.ones((1, F * E), jnp.float32),
        ln2_b=jnp.zeros((1, F * E), jnp.float32),
    )


def wukong_ref(x, p):
    """Pure-JAX reference following the PyTorch op order exactly (full f32 precision)."""
    F, E, P = NUM_FEATURES, EMBED_DIM, PROJECT_DIM
    B = x.shape[0]

    def ln(v, g, b):
        m = v.mean(-1, keepdims=True)
        var = jnp.square(v - m).mean(-1, keepdims=True)
        return (v - m) / jnp.sqrt(var + LN_EPS) * g + b

    with jax.default_matmul_precision("float32"):
        x_fm = x.reshape(B, F, E)
        projected = jnp.einsum('bfe,fp->bep', x_fm, p['proj'])
        fm = jnp.einsum('bfe,bep->bfp', x_fm, projected).reshape(B, F * P)
        h = ln(fm, p['ln1_g'], p['ln1_b'])
        h = jax.nn.relu(h @ p['w0'] + p['b0'])
        h = jax.nn.relu(h @ p['w1'] + p['b1'])
        h = jax.nn.relu(h @ p['w2'] + p['b2'])
        fmb = jax.nn.relu(h @ p['w3'] + p['b3'])
        lcb = x @ p['wl'] + p['bl']
        t = fmb @ p['wt_f'] + lcb @ p['wt_l'] + p['bt']
        return ln(t + x, p['ln2_g'], p['ln2_b'])


if __name__ == "__main__":
    key = jax.random.PRNGKey(0)
    kx, kp = jax.random.split(key)
    B = 512                                    # 2 grid steps at tb=256
    x = jax.random.normal(kx, (B, D), jnp.float32)
    params = init_params(kp)

    ref = wukong_ref(x, params)

    # Exact-precision path: proves the restructured FM / packed params match the
    # PyTorch forward tightly.
    out_f32 = jax.block_until_ready(wukong_layer(x, params, use_bf16=False))
    assert out_f32.shape == (B, D)
    assert bool(jnp.all(jnp.isfinite(out_f32)))
    assert jnp.allclose(out_f32, ref, rtol=2e-2, atol=2e-2)

    # Fast path (default): bf16 MXU inputs, f32 accumulation + f32 LayerNorm/elementwise.
    out = jax.block_until_ready(wukong_layer(x, params, use_bf16=True))
    assert out.shape == (B, D)
    assert bool(jnp.all(jnp.isfinite(out)))
    assert jnp.allclose(out, ref, rtol=1e-1, atol=1e-1)   # mixed-precision tolerance

    print("KERNEL_OK")
</pallas_src>

<mosaic_0001>
module attributes {stable_mosaic.version = 11 : i64} {
  func.func @wukong_kernel(%arg0: i32, %arg1: memref<256x224xf32, #tpu.memory_space<vmem>>, %arg2: memref<224x64xf32, #tpu.memory_space<vmem>>, %arg3: memref<4x64x224xf32, #tpu.memory_space<vmem>>, %arg4: memref<4x224x56xf32, #tpu.memory_space<vmem>>, %arg5: memref<4x56x40xf32, #tpu.memory_space<vmem>>, %arg6: memref<224x40xf32, #tpu.memory_space<vmem>>, %arg7: memref<80x224xf32, #tpu.memory_space<vmem>>, %arg8: memref<10x224xf32, #tpu.memory_space<vmem>>, %arg9: memref<256x224xf32, #tpu.memory_space<vmem>>) attributes {dimension_semantics = [#tpu.dimension_semantics<parallel>], iteration_bounds = array<i64: 2>, scalar_prefetch = 0 : i64, scratch_operands = 0 : i64, tpu.core_type = #tpu.core_type<tc>, window_params = [{transform_indices = @transform_0, window_bounds = array<i64: 256, 224>}, {pipeline_mode = #tpu.pipeline_mode<synchronous>, transform_indices = @transform_1, window_bounds = array<i64: 224, 64>}, {pipeline_mode = #tpu.pipeline_mode<synchronous>, transform_indices = @transform_2, window_bounds = array<i64: 4, 64, 224>}, {pipeline_mode = #tpu.pipeline_mode<synchronous>, transform_indices = @transform_3, window_bounds = array<i64: 4, 224, 56>}, {pipeline_mode = #tpu.pipeline_mode<synchronous>, transform_indices = @transform_4, window_bounds = array<i64: 4, 56, 40>}, {pipeline_mode = #tpu.pipeline_mode<synchronous>, transform_indices = @transform_5, window_bounds = array<i64: 224, 40>}, {pipeline_mode = #tpu.pipeline_mode<synchronous>, transform_indices = @transform_6, window_bounds = array<i64: 80, 224>}, {pipeline_mode = #tpu.pipeline_mode<synchronous>, transform_indices = @transform_7, window_bounds = array<i64: 10, 224>}, {transform_indices = @transform_8, window_bounds = array<i64: 256, 224>}]} {
    %c0 = arith.constant 0 : index
    %c0_0 = arith.constant 0 : index
    %0 = vector.load %arg1[%c0, %c0_0] : memref<256x224xf32, #tpu.memory_space<vmem>>, vector<256x224xf32>
    %c0_1 = arith.constant 0 : index
    %c0_2 = arith.constant 0 : index
    %1 = vector.load %arg8[%c0_1, %c0_2] : memref<10x224xf32, #tpu.memory_space<vmem>>, vector<10x224xf32>
    %2 = vector.extract_strided_slice %1 {offsets = [0, 0], sizes = [1, 56], strides = [1, 1]} : vector<10x224xf32> to vector<1x56xf32>
    %3 = vector.extract_strided_slice %1 {offsets = [1, 0], sizes = [1, 56], strides = [1, 1]} : vector<10x224xf32> to vector<1x56xf32>
    %4 = vector.extract_strided_slice %1 {offsets = [2, 0], sizes = [1, 40], strides = [1, 1]} : vector<10x224xf32> to vector<1x40xf32>
    %5 = vector.extract_strided_slice %1 {offsets = [3, 0], sizes = [1, 40], strides = [1, 1]} : vector<10x224xf32> to vector<1x40xf32>
    %6 = vector.extract_strided_slice %1 {offsets = [4, 0], sizes = [1, 40], strides = [1, 1]} : vector<10x224xf32> to vector<1x40xf32>
    %7 = vector.extract_strided_slice %1 {offsets = [5, 0], sizes = [1, 40], strides = [1, 1]} : vector<10x224xf32> to vector<1x40xf32>
    %8 = vector.extract_strided_slice %1 {offsets = [6, 0], sizes = [1, 40], strides = [1, 1]} : vector<10x224xf32> to vector<1x40xf32>
    %9 = vector.extract_strided_slice %1 {offsets = [7, 0], sizes = [1, 224], strides = [1, 1]} : vector<10x224xf32> to vector<1x224xf32>
    %10 = vector.extract_strided_slice %1 {offsets = [8, 0], sizes = [1, 224], strides = [1, 1]} : vector<10x224xf32> to vector<1x224xf32>
    %11 = vector.extract_strided_slice %1 {offsets = [9, 0], sizes = [1, 224], strides = [1, 1]} : vector<10x224xf32> to vector<1x224xf32>
    %c0_3 = arith.constant 0 : index
    %c0_4 = arith.constant 0 : index
    %12 = vector.load %arg2[%c0_3, %c0_4] : memref<224x64xf32, #tpu.memory_space<vmem>>, vector<224x64xf32>
    %cst = arith.constant dense<0.000000e+00> : vector<256x64xf32>
    %13 = tpu.matmul %0, %12, %cst {dimension_numbers = #tpu.dot_dimension_numbers<[1], [0], [0], [1], [0, 0, 1, 1], [], []>} : vector<256x224xf32>, vector<224x64xf32>, vector<256x64xf32> -> vector<256x64xf32>
    %cst_5 = arith.constant 0.000000e+00 : f32
    %14 = vector.broadcast %cst_5 : f32 to vector<256x56xf32>
    %c0_6 = arith.constant 0 : index
    %c0_7 = arith.constant 0 : index
    %c0_8 = arith.constant 0 : index
    %15 = vector.load %arg3[%c0_6, %c0_7, %c0_8] : memref<4x64x224xf32, #tpu.memory_space<vmem>>, vector<1x64x224xf32>
    %16 = vector.shape_cast %15 : vector<1x64x224xf32> to vector<64x224xf32>
    %cst_9 = arith.constant dense<0.000000e+00> : vector<256x224xf32>
    %17 = tpu.matmul %13, %16, %cst_9 {dimension_numbers = #tpu.dot_dimension_numbers<[1], [0], [0], [1], [0, 0, 1, 1], [], []>} : vector<256x64xf32>, vector<64x224xf32>, vector<256x224xf32> -> vector<256x224xf32>
    %18 = arith.mulf %0, %17 : vector<256x224xf32>
    %c0_10 = arith.constant 0 : index
    %c0_11 = arith.constant 0 : index
    %c0_12 = arith.constant 0 : index
    %19 = vector.load %arg4[%c0_10, %c0_11, %c0_12] : memref<4x224x56xf32, #tpu.memory_space<vmem>>, vector<1x224x56xf32>
    %20 = vector.shape_cast %19 : vector<1x224x56xf32> to vector<224x56xf32>
    %cst_13 = arith.constant dense<0.000000e+00> : vector<256x56xf32>
    %21 = tpu.matmul %18, %20, %cst_13 {dimension_numbers = #tpu.dot_dimension_numbers<[1], [0], [0], [1], [0, 0, 1, 1], [], []>} : vector<256x224xf32>, vector<224x56xf32>, vector<256x56xf32> -> vector<256x56xf32>
    %22 = arith.addf %14, %21 : vector<256x56xf32>
    %c1 = arith.constant 1 : index
    %c0_14 = arith.constant 0 : index
    %c0_15 = arith.constant 0 : index
    %23 = vector.load %arg3[%c1, %c0_14, %c0_15] : memref<4x64x224xf32, #tpu.memory_space<vmem>>, vector<1x64x224xf32>
    %24 = vector.shape_cast %23 : vector<1x64x224xf32> to vector<64x224xf32>
    %cst_16 = arith.constant dense<0.000000e+00> : vector<256x224xf32>
    %25 = tpu.matmul %13, %24, %cst_16 {dimension_numbers = #tpu.dot_dimension_numbers<[1], [0], [0], [1], [0, 0, 1, 1], [], []>} : vector<256x64xf32>, vector<64x224xf32>, vector<256x224xf32> -> vector<256x224xf32>
    %26 = arith.mulf %0, %25 : vector<256x224xf32>
    %c1_17 = arith.constant 1 : index
    %c0_18 = arith.constant 0 : index
    %c0_19 = arith.constant 0 : index
    %27 = vector.load %arg4[%c1_17, %c0_18, %c0_19] : memref<4x224x56xf32, #tpu.memory_space<vmem>>, vector<1x224x56xf32>
    %28 = vector.shape_cast %27 : vector<1x224x56xf32> to vector<224x56xf32>
    %cst_20 = arith.constant dense<0.000000e+00> : vector<256x56xf32>
    %29 = tpu.matmul %26, %28, %cst_20 {dimension_numbers = #tpu.dot_dimension_numbers<[1], [0], [0], [1], [0, 0, 1, 1], [], []>} : vector<256x224xf32>, vector<224x56xf32>, vector<256x56xf32> -> vector<256x56xf32>
    %30 = arith.addf %22, %29 : vector<256x56xf32>
    %c2 = arith.constant 2 : index
    %c0_21 = arith.constant 0 : index
    %c0_22 = arith.constant 0 : index
    %31 = vector.load %arg3[%c2, %c0_21, %c0_22] : memref<4x64x224xf32, #tpu.memory_space<vmem>>, vector<1x64x224xf32>
    %32 = vector.shape_cast %31 : vector<1x64x224xf32> to vector<64x224xf32>
    %cst_23 = arith.constant dense<0.000000e+00> : vector<256x224xf32>
    %33 = tpu.matmul %13, %32, %cst_23 {dimension_numbers = #tpu.dot_dimension_numbers<[1], [0], [0], [1], [0, 0, 1, 1], [], []>} : vector<256x64xf32>, vector<64x224xf32>, vector<256x224xf32> -> vector<256x224xf32>
    %34 = arith.mulf %0, %33 : vector<256x224xf32>
    %c2_24 = arith.constant 2 : index
    %c0_25 = arith.constant 0 : index
    %c0_26 = arith.constant 0 : index
    %35 = vector.load %arg4[%c2_24, %c0_25, %c0_26] : memref<4x224x56xf32, #tpu.memory_space<vmem>>, vector<1x224x56xf32>
    %36 = vector.shape_cast %35 : vector<1x224x56xf32> to vector<224x56xf32>
    %cst_27 = arith.constant dense<0.000000e+00> : vector<256x56xf32>
    %37 = tpu.matmul %34, %36, %cst_27 {dimension_numbers = #tpu.dot_dimension_numbers<[1], [0], [0], [1], [0, 0, 1, 1], [], []>} : vector<256x224xf32>, vector<224x56xf32>, vector<256x56xf32> -> vector<256x56xf32>
    %38 = arith.addf %30, %37 : vector<256x56xf32>
    %c3 = arith.constant 3 : index
    %c0_28 = arith.constant 0 : index
    %c0_29 = arith.constant 0 : index
    %39 = vector.load %arg3[%c3, %c0_28, %c0_29] : memref<4x64x224xf32, #tpu.memory_space<vmem>>, vector<1x64x224xf32>
    %40 = vector.shape_cast %39 : vector<1x64x224xf32> to vector<64x224xf32>
    %cst_30 = arith.constant dense<0.000000e+00> : vector<256x224xf32>
    %41 = tpu.matmul %13, %40, %cst_30 {dimension_numbers = #tpu.dot_dimension_numbers<[1], [0], [0], [1], [0, 0, 1, 1], [], []>} : vector<256x64xf32>, vector<64x224xf32>, vector<256x224xf32> -> vector<256x224xf32>
    %42 = arith.mulf %0, %41 : vector<256x224xf32>
    %c3_31 = arith.constant 3 : index
    %c0_32 = arith.constant 0 : index
    %c0_33 = arith.constant 0 : index
    %43 = vector.load %arg4[%c3_31, %c0_32, %c0_33] : memref<4x224x56xf32, #tpu.memory_space<vmem>>, vector<1x224x56xf32>
    %44 = vector.shape_cast %43 : vector<1x224x56xf32> to vector<224x56xf32>
    %cst_34 = arith.constant dense<0.000000e+00> : vector<256x56xf32>
    %45 = tpu.matmul %42, %44, %cst_34 {dimension_numbers = #tpu.dot_dimension_numbers<[1], [0], [0], [1], [0, 0, 1, 1], [], []>} : vector<256x224xf32>, vector<224x56xf32>, vector<256x56xf32> -> vector<256x56xf32>
    %46 = arith.addf %38, %45 : vector<256x56xf32>
    %c0_35 = arith.constant 0 : index
    %c0_36 = arith.constant 0 : index
    %c0_37 = arith.constant 0 : index
    %47 = vector.load %arg5[%c0_35, %c0_36, %c0_37] : memref<4x56x40xf32, #tpu.memory_space<vmem>>, vector<4x56x40xf32>
    %cst_38 = arith.constant dense<0.000000e+00> : vector<256xf32>
    %48 = vector.multi_reduction <add>, %46, %cst_38 [1] : vector<256x56xf32> to vector<256xf32>
    %49 = vector.shape_cast %48 : vector<256xf32> to vector<256x1xf32>
    %cst_39 = arith.constant 5.600000e+01 : f32
    %50 = vector.broadcast %cst_39 : f32 to vector<256x1xf32>
    %51 = arith.divf %49, %50 : vector<256x1xf32>
    %52 = vector.broadcast %51 : vector<256x1xf32> to vector<256x56xf32>
    %53 = arith.subf %46, %52 : vector<256x56xf32>
    %54 = arith.mulf %53, %53 : vector<256x56xf32>
    %cst_40 = arith.constant dense<0.000000e+00> : vector<256xf32>
    %55 = vector.multi_reduction <add>, %54, %cst_40 [1] : vector<256x56xf32> to vector<256xf32>
    %56 = vector.shape_cast %55 : vector<256xf32> to vector<256x1xf32>
    %cst_41 = arith.constant 5.600000e+01 : f32
    %57 = vector.broadcast %cst_41 : f32 to vector<256x1xf32>
    %58 = arith.divf %56, %57 : vector<256x1xf32>
    %cst_42 = arith.constant 9.99999974E-6 : f32
    %59 = vector.broadcast %cst_42 : f32 to vector<256x1xf32>
    %60 = arith.addf %58, %59 : vector<256x1xf32>
    %61 = math.rsqrt %60 : vector<256x1xf32>
    %62 = vector.broadcast %61 : vector<256x1xf32> to vector<256x56xf32>
    %63 = arith.mulf %53, %62 : vector<256x56xf32>
    %64 = vector.broadcast %2 : vector<1x56xf32> to vector<256x56xf32>
    %65 = arith.mulf %63, %64 : vector<256x56xf32>
    %66 = vector.broadcast %3 : vector<1x56xf32> to vector<256x56xf32>
    %67 = arith.addf %65, %66 : vector<256x56xf32>
    %68 = vector.extract_strided_slice %47 {offsets = [0, 0, 0], sizes = [1, 56, 40], strides = [1, 1, 1]} : vector<4x56x40xf32> to vector<1x56x40xf32>
    %69 = vector.shape_cast %68 : vector<1x56x40xf32> to vector<56x40xf32>
    %cst_43 = arith.constant dense<0.000000e+00> : vector<256x40xf32>
    %70 = tpu.matmul %67, %69, %cst_43 {dimension_numbers = #tpu.dot_dimension_numbers<[1], [0], [0], [1], [0, 0, 1, 1], [], []>} : vector<256x56xf32>, vector<56x40xf32>, vector<256x40xf32> -> vector<256x40xf32>
    %71 = vector.broadcast %4 : vector<1x40xf32> to vector<256x40xf32>
    %72 = arith.addf %70, %71 : vector<256x40xf32>
    %cst_44 = arith.constant 0.000000e+00 : f32
    %73 = vector.broadcast %cst_44 : f32 to vector<256x40xf32>
    %74 = arith.maximumf %72, %73 : vector<256x40xf32>
    %75 = vector.extract_strided_slice %47 {offsets = [1, 0, 0], sizes = [1, 40, 40], strides = [1, 1, 1]} : vector<4x56x40xf32> to vector<1x40x40xf32>
    %76 = vector.shape_cast %75 : vector<1x40x40xf32> to vector<40x40xf32>
    %cst_45 = arith.constant dense<0.000000e+00> : vector<256x40xf32>
    %77 = tpu.matmul %74, %76, %cst_45 {dimension_numbers = #tpu.dot_dimension_numbers<[1], [0], [0], [1], [0, 0, 1, 1], [], []>} : vector<256x40xf32>, vector<40x40xf32>, vector<256x40xf32> -> vector<256x40xf32>
    %78 = vector.broadcast %5 : vector<1x40xf32> to vector<256x40xf32>
    %79 = arith.addf %77, %78 : vector<256x40xf32>
    %cst_46 = arith.constant 0.000000e+00 : f32
    %80 = vector.broadcast %cst_46 : f32 to vector<256x40xf32>
    %81 = arith.maximumf %79, %80 : vector<256x40xf32>
    %82 = vector.extract_strided_slice %47 {offsets = [2, 0, 0], sizes = [1, 40, 40], strides = [1, 1, 1]} : vector<4x56x40xf32> to vector<1x40x40xf32>
    %83 = vector.shape_cast %82 : vector<1x40x40xf32> to vector<40x40xf32>
    %cst_47 = arith.constant dense<0.000000e+00> : vector<256x40xf32>
    %84 = tpu.matmul %81, %83, %cst_47 {dimension_numbers = #tpu.dot_dimension_numbers<[1], [0], [0], [1], [0, 0, 1, 1], [], []>} : vector<256x40xf32>, vector<40x40xf32>, vector<256x40xf32> -> vector<256x40xf32>
    %85 = vector.broadcast %6 : vector<1x40xf32> to vector<256x40xf32>
    %86 = arith.addf %84, %85 : vector<256x40xf32>
    %cst_48 = arith.constant 0.000000e+00 : f32
    %87 = vector.broadcast %cst_48 : f32 to vector<256x40xf32>
    %88 = arith.maximumf %86, %87 : vector<256x40xf32>
    %89 = vector.extract_strided_slice %47 {offsets = [3, 0, 0], sizes = [1, 40, 40], strides = [1, 1, 1]} : vector<4x56x40xf32> to vector<1x40x40xf32>
    %90 = vector.shape_cast %89 : vector<1x40x40xf32> to vector<40x40xf32>
    %cst_49 = arith.constant dense<0.000000e+00> : vector<256x40xf32>
    %91 = tpu.matmul %88, %90, %cst_49 {dimension_numbers = #tpu.dot_dimension_numbers<[1], [0], [0], [1], [0, 0, 1, 1], [], []>} : vector<256x40xf32>, vector<40x40xf32>, vector<256x40xf32> -> vector<256x40xf32>
    %92 = vector.broadcast %7 : vector<1x40xf32> to vector<256x40xf32>
    %93 = arith.addf %91, %92 : vector<256x40xf32>
    %cst_50 = arith.constant 0.000000e+00 : f32
    %94 = vector.broadcast %cst_50 : f32 to vector<256x40xf32>
    %95 = arith.maximumf %93, %94 : vector<256x40xf32>
    %c0_51 = arith.constant 0 : index
    %c0_52 = arith.constant 0 : index
    %96 = vector.load %arg6[%c0_51, %c0_52] : memref<224x40xf32, #tpu.memory_space<vmem>>, vector<224x40xf32>
    %cst_53 = arith.constant dense<0.000000e+00> : vector<256x40xf32>
    %97 = tpu.matmul %0, %96, %cst_53 {dimension_numbers = #tpu.dot_dimension_numbers<[1], [0], [0], [1], [0, 0, 1, 1], [], []>} : vector<256x224xf32>, vector<224x40xf32>, vector<256x40xf32> -> vector<256x40xf32>
    %98 = vector.broadcast %8 : vector<1x40xf32> to vector<256x40xf32>
    %99 = arith.addf %97, %98 : vector<256x40xf32>
    %c0_54 = arith.constant 0 : index
    %c0_55 = arith.constant 0 : index
    %100 = vector.load %arg7[%c0_54, %c0_55] : memref<80x224xf32, #tpu.memory_space<vmem>>, vector<80x224xf32>
    %101 = vector.extract_strided_slice %100 {offsets = [0, 0], sizes = [40, 224], strides = [1, 1]} : vector<80x224xf32> to vector<40x224xf32>
    %cst_56 = arith.constant dense<0.000000e+00> : vector<256x224xf32>
    %102 = tpu.matmul %95, %101, %cst_56 {dimension_numbers = #tpu.dot_dimension_numbers<[1], [0], [0], [1], [0, 0, 1, 1], [], []>} : vector<256x40xf32>, vector<40x224xf32>, vector<256x224xf32> -> vector<256x224xf32>
    %103 = vector.extract_strided_slice %100 {offsets = [40, 0], sizes = [40, 224], strides = [1, 1]} : vector<80x224xf32> to vector<40x224xf32>
    %cst_57 = arith.constant dense<0.000000e+00> : vector<256x224xf32>
    %104 = tpu.matmul %99, %103, %cst_57 {dimension_numbers = #tpu.dot_dimension_numbers<[1], [0], [0], [1], [0, 0, 1, 1], [], []>} : vector<256x40xf32>, vector<40x224xf32>, vector<256x224xf32> -> vector<256x224xf32>
    %105 = arith.addf %102, %104 : vector<256x224xf32>
    %106 = vector.broadcast %9 : vector<1x224xf32> to vector<256x224xf32>
    %107 = arith.addf %105, %106 : vector<256x224xf32>
    %108 = arith.addf %107, %0 : vector<256x224xf32>
    %cst_58 = arith.constant dense<0.000000e+00> : vector<256xf32>
    %109 = vector.multi_reduction <add>, %108, %cst_58 [1] : vector<256x224xf32> to vector<256xf32>
    %110 = vector.shape_cast %109 : vector<256xf32> to vector<256x1xf32>
    %cst_59 = arith.constant 2.240000e+02 : f32
    %111 = vector.broadcast %cst_59 : f32 to vector<256x1xf32>
    %112 = arith.divf %110, %111 : vector<256x1xf32>
    %113 = vector.broadcast %112 : vector<256x1xf32> to vector<256x224xf32>
    %114 = arith.subf %108, %113 : vector<256x224xf32>
    %115 = arith.mulf %114, %114 : vector<256x224xf32>
    %cst_60 = arith.constant dense<0.000000e+00> : vector<256xf32>
    %116 = vector.multi_reduction <add>, %115, %cst_60 [1] : vector<256x224xf32> to vector<256xf32>
    %117 = vector.shape_cast %116 : vector<256xf32> to vector<256x1xf32>
    %cst_61 = arith.constant 2.240000e+02 : f32
    %118 = vector.broadcast %cst_61 : f32 to vector<256x1xf32>
    %119 = arith.divf %117, %118 : vector<256x1xf32>
    %cst_62 = arith.constant 9.99999974E-6 : f32
    %120 = vector.broadcast %cst_62 : f32 to vector<256x1xf32>
    %121 = arith.addf %119, %120 : vector<256x1xf32>
    %122 = math.rsqrt %121 : vector<256x1xf32>
    %123 = vector.broadcast %122 : vector<256x1xf32> to vector<256x224xf32>
    %124 = arith.mulf %114, %123 : vector<256x224xf32>
    %125 = vector.broadcast %10 : vector<1x224xf32> to vector<256x224xf32>
    %126 = arith.mulf %124, %125 : vector<256x224xf32>
    %127 = vector.broadcast %11 : vector<1x224xf32> to vector<256x224xf32>
    %128 = arith.addf %126, %127 : vector<256x224xf32>
    %c0_63 = arith.constant 0 : index
    %c0_64 = arith.constant 0 : index
    %129 = vector.load %arg9[%c0_63, %c0_64] : memref<256x224xf32, #tpu.memory_space<vmem>>, vector<256x224xf32>
    tpu.vector_store %arg9[%c0_63, %c0_64], %128 {strides = array<i32>} : memref<256x224xf32, #tpu.memory_space<vmem>>, vector<256x224xf32>,
    return
  }
  func.func @transform_0(%arg0: i32) -> (i32, i32) {
    %c0_i32 = arith.constant 0 : i32
    %c0_i32_0 = arith.constant 0 : i32
    return %arg0, %c0_i32 : i32, i32
  }
  func.func @transform_1(%arg0: i32) -> (i32, i32) {
    %c0_i32 = arith.constant 0 : i32
    %c0_i32_0 = arith.constant 0 : i32
    %c0_i32_1 = arith.constant 0 : i32
    return %c0_i32, %c0_i32_0 : i32, i32
  }
  func.func @transform_2(%arg0: i32) -> (i32, i32, i32) {
    %c0_i32 = arith.constant 0 : i32
    %c0_i32_0 = arith.constant 0 : i32
    %c0_i32_1 = arith.constant 0 : i32
    %c0_i32_2 = arith.constant 0 : i32
    return %c0_i32, %c0_i32_0, %c0_i32_1 : i32, i32, i32
  }
  func.func @transform_3(%arg0: i32) -> (i32, i32, i32) {
    %c0_i32 = arith.constant 0 : i32
    %c0_i32_0 = arith.constant 0 : i32
    %c0_i32_1 = arith.constant 0 : i32
    %c0_i32_2 = arith.constant 0 : i32
    return %c0_i32, %c0_i32_0, %c0_i32_1 : i32, i32, i32
  }
  func.func @transform_4(%arg0: i32) -> (i32, i32, i32) {
    %c0_i32 = arith.constant 0 : i32
    %c0_i32_0 = arith.constant 0 : i32
    %c0_i32_1 = arith.constant 0 : i32
    %c0_i32_2 = arith.constant 0 : i32
    return %c0_i32, %c0_i32_0, %c0_i32_1 : i32, i32, i32
  }
  func.func @transform_5(%arg0: i32) -> (i32, i32) {
    %c0_i32 = arith.constant 0 : i32
    %c0_i32_0 = arith.constant 0 : i32
    %c0_i32_1 = arith.constant 0 : i32
    return %c0_i32, %c0_i32_0 : i32, i32
  }
  func.func @transform_6(%arg0: i32) -> (i32, i32) {
    %c0_i32 = arith.constant 0 : i32
    %c0_i32_0 = arith.constant 0 : i32
    %c0_i32_1 = arith.constant 0 : i32
    return %c0_i32, %c0_i32_0 : i32, i32
  }
  func.func @transform_7(%arg0: i32) -> (i32, i32) {
    %c0_i32 = arith.constant 0 : i32
    %c0_i32_0 = arith.constant 0 : i32
    %c0_i32_1 = arith.constant 0 : i32
    return %c0_i32, %c0_i32_0 : i32, i32
  }
  func.func @transform_8(%arg0: i32) -> (i32, i32) {
    %c0_i32 = arith.constant 0 : i32
    %c0_i32_0 = arith.constant 0 : i32
    return %arg0, %c0_i32 : i32, i32
  }
}

</mosaic_0001>

<bundles_post_ra>
// kernel: tpu_custom_call.1
= control target key start
LH: loop header
LB: loop body
LE: loop exit
PB: predicated region body
PF: predicated region fallthrough
CT: control target
= control target key end

     0   :  { %s9673_s27 = smov 0   ;;  %s14356_s0 = inlined_call_operand.vmem [shape: f32[512,224], index: 0, kind: input, shape index: {}]   ;;  %s14357_s1 = inlined_call_operand.vmem [shape: f32[224,64], index: 1, kind: input, shape index: {}]   ;;  %s14358_s2 = inlined_call_operand.vmem [shape: f32[4,64,224], index: 2, kind: input, shape index: {}]   ;;  %s14359_s3 = inlined_call_operand.vmem [shape: f32[4,224,56], index: 3, kind: input, shape index: {}]   ;;  %s14360_s4 = inlined_call_operand.vmem [shape: f32[4,56,40], index: 4, kind: input, shape index: {}]   ;;  %s14361_s5 = inlined_call_operand.vmem [shape: f32[224,40], index: 5, kind: input, shape index: {}]   ;;  %s14362_s6 = inlined_call_operand.vmem [shape: f32[80,224], index: 6, kind: input, shape index: {}]   ;;  %s14363_s7 = inlined_call_operand.vmem [shape: f32[10,224], index: 7, kind: input, shape index: {}]   ;;  %s14364_s8 = inlined_call_operand.vmem [shape: f32[512,224], index: 8, kind: output, shape index: {}]  }
   0x1 LB: > { %s7546_s28 = sadd.s32 4294967295, %s9624_s27   ;;  %p7550_p0 = scmp.ge.s32.totalorder %s9624_s27, 1  ;;  %s9624_s27 = sphi %s9673_s27, %s18_s27  }
   0x2   : > { %p264_p1 = scmp.lt.s32.totalorder %s9624_s27, 3 }
   0x4   : > { %p265_p2 = pnand %p7550_p0, %p264_p1 }
   0x6   : > { %268 = sbr.rel (%p265_p2) target bundleno = 3138 (0xc42), region = 52 }
   0xd   : > { %v382_v0 = vld [vmem:[%s14357_s1] sm:$0xff]  ;;  %v383_v1 = vld [vmem:[%s14357_s1 + $0x8] sm:$0xff]  ;;  %v384_v2 = vld [vmem:[%s14357_s1 + $0x10] sm:$0xff]  ;;  %s7551_s13 = sshll.u32 %s7546_s28, 5  ;;  %v14365_v3 = vmov 0.0|0.0   ;;  %vm410_vm0 = vcmask 785408  }
   0xe   : > { %8591 = vmatprep.subr.bf16.mxu0 %v14365_v3  ;;  %v8592_v4 = vpack.c.bf16 %v383_v1, %v382_v0  ;;  %v385_v5 = vld [vmem:[%s14357_s1 + $0x18] sm:$0xff]  ;;  %p301_p3 = scmp.lt.s32.totalorder %s7551_s13, 63  ;;  %v386_v7 = vld [vmem:[%s14357_s1 + $0x20] sm:$0xff]  ;;  %v387_v8 = vld [vmem:[%s14357_s1 + $0x28] sm:$0xff]  ;;  %vm748_vm1 = vcmask 523264   ;;  %vm3665_vm2 = vcmask 457728  }
   0xf   : > { %v8595_v6 = vpack.c.bf16 %v385_v5, %v384_v2  ;;  %v8598_v9 = vpack.c.bf16 %v387_v8, %v386_v7  ;;  %v388_v10 = vld [vmem:[%s14357_s1 + $0x30] sm:$0xff]  ;;  %v389_v11 = vld [vmem:[%s14357_s1 + $0x38] sm:$0xff]  ;;  %v390_v14 = vld [vmem:[%s14357_s1 + $0x40] sm:$0xff]  ;;  %vm4516_vm3 = vcmask 326656  }
  0x10   : > { %8593 = vmatpush1.bf16.msra.mxu0 %v8592_v4  ;;  %s14790_s13 = smov (!%p301_p3, %s7551_s13), 63  ;;  %v8601_v13 = vpack.c.bf16 %v389_v11, %v388_v10  ;;  %v391_v15 = vld [vmem:[%s14357_s1 + $0x48] sm:$0xff]  ;;  %v392_v17 = vld [vmem:[%s14357_s1 + $0x50] sm:$0xff]  ;;  %v393_v18 = vld [vmem:[%s14357_s1 + $0x58] sm:$0xff] }
  0x11   : > { %8594 = vmatprep.subr.bf16.mxu0 %v14365_v3  ;;  %s8203_s20 = sshll.u32 %s14790_s13, 4  ;;  %v8604_v16 = vpack.c.bf16 %v391_v15, %v390_v14  ;;  %v8607_v19 = vpack.c.bf16 %v393_v18, %v392_v17  ;;  %v394_v20 = vld [vmem:[%s14357_s1 + $0x60] sm:$0xff]  ;;  %v395_v21 = vld [vmem:[%s14357_s1 + $0x68] sm:$0xff]  ;;  %v396_v23 = vld [vmem:[%s14357_s1 + $0x70] sm:$0xff] }
  0x12   : > { %s9709_s23 = scalar_lea.vmem %s14356_s0, %s8203_s20  ;;  %v8610_v22 = vpack.c.bf16 %v395_v21, %v394_v20  ;;  %v397_v24 = vld [vmem:[%s14357_s1 + $0x78] sm:$0xff]  ;;  %v398_v26 = vld [vmem:[%s14357_s1 + $0x80] sm:$0xff]  ;;  %v399_v27 = vld [vmem:[%s14357_s1 + $0x88] sm:$0xff]  ;;  %s14067_s12 = scalar_lea.vmem %s14364_s8, %s8203_s20 }
  0x13   : > { %v315_v12 = vld [vmem:[%s9709_s23 + $0x8] sm:$0xff]  ;;  %v8613_v25 = vpack.c.bf16 %v397_v24, %v396_v23  ;;  %v8616_v28 = vpack.c.bf16 %v399_v27, %v398_v26  ;;  %v400_v29 = vld [vmem:[%s14357_s1 + $0x90] sm:$0xff]  ;;  %v401_v30 = vld [vmem:[%s14357_s1 + $0x98] sm:$0xff] }
  0x14   : > { %8596 = vmatpush1.bf16.msra.mxu0 %v8595_v6  ;;  %7557 = vmatprep.mubr.msk.f32.mxu0 %vm410_vm0, %v315_v12  ;;  %v8619_v31 = vpack.c.bf16 %v401_v30, %v400_v29  ;;  %v402_v32 = vld [vmem:[%s14357_s1 + $0xa0] sm:$0xff]  ;;  %v403_v33 = vld [vmem:[%s14357_s1 + $0xa8] sm:$0xff]  ;;  %v404_v35 = vld [vmem:[%s14357_s1 + $0xb0] sm:$0xff] }
  0x15   : > { %8597 = vmatprep.subr.bf16.mxu0 %v14365_v3  ;;  %v8622_v34 = vpack.c.bf16 %v403_v33, %v402_v32  ;;  %v405_v36 = vld [vmem:[%s14357_s1 + $0xb8] sm:$0xff]  ;;  %v406_v38 = vld [vmem:[%s14357_s1 + $0xc0] sm:$0xff]  ;;  %v407_v39 = vld [vmem:[%s14357_s1 + $0xc8] sm:$0xff] }
  0x16   : > { %v8625_v37 = vpack.c.bf16 %v405_v36, %v404_v35  ;;  %v8628_v40 = vpack.c.bf16 %v407_v39, %v406_v38  ;;  %v408_v41 = vld [vmem:[%s14357_s1 + $0xd0] sm:$0xff]  ;;  %v409_v42 = vld [vmem:[%s14357_s1 + $0xd8] sm:$0xff]  ;;  %v314_v44 = vld [vmem:[%s9709_s23] sm:$0xff] }
  0x17   : > { %v8631_v43 = vpack.c.bf16 %v409_v42, %v408_v41  ;;  %v317_v45 = vld [vmem:[%s9709_s23 + $0x18] sm:$0xff]  ;;  %v733_v46 = vld [vmem:[%s14358_s2 + $0x8] sm:$0xff]  ;;  %v732_v48 = vld [vmem:[%s14358_s2] sm:$0xff] }
  0x18   : > { %8599 = vmatpush1.bf16.msra.mxu0 %v8598_v9  ;;  %v735_v47 = vld [vmem:[%s14358_s2 + $0x18] sm:$0xff]  ;;  %v734_v50 = vld [vmem:[%s14358_s2 + $0x10] sm:$0xff]  ;;  %v737_v51 = vld [vmem:[%s14358_s2 + $0x28] sm:$0xff] }
  0x19   : > { %8600 = vmatprep.subr.bf16.mxu0 %v14365_v3  ;;  %v8633_v49 = vpack.c.bf16 %v735_v47, %v733_v46  ;;  %v739_v52 = vld [vmem:[%s14358_s2 + $0x38] sm:$0xff]  ;;  %v8635_v53 = vpack.c.bf16 %v734_v50, %v732_v48  ;;  %v736_v55 = vld [vmem:[%s14358_s2 + $0x20] sm:$0xff]  ;;  %v738_v56 = vld [vmem:[%s14358_s2 + $0x30] sm:$0xff] }
  0x1a   : > { %v8637_v54 = vpack.c.bf16 %v739_v52, %v737_v51  ;;  %v741_v57 = vld [vmem:[%s14358_s2 + $0x48] sm:$0xff]  ;;  %v743_v58 = vld [vmem:[%s14358_s2 + $0x58] sm:$0xff]  ;;  %v8639_v59 = vpack.c.bf16 %v738_v56, %v736_v55  ;;  %v316_v60 = vld [vmem:[%s9709_s23 + $0x10] sm:$0xff] }
  0x1b   : > { %8634 = vmatprep.subr.bf16.mxu1 %v8633_v49  ;;  %v8641_v61 = vpack.c.bf16 %v743_v58, %v741_v57  ;;  %v740_v62 = vld [vmem:[%s14358_s2 + $0x40] sm:$0xff]  ;;  %v742_v63 = vld [vmem:[%s14358_s2 + $0x50] sm:$0xff]  ;;  %v319_v0 = vld [vmem:[%s9709_s23 + $0x28] sm:$0xff]  ;;  %v14367_v49 = vmov 0.0  }
  0x1c   : > { %8602 = vmatpush1.bf16.msra.mxu0 %v8601_v13  ;;  %8636 = vmatpush1.bf16.msra.mxu1 %v8635_v53  ;;  %v745_v1 = vld [vmem:[%s14358_s2 + $0x68] sm:$0xff]  ;;  %v747_v2 = vld [vmem:[%s14358_s2 + $0x78] sm:$0xff]  ;;  %v8643_v4 = vpack.c.bf16 %v742_v63, %v740_v62  ;;  %v318_v5 = vld [vmem:[%s9709_s23 + $0x20] sm:$0xff] }
  0x1d   : > { %8603 = vmatprep.subr.bf16.mxu0 %v14365_v3  ;;  %8638 = vmatprep.subr.bf16.mxu1 %v8637_v54  ;;  %v8645_v6 = vpack.c.bf16 %v747_v2, %v745_v1  ;;  %v744_v7 = vld [vmem:[%s14358_s2 + $0x60] sm:$0xff]  ;;  %v746_v8 = vld [vmem:[%s14358_s2 + $0x70] sm:$0xff]  ;;  %v321_v9 = vld [vmem:[%s9709_s23 + $0x38] sm:$0xff] }
  0x1e   : > { %v8647_v10 = vpack.c.bf16 %v746_v8, %v744_v7  ;;  %v320_v11 = vld [vmem:[%s9709_s23 + $0x30] sm:$0xff]  ;;  %v323_v12 = vld [vmem:[%s9709_s23 + $0x48] sm:$0xff]  ;;  %v322_v13 = vld [vmem:[%s9709_s23 + $0x40] sm:$0xff]  ;;  %909 = vmatprep.mubr.f32.mxu1 %v14367_v49 }
  0x1f   : > { %v325_v14 = vld [vmem:[%s9709_s23 + $0x58] sm:$0xff]  ;;  %v324_v15 = vld [vmem:[%s9709_s23 + $0x50] sm:$0xff]  ;;  %v326_v17 = vld [vmem:[%s9709_s23 + $0x60] sm:$0xff] }
  0x20   : > { %8605 = vmatpush1.bf16.msra.mxu0 %v8604_v16  ;;  %8640 = vmatpush1.bf16.msra.mxu1 %v8639_v59  ;;  %v327_v16 = vld [vmem:[%s9709_s23 + $0x68] sm:$0xff]  ;;  %v329_v18 = vld [vmem:[%s9709_s23 + $0x78] sm:$0xff]  ;;  %v330_v21 = vld [vmem:[%s9709_s23 + $0x80] sm:$0xff] }
  0x21   : > { %8606 = vmatprep.subr.bf16.mxu0 %v14365_v3  ;;  %8642 = vmatprep.subr.bf16.mxu1 %v8641_v61  ;;  %v331_v20 = vld [vmem:[%s9709_s23 + $0x88] sm:$0xff]  ;;  %v332_v23 = vld [vmem:[%s9709_s23 + $0x90] sm:$0xff]  ;;  %v337_v26 = vld [vmem:[%s9709_s23 + $0xb8] sm:$0xff] }
  0x22   : > { %v335_v24 = vld [vmem:[%s9709_s23 + $0xa8] sm:$0xff]  ;;  %v336_v27 = vld [vmem:[%s9709_s23 + $0xb0] sm:$0xff]  ;;  %v338_v29 = vld [vmem:[%s9709_s23 + $0xc0] sm:$0xff] }
  0x23   : > { %v341_v30 = vld [vmem:[%s9709_s23 + $0xd8] sm:$0xff]  ;;  %v343_v32 = vld [vmem:[%s9709_s23 + $0xe8] sm:$0xff]  ;;  %v342_v33 = vld [vmem:[%s9709_s23 + $0xe0] sm:$0xff] }
  0x24   : > { %8608 = vmatpush1.bf16.msra.mxu0 %v8607_v19  ;;  %8644 = vmatpush1.bf16.msra.mxu1 %v8643_v4  ;;  %v328_v19 = vld [vmem:[%s9709_s23 + $0x70] sm:$0xff]  ;;  %v347_v36 = vld [vmem:[%s9709_s23 + $0x108] sm:$0xff]  ;;  %v349_v38 = vld [vmem:[%s9709_s23 + $0x118] sm:$0xff] }
  0x25   : > { %8609 = vmatprep.subr.bf16.mxu0 %v14365_v3  ;;  %8646 = vmatprep.subr.bf16.mxu1 %v8645_v6  ;;  %v344_v35 = vld [vmem:[%s9709_s23 + $0xf0] sm:$0xff]  ;;  %v350_v41 = vld [vmem:[%s9709_s23 + $0x120] sm:$0xff]  ;;  %v353_v42 = vld [vmem:[%s9709_s23 + $0x138] sm:$0xff] }
  0x26   : > { %v348_v39 = vld [vmem:[%s9709_s23 + $0x110] sm:$0xff]  ;;  %v357_v46 = vld [vmem:[%s9709_s23 + $0x158] sm:$0xff]  ;;  %v359_v48 = vld [vmem:[%s9709_s23 + $0x168] sm:$0xff] }
  0x27   : > { %v356_v47 = vld [vmem:[%s9709_s23 + $0x150] sm:$0xff]  ;;  %v7622_v50 = vld [vmem:[%s14358_s2 + $0x88] sm:$0xff]  ;;  %v7624_v51 = vld [vmem:[%s14358_s2 + $0x98] sm:$0xff] }
  0x28   : > { %8611 = vmatpush1.bf16.msra.mxu0 %v8610_v22  ;;  %8648 = vmatpush1.bf16.msra.mxu1 %v8647_v10  ;;  %v333_v22 = vld [vmem:[%s9709_s23 + $0x98] sm:$0xff]  ;;  %v8649_v52 = vpack.c.bf16 %v7624_v51, %v7622_v50  ;;  %v358_v53 = vld [vmem:[%s9709_s23 + $0x160] sm:$0xff]  ;;  %v360_v55 = vld [vmem:[%s9709_s23 + $0x170] sm:$0xff] }
  0x29   : > { %8612 = vmatprep.subr.bf16.mxu0 %v14365_v3  ;;  %v361_v54 = vld [vmem:[%s9709_s23 + $0x178] sm:$0xff]  ;;  %v363_v56 = vld [vmem:[%s9709_s23 + $0x188] sm:$0xff]  ;;  %v362_v57 = vld [vmem:[%s9709_s23 + $0x180] sm:$0xff] }
  0x2a   : > { %8650 = vmatprep.subr.bf16.mxu1 %v8649_v52  ;;  %v365_v58 = vld [vmem:[%s9709_s23 + $0x198] sm:$0xff]  ;;  %v364_v59 = vld [vmem:[%s9709_s23 + $0x190] sm:$0xff]  ;;  %v366_v61 = vld [vmem:[%s9709_s23 + $0x1a0] sm:$0xff] }
  0x2b   : > { %v369_v62 = vld [vmem:[%s9709_s23 + $0x1b8] sm:$0xff]  ;;  %v368_v63 = vld [vmem:[%s9709_s23 + $0x1b0] sm:$0xff]  ;;  %v370_v1 = vld [vmem:[%s9709_s23 + $0x1c0] sm:$0xff] }
  0x2c   : > { %8614 = vmatpush1.bf16.msra.mxu0 %v8613_v25  ;;  %v334_v25 = vld [vmem:[%s9709_s23 + $0xa0] sm:$0xff]  ;;  %v373_v2 = vld [vmem:[%s9709_s23 + $0x1d8] sm:$0xff]  ;;  %v372_v4 = vld [vmem:[%s9709_s23 + $0x1d0] sm:$0xff] }
  0x2d   : > { %8615 = vmatprep.subr.bf16.mxu0 %v14365_v3  ;;  %v374_v6 = vld [vmem:[%s9709_s23 + $0x1e0] sm:$0xff]  ;;  %v377_v7 = vld [vmem:[%s9709_s23 + $0x1f8] sm:$0xff]  ;;  %v376_v8 = vld [vmem:[%s9709_s23 + $0x1f0] sm:$0xff] }
  0x2e   : > { %v7623_v10 = vld [vmem:[%s14358_s2 + $0x90] sm:$0xff] }
  0x30   : > { %8617 = vmatpush1.bf16.msra.mxu0 %v8616_v28  ;;  %v339_v28 = vld [vmem:[%s9709_s23 + $0xc8] sm:$0xff] }
  0x31   : > { %8618 = vmatprep.subr.bf16.mxu0 %v14365_v3 }
  0x34   : > { %8620 = vmatpush1.bf16.msra.mxu0 %v8619_v31  ;;  %v340_v31 = vld [vmem:[%s9709_s23 + $0xd0] sm:$0xff] }
  0x35   : > { %8621 = vmatprep.subr.bf16.mxu0 %v14365_v3 }
  0x38   : > { %8623 = vmatpush1.bf16.msra.mxu0 %v8622_v34  ;;  %v345_v34 = vld [vmem:[%s9709_s23 + $0xf8] sm:$0xff] }
  0x39   : > { %8624 = vmatprep.subr.bf16.mxu0 %v14365_v3 }
  0x3c   : > { %8626 = vmatpush1.bf16.msra.mxu0 %v8625_v37  ;;  %v346_v37 = vld [vmem:[%s9709_s23 + $0x100] sm:$0xff] }
  0x3d   : > { %8627 = vmatprep.subr.bf16.mxu0 %v14365_v3 }
  0x40   : > { %8629 = vmatpush1.bf16.msra.mxu0 %v8628_v40  ;;  %v351_v40 = vld [vmem:[%s9709_s23 + $0x128] sm:$0xff] }
  0x41   : > { %8630 = vmatprep.subr.bf16.mxu0 %v14365_v3 }
  0x44   : > { %8632 = vmatpush1.bf16.msra.mxu0 %v8631_v43  ;;  %v352_v43 = vld [vmem:[%s9709_s23 + $0x130] sm:$0xff] }
  0x45   : > { %8665 = vmatprep.subr.bf16.mxu0 %v14365_v3 }
  0x47   : > { %572 = vmatmul.mubr.f32.vlgmr.msra.gmra.mrb[0].mxu0 %v314_v44  ;;  %v355_v44 = vld [vmem:[%s9709_s23 + $0x148] sm:$0xff] }
  0x48   : > { %7558 = vmatprep.mubr.msk.f32.mxu0 %vm410_vm0, %v317_v45  ;;  %v354_v45 = vld [vmem:[%s9709_s23 + $0x140] sm:$0xff] }
  0x4b   : > { %577 = vmatmul.mubr.f32.gmra.mrb[2].mxu0 %v316_v60  ;;  %v367_v60 = vld [vmem:[%s9709_s23 + $0x1a8] sm:$0xff] }
  0x4c   : > { %7559 = vmatprep.mubr.msk.f32.mxu0 %vm410_vm0, %v319_v0  ;;  %v371_v0 = vld [vmem:[%s9709_s23 + $0x1c8] sm:$0xff] }
  0x4f   : > { %582 = vmatmul.mubr.f32.gmra.mrb[4].mxu0 %v318_v5  ;;  %v375_v5 = vld [vmem:[%s9709_s23 + $0x1e8] sm:$0xff] }
  0x50   : > { %7560 = vmatprep.mubr.msk.f32.mxu0 %vm410_vm0, %v321_v9  ;;  %v7621_v9 = vld [vmem:[%s14358_s2 + $0x80] sm:$0xff] }
  0x53   : > { %587 = vmatmul.mubr.f32.gmra.mrb[6].mxu0 %v320_v11  ;;  %v7626_v11 = vld [vmem:[%s14358_s2 + $0xa8] sm:$0xff] }
  0x54   : > { %7561 = vmatprep.mubr.msk.f32.mxu0 %vm410_vm0, %v323_v12  ;;  %v7628_v12 = vld [vmem:[%s14358_s2 + $0xb8] sm:$0xff] }
  0x57   : > { %592 = vmatmul.mubr.f32.gmra.mrb[8].mxu0 %v322_v13  ;;  %v8651_v13 = vpack.c.bf16 %v7623_v10, %v7621_v9 }
  0x58   : > { %7562 = vmatprep.mubr.msk.f32.mxu0 %vm410_vm0, %v325_v14  ;;  %v8653_v14 = vpack.c.bf16 %v7628_v12, %v7626_v11 }
  0x5b   : > { %597 = vmatmul.mubr.f32.gmra.mrb[10].mxu0 %v324_v15  ;;  %v7625_v15 = vld [vmem:[%s14358_s2 + $0xa0] sm:$0xff] }
  0x5c   : > { %7563 = vmatprep.mubr.msk.f32.mxu0 %vm410_vm0, %v327_v16  ;;  %v7627_v16 = vld [vmem:[%s14358_s2 + $0xb0] sm:$0xff] }
  0x5f   : > { %602 = vmatmul.mubr.f32.gmra.mrb[12].mxu0 %v326_v17 }
  0x60   : > { %7564 = vmatprep.mubr.msk.f32.mxu0 %vm410_vm0, %v329_v18  ;;  %v7630_v18 = vld [vmem:[%s14358_s2 + $0xc8] sm:$0xff] }
  0x63   : > { %607 = vmatmul.mubr.f32.gmra.mrb[14].mxu0 %v328_v19  ;;  %v7632_v19 = vld [vmem:[%s14358_s2 + $0xd8] sm:$0xff] }
  0x64   : > { %7565 = vmatprep.mubr.msk.f32.mxu0 %vm410_vm0, %v331_v20 }
  0x67   : > { %612 = vmatmul.mubr.f32.gmra.mrb[16].mxu0 %v330_v21  ;;  %v8655_v21 = vpack.c.bf16 %v7627_v16, %v7625_v15  ;;  %v7670_v15 = vld [vmem:[%s14359_s3 + $0xe8] sm:$0xff] }
  0x68   : > { %7566 = vmatprep.mubr.msk.f32.mxu0 %vm410_vm0, %v333_v22  ;;  %v8657_v22 = vpack.c.bf16 %v7632_v19, %v7630_v18 }
  0x6b   : > { %617 = vmatmul.mubr.f32.gmra.mrb[18].mxu0 %v332_v23  ;;  %v7629_v23 = vld [vmem:[%s14358_s2 + $0xc0] sm:$0xff] }
  0x6c   : > { %7567 = vmatprep.mubr.msk.f32.mxu0 %vm410_vm0, %v335_v24  ;;  %v7631_v24 = vld [vmem:[%s14358_s2 + $0xd0] sm:$0xff] }
  0x6f   : > { %622 = vmatmul.mubr.f32.gmra.mrb[20].mxu0 %v334_v25 }
  0x70   : > { %7568 = vmatprep.mubr.msk.f32.mxu0 %vm410_vm0, %v337_v26  ;;  %v7634_v26 = vld [vmem:[%s14358_s2 + $0xe8] sm:$0xff] }
  0x73   : > { %627 = vmatmul.mubr.f32.gmra.mrb[22].mxu0 %v336_v27  ;;  %v7636_v27 = vld [vmem:[%s14358_s2 + $0xf8] sm:$0xff] }
  0x74   : > { %7569 = vmatprep.mubr.msk.f32.mxu0 %vm410_vm0, %v339_v28 }
  0x77   : > { %632 = vmatmul.mubr.f32.gmra.mrb[24].mxu0 %v338_v29  ;;  %v8659_v29 = vpack.c.bf16 %v7631_v24, %v7629_v23  ;;  %v7672_v23 = vld [vmem:[%s14359_s3 + $0xf8] sm:$0xff] }
  0x78   : > { %7570 = vmatprep.mubr.msk.f32.mxu0 %vm410_vm0, %v341_v30  ;;  %v8661_v30 = vpack.c.bf16 %v7636_v27, %v7634_v26 }
  0x7b   : > { %637 = vmatmul.mubr.f32.gmra.mrb[26].mxu0 %v340_v31  ;;  %v7633_v31 = vld [vmem:[%s14358_s2 + $0xe0] sm:$0xff] }
  0x7c   : > { %7571 = vmatprep.mubr.msk.f32.mxu0 %vm410_vm0, %v343_v32  ;;  %v7635_v32 = vld [vmem:[%s14358_s2 + $0xf0] sm:$0xff] }
  0x7f   : > { %642 = vmatmul.mubr.f32.gmra.mrb[28].mxu0 %v342_v33 }
  0x80   : > { %7572 = vmatprep.mubr.msk.f32.mxu0 %vm410_vm0, %v345_v34 }
  0x83   : > { %647 = vmatmul.mubr.f32.gmra.mrb[30].mxu0 %v344_v35  ;;  %v8663_v35 = vpack.c.bf16 %v7635_v32, %v7633_v31  ;;  %v7673_v32 = vld [vmem:[%s14359_s3 + $0x100] sm:$0xff] }
  0x84   : > { %7573 = vmatprep.mubr.msk.f32.mxu0 %vm410_vm0, %v347_v36 }
  0x87   : > { %652 = vmatmul.mubr.f32.gmra.mrb[32].mxu0 %v346_v37 }
  0x88   : > { %7574 = vmatprep.mubr.msk.f32.mxu0 %vm410_vm0, %v349_v38 }
  0x8b   : > { %657 = vmatmul.mubr.f32.gmra.mrb[34].mxu0 %v348_v39 }
  0x8c   : > { %7575 = vmatprep.mubr.msk.f32.mxu0 %vm410_vm0, %v351_v40 }
  0x8f   : > { %662 = vmatmul.mubr.f32.gmra.mrb[36].mxu0 %v350_v41 }
  0x90   : > { %7576 = vmatprep.mubr.msk.f32.mxu0 %vm410_vm0, %v353_v42 }
  0x93   : > { %667 = vmatmul.mubr.f32.gmra.mrb[38].mxu0 %v352_v43 }
  0x94   : > { %7577 = vmatprep.mubr.msk.f32.mxu0 %vm410_vm0, %v355_v44 }
  0x97   : > { %672 = vmatmul.mubr.f32.gmra.mrb[40].mxu0 %v354_v45 }
  0x98   : > { %7578 = vmatprep.mubr.msk.f32.mxu0 %vm410_vm0, %v357_v46 }
  0x9b   : > { %677 = vmatmul.mubr.f32.gmra.mrb[42].mxu0 %v356_v47 }
  0x9c   : > { %7579 = vmatprep.mubr.msk.f32.mxu0 %vm410_vm0, %v359_v48 }
  0x9f   : > { %682 = vmatmul.mubr.f32.gmra.mrb[44].mxu0 %v358_v53 }
  0xa0   : > { %7580 = vmatprep.mubr.msk.f32.mxu0 %vm410_vm0, %v361_v54 }
  0xa3   : > { %687 = vmatmul.mubr.f32.gmra.mrb[46].mxu0 %v360_v55 }
  0xa4   : > { %7581 = vmatprep.mubr.msk.f32.mxu0 %vm410_vm0, %v363_v56 }
  0xa7   : > { %692 = vmatmul.mubr.f32.gmra.mrb[48].mxu0 %v362_v57 }
  0xa8   : > { %7582 = vmatprep.mubr.msk.f32.mxu0 %vm410_vm0, %v365_v58 }
  0xab   : > { %697 = vmatmul.mubr.f32.gmra.mrb[50].mxu0 %v364_v59 }
  0xac   : > { %7583 = vmatprep.mubr.msk.f32.mxu0 %vm410_vm0, %v367_v60 }
  0xaf   : > { %702 = vmatmul.mubr.f32.gmra.mrb[52].mxu0 %v366_v61 }
  0xb0   : > { %7584 = vmatprep.mubr.msk.f32.mxu0 %vm410_vm0, %v369_v62 }
  0xb3   : > { %707 = vmatmul.mubr.f32.gmra.mrb[54].mxu0 %v368_v63 }
  0xb4   : > { %7585 = vmatprep.mubr.msk.f32.mxu0 %vm410_vm0, %v371_v0 }
  0xb7   : > { %712 = vmatmul.mubr.f32.gmra.mrb[56].mxu0 %v370_v1 }
  0xb8   : > { %7586 = vmatprep.mubr.msk.f32.mxu0 %vm410_vm0, %v373_v2 }
  0xbb   : > { %717 = vmatmul.mubr.f32.gmra.mrb[58].mxu0 %v372_v4 }
  0xbc   : > { %7587 = vmatprep.mubr.msk.f32.mxu0 %vm410_vm0, %v375_v5 }
  0xbf   : > { %722 = vmatmul.mubr.f32.gmra.mrb[60].mxu0 %v374_v6 }
  0xc0   : > { %7588 = vmatprep.mubr.msk.f32.mxu0 %vm410_vm0, %v377_v7 }
  0xc3   : > { %727 = vmatmul.mubr.f32.gmra.mrb[62].mxu0 %v376_v8 }
 0x11a   : > { %v9959_v17 = vpop.f32.mrb[0].mxu0 }
 0x11b   : > { %v575_v20 = vpop.f32.mrb[1].mxu0  ;;  %7589 = vmatmul.mubr.msk.f32.vlgmr.msra.gmra.mrb[0].mxu1 %vm748_vm1, %v9959_v17 }
 0x11c   : > { %8652 = vmatpush1.bf16.msra.mxu1 %v8651_v13  ;;  %915 = vmatprep.mubr.f32.mxu1 %v14367_v49 }
 0x11d   : > { %8654 = vmatprep.subr.bf16.mxu1 %v8653_v14  ;;  %v7669_v14 = vld [vmem:[%s14359_s3 + $0xe0] sm:$0xff] }
 0x11e   : > { %v9976_v25 = vpop.f32.mrb[2].mxu0  ;;  %v8666_v16 = vpack.c.bf16 %v7670_v15, %v7669_v14  ;;  %v7678_v14 = vld [vmem:[%s14359_s3 + $0x128] sm:$0xff] }
 0x11f   : > { %v580_v28 = vpop.f32.mrb[3].mxu0  ;;  %7590 = vmatmul.mubr.msk.f32.gmra.mrb[2].mxu1 %vm748_vm1, %v9976_v25 }
 0x120   : > { %921 = vmatprep.mubr.f32.mxu1 %v14367_v49  ;;  %8656 = vmatpush1.bf16.msra.mxu1 %v8655_v21 }
 0x121   : > { %8658 = vmatprep.subr.bf16.mxu1 %v8657_v22  ;;  %8667 = vmatpush1.bf16.msra.mxu0 %v8666_v16  ;;  %v7671_v22 = vld [vmem:[%s14359_s3 + $0xf0] sm:$0xff]  ;;  %v7765_v16 = vld [vmem:[%s14358_s2 + $0x120] sm:$0xff] }
 0x122   : > { %v9993_v33 = vpop.f32.mrb[4].mxu0  ;;  %8668 = vmatprep.subr.bf16.mxu0 %v14365_v3  ;;  %v8669_v24 = vpack.c.bf16 %v7672_v23, %v7671_v22  ;;  %v7770_v22 = vld [vmem:[%s14358_s2 + $0x148] sm:$0xff]  ;;  %v7772_v23 = vld [vmem:[%s14358_s2 + $0x158] sm:$0xff] }
 0x123   : > { %v585_v34 = vpop.f32.mrb[5].mxu0  ;;  %7591 = vmatmul.mubr.msk.f32.gmra.mrb[4].mxu1 %vm748_vm1, %v9993_v33 }
 0x124   : > { %927 = vmatprep.mubr.f32.mxu1 %v14367_v49  ;;  %8660 = vmatpush1.bf16.msra.mxu1 %v8659_v29  ;;  %v7674_v34 = vld [vmem:[%s14359_s3 + $0x108] sm:$0xff] }
 0x125   : > { %8662 = vmatprep.subr.bf16.mxu1 %v8661_v30  ;;  %8670 = vmatpush1.bf16.msra.mxu0 %v8669_v24 }
 0x126   : > { %v9998_v36 = vpop.f32.mrb[6].mxu0  ;;  %8671 = vmatprep.subr.bf16.mxu0 %v14365_v3 }
 0x127   : > { %v590_v37 = vpop.f32.mrb[7].mxu0  ;;  %7592 = vmatmul.mubr.msk.f32.gmra.mrb[6].mxu1 %vm748_vm1, %v9998_v36 }
 0x128   : > { %933 = vmatprep.mubr.f32.mxu1 %v14367_v49  ;;  %8664 = vmatpush1.bf16.msra.mxu1 %v8663_v35  ;;  %v8672_v35 = vpack.c.bf16 %v7674_v34, %v7673_v32  ;;  %v7762_v37 = vld [vmem:[%s14358_s2 + $0x108] sm:$0xff]  ;;  %v7776_v34 = vld [vmem:[%s14358_s2 + $0x178] sm:$0xff] }
 0x129   : > { %v7774_v32 = vld [vmem:[%s14358_s2 + $0x168] sm:$0xff] }
 0x12a   : > { %v10003_v38 = vpop.f32.mrb[8].mxu0  ;;  %8673 = vmatpush1.bf16.msra.mxu0 %v8672_v35 }
 0x12b   : > { %v595_v39 = vpop.f32.mrb[9].mxu0  ;;  %7593 = vmatmul.mubr.msk.f32.gmra.mrb[8].mxu1 %vm748_vm1, %v10003_v38  ;;  %8674 = vmatprep.subr.bf16.mxu0 %v14365_v3 }
 0x12c   : > { %939 = vmatprep.mubr.f32.mxu1 %v14367_v49  ;;  %v7764_v39 = vld [vmem:[%s14358_s2 + $0x118] sm:$0xff] }
 0x12e   : > { %v10008_v40 = vpop.f32.mrb[10].mxu0 }
 0x12f   : > { %v600_v41 = vpop.f32.mrb[11].mxu0  ;;  %7594 = vmatmul.mubr.msk.f32.gmra.mrb[10].mxu1 %vm748_vm1, %v10008_v40 }
 0x130   : > { %945 = vmatprep.mubr.f32.mxu1 %v14367_v49  ;;  %v8749_v41 = vpack.c.bf16 %v7764_v39, %v7762_v37  ;;  %v7679_v37 = vld [vmem:[%s14359_s3 + $0x130] sm:$0xff]  ;;  %v7680_v39 = vld [vmem:[%s14359_s3 + $0x138] sm:$0xff] }
 0x132   : > { %v10013_v42 = vpop.f32.mrb[12].mxu0  ;;  %8750 = vmatprep.subr.bf16.mxu1 %v8749_v41  ;;  %v8761_v41 = vpack.c.bf16 %v7776_v34, %v7774_v32  ;;  %v7695_v34 = vld [vmem:[%s14359_s3 + $0x1b0] sm:$0xff] }
 0x133   : > { %v605_v43 = vpop.f32.mrb[13].mxu0  ;;  %7595 = vmatmul.mubr.msk.f32.gmra.mrb[12].mxu1 %vm748_vm1, %v10013_v42 }
 0x134   : > { %951 = vmatprep.mubr.f32.mxu1 %v14367_v49 }
 0x136   : > { %v10018_v44 = vpop.f32.mrb[14].mxu0 }
 0x137   : > { %v610_v45 = vpop.f32.mrb[15].mxu0  ;;  %7596 = vmatmul.mubr.msk.f32.gmra.mrb[14].mxu1 %vm748_vm1, %v10018_v44 }
 0x138   : > { %957 = vmatprep.mubr.f32.mxu1 %v14367_v49 }
 0x13a   : > { %v10023_v46 = vpop.f32.mrb[16].mxu0 }
 0x13b   : > { %v615_v47 = vpop.f32.mrb[17].mxu0  ;;  %7597 = vmatmul.mubr.msk.f32.gmra.mrb[16].mxu1 %vm748_vm1, %v10023_v46 }
 0x13c   : > { %963 = vmatprep.mubr.f32.mxu1 %v14367_v49 }
 0x13e   : > { %v10028_v48 = vpop.f32.mrb[18].mxu0 }
 0x13f   : > { %v620_v50 = vpop.f32.mrb[19].mxu0  ;;  %7598 = vmatmul.mubr.msk.f32.gmra.mrb[18].mxu1 %vm748_vm1, %v10028_v48 }
 0x140   : > { %969 = vmatprep.mubr.f32.mxu1 %v14367_v49 }
 0x142   : > { %v10033_v51 = vpop.f32.mrb[20].mxu0 }
 0x143   : > { %v625_v52 = vpop.f32.mrb[21].mxu0  ;;  %7599 = vmatmul.mubr.msk.f32.gmra.mrb[20].mxu1 %vm748_vm1, %v10033_v51 }
 0x144   : > { %975 = vmatprep.mubr.f32.mxu1 %v14367_v49  ;;  %v7675_v52 = vld [vmem:[%s14359_s3 + $0x110] sm:$0xff] }
 0x146   : > { %v10038_v53 = vpop.f32.mrb[22].mxu0 }
 0x147   : > { %v630_v54 = vpop.f32.mrb[23].mxu0  ;;  %7600 = vmatmul.mubr.msk.f32.gmra.mrb[22].mxu1 %vm748_vm1, %v10038_v53 }
 0x148   : > { %981 = vmatprep.mubr.f32.mxu1 %v14367_v49  ;;  %v7676_v54 = vld [vmem:[%s14359_s3 + $0x118] sm:$0xff] }
 0x14a   : > { %v10043_v55 = vpop.f32.mrb[24].mxu0 }
 0x14b   : > { %v635_v56 = vpop.f32.mrb[25].mxu0  ;;  %7601 = vmatmul.mubr.msk.f32.gmra.mrb[24].mxu1 %vm748_vm1, %v10043_v55 }
 0x14c   : > { %987 = vmatprep.mubr.f32.mxu1 %v14367_v49  ;;  %v8675_v56 = vpack.c.bf16 %v7676_v54, %v7675_v52  ;;  %v8681_v52 = vpack.c.bf16 %v7680_v39, %v7679_v37 }
 0x14e   : > { %v10048_v57 = vpop.f32.mrb[26].mxu0  ;;  %8676 = vmatpush1.bf16.msra.mxu0 %v8675_v56  ;;  %v7681_v56 = vld [vmem:[%s14359_s3 + $0x140] sm:$0xff] }
 0x14f   : > { %v640_v58 = vpop.f32.mrb[27].mxu0  ;;  %7602 = vmatmul.mubr.msk.f32.gmra.mrb[26].mxu1 %vm748_vm1, %v10048_v57  ;;  %8677 = vmatprep.subr.bf16.mxu0 %v14365_v3 }
 0x150   : > { %993 = vmatprep.mubr.f32.mxu1 %v14367_v49 }
 0x152   : > { %v10053_v59 = vpop.f32.mrb[28].mxu0 }
 0x153   : > { %v645_v60 = vpop.f32.mrb[29].mxu0  ;;  %7603 = vmatmul.mubr.msk.f32.gmra.mrb[28].mxu1 %vm748_vm1, %v10053_v59 }
 0x154   : > { %999 = vmatprep.mubr.f32.mxu1 %v14367_v49 }
 0x156   : > { %v10058_v61 = vpop.f32.mrb[30].mxu0 }
 0x157   : > { %v650_v62 = vpop.f32.mrb[31].mxu0  ;;  %7604 = vmatmul.mubr.msk.f32.gmra.mrb[30].mxu1 %vm748_vm1, %v10058_v61 }
 0x158   : > { %1005 = vmatprep.mubr.f32.mxu1 %v14367_v49  ;;  %v7761_v62 = vld [vmem:[%s14358_s2 + $0x100] sm:$0xff] }
 0x15a   : > { %v10063_v63 = vpop.f32.mrb[32].mxu0 }
 0x15b   : > { %v655_v0 = vpop.f32.mrb[33].mxu0  ;;  %7605 = vmatmul.mubr.msk.f32.gmra.mrb[32].mxu1 %vm748_vm1, %v10063_v63 }
 0x15c   : > { %1011 = vmatprep.mubr.f32.mxu1 %v14367_v49  ;;  %v7763_v0 = vld [vmem:[%s14358_s2 + $0x110] sm:$0xff] }
 0x15e   : > { %v10068_v1 = vpop.f32.mrb[34].mxu0 }
 0x15f   : > { %v660_v2 = vpop.f32.mrb[35].mxu0  ;;  %7606 = vmatmul.mubr.msk.f32.gmra.mrb[34].mxu1 %vm748_vm1, %v10068_v1 }
 0x160   : > { %1017 = vmatprep.mubr.f32.mxu1 %v14367_v49 }
 0x162   : > { %v10073_v4 = vpop.f32.mrb[36].mxu0 }
 0x163   : > { %v665_v5 = vpop.f32.mrb[37].mxu0  ;;  %7607 = vmatmul.mubr.msk.f32.gmra.mrb[36].mxu1 %vm748_vm1, %v10073_v4 }
 0x164   : > { %1023 = vmatprep.mubr.f32.mxu1 %v14367_v49  ;;  %v7766_v5 = vld [vmem:[%s14358_s2 + $0x128] sm:$0xff] }
 0x166   : > { %v10078_v6 = vpop.f32.mrb[38].mxu0 }
 0x167   : > { %v670_v7 = vpop.f32.mrb[39].mxu0  ;;  %7608 = vmatmul.mubr.msk.f32.gmra.mrb[38].mxu1 %vm748_vm1, %v10078_v6 }
 0x168   : > { %1029 = vmatprep.mubr.f32.mxu1 %v14367_v49  ;;  %v7768_v7 = vld [vmem:[%s14358_s2 + $0x138] sm:$0xff] }
 0x169   : > { %v8753_v15 = vpack.c.bf16 %v7768_v7, %v7766_v5  ;;  %v7684_v5 = vld [vmem:[%s14359_s3 + $0x158] sm:$0xff] }
 0x16a   : > { %v10083_v8 = vpop.f32.mrb[40].mxu0 }
 0x16b   : > { %v675_v9 = vpop.f32.mrb[41].mxu0  ;;  %7609 = vmatmul.mubr.msk.f32.gmra.mrb[40].mxu1 %vm748_vm1, %v10083_v8 }
 0x16c   : > { %1035 = vmatprep.mubr.f32.mxu1 %v14367_v49 }
 0x16e   : > { %v10088_v10 = vpop.f32.mrb[42].mxu0 }
 0x16f   : > { %v680_v11 = vpop.f32.mrb[43].mxu0  ;;  %7610 = vmatmul.mubr.msk.f32.gmra.mrb[42].mxu1 %vm748_vm1, %v10088_v10 }
 0x170   : > { %1041 = vmatprep.mubr.f32.mxu1 %v14367_v49  ;;  %v8751_v11 = vpack.c.bf16 %v7763_v0, %v7761_v62  ;;  %v7683_v0 = vld [vmem:[%s14359_s3 + $0x150] sm:$0xff] }
 0x171   : > { %v8687_v7 = vpack.c.bf16 %v7684_v5, %v7683_v0 }
 0x172   : > { %v10093_v12 = vpop.f32.mrb[44].mxu0 }
 0x173   : > { %v685_v13 = vpop.f32.mrb[45].mxu0  ;;  %7611 = vmatmul.mubr.msk.f32.gmra.mrb[44].mxu1 %vm748_vm1, %v10093_v12 }
 0x174   : > { %1047 = vmatprep.mubr.f32.mxu1 %v14367_v49  ;;  %v7677_v13 = vld [vmem:[%s14359_s3 + $0x120] sm:$0xff] }
 0x176   : > { %v10104_v18 = vpop.f32.mrb[46].mxu0 }
 0x177   : > { %v690_v19 = vpop.f32.mrb[47].mxu0  ;;  %7612 = vmatmul.mubr.msk.f32.gmra.mrb[46].mxu1 %vm748_vm1, %v10104_v18 }
 0x178   : > { %1053 = vmatprep.mubr.f32.mxu1 %v14367_v49  ;;  %v7767_v19 = vld [vmem:[%s14358_s2 + $0x130] sm:$0xff] }
 0x179   : > { %v8755_v24 = vpack.c.bf16 %v7767_v19, %v7765_v16  ;;  %v7689_v19 = vld [vmem:[%s14359_s3 + $0x180] sm:$0xff] }
 0x17a   : > { %v10110_v20 = vpop.f32.mrb[48].mxu0 }
 0x17b   : > { %v695_v21 = vpop.f32.mrb[49].mxu0  ;;  %7613 = vmatmul.mubr.msk.f32.gmra.mrb[48].mxu1 %vm748_vm1, %v10110_v20 }
 0x17c   : > { %1059 = vmatprep.mubr.f32.mxu1 %v14367_v49  ;;  %v8678_v21 = vpack.c.bf16 %v7678_v14, %v7677_v13  ;;  %v7687_v14 = vld [vmem:[%s14359_s3 + $0x170] sm:$0xff] }
 0x17e   : > { %v10121_v26 = vpop.f32.mrb[50].mxu0  ;;  %8679 = vmatpush1.bf16.msra.mxu0 %v8678_v21  ;;  %v7690_v21 = vld [vmem:[%s14359_s3 + $0x188] sm:$0xff] }
 0x17f   : > { %v700_v27 = vpop.f32.mrb[51].mxu0  ;;  %7614 = vmatmul.mubr.msk.f32.gmra.mrb[50].mxu1 %vm748_vm1, %v10121_v26  ;;  %8680 = vmatprep.subr.bf16.mxu0 %v14365_v3 }
 0x180   : > { %1065 = vmatprep.mubr.f32.mxu1 %v14367_v49  ;;  %v8757_v27 = vpack.c.bf16 %v7772_v23, %v7770_v22  ;;  %v8696_v22 = vpack.c.bf16 %v7690_v21, %v7689_v19  ;;  %v7691_v23 = vld [vmem:[%s14359_s3 + $0x190] sm:$0xff] }
 0x182   : > { %v10127_v28 = vpop.f32.mrb[52].mxu0  ;;  %8682 = vmatpush1.bf16.msra.mxu0 %v8681_v52 }
 0x183   : > { %14452 = vst [vmem:[#allocation2_spill] sm:$0xff] %v10127_v28  ;;  %v705_v29 = vpop.f32.mrb[53].mxu0  ;;  %7615 = vmatmul.mubr.msk.f32.gmra.mrb[52].mxu1 %vm748_vm1, %v10127_v28  ;;  %8683 = vmatprep.subr.bf16.mxu0 %v14365_v3 }
 0x184   : > { %1071 = vmatprep.mubr.f32.mxu1 %v14367_v49  ;;  %v7769_v29 = vld [vmem:[%s14358_s2 + $0x140] sm:$0xff] }
 0x186   : > { %v10132_v30 = vpop.f32.mrb[54].mxu0 }
 0x187   : > { %14453 = vst [vmem:[#allocation3_spill] sm:$0xff] %v10132_v30  ;;  %v710_v31 = vpop.f32.mrb[55].mxu0  ;;  %7616 = vmatmul.mubr.msk.f32.gmra.mrb[54].mxu1 %vm748_vm1, %v10132_v30 }
 0x188   : > { %1077 = vmatprep.mubr.f32.mxu1 %v14367_v49  ;;  %v7771_v31 = vld [vmem:[%s14358_s2 + $0x150] sm:$0xff] }
 0x189   : > { %v8759_v35 = vpack.c.bf16 %v7771_v31, %v7769_v29  ;;  %v7693_v29 = vld [vmem:[%s14359_s3 + $0x1a0] sm:$0xff]  ;;  %v7694_v31 = vld [vmem:[%s14359_s3 + $0x1a8] sm:$0xff] }
 0x18a   : > { %v10149_v43 = vpop.f32.mrb[56].mxu0  ;;  %v8702_v32 = vpack.c.bf16 %v7694_v31, %v7693_v29  ;;  %v7871_v29 = vld [vmem:[%s14358_s2 + $0x190] sm:$0xff] }
 0x18b   : > { %14454 = vst [vmem:[#allocation4_spill] sm:$0xff] %v10149_v43  ;;  %v715_v45 = vpop.f32.mrb[57].mxu0  ;;  %7617 = vmatmul.mubr.msk.f32.gmra.mrb[56].mxu1 %vm748_vm1, %v10149_v43 }
 0x18c   : > { %1083 = vmatprep.mubr.f32.mxu1 %v14367_v49  ;;  %v7773_v45 = vld [vmem:[%s14358_s2 + $0x160] sm:$0xff] }
 0x18e   : > { %v10155_v47 = vpop.f32.mrb[58].mxu0 }
 0x18f   : > { %14455 = vst [vmem:[#allocation5_spill] sm:$0xff] %v10155_v47  ;;  %v720_v50 = vpop.f32.mrb[59].mxu0  ;;  %7618 = vmatmul.mubr.msk.f32.gmra.mrb[58].mxu1 %vm748_vm1, %v10155_v47 }
 0x190   : > { %1089 = vmatprep.mubr.f32.mxu1 %v14367_v49  ;;  %v7775_v50 = vld [vmem:[%s14358_s2 + $0x170] sm:$0xff] }
 0x191   : > { %v8763_v54 = vpack.c.bf16 %v7775_v50, %v7773_v45 }
 0x192   : > { %v10166_v58 = vpop.f32.mrb[60].mxu0 }
 0x193   : > { %14456 = vst [vmem:[#allocation6_spill] sm:$0xff] %v10166_v58  ;;  %v725_v60 = vpop.f32.mrb[61].mxu0  ;;  %7619 = vmatmul.mubr.msk.f32.gmra.mrb[60].mxu1 %vm748_vm1, %v10166_v58 }
 0x194   : > { %1095 = vmatprep.mubr.f32.mxu1 %v14367_v49  ;;  %v7682_v60 = vld [vmem:[%s14359_s3 + $0x148] sm:$0xff] }
 0x195   : > { %v8684_v62 = vpack.c.bf16 %v7682_v60, %v7681_v56 }
 0x196   : > { %v10178_v2 = vpop.f32.mrb[62].mxu0 }
 0x197   : > { %14457 = vst [vmem:[#allocation7_spill] sm:$0xff] %v10178_v2  ;;  %v730_v9 = vpop.f32.mrb[63].mxu0  ;;  %7620 = vmatmul.mubr.msk.f32.gmra.mrb[62].mxu1 %vm748_vm1, %v10178_v2  ;;  %8685 = vmatpush1.bf16.msra.mxu0 %v8684_v62 }
 0x198   : > { %1275 = vmatprep.mubr.f32.mxu1 %v14367_v49  ;;  %8686 = vmatprep.subr.bf16.mxu0 %v14365_v3  ;;  %v7685_v9 = vld [vmem:[%s14359_s3 + $0x160] sm:$0xff] }
 0x19b   : > { %7637 = vmatmul.mubr.msk.f32.vlgmr.msra.gmra.mrb[64].mxu1 %vm748_vm1, %v9959_v17  ;;  %8688 = vmatpush1.bf16.msra.mxu0 %v8687_v7 }
 0x19c   : > { %1281 = vmatprep.mubr.f32.mxu1 %v14367_v49  ;;  %8752 = vmatpush1.bf16.msra.mxu1 %v8751_v11  ;;  %v7686_v11 = vld [vmem:[%s14359_s3 + $0x168] sm:$0xff] }
 0x19d   : > { %8754 = vmatprep.subr.bf16.mxu1 %v8753_v15  ;;  %8689 = vmatprep.subr.bf16.mxu0 %v14365_v3  ;;  %v8690_v13 = vpack.c.bf16 %v7686_v11, %v7685_v9  ;;  %v7688_v15 = vld [vmem:[%s14359_s3 + $0x178] sm:$0xff] }
 0x19e   : > { %v8693_v16 = vpack.c.bf16 %v7688_v15, %v7687_v14  ;;  %v7872_v14 = vld [vmem:[%s14358_s2 + $0x198] sm:$0xff] }
 0x19f   : > { %7638 = vmatmul.mubr.msk.f32.gmra.mrb[66].mxu1 %vm748_vm1, %v9976_v25  ;;  %8691 = vmatpush1.bf16.msra.mxu0 %v8690_v13  ;;  %v7870_v13 = vld [vmem:[%s14358_s2 + $0x188] sm:$0xff] }
 0x1a0   : > { %1287 = vmatprep.mubr.f32.mxu1 %v14367_v49  ;;  %8756 = vmatpush1.bf16.msra.mxu1 %v8755_v24  ;;  %v7692_v24 = vld [vmem:[%s14359_s3 + $0x198] sm:$0xff]  ;;  %v8807_v15 = vpack.c.bf16 %v7872_v14, %v7870_v13  ;;  %v7873_v14 = vld [vmem:[%s14358_s2 + $0x1a0] sm:$0xff] }
 0x1a1   : > { %8758 = vmatprep.subr.bf16.mxu1 %v8757_v27  ;;  %8692 = vmatprep.subr.bf16.mxu0 %v14365_v3  ;;  %v8699_v27 = vpack.c.bf16 %v7692_v24, %v7691_v23 }
 0x1a3   : > { %7639 = vmatmul.mubr.msk.f32.gmra.mrb[68].mxu1 %vm748_vm1, %v9993_v33  ;;  %8694 = vmatpush1.bf16.msra.mxu0 %v8693_v16 }
 0x1a4   : > { %1293 = vmatprep.mubr.f32.mxu1 %v14367_v49  ;;  %8760 = vmatpush1.bf16.msra.mxu1 %v8759_v35  ;;  %v7696_v35 = vld [vmem:[%s14359_s3 + $0x1b8] sm:$0xff] }
 0x1a5   : > { %8762 = vmatprep.subr.bf16.mxu1 %v8761_v41  ;;  %8695 = vmatprep.subr.bf16.mxu0 %v14365_v3  ;;  %v8705_v37 = vpack.c.bf16 %v7696_v35, %v7695_v34  ;;  %v7876_v34 = vld [vmem:[%s14358_s2 + $0x1b8] sm:$0xff] }
 0x1a7   : > { %7640 = vmatmul.mubr.msk.f32.gmra.mrb[70].mxu1 %vm748_vm1, %v9998_v36  ;;  %8697 = vmatpush1.bf16.msra.mxu0 %v8696_v22 }
 0x1a8   : > { %1299 = vmatprep.mubr.f32.mxu1 %v14367_v49  ;;  %8764 = vmatpush1.bf16.msra.mxu1 %v8763_v54 }
 0x1a9   : > { %8698 = vmatprep.subr.bf16.mxu0 %v14365_v3  ;;  %8808 = vmatprep.subr.bf16.mxu1 %v8807_v15  ;;  %v7875_v15 = vld [vmem:[%s14358_s2 + $0x1b0] sm:$0xff] }
 0x1ab   : > { %7641 = vmatmul.mubr.msk.f32.gmra.mrb[72].mxu1 %vm748_vm1, %v10003_v38  ;;  %8700 = vmatpush1.bf16.msra.mxu0 %v8699_v27  ;;  %v7869_v27 = vld [vmem:[%s14358_s2 + $0x180] sm:$0xff] }
 0x1ac   : > { %1305 = vmatprep.mubr.f32.mxu1 %v14367_v49  ;;  %8701 = vmatprep.subr.bf16.mxu0 %v14365_v3 }
 0x1af   : > { %7642 = vmatmul.mubr.msk.f32.gmra.mrb[74].mxu1 %vm748_vm1, %v10008_v40  ;;  %8703 = vmatpush1.bf16.msra.mxu0 %v8702_v32  ;;  %v7874_v32 = vld [vmem:[%s14358_s2 + $0x1a8] sm:$0xff] }
 0x1b0   : > { %1311 = vmatprep.mubr.f32.mxu1 %v14367_v49  ;;  %8704 = vmatprep.subr.bf16.mxu0 %v14365_v3  ;;  %v8811_v13 = vpack.c.bf16 %v7876_v34, %v7874_v32  ;;  %v8813_v32 = vpack.c.bf16 %v7875_v15, %v7873_v14  ;;  %v7881_v14 = vld [vmem:[%s14358_s2 + $0x1e0] sm:$0xff]  ;;  %v7883_v15 = vld [vmem:[%s14358_s2 + $0x1f0] sm:$0xff] }
 0x1b3   : > { %7643 = vmatmul.mubr.msk.f32.gmra.mrb[76].mxu1 %vm748_vm1, %v10013_v42  ;;  %8706 = vmatpush1.bf16.msra.mxu0 %v8705_v37  ;;  %v8809_v37 = vpack.c.bf16 %v7871_v29, %v7869_v27  ;;  %v14473_v29 = vmov 0.0  }
 0x1b4   : > { %1317 = vmatprep.mubr.f32.mxu1 %v14367_v49  ;;  %8707 = vmatprep.subr.bf16.mxu0 %v14365_v3 }
 0x1b7   : > { %7644 = vmatmul.mubr.msk.f32.gmra.mrb[78].mxu1 %vm748_vm1, %v10018_v44 }
 0x1b8   : > { %1323 = vmatprep.mubr.f32.mxu1 %v14367_v49 }
 0x1bb   : > { %7645 = vmatmul.mubr.msk.f32.gmra.mrb[80].mxu1 %vm748_vm1, %v10023_v46 }
 0x1bc   : > { %1329 = vmatprep.mubr.f32.mxu1 %v14367_v49 }
 0x1bf   : > { %7646 = vmatmul.mubr.msk.f32.gmra.mrb[82].mxu1 %vm748_vm1, %v10028_v48 }
 0x1c0   : > { %1335 = vmatprep.mubr.f32.mxu1 %v14367_v49 }
 0x1c3   : > { %7647 = vmatmul.mubr.msk.f32.gmra.mrb[84].mxu1 %vm748_vm1, %v10033_v51 }
 0x1c4   : > { %1341 = vmatprep.mubr.f32.mxu1 %v14367_v49 }
 0x1c7   : > { %7648 = vmatmul.mubr.msk.f32.gmra.mrb[86].mxu1 %vm748_vm1, %v10038_v53 }
 0x1c8   : > { %1347 = vmatprep.mubr.f32.mxu1 %v14367_v49 }
 0x1cb   : > { %7649 = vmatmul.mubr.msk.f32.gmra.mrb[88].mxu1 %vm748_vm1, %v10043_v55 }
 0x1cc   : > { %1353 = vmatprep.mubr.f32.mxu1 %v14367_v49 }
 0x1cf   : > { %7650 = vmatmul.mubr.msk.f32.gmra.mrb[90].mxu1 %vm748_vm1, %v10048_v57 }
 0x1d0   : > { %1359 = vmatprep.mubr.f32.mxu1 %v14367_v49 }
 0x1d3   : > { %7651 = vmatmul.mubr.msk.f32.gmra.mrb[92].mxu1 %vm748_vm1, %v10053_v59 }
 0x1d4   : > { %1365 = vmatprep.mubr.f32.mxu1 %v14367_v49 }
 0x1d7   : > { %7652 = vmatmul.mubr.msk.f32.gmra.mrb[94].mxu1 %vm748_vm1, %v10058_v61 }
 0x1d8   : > { %1371 = vmatprep.mubr.f32.mxu1 %v14367_v49 }
 0x1db   : > { %7653 = vmatmul.mubr.msk.f32.gmra.mrb[96].mxu1 %vm748_vm1, %v10063_v63 }
 0x1dc   : > { %1377 = vmatprep.mubr.f32.mxu1 %v14367_v49 }
 0x1df   : > { %7654 = vmatmul.mubr.msk.f32.gmra.mrb[98].mxu1 %vm748_vm1, %v10068_v1 }
 0x1e0   : > { %1383 = vmatprep.mubr.f32.mxu1 %v14367_v49 }
 0x1e3   : > { %7655 = vmatmul.mubr.msk.f32.gmra.mrb[100].mxu1 %vm748_vm1, %v10073_v4 }
 0x1e4   : > { %1389 = vmatprep.mubr.f32.mxu1 %v14367_v49 }
 0x1e7   : > { %7656 = vmatmul.mubr.msk.f32.gmra.mrb[102].mxu1 %vm748_vm1, %v10078_v6 }
 0x1e8   : > { %1395 = vmatprep.mubr.f32.mxu1 %v14367_v49 }
 0x1eb   : > { %7657 = vmatmul.mubr.msk.f32.gmra.mrb[104].mxu1 %vm748_vm1, %v10083_v8 }
 0x1ec   : > { %1401 = vmatprep.mubr.f32.mxu1 %v14367_v49 }
 0x1ee   : > { %v10351_v39 = vpop.f32.mrb[0].mxu1 }
 0x1ef   : > { %v10353_v41 = vpop.f32.mrb[1].mxu1  ;;  %7658 = vmatmul.mubr.msk.f32.gmra.mrb[106].mxu1 %vm748_vm1, %v10088_v10 }
 0x1f0   : > { %1407 = vmatprep.mubr.f32.mxu1 %v14367_v49 }
 0x1f2   : > { %v10359_v45 = vpop.f32.mrb[2].mxu1 }
 0x1f3   : > { %v10361_v50 = vpop.f32.mrb[3].mxu1  ;;  %7659 = vmatmul.mubr.msk.f32.gmra.mrb[108].mxu1 %vm748_vm1, %v10093_v12 }
 0x1f4   : > { %1413 = vmatprep.mubr.f32.mxu1 %v14367_v49 }
 0x1f6   : > { %v10366_v52 = vpop.f32.mrb[4].mxu1 }
 0x1f7   : > { %v10368_v54 = vpop.f32.mrb[5].mxu1  ;;  %7660 = vmatmul.mubr.msk.f32.gmra.mrb[110].mxu1 %vm748_vm1, %v10104_v18 }
 0x1f8   : > { %1419 = vmatprep.mubr.f32.mxu1 %v14367_v49 }
 0x1fa   : > { %v10373_v56 = vpop.f32.mrb[6].mxu1 }
 0x1fb   : > { %v10375_v60 = vpop.f32.mrb[7].mxu1  ;;  %7661 = vmatmul.mubr.msk.f32.gmra.mrb[112].mxu1 %vm748_vm1, %v10110_v20 }
 0x1fc   : > { %1425 = vmatprep.mubr.f32.mxu1 %v14367_v49 }
 0x1fe   : > { %v10380_v62 = vpop.f32.mrb[8].mxu1 }
 0x1ff   : > { %14458 = vst [vmem:[#allocation8_spill] sm:$0xff] %v10380_v62  ;;  %v10382_v0 = vpop.f32.mrb[9].mxu1  ;;  %7662 = vmatmul.mubr.msk.f32.gmra.mrb[114].mxu1 %vm748_vm1, %v10121_v26 }
 0x200   : > { %1431 = vmatprep.mubr.f32.mxu1 %v14367_v49 }
 0x202   : > { %v10387_v5 = vpop.f32.mrb[10].mxu1 }
 0x203   : > { %14459 = vst [vmem:[#allocation9_spill] sm:$0xff] %v10387_v5  ;;  %v10389_v7 = vpop.f32.mrb[11].mxu1  ;;  %7663 = vmatmul.mubr.msk.f32.gmra.mrb[116].mxu1 %vm748_vm1, %v10127_v28  ;;  %v10714_v5 = vld [vmem:[%s9709_s23 + $0x40] sm:$0xff] }
 0x204   : > { %14460 = vst [vmem:[#allocation10_spill] sm:$0xff] %v10389_v7  ;;  %1437 = vmatprep.mubr.f32.mxu1 %v14367_v49  ;;  %14515 = vst [vmem:[#allocation63_spill] sm:$0xff] %v10714_v5 }
 0x206   : > { %v10394_v9 = vpop.f32.mrb[12].mxu1 }
 0x207   : > { %14461 = vst [vmem:[#allocation11_spill] sm:$0xff] %v10394_v9  ;;  %v10396_v11 = vpop.f32.mrb[13].mxu1  ;;  %7664 = vmatmul.mubr.msk.f32.gmra.mrb[118].mxu1 %vm748_vm1, %v10132_v30  ;;  %v10695_v9 = vld [vmem:[%s9709_s23 + $0x30] sm:$0xff] }
 0x208   : > { %14462 = vst [vmem:[#allocation12_spill] sm:$0xff] %v10396_v11  ;;  %1443 = vmatprep.mubr.f32.mxu1 %v14367_v49 }
 0x20a   : > { %v10407_v16 = vpop.f32.mrb[14].mxu1 }
 0x20b   : > { %14463 = vst [vmem:[#allocation13_spill] sm:$0xff] %v10407_v16  ;;  %v10409_v19 = vpop.f32.mrb[15].mxu1  ;;  %7665 = vmatmul.mubr.msk.f32.gmra.mrb[120].mxu1 %vm748_vm1, %v10149_v43  ;;  %v10676_v16 = vld [vmem:[%s9709_s23 + $0x20] sm:$0xff] }
 0x20c   : > { %14464 = vst [vmem:[#allocation14_spill] sm:$0xff] %v10409_v19  ;;  %1449 = vmatprep.mubr.f32.mxu1 %v14367_v49 }
 0x20e   : > { %v10414_v21 = vpop.f32.mrb[16].mxu1 }
 0x20f   : > { %14465 = vst [vmem:[#allocation15_spill] sm:$0xff] %v10414_v21  ;;  %v10416_v22 = vpop.f32.mrb[17].mxu1  ;;  %7666 = vmatmul.mubr.msk.f32.gmra.mrb[122].mxu1 %vm748_vm1, %v10155_v47  ;;  %v10657_v21 = vld [vmem:[%s9709_s23 + $0x10] sm:$0xff] }
 0x210   : > { %14466 = vst [vmem:[#allocation16_spill] sm:$0xff] %v10416_v22  ;;  %1455 = vmatprep.mubr.f32.mxu1 %v14367_v49 }
 0x212   : > { %v10421_v23 = vpop.f32.mrb[18].mxu1 }
 0x213   : > { %14467 = vst [vmem:[#allocation17_spill] sm:$0xff] %v10421_v23  ;;  %v10423_v24 = vpop.f32.mrb[19].mxu1  ;;  %7667 = vmatmul.mubr.msk.f32.gmra.mrb[124].mxu1 %vm748_vm1, %v10166_v58 }
 0x214   : > { %14468 = vst [vmem:[#allocation18_spill] sm:$0xff] %v10423_v24  ;;  %1461 = vmatprep.mubr.f32.mxu1 %v14367_v49 }
 0x216   : > { %v10434_v31 = vpop.f32.mrb[20].mxu1 }
 0x217   : > { %14469 = vst [vmem:[#allocation19_spill] sm:$0xff] %v10434_v31  ;;  %v10442_v35 = vpop.f32.mrb[21].mxu1  ;;  %7668 = vmatmul.mubr.msk.f32.gmra.mrb[126].mxu1 %vm748_vm1, %v10178_v2  ;;  %v7878_v31 = vld [vmem:[%s14358_s2 + $0x1c8] sm:$0xff] }
 0x218   : > { %14470 = vst [vmem:[#allocation20_spill] sm:$0xff] %v10442_v35  ;;  %2284 = vmatprep.mubr.f32.mxu1 %v14367_v49  ;;  %v7880_v49 = vld [vmem:[%s14358_s2 + $0x1d8] sm:$0xff]  ;;  %v7879_v35 = vld [vmem:[%s14358_s2 + $0x1d0] sm:$0xff] }
 0x219   : > { %v8815_v34 = vpack.c.bf16 %v7880_v49, %v7878_v31 }
 0x21a   : > { %v10453_v3 = vpop.f32.mrb[22].mxu1 }
 0x21b   : > { %14471 = vst [vmem:[#allocation21_spill] sm:$0xff] %v10453_v3  ;;  %v10461_v27 = vpop.f32.mrb[23].mxu1  ;;  %7777 = vmatmul.mubr.msk.f32.vlgmr.msra.gmra.mrb[128].mxu1 %vm748_vm1, %v9959_v17  ;;  %v7877_v3 = vld [vmem:[%s14358_s2 + $0x1c0] sm:$0xff] }
 0x21c   : > { %14472 = vst [vmem:[#allocation22_spill] sm:$0xff] %v10461_v27  ;;  %2290 = vmatprep.mubr.f32.mxu1 %v14473_v29  ;;  %8810 = vmatpush1.bf16.msra.mxu1 %v8809_v37  ;;  %v7882_v27 = vld [vmem:[%s14358_s2 + $0x1e8] sm:$0xff]  ;;  %v7884_v37 = vld [vmem:[%s14358_s2 + $0x1f8] sm:$0xff]  ;;  %v8817_v49 = vpack.c.bf16 %v7879_v35, %v7877_v3  ;;  %v8821_v3 = vpack.c.bf16 %v7883_v15, %v7881_v14 }
 0x21d   : > { %8812 = vmatprep.subr.bf16.mxu1 %v8811_v13  ;;  %v8819_v31 = vpack.c.bf16 %v7884_v37, %v7882_v27 }
 0x21e   : > { %v10472_v23 = vpop.f32.mrb[24].mxu1 }
 0x21f   : > { %14474 = vst [vmem:[#allocation23_spill] sm:$0xff] %v10472_v23  ;;  %v10480_v13 = vpop.f32.mrb[25].mxu1  ;;  %7778 = vmatmul.mubr.msk.f32.gmra.mrb[130].mxu1 %vm748_vm1, %v9976_v25 }
 0x220   : > { %14475 = vst [vmem:[#allocation24_spill] sm:$0xff] %v10480_v13  ;;  %2296 = vmatprep.mubr.f32.mxu1 %v14473_v29  ;;  %8814 = vmatpush1.bf16.msra.mxu1 %v8813_v32  ;;  %v14480_v32 = vmov 0.0|0.0  }
 0x221   : > { %8816 = vmatprep.subr.bf16.mxu1 %v8815_v34 }
 0x222   : > { %v10491_v23 = vpop.f32.mrb[26].mxu1 }
 0x223   : > { %14476 = vst [vmem:[#allocation25_spill] sm:$0xff] %v10491_v23  ;;  %v10493_v13 = vpop.f32.mrb[27].mxu1  ;;  %7779 = vmatmul.mubr.msk.f32.gmra.mrb[132].mxu1 %vm748_vm1, %v9993_v33  ;;  %v1168_v23 = vld [vmem:[%s14359_s3 + $0x10] sm:$0xff] }
 0x224   : > { %14477 = vst [vmem:[#allocation26_spill] sm:$0xff] %v10493_v13  ;;  %2302 = vmatprep.mubr.f32.mxu1 %v14473_v29  ;;  %8818 = vmatpush1.bf16.msra.mxu1 %v8817_v49  ;;  %v1169_v13 = vld [vmem:[%s14359_s3 + $0x18] sm:$0xff] }
 0x225   : > { %8820 = vmatprep.subr.bf16.mxu1 %v8819_v31 }
 0x226   : > { %v10498_v35 = vpop.f32.mrb[28].mxu1 }
 0x227   : > { %14478 = vst [vmem:[#allocation27_spill] sm:$0xff] %v10498_v35  ;;  %v10500_v27 = vpop.f32.mrb[29].mxu1  ;;  %7780 = vmatmul.mubr.msk.f32.gmra.mrb[134].mxu1 %vm748_vm1, %v9998_v36  ;;  %v10639_v35 = vld [vmem:[%s9709_s23] sm:$0xff] }
 0x228   : > { %14479 = vst [vmem:[#allocation28_spill] sm:$0xff] %v10500_v27  ;;  %2308 = vmatprep.mubr.f32.mxu1 %v14473_v29  ;;  %8822 = vmatpush1.bf16.msra.mxu1 %v8821_v3 }
 0x229   : > { %8959 = vmatprep.subr.bf16.mxu1 %v14480_v32 }
 0x22a   : > { %v10506_v34 = vpop.f32.mrb[30].mxu1 }
 0x22b   : > { %14481 = vst [vmem:[#allocation29_spill] sm:$0xff] %v10506_v34  ;;  %v10508_v37 = vpop.f32.mrb[31].mxu1  ;;  %7781 = vmatmul.mubr.msk.f32.gmra.mrb[136].mxu1 %vm748_vm1, %v10003_v38 }
 0x22c   : > { %14482 = vst [vmem:[#allocation30_spill] sm:$0xff] %v10508_v37  ;;  %2314 = vmatprep.mubr.f32.mxu1 %v14473_v29 }
 0x22e   : > { %v10513_v49 = vpop.f32.mrb[32].mxu1 }
 0x22f   : > { %14483 = vst [vmem:[#allocation31_spill] sm:$0xff] %v10513_v49  ;;  %v10515_v31 = vpop.f32.mrb[33].mxu1  ;;  %7782 = vmatmul.mubr.msk.f32.gmra.mrb[138].mxu1 %vm748_vm1, %v10008_v40 }
 0x230   : > { %14484 = vst [vmem:[#allocation32_spill] sm:$0xff] %v10515_v31  ;;  %2320 = vmatprep.mubr.f32.mxu1 %v14473_v29 }
 0x232   : > { %v10520_v14 = vpop.f32.mrb[34].mxu1 }
 0x233   : > { %14485 = vst [vmem:[#allocation33_spill] sm:$0xff] %v10520_v14  ;;  %v10522_v15 = vpop.f32.mrb[35].mxu1  ;;  %7783 = vmatmul.mubr.msk.f32.gmra.mrb[140].mxu1 %vm748_vm1, %v10013_v42 }
 0x234   : > { %14486 = vst [vmem:[#allocation34_spill] sm:$0xff] %v10522_v15  ;;  %2326 = vmatprep.mubr.f32.mxu1 %v14473_v29 }
 0x236   : > { %v10527_v3 = vpop.f32.mrb[36].mxu1 }
 0x237   : > { %14487 = vst [vmem:[#allocation35_spill] sm:$0xff] %v10527_v3  ;;  %v10529_v34 = vpop.f32.mrb[37].mxu1  ;;  %7784 = vmatmul.mubr.msk.f32.gmra.mrb[142].mxu1 %vm748_vm1, %v10018_v44 }
 0x238   : > { %14488 = vst [vmem:[#allocation36_spill] sm:$0xff] %v10529_v34  ;;  %2332 = vmatprep.mubr.f32.mxu1 %v14473_v29 }
 0x23a   : > { %v10534_v49 = vpop.f32.mrb[38].mxu1 }
 0x23b   : > { %14489 = vst [vmem:[#allocation37_spill] sm:$0xff] %v10534_v49  ;;  %v10536_v31 = vpop.f32.mrb[39].mxu1  ;;  %7785 = vmatmul.mubr.msk.f32.gmra.mrb[144].mxu1 %vm748_vm1, %v10023_v46 }
 0x23c   : > { %14490 = vst [vmem:[#allocation38_spill] sm:$0xff] %v10536_v31  ;;  %2338 = vmatprep.mubr.f32.mxu1 %v14473_v29 }
 0x23e   : > { %v10541_v14 = vpop.f32.mrb[40].mxu1 }
 0x23f   : > { %14491 = vst [vmem:[#allocation39_spill] sm:$0xff] %v10541_v14  ;;  %v10543_v15 = vpop.f32.mrb[41].mxu1  ;;  %7786 = vmatmul.mubr.msk.f32.gmra.mrb[146].mxu1 %vm748_vm1, %v10028_v48 }
 0x240   : > { %14492 = vst [vmem:[#allocation40_spill] sm:$0xff] %v10543_v15  ;;  %2344 = vmatprep.mubr.f32.mxu1 %v14473_v29 }
 0x242   : > { %v10548_v3 = vpop.f32.mrb[42].mxu1 }
 0x243   : > { %14493 = vst [vmem:[#allocation41_spill] sm:$0xff] %v10548_v3  ;;  %v10550_v34 = vpop.f32.mrb[43].mxu1  ;;  %7787 = vmatmul.mubr.msk.f32.gmra.mrb[148].mxu1 %vm748_vm1, %v10033_v51 }
 0x244   : > { %14494 = vst [vmem:[#allocation42_spill] sm:$0xff] %v10550_v34  ;;  %2350 = vmatprep.mubr.f32.mxu1 %v14473_v29 }
 0x246   : > { %v10555_v49 = vpop.f32.mrb[44].mxu1 }
 0x247   : > { %14495 = vst [vmem:[#allocation43_spill] sm:$0xff] %v10555_v49  ;;  %v10557_v31 = vpop.f32.mrb[45].mxu1  ;;  %7788 = vmatmul.mubr.msk.f32.gmra.mrb[150].mxu1 %vm748_vm1, %v10038_v53 }
 0x248   : > { %14496 = vst [vmem:[#allocation44_spill] sm:$0xff] %v10557_v31  ;;  %2356 = vmatprep.mubr.f32.mxu1 %v14473_v29 }
 0x24a   : > { %v10562_v14 = vpop.f32.mrb[46].mxu1 }
 0x24b   : > { %14497 = vst [vmem:[#allocation45_spill] sm:$0xff] %v10562_v14  ;;  %v10564_v15 = vpop.f32.mrb[47].mxu1  ;;  %7789 = vmatmul.mubr.msk.f32.gmra.mrb[152].mxu1 %vm748_vm1, %v10043_v55 }
 0x24c   : > { %14498 = vst [vmem:[#allocation46_spill] sm:$0xff] %v10564_v15  ;;  %2362 = vmatprep.mubr.f32.mxu1 %v14473_v29 }
 0x24e   : > { %v10569_v3 = vpop.f32.mrb[48].mxu1 }
 0x24f   : > { %14499 = vst [vmem:[#allocation47_spill] sm:$0xff] %v10569_v3  ;;  %v10571_v34 = vpop.f32.mrb[49].mxu1  ;;  %7790 = vmatmul.mubr.msk.f32.gmra.mrb[154].mxu1 %vm748_vm1, %v10048_v57 }
 0x250   : > { %14500 = vst [vmem:[#allocation48_spill] sm:$0xff] %v10571_v34  ;;  %2368 = vmatprep.mubr.f32.mxu1 %v14473_v29 }
 0x252   : > { %v10576_v49 = vpop.f32.mrb[50].mxu1 }
 0x253   : > { %14501 = vst [vmem:[#allocation49_spill] sm:$0xff] %v10576_v49  ;;  %v10578_v31 = vpop.f32.mrb[51].mxu1  ;;  %7791 = vmatmul.mubr.msk.f32.gmra.mrb[156].mxu1 %vm748_vm1, %v10053_v59 }
 0x254   : > { %14502 = vst [vmem:[#allocation50_spill] sm:$0xff] %v10578_v31  ;;  %2374 = vmatprep.mubr.f32.mxu1 %v14473_v29 }
 0x256   : > { %v10583_v14 = vpop.f32.mrb[52].mxu1 }
 0x257   : > { %14503 = vst [vmem:[#allocation51_spill] sm:$0xff] %v10583_v14  ;;  %v10585_v15 = vpop.f32.mrb[53].mxu1  ;;  %7792 = vmatmul.mubr.msk.f32.gmra.mrb[158].mxu1 %vm748_vm1, %v10058_v61 }
 0x258   : > { %14504 = vst [vmem:[#allocation52_spill] sm:$0xff] %v10585_v15  ;;  %2380 = vmatprep.mubr.f32.mxu1 %v14473_v29 }
 0x25a   : > { %v10590_v3 = vpop.f32.mrb[54].mxu1 }
 0x25b   : > { %14505 = vst [vmem:[#allocation53_spill] sm:$0xff] %v10590_v3  ;;  %v10592_v34 = vpop.f32.mrb[55].mxu1  ;;  %7793 = vmatmul.mubr.msk.f32.gmra.mrb[160].mxu1 %vm748_vm1, %v10063_v63 }
 0x25c   : > { %14506 = vst [vmem:[#allocation54_spill] sm:$0xff] %v10592_v34  ;;  %2386 = vmatprep.mubr.f32.mxu1 %v14473_v29 }
 0x25e   : > { %v10597_v49 = vpop.f32.mrb[56].mxu1 }
 0x25f   : > { %14507 = vst [vmem:[#allocation55_spill] sm:$0xff] %v10597_v49  ;;  %v10599_v31 = vpop.f32.mrb[57].mxu1  ;;  %7794 = vmatmul.mubr.msk.f32.gmra.mrb[162].mxu1 %vm748_vm1, %v10068_v1 }
 0x260   : > { %14508 = vst [vmem:[#allocation56_spill] sm:$0xff] %v10599_v31  ;;  %2392 = vmatprep.mubr.f32.mxu1 %v14473_v29 }
 0x262   : > { %v10604_v14 = vpop.f32.mrb[58].mxu1 }
 0x263   : > { %14509 = vst [vmem:[#allocation57_spill] sm:$0xff] %v10604_v14  ;;  %v10606_v15 = vpop.f32.mrb[59].mxu1  ;;  %7795 = vmatmul.mubr.msk.f32.gmra.mrb[164].mxu1 %vm748_vm1, %v10073_v4 }
 0x264   : > { %14510 = vst [vmem:[#allocation58_spill] sm:$0xff] %v10606_v15  ;;  %2398 = vmatprep.mubr.f32.mxu1 %v14473_v29 }
 0x266   : > { %v10611_v3 = vpop.f32.mrb[60].mxu1 }
 0x267   : > { %14511 = vst [vmem:[#allocation59_spill] sm:$0xff] %v10611_v3  ;;  %v10613_v49 = vpop.f32.mrb[61].mxu1  ;;  %7796 = vmatmul.mubr.msk.f32.gmra.mrb[166].mxu1 %vm748_vm1, %v10078_v6  ;;  %v1166_v3 = vld [vmem:[%s14359_s3] sm:$0xff] }
 0x268   : > { %14512 = vst [vmem:[#allocation60_spill] sm:$0xff] %v10613_v49  ;;  %2404 = vmatprep.mubr.f32.mxu1 %v14473_v29  ;;  %v1167_v49 = vld [vmem:[%s14359_s3 + $0x8] sm:$0xff] }
 0x269   : > { %v8708_v37 = vpack.c.bf16 %v1167_v49, %v1166_v3  ;;  %v10652_v49 = vld [vmem:[%s9709_s23 + $0x18] sm:$0xff]  ;;  %v8711_v3 = vpack.c.bf16 %v1169_v13, %v1168_v23  ;;  %v10671_v23 = vld [vmem:[%s9709_s23 + $0x28] sm:$0xff] }
 0x26a   : > { %v10618_v31 = vpop.f32.mrb[62].mxu1 }
 0x26b   : > { %14513 = vst [vmem:[#allocation61_spill] sm:$0xff] %v10618_v31  ;;  %v10620_v14 = vpop.f32.mrb[63].mxu1  ;;  %7797 = vmatmul.mubr.msk.f32.gmra.mrb[168].mxu1 %vm748_vm1, %v10083_v8  ;;  %v10634_v31 = vld [vmem:[%s9709_s23 + $0x8] sm:$0xff] }
 0x26c   : > { %14514 = vst [vmem:[#allocation62_spill] sm:$0xff] %v10620_v14  ;;  %2410 = vmatprep.mubr.f32.mxu1 %v14473_v29 }
 0x26e   : > { %v1277_v15 = vpop.f32.mrb[64].mxu1 }
 0x26f   : > { %v1279_v34 = vpop.f32.mrb[65].mxu1  ;;  %7798 = vmatmul.mubr.msk.f32.gmra.mrb[170].mxu1 %vm748_vm1, %v10088_v10  ;;  %v1468_v27 = vmul.f32 %v10639_v35, %v1277_v15 }
 0x270   : > { %v1469_v14 = vmul.f32 %v10634_v31, %v1279_v34  ;;  %2416 = vmatprep.mubr.f32.mxu1 %v14473_v29 }
 0x272   : > { %v1283_v24 = vpop.f32.mrb[66].mxu1  ;;  %7697 = vmatprep.mubr.msk.f32.mxu0 %vm410_vm0, %v1469_v14  ;;  %v1171_v14 = vld [vmem:[%s14359_s3 + $0x28] sm:$0xff] }
 0x273   : > { %v1285_v34 = vpop.f32.mrb[67].mxu1  ;;  %1722 = vmatmul.mubr.f32.vlgmr.msra.gmra.mrb[64].mxu0 %v1468_v27  ;;  %7799 = vmatmul.mubr.msk.f32.gmra.mrb[172].mxu1 %vm748_vm1, %v10093_v12  ;;  %v1470_v22 = vmul.f32 %v10657_v21, %v1283_v24  ;;  %v1170_v27 = vld [vmem:[%s14359_s3 + $0x20] sm:$0xff] }
 0x274   : > { %v1471_v15 = vmul.f32 %v10652_v49, %v1285_v34  ;;  %8709 = vmatpush1.bf16.msra.mxu0 %v8708_v37  ;;  %2422 = vmatprep.mubr.f32.mxu1 %v14473_v29  ;;  %v8714_v13 = vpack.c.bf16 %v1171_v14, %v1170_v27  ;;  %v10690_v27 = vld [vmem:[%s9709_s23 + $0x38] sm:$0xff] }
 0x275   : > { %8710 = vmatprep.subr.bf16.mxu0 %v14480_v32 }
 0x276   : > { %v1289_v34 = vpop.f32.mrb[68].mxu1  ;;  %7698 = vmatprep.mubr.msk.f32.mxu0 %vm410_vm0, %v1471_v15  ;;  %v1173_v15 = vld [vmem:[%s14359_s3 + $0x38] sm:$0xff] }
 0x277   : > { %v1291_v37 = vpop.f32.mrb[69].mxu1  ;;  %1727 = vmatmul.mubr.f32.gmra.mrb[66].mxu0 %v1470_v22  ;;  %7800 = vmatmul.mubr.msk.f32.gmra.mrb[174].mxu1 %vm748_vm1, %v10104_v18  ;;  %v1472_v19 = vmul.f32 %v10676_v16, %v1289_v34  ;;  %v1172_v22 = vld [vmem:[%s14359_s3 + $0x30] sm:$0xff] }
 0x278   : > { %v1473_v24 = vmul.f32 %v10671_v23, %v1291_v37  ;;  %2428 = vmatprep.mubr.f32.mxu1 %v14473_v29  ;;  %8712 = vmatpush1.bf16.msra.mxu0 %v8711_v3  ;;  %v8717_v34 = vpack.c.bf16 %v1173_v15, %v1172_v22  ;;  %v10709_v22 = vld [vmem:[%s9709_s23 + $0x48] sm:$0xff] }
 0x279   : > { %8713 = vmatprep.subr.bf16.mxu0 %v14480_v32 }
 0x27a   : > { %v1295_v37 = vpop.f32.mrb[70].mxu1  ;;  %7699 = vmatprep.mubr.msk.f32.mxu0 %vm410_vm0, %v1473_v24  ;;  %v1175_v24 = vld [vmem:[%s14359_s3 + $0x48] sm:$0xff] }
 0x27b   : > { %v1297_v3 = vpop.f32.mrb[71].mxu1  ;;  %1732 = vmatmul.mubr.f32.gmra.mrb[68].mxu0 %v1472_v19  ;;  %7801 = vmatmul.mubr.msk.f32.gmra.mrb[176].mxu1 %vm748_vm1, %v10110_v20  ;;  %v1474_v11 = vmul.f32 %v10695_v9, %v1295_v37  ;;  %v1174_v19 = vld [vmem:[%s14359_s3 + $0x40] sm:$0xff] }
 0x27c   : > { %v1475_v14 = vmul.f32 %v10690_v27, %v1297_v3  ;;  %2434 = vmatprep.mubr.f32.mxu1 %v14473_v29  ;;  %8715 = vmatpush1.bf16.msra.mxu0 %v8714_v13  ;;  %v8720_v37 = vpack.c.bf16 %v1175_v24, %v1174_v19  ;;  %v10728_v19 = vld [vmem:[%s9709_s23 + $0x58] sm:$0xff] }
 0x27d   : > { %8716 = vmatprep.subr.bf16.mxu0 %v14480_v32 }
 0x27e   : > { %v1301_v3 = vpop.f32.mrb[72].mxu1  ;;  %7700 = vmatprep.mubr.msk.f32.mxu0 %vm410_vm0, %v1475_v14  ;;  %v1177_v14 = vld [vmem:[%s14359_s3 + $0x58] sm:$0xff] }
 0x27f   : > { %v1303_v13 = vpop.f32.mrb[73].mxu1  ;;  %1737 = vmatmul.mubr.f32.gmra.mrb[70].mxu0 %v1474_v11  ;;  %7802 = vmatmul.mubr.msk.f32.gmra.mrb[178].mxu1 %vm748_vm1, %v10121_v26  ;;  %v1476_v7 = vmul.f32 %v10714_v5, %v1301_v3  ;;  %v1176_v11 = vld [vmem:[%s14359_s3 + $0x50] sm:$0xff] }
 0x280   : > { %v1477_v15 = vmul.f32 %v10709_v22, %v1303_v13  ;;  %2440 = vmatprep.mubr.f32.mxu1 %v14473_v29  ;;  %8718 = vmatpush1.bf16.msra.mxu0 %v8717_v34  ;;  %v8723_v3 = vpack.c.bf16 %v1177_v14, %v1176_v11  ;;  %v10733_v5 = vld [vmem:[%s9709_s23 + $0x50] sm:$0xff]  ;;  %v10747_v11 = vld [vmem:[%s9709_s23 + $0x68] sm:$0xff] }
 0x281   : > { %8719 = vmatprep.subr.bf16.mxu0 %v14480_v32  ;;  %14516 = vst [vmem:[#allocation64_spill] sm:$0xff] %v10733_v5 }
 0x282   : > { %v1307_v13 = vpop.f32.mrb[74].mxu1  ;;  %7701 = vmatprep.mubr.msk.f32.mxu0 %vm410_vm0, %v1477_v15  ;;  %v1179_v15 = vld [vmem:[%s14359_s3 + $0x68] sm:$0xff] }
 0x283   : > { %v1309_v34 = vpop.f32.mrb[75].mxu1  ;;  %1742 = vmatmul.mubr.f32.gmra.mrb[72].mxu0 %v1476_v7  ;;  %7803 = vmatmul.mubr.msk.f32.gmra.mrb[180].mxu1 %vm748_vm1, %v10127_v28  ;;  %v1478_v62 = vmul.f32 %v10733_v5, %v1307_v13  ;;  %v1178_v7 = vld [vmem:[%s14359_s3 + $0x60] sm:$0xff] }
 0x284   : > { %v1479_v24 = vmul.f32 %v10728_v19, %v1309_v34  ;;  %2446 = vmatprep.mubr.f32.mxu1 %v14473_v29  ;;  %8721 = vmatpush1.bf16.msra.mxu0 %v8720_v37  ;;  %v8726_v13 = vpack.c.bf16 %v1179_v15, %v1178_v7  ;;  %v10752_v5 = vld [vmem:[%s9709_s23 + $0x60] sm:$0xff]  ;;  %v10766_v7 = vld [vmem:[%s9709_s23 + $0x78] sm:$0xff] }
 0x285   : > { %8722 = vmatprep.subr.bf16.mxu0 %v14480_v32  ;;  %14517 = vst [vmem:[#allocation65_spill] sm:$0xff] %v10752_v5 }
 0x286   : > { %v1313_v34 = vpop.f32.mrb[76].mxu1  ;;  %7702 = vmatprep.mubr.msk.f32.mxu0 %vm410_vm0, %v1479_v24  ;;  %v1181_v24 = vld [vmem:[%s14359_s3 + $0x78] sm:$0xff] }
 0x287   : > { %v1315_v37 = vpop.f32.mrb[77].mxu1  ;;  %1747 = vmatmul.mubr.f32.gmra.mrb[74].mxu0 %v1478_v62  ;;  %7804 = vmatmul.mubr.msk.f32.gmra.mrb[182].mxu1 %vm748_vm1, %v10132_v30  ;;  %v1480_v28 = vmul.f32 %v10752_v5, %v1313_v34  ;;  %v1180_v62 = vld [vmem:[%s14359_s3 + $0x70] sm:$0xff] }
 0x288   : > { %v1481_v14 = vmul.f32 %v10747_v11, %v1315_v37  ;;  %2452 = vmatprep.mubr.f32.mxu1 %v14473_v29  ;;  %8724 = vmatpush1.bf16.msra.mxu0 %v8723_v3  ;;  %v8729_v34 = vpack.c.bf16 %v1181_v24, %v1180_v62  ;;  %v10771_v5 = vld [vmem:[%s9709_s23 + $0x70] sm:$0xff]  ;;  %v10785_v62 = vld [vmem:[%s9709_s23 + $0x88] sm:$0xff] }
 0x289   : > { %8725 = vmatprep.subr.bf16.mxu0 %v14480_v32  ;;  %14518 = vst [vmem:[#allocation66_spill] sm:$0xff] %v10771_v5 }
 0x28a   : > { %v1319_v37 = vpop.f32.mrb[78].mxu1  ;;  %7703 = vmatprep.mubr.msk.f32.mxu0 %vm410_vm0, %v1481_v14  ;;  %v1183_v14 = vld [vmem:[%s14359_s3 + $0x88] sm:$0xff] }
 0x28b   : > { %v1321_v3 = vpop.f32.mrb[79].mxu1  ;;  %1752 = vmatmul.mubr.f32.gmra.mrb[76].mxu0 %v1480_v28  ;;  %7805 = vmatmul.mubr.msk.f32.gmra.mrb[184].mxu1 %vm748_vm1, %v10149_v43  ;;  %v1482_v30 = vmul.f32 %v10771_v5, %v1319_v37  ;;  %v1182_v28 = vld [vmem:[%s14359_s3 + $0x80] sm:$0xff] }
 0x28c   : > { %v1483_v15 = vmul.f32 %v10766_v7, %v1321_v3  ;;  %2458 = vmatprep.mubr.f32.mxu1 %v14473_v29  ;;  %8727 = vmatpush1.bf16.msra.mxu0 %v8726_v13  ;;  %v8732_v37 = vpack.c.bf16 %v1183_v14, %v1182_v28  ;;  %v10790_v5 = vld [vmem:[%s9709_s23 + $0x80] sm:$0xff]  ;;  %v10804_v28 = vld [vmem:[%s9709_s23 + $0x98] sm:$0xff] }
 0x28d   : > { %8728 = vmatprep.subr.bf16.mxu0 %v14480_v32  ;;  %14519 = vst [vmem:[#allocation67_spill] sm:$0xff] %v10790_v5 }
 0x28e   : > { %v1325_v3 = vpop.f32.mrb[80].mxu1  ;;  %7704 = vmatprep.mubr.msk.f32.mxu0 %vm410_vm0, %v1483_v15  ;;  %v1185_v15 = vld [vmem:[%s14359_s3 + $0x98] sm:$0xff] }
 0x28f   : > { %v1327_v13 = vpop.f32.mrb[81].mxu1  ;;  %1757 = vmatmul.mubr.f32.gmra.mrb[78].mxu0 %v1482_v30  ;;  %7806 = vmatmul.mubr.msk.f32.gmra.mrb[186].mxu1 %vm748_vm1, %v10155_v47  ;;  %v1484_v43 = vmul.f32 %v10790_v5, %v1325_v3  ;;  %v1184_v30 = vld [vmem:[%s14359_s3 + $0x90] sm:$0xff] }
 0x290   : > { %v1485_v24 = vmul.f32 %v10785_v62, %v1327_v13  ;;  %2464 = vmatprep.mubr.f32.mxu1 %v14473_v29  ;;  %8730 = vmatpush1.bf16.msra.mxu0 %v8729_v34  ;;  %v8735_v3 = vpack.c.bf16 %v1185_v15, %v1184_v30  ;;  %v10809_v5 = vld [vmem:[%s9709_s23 + $0x90] sm:$0xff]  ;;  %v10823_v30 = vld [vmem:[%s9709_s23 + $0xa8] sm:$0xff] }
 0x291   : > { %8731 = vmatprep.subr.bf16.mxu0 %v14480_v32  ;;  %14520 = vst [vmem:[#allocation68_spill] sm:$0xff] %v10809_v5 }
 0x292   : > { %v1331_v13 = vpop.f32.mrb[82].mxu1  ;;  %7705 = vmatprep.mubr.msk.f32.mxu0 %vm410_vm0, %v1485_v24  ;;  %v1187_v24 = vld [vmem:[%s14359_s3 + $0xa8] sm:$0xff] }
 0x293   : > { %v1333_v34 = vpop.f32.mrb[83].mxu1  ;;  %1762 = vmatmul.mubr.f32.gmra.mrb[80].mxu0 %v1484_v43  ;;  %7807 = vmatmul.mubr.msk.f32.gmra.mrb[188].mxu1 %vm748_vm1, %v10166_v58  ;;  %v1486_v47 = vmul.f32 %v10809_v5, %v1331_v13  ;;  %v1186_v43 = vld [vmem:[%s14359_s3 + $0xa0] sm:$0xff] }
 0x294   : > { %v1487_v14 = vmul.f32 %v10804_v28, %v1333_v34  ;;  %2470 = vmatprep.mubr.f32.mxu1 %v14473_v29  ;;  %8733 = vmatpush1.bf16.msra.mxu0 %v8732_v37  ;;  %v8738_v13 = vpack.c.bf16 %v1187_v24, %v1186_v43  ;;  %v10828_v5 = vld [vmem:[%s9709_s23 + $0xa0] sm:$0xff]  ;;  %v10842_v43 = vld [vmem:[%s9709_s23 + $0xb8] sm:$0xff] }
 0x295   : > { %8734 = vmatprep.subr.bf16.mxu0 %v14480_v32  ;;  %14521 = vst [vmem:[#allocation69_spill] sm:$0xff] %v10828_v5 }
 0x296   : > { %v1337_v34 = vpop.f32.mrb[84].mxu1  ;;  %7706 = vmatprep.mubr.msk.f32.mxu0 %vm410_vm0, %v1487_v14  ;;  %v1189_v14 = vld [vmem:[%s14359_s3 + $0xb8] sm:$0xff] }
 0x297   : > { %v1339_v37 = vpop.f32.mrb[85].mxu1  ;;  %1767 = vmatmul.mubr.f32.gmra.mrb[82].mxu0 %v1486_v47  ;;  %7808 = vmatmul.mubr.msk.f32.gmra.mrb[190].mxu1 %vm748_vm1, %v10178_v2  ;;  %v1488_v58 = vmul.f32 %v10828_v5, %v1337_v34  ;;  %v1188_v47 = vld [vmem:[%s14359_s3 + $0xb0] sm:$0xff] }
 0x298   : > { %v1489_v15 = vmul.f32 %v10823_v30, %v1339_v37  ;;  %3004 = vmatprep.mubr.f32.mxu1 %v14473_v29  ;;  %8736 = vmatpush1.bf16.msra.mxu0 %v8735_v3  ;;  %v8741_v34 = vpack.c.bf16 %v1189_v14, %v1188_v47  ;;  %v10847_v5 = vld [vmem:[%s9709_s23 + $0xb0] sm:$0xff]  ;;  %v10861_v47 = vld [vmem:[%s9709_s23 + $0xc8] sm:$0xff] }
 0x299   : > { %8737 = vmatprep.subr.bf16.mxu0 %v14480_v32  ;;  %14522 = vst [vmem:[#allocation70_spill] sm:$0xff] %v10847_v5 }
 0x29a   : > { %v1343_v37 = vpop.f32.mrb[86].mxu1  ;;  %7707 = vmatprep.mubr.msk.f32.mxu0 %vm410_vm0, %v1489_v15 }
 0x29b   : > { %v1345_v3 = vpop.f32.mrb[87].mxu1  ;;  %1772 = vmatmul.mubr.f32.gmra.mrb[84].mxu0 %v1488_v58  ;;  %7885 = vmatmul.mubr.msk.f32.vlgmr.msra.gmra.mrb[192].mxu1 %vm748_vm1, %v9959_v17  ;;  %v1490_v2 = vmul.f32 %v10847_v5, %v1343_v37  ;;  %v1190_v17 = vld [vmem:[%s14359_s3 + $0xc0] sm:$0xff]  ;;  %v1191_v58 = vld [vmem:[%s14359_s3 + $0xc8] sm:$0xff] }
 0x29c   : > { %v1491_v24 = vmul.f32 %v10842_v43, %v1345_v3  ;;  %3010 = vmatprep.mubr.f32.mxu1 %v14473_v29  ;;  %8739 = vmatpush1.bf16.msra.mxu0 %v8738_v13  ;;  %v8744_v37 = vpack.c.bf16 %v1191_v58, %v1190_v17  ;;  %v10866_v3 = vld [vmem:[%s9709_s23 + $0xc0] sm:$0xff]  ;;  %v10880_v17 = vld [vmem:[%s9709_s23 + $0xd8] sm:$0xff] }
 0x29d   : > { %8740 = vmatprep.subr.bf16.mxu0 %v14480_v32  ;;  %14523 = vst [vmem:[#allocation71_spill] sm:$0xff] %v10866_v3 }
 0x29e   : > { %v1349_v15 = vpop.f32.mrb[88].mxu1  ;;  %7708 = vmatprep.mubr.msk.f32.mxu0 %vm410_vm0, %v1491_v24 }
 0x29f   : > { %v1351_v13 = vpop.f32.mrb[89].mxu1  ;;  %1777 = vmatmul.mubr.f32.gmra.mrb[86].mxu0 %v1490_v2  ;;  %7886 = vmatmul.mubr.msk.f32.gmra.mrb[194].mxu1 %vm748_vm1, %v9976_v25  ;;  %v1492_v5 = vmul.f32 %v10866_v3, %v1349_v15  ;;  %v1192_v25 = vld [vmem:[%s14359_s3 + $0xd0] sm:$0xff]  ;;  %v1193_v2 = vld [vmem:[%s14359_s3 + $0xd8] sm:$0xff] }
 0x2a0   : > { %v1493_v14 = vmul.f32 %v10861_v47, %v1351_v13  ;;  %3016 = vmatprep.mubr.f32.mxu1 %v14473_v29  ;;  %8742 = vmatpush1.bf16.msra.mxu0 %v8741_v34  ;;  %v8747_v15 = vpack.c.bf16 %v1193_v2, %v1192_v25  ;;  %v10885_v13 = vld [vmem:[%s9709_s23 + $0xd0] sm:$0xff]  ;;  %v10898_v25 = vld [vmem:[%s9709_s23 + $0xe0] sm:$0xff] }
 0x2a1   : > { %8743 = vmatprep.subr.bf16.mxu0 %v14480_v32 }
 0x2a2   : > { %v1355_v24 = vpop.f32.mrb[90].mxu1  ;;  %7709 = vmatprep.mubr.msk.f32.mxu0 %vm410_vm0, %v1493_v14 }
 0x2a3   : > { %v1357_v34 = vpop.f32.mrb[91].mxu1  ;;  %1782 = vmatmul.mubr.f32.gmra.mrb[88].mxu0 %v1492_v5  ;;  %7887 = vmatmul.mubr.msk.f32.gmra.mrb[196].mxu1 %vm748_vm1, %v9993_v33  ;;  %v1494_v3 = vmul.f32 %v10885_v13, %v1355_v24  ;;  %v10893_v5 = vld [vmem:[%s9709_s23 + $0xe8] sm:$0xff] }
 0x2a4   : > { %v1495_v58 = vmul.f32 %v10880_v17, %v1357_v34  ;;  %3022 = vmatprep.mubr.f32.mxu1 %v14473_v29  ;;  %8745 = vmatpush1.bf16.msra.mxu0 %v8744_v37 }
 0x2a5   : > { %8746 = vmatprep.subr.bf16.mxu0 %v14480_v32 }
 0x2a6   : > { %v1361_v14 = vpop.f32.mrb[92].mxu1  ;;  %7710 = vmatprep.mubr.msk.f32.mxu0 %vm410_vm0, %v1495_v58  ;;  %v10911_v58 = vld [vmem:[%s9709_s23 + $0xf0] sm:$0xff] }
 0x2a7   : > { %v1363_v33 = vpop.f32.mrb[93].mxu1  ;;  %1787 = vmatmul.mubr.f32.gmra.mrb[90].mxu0 %v1494_v3  ;;  %7888 = vmatmul.mubr.msk.f32.gmra.mrb[198].mxu1 %vm748_vm1, %v9998_v36  ;;  %v1496_v2 = vmul.f32 %v10898_v25, %v1361_v14  ;;  %v10906_v36 = vld [vmem:[%s9709_s23 + $0xf8] sm:$0xff] }
 0x2a8   : > { %v1497_v37 = vmul.f32 %v10893_v5, %v1363_v33  ;;  %3028 = vmatprep.mubr.f32.mxu1 %v14473_v29  ;;  %8748 = vmatpush1.bf16.msra.mxu0 %v8747_v15 }
 0x2a9   : > { %8765 = vmatprep.subr.bf16.mxu0 %v14480_v32 }
 0x2aa   : > { %v1367_v24 = vpop.f32.mrb[94].mxu1  ;;  %7711 = vmatprep.mubr.msk.f32.mxu0 %vm410_vm0, %v1497_v37 }
 0x2ab   : > { %v1369_v3 = vpop.f32.mrb[95].mxu1  ;;  %1792 = vmatmul.mubr.f32.gmra.mrb[92].mxu0 %v1496_v2  ;;  %7889 = vmatmul.mubr.msk.f32.gmra.mrb[200].mxu1 %vm748_vm1, %v10003_v38  ;;  %v1498_v15 = vmul.f32 %v10911_v58, %v1367_v24  ;;  %v10918_v38 = vld [vmem:[%s9709_s23 + $0x108] sm:$0xff]  ;;  %v10923_v2 = vld [vmem:[%s9709_s23 + $0x100] sm:$0xff] }
 0x2ac   : > { %v1499_v34 = vmul.f32 %v10906_v36, %v1369_v3  ;;  %3034 = vmatprep.mubr.f32.mxu1 %v14473_v29  ;;  %14524 = vst [vmem:[#allocation72_spill] sm:$0xff] %v10923_v2 }
 0x2ae   : > { %v1373_v14 = vpop.f32.mrb[96].mxu1  ;;  %7712 = vmatprep.mubr.msk.f32.mxu0 %vm410_vm0, %v1499_v34 }
 0x2af   : > { %v1375_v33 = vpop.f32.mrb[97].mxu1  ;;  %1797 = vmatmul.mubr.f32.gmra.mrb[94].mxu0 %v1498_v15  ;;  %7890 = vmatmul.mubr.msk.f32.gmra.mrb[202].mxu1 %vm748_vm1, %v10008_v40  ;;  %v1500_v24 = vmul.f32 %v10923_v2, %v1373_v14  ;;  %v10930_v40 = vld [vmem:[%s9709_s23 + $0x118] sm:$0xff] }
 0x2b0   : > { %v1501_v37 = vmul.f32 %v10918_v38, %v1375_v33  ;;  %3040 = vmatprep.mubr.f32.mxu1 %v14473_v29  ;;  %v10935_v33 = vld [vmem:[%s9709_s23 + $0x110] sm:$0xff] }
 0x2b1   : > { %14525 = vst [vmem:[#allocation73_spill] sm:$0xff] %v10935_v33 }
 0x2b2   : > { %v1379_v3 = vpop.f32.mrb[98].mxu1  ;;  %7713 = vmatprep.mubr.msk.f32.mxu0 %vm410_vm0, %v1501_v37 }
 0x2b3   : > { %v1381_v34 = vpop.f32.mrb[99].mxu1  ;;  %1802 = vmatmul.mubr.f32.gmra.mrb[96].mxu0 %v1500_v24  ;;  %7891 = vmatmul.mubr.msk.f32.gmra.mrb[204].mxu1 %vm748_vm1, %v10013_v42  ;;  %v1502_v14 = vmul.f32 %v10935_v33, %v1379_v3  ;;  %v10942_v42 = vld [vmem:[%s9709_s23 + $0x128] sm:$0xff] }
 0x2b4   : > { %v1503_v15 = vmul.f32 %v10930_v40, %v1381_v34  ;;  %3046 = vmatprep.mubr.f32.mxu1 %v14473_v29  ;;  %v10947_v34 = vld [vmem:[%s9709_s23 + $0x120] sm:$0xff] }
 0x2b5   : > { %14526 = vst [vmem:[#allocation74_spill] sm:$0xff] %v10947_v34 }
 0x2b6   : > { %v1385_v2 = vpop.f32.mrb[100].mxu1  ;;  %7714 = vmatprep.mubr.msk.f32.mxu0 %vm410_vm0, %v1503_v15 }
 0x2b7   : > { %v1387_v37 = vpop.f32.mrb[101].mxu1  ;;  %1807 = vmatmul.mubr.f32.gmra.mrb[98].mxu0 %v1502_v14  ;;  %7892 = vmatmul.mubr.msk.f32.gmra.mrb[206].mxu1 %vm748_vm1, %v10018_v44  ;;  %v1504_v3 = vmul.f32 %v10947_v34, %v1385_v2  ;;  %v10954_v44 = vld [vmem:[%s9709_s23 + $0x138] sm:$0xff] }
 0x2b8   : > { %v1505_v24 = vmul.f32 %v10942_v42, %v1387_v37  ;;  %3052 = vmatprep.mubr.f32.mxu1 %v14473_v29  ;;  %v10959_v37 = vld [vmem:[%s9709_s23 + $0x130] sm:$0xff] }
 0x2b9   : > { %14527 = vst [vmem:[#allocation75_spill] sm:$0xff] %v10959_v37 }
 0x2ba   : > { %v1391_v33 = vpop.f32.mrb[102].mxu1  ;;  %7715 = vmatprep.mubr.msk.f32.mxu0 %vm410_vm0, %v1505_v24 }
 0x2bb   : > { %v1393_v15 = vpop.f32.mrb[103].mxu1  ;;  %1812 = vmatmul.mubr.f32.gmra.mrb[100].mxu0 %v1504_v3  ;;  %7893 = vmatmul.mubr.msk.f32.gmra.mrb[208].mxu1 %vm748_vm1, %v10023_v46  ;;  %v1506_v2 = vmul.f32 %v10959_v37, %v1391_v33  ;;  %v10966_v46 = vld [vmem:[%s9709_s23 + $0x148] sm:$0xff] }
 0x2bc   : > { %v1507_v14 = vmul.f32 %v10954_v44, %v1393_v15  ;;  %3058 = vmatprep.mubr.f32.mxu1 %v14473_v29  ;;  %v10971_v15 = vld [vmem:[%s9709_s23 + $0x140] sm:$0xff] }
 0x2bd   : > { %14528 = vst [vmem:[#allocation76_spill] sm:$0xff] %v10971_v15 }
 0x2be   : > { %v1397_v34 = vpop.f32.mrb[104].mxu1  ;;  %7716 = vmatprep.mubr.msk.f32.mxu0 %vm410_vm0, %v1507_v14 }
 0x2bf   : > { %v1399_v24 = vpop.f32.mrb[105].mxu1  ;;  %1817 = vmatmul.mubr.f32.gmra.mrb[102].mxu0 %v1506_v2  ;;  %7894 = vmatmul.mubr.msk.f32.gmra.mrb[210].mxu1 %vm748_vm1, %v10028_v48  ;;  %v1508_v33 = vmul.f32 %v10971_v15, %v1397_v34  ;;  %v10978_v48 = vld [vmem:[%s9709_s23 + $0x158] sm:$0xff] }
 0x2c0   : > { %v1509_v3 = vmul.f32 %v10966_v46, %v1399_v24  ;;  %3064 = vmatprep.mubr.f32.mxu1 %v14473_v29  ;;  %v10983_v24 = vld [vmem:[%s9709_s23 + $0x150] sm:$0xff] }
 0x2c1   : > { %14529 = vst [vmem:[#allocation77_spill] sm:$0xff] %v10983_v24 }
 0x2c2   : > { %v1403_v37 = vpop.f32.mrb[106].mxu1  ;;  %7717 = vmatprep.mubr.msk.f32.mxu0 %vm410_vm0, %v1509_v3 }
 0x2c3   : > { %v1405_v14 = vpop.f32.mrb[107].mxu1  ;;  %1822 = vmatmul.mubr.f32.gmra.mrb[104].mxu0 %v1508_v33  ;;  %7895 = vmatmul.mubr.msk.f32.gmra.mrb[212].mxu1 %vm748_vm1, %v10033_v51  ;;  %v1510_v34 = vmul.f32 %v10983_v24, %v1403_v37  ;;  %v10990_v51 = vld [vmem:[%s9709_s23 + $0x168] sm:$0xff] }
 0x2c4   : > { %v1511_v2 = vmul.f32 %v10978_v48, %v1405_v14  ;;  %3070 = vmatprep.mubr.f32.mxu1 %v14473_v29  ;;  %v10995_v14 = vld [vmem:[%s9709_s23 + $0x160] sm:$0xff] }
 0x2c5   : > { %14530 = vst [vmem:[#allocation78_spill] sm:$0xff] %v10995_v14 }
 0x2c6   : > { %v1409_v15 = vpop.f32.mrb[108].mxu1  ;;  %7718 = vmatprep.mubr.msk.f32.mxu0 %vm410_vm0, %v1511_v2 }
 0x2c7   : > { %v1411_v3 = vpop.f32.mrb[109].mxu1  ;;  %1827 = vmatmul.mubr.f32.gmra.mrb[106].mxu0 %v1510_v34  ;;  %7896 = vmatmul.mubr.msk.f32.gmra.mrb[214].mxu1 %vm748_vm1, %v10038_v53  ;;  %v1512_v37 = vmul.f32 %v10995_v14, %v1409_v15  ;;  %v11002_v53 = vld [vmem:[%s9709_s23 + $0x178] sm:$0xff] }
 0x2c8   : > { %v1513_v33 = vmul.f32 %v10990_v51, %v1411_v3  ;;  %3076 = vmatprep.mubr.f32.mxu1 %v14473_v29  ;;  %v11007_v3 = vld [vmem:[%s9709_s23 + $0x170] sm:$0xff] }
 0x2c9   : > { %14531 = vst [vmem:[#allocation79_spill] sm:$0xff] %v11007_v3 }
 0x2ca   : > { %v1415_v24 = vpop.f32.mrb[110].mxu1  ;;  %7719 = vmatprep.mubr.msk.f32.mxu0 %vm410_vm0, %v1513_v33 }
 0x2cb   : > { %v1417_v2 = vpop.f32.mrb[111].mxu1  ;;  %1832 = vmatmul.mubr.f32.gmra.mrb[108].mxu0 %v1512_v37  ;;  %7897 = vmatmul.mubr.msk.f32.gmra.mrb[216].mxu1 %vm748_vm1, %v10043_v55  ;;  %v1514_v15 = vmul.f32 %v11007_v3, %v1415_v24  ;;  %v11014_v55 = vld [vmem:[%s9709_s23 + $0x188] sm:$0xff] }
 0x2cc   : > { %v1515_v34 = vmul.f32 %v11002_v53, %v1417_v2  ;;  %3082 = vmatprep.mubr.f32.mxu1 %v14473_v29  ;;  %v11019_v2 = vld [vmem:[%s9709_s23 + $0x180] sm:$0xff] }
 0x2cd   : > { %14532 = vst [vmem:[#allocation80_spill] sm:$0xff] %v11019_v2 }
 0x2ce   : > { %v1421_v14 = vpop.f32.mrb[112].mxu1  ;;  %7720 = vmatprep.mubr.msk.f32.mxu0 %vm410_vm0, %v1515_v34 }
 0x2cf   : > { %v1423_v33 = vpop.f32.mrb[113].mxu1  ;;  %1837 = vmatmul.mubr.f32.gmra.mrb[110].mxu0 %v1514_v15  ;;  %7898 = vmatmul.mubr.msk.f32.gmra.mrb[218].mxu1 %vm748_vm1, %v10048_v57  ;;  %v1516_v24 = vmul.f32 %v11019_v2, %v1421_v14  ;;  %v11026_v57 = vld [vmem:[%s9709_s23 + $0x198] sm:$0xff] }
 0x2d0   : > { %v1517_v37 = vmul.f32 %v11014_v55, %v1423_v33  ;;  %3088 = vmatprep.mubr.f32.mxu1 %v14473_v29  ;;  %v11031_v33 = vld [vmem:[%s9709_s23 + $0x190] sm:$0xff] }
 0x2d1   : > { %14533 = vst [vmem:[#allocation81_spill] sm:$0xff] %v11031_v33 }
 0x2d2   : > { %v1427_v3 = vpop.f32.mrb[114].mxu1  ;;  %7721 = vmatprep.mubr.msk.f32.mxu0 %vm410_vm0, %v1517_v37 }
 0x2d3   : > { %v1429_v34 = vpop.f32.mrb[115].mxu1  ;;  %1842 = vmatmul.mubr.f32.gmra.mrb[112].mxu0 %v1516_v24  ;;  %7899 = vmatmul.mubr.msk.f32.gmra.mrb[220].mxu1 %vm748_vm1, %v10053_v59  ;;  %v1518_v14 = vmul.f32 %v11031_v33, %v1427_v3  ;;  %v11038_v59 = vld [vmem:[%s9709_s23 + $0x1a8] sm:$0xff] }
 0x2d4   : > { %v1519_v15 = vmul.f32 %v11026_v57, %v1429_v34  ;;  %3094 = vmatprep.mubr.f32.mxu1 %v14473_v29  ;;  %v11043_v34 = vld [vmem:[%s9709_s23 + $0x1a0] sm:$0xff] }
 0x2d5   : > { %14534 = vst [vmem:[#allocation82_spill] sm:$0xff] %v11043_v34 }
 0x2d6   : > { %v1433_v2 = vpop.f32.mrb[116].mxu1  ;;  %7722 = vmatprep.mubr.msk.f32.mxu0 %vm410_vm0, %v1519_v15 }
 0x2d7   : > { %v1435_v37 = vpop.f32.mrb[117].mxu1  ;;  %1847 = vmatmul.mubr.f32.gmra.mrb[114].mxu0 %v1518_v14  ;;  %7900 = vmatmul.mubr.msk.f32.gmra.mrb[222].mxu1 %vm748_vm1, %v10058_v61  ;;  %v1520_v3 = vmul.f32 %v11043_v34, %v1433_v2  ;;  %v11050_v61 = vld [vmem:[%s9709_s23 + $0x1b8] sm:$0xff] }
 0x2d8   : > { %v1521_v24 = vmul.f32 %v11038_v59, %v1435_v37  ;;  %3100 = vmatprep.mubr.f32.mxu1 %v14473_v29  ;;  %v11055_v37 = vld [vmem:[%s9709_s23 + $0x1b0] sm:$0xff] }
 0x2d9   : > { %14535 = vst [vmem:[#allocation83_spill] sm:$0xff] %v11055_v37 }
 0x2da   : > { %v1439_v33 = vpop.f32.mrb[118].mxu1  ;;  %7723 = vmatprep.mubr.msk.f32.mxu0 %vm410_vm0, %v1521_v24 }
 0x2db   : > { %v1441_v15 = vpop.f32.mrb[119].mxu1  ;;  %1852 = vmatmul.mubr.f32.gmra.mrb[116].mxu0 %v1520_v3  ;;  %7901 = vmatmul.mubr.msk.f32.gmra.mrb[224].mxu1 %vm748_vm1, %v10063_v63  ;;  %v1522_v2 = vmul.f32 %v11055_v37, %v1439_v33  ;;  %v11062_v63 = vld [vmem:[%s9709_s23 + $0x1c8] sm:$0xff] }
 0x2dc   : > { %v1523_v14 = vmul.f32 %v11050_v61, %v1441_v15  ;;  %3106 = vmatprep.mubr.f32.mxu1 %v14473_v29  ;;  %v11067_v15 = vld [vmem:[%s9709_s23 + $0x1c0] sm:$0xff] }
 0x2dd   : > { %14536 = vst [vmem:[#allocation84_spill] sm:$0xff] %v11067_v15 }
 0x2de   : > { %v1445_v34 = vpop.f32.mrb[120].mxu1  ;;  %7724 = vmatprep.mubr.msk.f32.mxu0 %vm410_vm0, %v1523_v14 }
 0x2df   : > { %v1447_v24 = vpop.f32.mrb[121].mxu1  ;;  %1857 = vmatmul.mubr.f32.gmra.mrb[118].mxu0 %v1522_v2  ;;  %7902 = vmatmul.mubr.msk.f32.gmra.mrb[226].mxu1 %vm748_vm1, %v10068_v1  ;;  %v1524_v33 = vmul.f32 %v11067_v15, %v1445_v34  ;;  %v11074_v1 = vld [vmem:[%s9709_s23 + $0x1d8] sm:$0xff] }
 0x2e0   : > { %v1525_v3 = vmul.f32 %v11062_v63, %v1447_v24  ;;  %3112 = vmatprep.mubr.f32.mxu1 %v14473_v29  ;;  %14537 = vst [vmem:[#allocation85_spill] sm:$0xff] %v11074_v1  ;;  %v11079_v24 = vld [vmem:[%s9709_s23 + $0x1d0] sm:$0xff] }
 0x2e1   : > { %14538 = vst [vmem:[#allocation86_spill] sm:$0xff] %v11079_v24 }
 0x2e2   : > { %v1451_v37 = vpop.f32.mrb[122].mxu1  ;;  %7725 = vmatprep.mubr.msk.f32.mxu0 %vm410_vm0, %v1525_v3  ;;  %v7917_v3 = vld [vmem:[%s14359_s3 + $0x2a0] sm:$0xff] }
 0x2e3   : > { %v1453_v14 = vpop.f32.mrb[123].mxu1  ;;  %1862 = vmatmul.mubr.f32.gmra.mrb[120].mxu0 %v1524_v33  ;;  %7903 = vmatmul.mubr.msk.f32.gmra.mrb[228].mxu1 %vm748_vm1, %v10073_v4  ;;  %v1526_v34 = vmul.f32 %v11079_v24, %v1451_v37  ;;  %v7918_v33 = vld [vmem:[%s14359_s3 + $0x2a8] sm:$0xff] }
 0x2e4   : > { %v1527_v2 = vmul.f32 %v11074_v1, %v1453_v14  ;;  %3118 = vmatprep.mubr.f32.mxu1 %v14473_v29  ;;  %v11089_v15 = vpack.c.bf16 %v7918_v33, %v7917_v3  ;;  %v11094_v37 = vld [vmem:[%s9709_s23 + $0x1e8] sm:$0xff]  ;;  %v11100_v1 = vld [vmem:[%s9709_s23 + $0x1e0] sm:$0xff] }
 0x2e5   : > { %14540 = vst [vmem:[#allocation88_spill] sm:$0xff] %v11100_v1 }
 0x2e6   : > { %v1457_v4 = vpop.f32.mrb[124].mxu1  ;;  %7726 = vmatprep.mubr.msk.f32.mxu0 %vm410_vm0, %v1527_v2  ;;  %14539 = vst [vmem:[#allocation87_spill] sm:$0xff] %v11089_v15  ;;  %8973 = vmatpush1.bf16.msra.mxu1 %v11089_v15 }
 0x2e7   : > { %v1459_v14 = vpop.f32.mrb[125].mxu1  ;;  %1867 = vmatmul.mubr.f32.gmra.mrb[122].mxu0 %v1526_v34  ;;  %7904 = vmatmul.mubr.msk.f32.gmra.mrb[230].mxu1 %vm748_vm1, %v10078_v6  ;;  %v1528_v2 = vmul.f32 %v11100_v1, %v1457_v4  ;;  %v7919_v6 = vld [vmem:[%s14359_s3 + $0x2b0] sm:$0xff]  ;;  %v7920_v34 = vld [vmem:[%s14359_s3 + $0x2b8] sm:$0xff]  ;;  %v7809_v1 = vld [vmem:[%s14359_s3 + $0x1c0] sm:$0xff] }
 0x2e8   : > { %v1529_v24 = vmul.f32 %v11094_v37, %v1459_v14  ;;  %3124 = vmatprep.mubr.f32.mxu1 %v14473_v29  ;;  %8960 = vmatprep.subr.bf16.mxu1 %v14480_v32  ;;  %v11111_v33 = vpack.c.bf16 %v7920_v34, %v7919_v6  ;;  %v11116_v4 = vld [vmem:[%s9709_s23 + $0x1f8] sm:$0xff]  ;;  %v7922_v34 = vld [vmem:[%s14359_s3 + $0x2c8] sm:$0xff] }
 0x2e9   : > { %14542 = vst [vmem:[#allocation90_spill] sm:$0xff] %v11116_v4 }
 0x2ea   : > { %v1463_v3 = vpop.f32.mrb[126].mxu1  ;;  %7727 = vmatprep.mubr.msk.f32.mxu0 %vm410_vm0, %v1529_v24  ;;  %14541 = vst [vmem:[#allocation89_spill] sm:$0xff] %v11111_v33  ;;  %8974 = vmatpush1.bf16.msra.mxu1 %v11111_v33  ;;  %v11125_v24 = vld [vmem:[%s9709_s23 + $0x1f0] sm:$0xff] }
 0x2eb   : > { %v1465_v14 = vpop.f32.mrb[127].mxu1  ;;  %1872 = vmatmul.mubr.f32.gmra.mrb[124].mxu0 %v1528_v2  ;;  %7905 = vmatmul.mubr.msk.f32.gmra.mrb[232].mxu1 %vm748_vm1, %v10083_v8  ;;  %14543 = vst [vmem:[#allocation91_spill] sm:$0xff] %v11125_v24  ;;  %v1530_v6 = vmul.f32 %v11125_v24, %v1463_v3  ;;  %v7810_v8 = vld [vmem:[%s14359_s3 + $0x1c8] sm:$0xff]  ;;  %v7921_v2 = vld [vmem:[%s14359_s3 + $0x2c0] sm:$0xff] }
 0x2ec   : > { %v1531_v15 = vmul.f32 %v11116_v4, %v1465_v14  ;;  %3130 = vmatprep.mubr.f32.mxu1 %v14473_v29  ;;  %8961 = vmatprep.subr.bf16.mxu1 %v14480_v32  ;;  %v1103_v14 = vmul.f32 %v10634_v31, %v10353_v41  ;;  %v11143_v33 = vpack.c.bf16 %v7922_v34, %v7921_v2  ;;  %v7923_v31 = vld [vmem:[%s14359_s3 + $0x2d0] sm:$0xff]  ;;  %v7925_v2 = vld [vmem:[%s14359_s3 + $0x2e0] sm:$0xff]  ;;  %v7926_v34 = vld [vmem:[%s14359_s3 + $0x2e8] sm:$0xff] }
 0x2ed   : > { %v8766_v4 = vpack.c.bf16 %v7810_v8, %v7809_v1  ;;  %v1102_v41 = vmul.f32 %v10639_v35, %v10351_v39  ;;  %v7811_v1 = vld [vmem:[%s14359_s3 + $0x1d0] sm:$0xff]  ;;  %v7812_v39 = vld [vmem:[%s14359_s3 + $0x1d8] sm:$0xff] }
 0x2ee   : > { %7728 = vmatprep.mubr.msk.f32.mxu0 %vm410_vm0, %v1531_v15  ;;  %v11141_v3 = vpop.f32.mrb[128].mxu1  ;;  %8975 = vmatpush1.bf16.msra.mxu1 %v11143_v33  ;;  %v7924_v15 = vld [vmem:[%s14359_s3 + $0x2d8] sm:$0xff] }
 0x2ef   : > { %1877 = vmatmul.mubr.f32.gmra.mrb[126].mxu0 %v1530_v6  ;;  %v11145_v24 = vpop.f32.mrb[129].mxu1  ;;  %7906 = vmatmul.mubr.msk.f32.gmra.mrb[234].mxu1 %vm748_vm1, %v10088_v10  ;;  %v1105_v10 = vmul.f32 %v10652_v49, %v10361_v50  ;;  %v11171_v35 = vpack.c.bf16 %v7924_v15, %v7923_v31  ;;  %v1104_v50 = vmul.f32 %v10657_v21, %v10359_v45  ;;  %v7813_v45 = vld [vmem:[%s14359_s3 + $0x1e0] sm:$0xff]  ;;  %v7814_v21 = vld [vmem:[%s14359_s3 + $0x1e8] sm:$0xff]  ;;  %v7927_v31 = vld [vmem:[%s14359_s3 + $0x2f0] sm:$0xff] }
 0x2f0   : > { %7729 = vmatprep.mubr.msk.f32.mxu0 %vm410_vm0, %v1103_v14  ;;  %3136 = vmatprep.mubr.f32.mxu1 %v14473_v29  ;;  %v8769_v49 = vpack.c.bf16 %v7812_v39, %v7811_v1  ;;  %v11199_v14 = vpack.c.bf16 %v7926_v34, %v7925_v2  ;;  %v7928_v15 = vld [vmem:[%s14359_s3 + $0x2f8] sm:$0xff] }
 0x2f1   : > { %8962 = vmatprep.subr.bf16.mxu1 %v14480_v32  ;;  %v11228_v1 = vpack.c.bf16 %v7928_v15, %v7927_v31 }
 0x2f2   : > { %v11162_v6 = vpop.f32.mrb[130].mxu1  ;;  %8976 = vmatpush1.bf16.msra.mxu1 %v11171_v35 }
 0x2f3   : > { %2043 = vmatmul.mubr.f32.vlgmr.msra.gmra.mrb[64].mxu0 %v1102_v41  ;;  %v11173_v8 = vpop.f32.mrb[131].mxu1  ;;  %7907 = vmatmul.mubr.msk.f32.gmra.mrb[236].mxu1 %vm748_vm1, %v10093_v12  ;;  %v1107_v12 = vmul.f32 %v10671_v23, %v10368_v54  ;;  %v1106_v54 = vmul.f32 %v10676_v16, %v10366_v52  ;;  %v8772_v23 = vpack.c.bf16 %v7814_v21, %v7813_v45  ;;  %v7815_v52 = vld [vmem:[%s14359_s3 + $0x1f0] sm:$0xff]  ;;  %v7816_v16 = vld [vmem:[%s14359_s3 + $0x1f8] sm:$0xff] }
 0x2f4   : > { %8767 = vmatpush1.bf16.msra.mxu0 %v8766_v4  ;;  %7730 = vmatprep.mubr.msk.f32.mxu0 %vm410_vm0, %v1105_v10 }
 0x2f5   : > { %3142 = vmatprep.mubr.f32.mxu1 %v14473_v29  ;;  %8768 = vmatprep.subr.bf16.mxu0 %v14480_v32 }
 0x2f6   : > { %v11190_v4 = vpop.f32.mrb[132].mxu1  ;;  %8963 = vmatprep.subr.bf16.mxu1 %v14480_v32 }
 0x2f7   : > { %2048 = vmatmul.mubr.f32.gmra.mrb[66].mxu0 %v1104_v50  ;;  %v11201_v41 = vpop.f32.mrb[133].mxu1  ;;  %7908 = vmatmul.mubr.msk.f32.gmra.mrb[238].mxu1 %vm748_vm1, %v10104_v18  ;;  %v1109_v18 = vmul.f32 %v10690_v27, %v10375_v60  ;;  %v1108_v60 = vmul.f32 %v10695_v9, %v10373_v56  ;;  %v8775_v27 = vpack.c.bf16 %v7816_v16, %v7815_v52  ;;  %v7929_v50 = vld [vmem:[%s14359_s3 + $0x300] sm:$0xff]  ;;  %v7818_v9 = vld [vmem:[%s14359_s3 + $0x208] sm:$0xff]  ;;  %v7820_v52 = vld [vmem:[%s14359_s3 + $0x218] sm:$0xff] }
 0x2f8   : > { %7731 = vmatprep.mubr.msk.f32.mxu0 %vm410_vm0, %v1107_v12  ;;  %3148 = vmatprep.mubr.f32.mxu1 %v14473_v29  ;;  %v7817_v56 = vld [vmem:[%s14359_s3 + $0x200] sm:$0xff] }
 0x2f9   : > { %8770 = vmatpush1.bf16.msra.mxu0 %v8769_v49  ;;  %8977 = vmatpush1.bf16.msra.mxu1 %v11199_v14  ;;  %v7930_v49 = vld [vmem:[%s14359_s3 + $0x308] sm:$0xff]  ;;  %v8778_v21 = vpack.c.bf16 %v7818_v9, %v7817_v56  ;;  %v7933_v56 = vld [vmem:[%s14359_s3 + $0x320] sm:$0xff] }
 0x2fa   : > { %v11218_v10 = vpop.f32.mrb[134].mxu1  ;;  %8771 = vmatprep.subr.bf16.mxu0 %v14480_v32  ;;  %8964 = vmatprep.subr.bf16.mxu1 %v14480_v32  ;;  %v11257_v34 = vpack.c.bf16 %v7930_v49, %v7929_v50  ;;  %v14549_v50 = vld [vmem:[#allocation64_spill] sm:$0xff]  ;;  %v7934_v9 = vld [vmem:[%s14359_s3 + $0x328] sm:$0xff] }
 0x2fb   : > { %2053 = vmatmul.mubr.f32.gmra.mrb[68].mxu0 %v1106_v54  ;;  %v11230_v39 = vpop.f32.mrb[135].mxu1  ;;  %7909 = vmatmul.mubr.msk.f32.gmra.mrb[240].mxu1 %vm748_vm1, %v10110_v20  ;;  %v1111_v20 = vmul.f32 %v10709_v22, %v10382_v0  ;;  %v14544_v0 = vld [vmem:[#allocation8_spill] sm:$0xff]  ;;  %v14545_v22 = vld [vmem:[#allocation63_spill] sm:$0xff] }
 0x2fc   : > { %7732 = vmatprep.mubr.msk.f32.mxu0 %vm410_vm0, %v1109_v18  ;;  %3154 = vmatprep.mubr.f32.mxu1 %v14473_v29  ;;  %v1110_v45 = vmul.f32 %v14545_v22, %v14544_v0  ;;  %v7931_v54 = vld [vmem:[%s14359_s3 + $0x310] sm:$0xff] }
 0x2fd   : > { %8773 = vmatpush1.bf16.msra.mxu0 %v8772_v23  ;;  %8978 = vmatpush1.bf16.msra.mxu1 %v11228_v1  ;;  %v7932_v23 = vld [vmem:[%s14359_s3 + $0x318] sm:$0xff]  ;;  %v7819_v18 = vld [vmem:[%s14359_s3 + $0x210] sm:$0xff] }
 0x2fe   : > { %v11247_v2 = vpop.f32.mrb[136].mxu1  ;;  %8774 = vmatprep.subr.bf16.mxu0 %v14480_v32  ;;  %8965 = vmatprep.subr.bf16.mxu1 %v14480_v32  ;;  %v11286_v16 = vpack.c.bf16 %v7932_v23, %v7931_v54  ;;  %v14550_v0 = vld [vmem:[#allocation12_spill] sm:$0xff]  ;;  %v7822_v54 = vld [vmem:[%s14359_s3 + $0x228] sm:$0xff]  ;;  %v11315_v23 = vpack.c.bf16 %v7934_v9, %v7933_v56 }
 0x2ff   : > { %2058 = vmatmul.mubr.f32.gmra.mrb[70].mxu0 %v1108_v60  ;;  %v11259_v12 = vpop.f32.mrb[137].mxu1  ;;  %7910 = vmatmul.mubr.msk.f32.gmra.mrb[242].mxu1 %vm748_vm1, %v10121_v26  ;;  %v14546_v26 = vld [vmem:[#allocation10_spill] sm:$0xff]  ;;  %v1115_v22 = vmul.f32 %v10747_v11, %v14550_v0  ;;  %v14552_v11 = vld [vmem:[#allocation3_spill] sm:$0xff]  ;;  %v7824_v0 = vld [vmem:[%s14359_s3 + $0x238] sm:$0xff] }
 0x300   : > { %7733 = vmatprep.mubr.msk.f32.mxu0 %vm410_vm0, %v1111_v20  ;;  %3160 = vmatprep.mubr.f32.mxu1 %v14473_v29  ;;  %v1113_v31 = vmul.f32 %v10728_v19, %v14546_v26  ;;  %v14547_v19 = vld [vmem:[#allocation2_spill] sm:$0xff]  ;;  %v8781_v20 = vpack.c.bf16 %v7820_v52, %v7819_v18  ;;  %14551 = vst [vmem:[#allocation8_spill] sm:$0xff] %v11315_v23  ;;  %v14554_v18 = vld [vmem:[#allocation65_spill] sm:$0xff] }
 0x301   : > { %8776 = vmatpush1.bf16.msra.mxu0 %v8775_v27  ;;  %8979 = vmatpush1.bf16.msra.mxu1 %v11257_v34  ;;  %v14548_v27 = vld [vmem:[#allocation9_spill] sm:$0xff] }
 0x302   : > { %v11276_v15 = vpop.f32.mrb[138].mxu1  ;;  %8777 = vmatprep.subr.bf16.mxu0 %v14480_v32  ;;  %v1112_v49 = vmul.f32 %v14549_v50, %v14548_v27  ;;  %8966 = vmatprep.subr.bf16.mxu1 %v14480_v32  ;;  %v7935_v27 = vld [vmem:[%s14359_s3 + $0x330] sm:$0xff]  ;;  %v7936_v50 = vld [vmem:[%s14359_s3 + $0x338] sm:$0xff] }
 0x303   : > { %2063 = vmatmul.mubr.f32.gmra.mrb[72].mxu0 %v1110_v45  ;;  %v11288_v60 = vpop.f32.mrb[139].mxu1  ;;  %7911 = vmatmul.mubr.msk.f32.gmra.mrb[244].mxu1 %vm748_vm1, %v14547_v19 }
 0x304   : > { %7734 = vmatprep.mubr.msk.f32.mxu0 %vm410_vm0, %v1113_v31  ;;  %3166 = vmatprep.mubr.f32.mxu1 %v14473_v29  ;;  %v14553_v31 = vld [vmem:[#allocation11_spill] sm:$0xff] }
 0x305   : > { %8779 = vmatpush1.bf16.msra.mxu0 %v8778_v21  ;;  %v7821_v21 = vld [vmem:[%s14359_s3 + $0x220] sm:$0xff]  ;;  %8980 = vmatpush1.bf16.msra.mxu1 %v11286_v16  ;;  %v1114_v52 = vmul.f32 %v14554_v18, %v14553_v31 }
 0x306   : > { %v11305_v45 = vpop.f32.mrb[140].mxu1  ;;  %8780 = vmatprep.subr.bf16.mxu0 %v14480_v32  ;;  %v8784_v19 = vpack.c.bf16 %v7822_v54, %v7821_v21  ;;  %8967 = vmatprep.subr.bf16.mxu1 %v14480_v32  ;;  %v14558_v54 = vld [vmem:[#allocation13_spill] sm:$0xff] }
 0x307   : > { %2068 = vmatmul.mubr.f32.gmra.mrb[74].mxu0 %v1112_v49  ;;  %v11317_v26 = vpop.f32.mrb[141].mxu1  ;;  %7912 = vmatmul.mubr.msk.f32.gmra.mrb[246].mxu1 %vm748_vm1, %v14552_v11  ;;  %v14555_v49 = vld [vmem:[#allocation14_spill] sm:$0xff] }
 0x308   : > { %7735 = vmatprep.mubr.msk.f32.mxu0 %vm410_vm0, %v1115_v22  ;;  %3172 = vmatprep.mubr.f32.mxu1 %v14473_v29  ;;  %v1117_v56 = vmul.f32 %v10766_v7, %v14555_v49  ;;  %v11344_v22 = vpack.c.bf16 %v7936_v50, %v7935_v27  ;;  %v14557_v7 = vld [vmem:[#allocation4_spill] sm:$0xff]  ;;  %v14559_v11 = vld [vmem:[#allocation66_spill] sm:$0xff]  ;;  %v7938_v27 = vld [vmem:[%s14359_s3 + $0x348] sm:$0xff] }
 0x309   : > { %8782 = vmatpush1.bf16.msra.mxu0 %v8781_v20  ;;  %v7823_v20 = vld [vmem:[%s14359_s3 + $0x230] sm:$0xff]  ;;  %8981 = vmatpush1.bf16.msra.mxu1 %v11315_v23  ;;  %v1116_v31 = vmul.f32 %v14559_v11, %v14558_v54  ;;  %v14563_v54 = vld [vmem:[#allocation15_spill] sm:$0xff] }
 0x30a   : > { %v11334_v9 = vpop.f32.mrb[142].mxu1  ;;  %8783 = vmatprep.subr.bf16.mxu0 %v14480_v32  ;;  %14556 = vst [vmem:[#allocation63_spill] sm:$0xff] %v11344_v22  ;;  %v8787_v18 = vpack.c.bf16 %v7824_v0, %v7823_v20  ;;  %8968 = vmatprep.subr.bf16.mxu1 %v14480_v32  ;;  %v14560_v50 = vld [vmem:[#allocation16_spill] sm:$0xff]  ;;  %v7826_v20 = vld [vmem:[%s14359_s3 + $0x248] sm:$0xff] }
 0x30b   : > { %2073 = vmatmul.mubr.f32.gmra.mrb[76].mxu0 %v1114_v52  ;;  %v11346_v21 = vpop.f32.mrb[143].mxu1  ;;  %7913 = vmatmul.mubr.msk.f32.gmra.mrb[248].mxu1 %vm748_vm1, %v14557_v7  ;;  %v7937_v52 = vld [vmem:[%s14359_s3 + $0x340] sm:$0xff]  ;;  %v1119_v49 = vmul.f32 %v10785_v62, %v14560_v50  ;;  %v14562_v62 = vld [vmem:[#allocation5_spill] sm:$0xff]  ;;  %v14564_v11 = vld [vmem:[#allocation67_spill] sm:$0xff] }
 0x30c   : > { %7736 = vmatprep.mubr.msk.f32.mxu0 %vm410_vm0, %v1117_v56  ;;  %3178 = vmatprep.mubr.f32.mxu1 %v14473_v29  ;;  %v11373_v0 = vpack.c.bf16 %v7938_v27, %v7937_v52  ;;  %v1118_v50 = vmul.f32 %v14564_v11, %v14563_v54  ;;  %v7940_v52 = vld [vmem:[%s14359_s3 + $0x358] sm:$0xff]  ;;  %v14565_v27 = vld [vmem:[#allocation18_spill] sm:$0xff] }
 0x30d   : > { %8785 = vmatpush1.bf16.msra.mxu0 %v8784_v19  ;;  %v7825_v19 = vld [vmem:[%s14359_s3 + $0x240] sm:$0xff]  ;;  %8982 = vmatpush1.bf16.msra.mxu1 %v11344_v22  ;;  %v14569_v11 = vld [vmem:[#allocation17_spill] sm:$0xff] }
 0x30e   : > { %v11363_v56 = vpop.f32.mrb[144].mxu1  ;;  %8786 = vmatprep.subr.bf16.mxu0 %v14480_v32  ;;  %14561 = vst [vmem:[#allocation10_spill] sm:$0xff] %v11373_v0  ;;  %v8790_v23 = vpack.c.bf16 %v7826_v20, %v7825_v19  ;;  %8969 = vmatprep.subr.bf16.mxu1 %v14480_v32  ;;  %v7828_v19 = vld [vmem:[%s14359_s3 + $0x258] sm:$0xff] }
 0x30f   : > { %2078 = vmatmul.mubr.f32.gmra.mrb[78].mxu0 %v1116_v31  ;;  %v11375_v7 = vpop.f32.mrb[145].mxu1  ;;  %7914 = vmatmul.mubr.msk.f32.gmra.mrb[250].mxu1 %vm748_vm1, %v14562_v62  ;;  %v7939_v31 = vld [vmem:[%s14359_s3 + $0x350] sm:$0xff] }
 0x310   : > { %7737 = vmatprep.mubr.msk.f32.mxu0 %vm410_vm0, %v1119_v49  ;;  %3184 = vmatprep.mubr.f32.mxu1 %v14473_v29  ;;  %v1121_v49 = vmul.f32 %v10804_v28, %v14565_v27  ;;  %v11402_v20 = vpack.c.bf16 %v7940_v52, %v7939_v31  ;;  %v14568_v28 = vld [vmem:[#allocation6_spill] sm:$0xff]  ;;  %v14570_v27 = vld [vmem:[#allocation68_spill] sm:$0xff]  ;;  %v7942_v31 = vld [vmem:[%s14359_s3 + $0x368] sm:$0xff] }
 0x311   : > { %8788 = vmatpush1.bf16.msra.mxu0 %v8787_v18  ;;  %v7827_v18 = vld [vmem:[%s14359_s3 + $0x250] sm:$0xff]  ;;  %8983 = vmatpush1.bf16.msra.mxu1 %v11373_v0  ;;  %v1120_v22 = vmul.f32 %v14570_v27, %v14569_v11  ;;  %v14575_v27 = vld [vmem:[#allocation19_spill] sm:$0xff] }
 0x312   : > { %v11392_v62 = vpop.f32.mrb[146].mxu1  ;;  %8789 = vmatprep.subr.bf16.mxu0 %v14480_v32  ;;  %14567 = vst [vmem:[#allocation9_spill] sm:$0xff] %v11402_v20  ;;  %8970 = vmatprep.subr.bf16.mxu1 %v14480_v32  ;;  %v14571_v52 = vld [vmem:[#allocation20_spill] sm:$0xff] }
 0x313   : > { %14566 = vst [vmem:[#allocation2_spill] sm:$0xff] %v11392_v62  ;;  %2083 = vmatmul.mubr.f32.gmra.mrb[80].mxu0 %v1118_v50  ;;  %v11404_v54 = vpop.f32.mrb[147].mxu1  ;;  %7915 = vmatmul.mubr.msk.f32.gmra.mrb[252].mxu1 %vm748_vm1, %v14568_v28  ;;  %v8793_v62 = vpack.c.bf16 %v7828_v19, %v7827_v18  ;;  %v7941_v50 = vld [vmem:[%s14359_s3 + $0x360] sm:$0xff]  ;;  %v7830_v18 = vld [vmem:[%s14359_s3 + $0x268] sm:$0xff] }
 0x314   : > { %7738 = vmatprep.mubr.msk.f32.mxu0 %vm410_vm0, %v1121_v49  ;;  %3190 = vmatprep.mubr.f32.mxu1 %v14473_v29  ;;  %v1123_v49 = vmul.f32 %v10823_v30, %v14571_v52  ;;  %v11431_v19 = vpack.c.bf16 %v7942_v31, %v7941_v50  ;;  %v14574_v30 = vld [vmem:[#allocation7_spill] sm:$0xff]  ;;  %v14576_v52 = vld [vmem:[#allocation69_spill] sm:$0xff]  ;;  %v7943_v50 = vld [vmem:[%s14359_s3 + $0x370] sm:$0xff] }
 0x315   : > { %8791 = vmatpush1.bf16.msra.mxu0 %v8790_v23  ;;  %v7829_v23 = vld [vmem:[%s14359_s3 + $0x260] sm:$0xff]  ;;  %8984 = vmatpush1.bf16.msra.mxu1 %v11402_v20  ;;  %v1122_v29 = vmul.f32 %v14576_v52, %v14575_v27 }
 0x316   : > { %v11421_v28 = vpop.f32.mrb[148].mxu1  ;;  %8792 = vmatprep.subr.bf16.mxu0 %v14480_v32  ;;  %8971 = vmatprep.subr.bf16.mxu1 %v14480_v32  ;;  %v8796_v0 = vpack.c.bf16 %v7830_v18, %v7829_v23  ;;  %v14577_v31 = vld [vmem:[#allocation22_spill] sm:$0xff] }
 0x317   : > { %14572 = vst [vmem:[#allocation64_spill] sm:$0xff] %v11421_v28  ;;  %2088 = vmatmul.mubr.f32.gmra.mrb[82].mxu0 %v1120_v22  ;;  %v11433_v11 = vpop.f32.mrb[149].mxu1  ;;  %7916 = vmatmul.mubr.msk.f32.gmra.mrb[254].mxu1 %vm748_vm1, %v14574_v30  ;;  %v7944_v22 = vld [vmem:[%s14359_s3 + $0x378] sm:$0xff]  ;;  %v1125_v30 = vmul.f32 %v10842_v43, %v14577_v31  ;;  %v14581_v27 = vld [vmem:[#allocation70_spill] sm:$0xff] }
 0x318   : > { %14573 = vst [vmem:[#allocation12_spill] sm:$0xff] %v11433_v11  ;;  %7739 = vmatprep.mubr.msk.f32.mxu0 %vm410_vm0, %v1123_v49  ;;  %v7832_v49 = vld [vmem:[%s14359_s3 + $0x278] sm:$0xff]  ;;  %v11459_v23 = vpack.c.bf16 %v7944_v22, %v7943_v50  ;;  %v7834_v50 = vld [vmem:[%s14359_s3 + $0x288] sm:$0xff] }
 0x319   : > { %8794 = vmatpush1.bf16.msra.mxu0 %v8793_v62  ;;  %v7831_v62 = vld [vmem:[%s14359_s3 + $0x270] sm:$0xff]  ;;  %8985 = vmatpush1.bf16.msra.mxu1 %v11431_v19  ;;  %v14580_v43 = vld [vmem:[#allocation21_spill] sm:$0xff] }
 0x31a   : > { %v11449_v20 = vpop.f32.mrb[150].mxu1  ;;  %8795 = vmatprep.subr.bf16.mxu0 %v14480_v32  ;;  %14579 = vst [vmem:[#allocation11_spill] sm:$0xff] %v11459_v23  ;;  %8972 = vmatprep.subr.bf16.mxu1 %v14480_v32  ;;  %v1124_v52 = vmul.f32 %v14581_v27, %v14580_v43  ;;  %v8799_v31 = vpack.c.bf16 %v7832_v49, %v7831_v62  ;;  %v14585_v62 = vld [vmem:[#allocation26_spill] sm:$0xff]  ;;  %v7835_v27 = vld [vmem:[%s14359_s3 + $0x290] sm:$0xff] }
 0x31b   : > { %14578 = vst [vmem:[#allocation3_spill] sm:$0xff] %v11449_v20  ;;  %2093 = vmatmul.mubr.f32.gmra.mrb[84].mxu0 %v1122_v29  ;;  %v11461_v18 = vpop.f32.mrb[151].mxu1  ;;  %v14582_v20 = vld [vmem:[#allocation24_spill] sm:$0xff]  ;;  %v7833_v29 = vld [vmem:[%s14359_s3 + $0x280] sm:$0xff]  ;;  %v1129_v49 = vmul.f32 %v10880_v17, %v14585_v62 }
 0x31c   : > { %7740 = vmatprep.mubr.msk.f32.mxu0 %vm410_vm0, %v1125_v30  ;;  %v1127_v28 = vmul.f32 %v10861_v47, %v14582_v20  ;;  %v14583_v47 = vld [vmem:[#allocation23_spill] sm:$0xff]  ;;  %v8802_v30 = vpack.c.bf16 %v7834_v50, %v7833_v29  ;;  %v14587_v50 = vld [vmem:[#allocation28_spill] sm:$0xff] }
 0x31d   : > { %8797 = vmatpush1.bf16.msra.mxu0 %v8796_v0  ;;  %8986 = vmatpush1.bf16.msra.mxu1 %v11459_v23  ;;  %v14584_v20 = vld [vmem:[#allocation71_spill] sm:$0xff]  ;;  %v14589_v23 = vld [vmem:[#allocation30_spill] sm:$0xff] }
 0x31e   : > { %v11469_v11 = vpop.f32.mrb[152].mxu1  ;;  %8798 = vmatprep.subr.bf16.mxu0 %v14480_v32  ;;  %v1126_v22 = vmul.f32 %v14584_v20, %v14583_v47  ;;  %v1131_v47 = vmul.f32 %v10893_v5, %v14587_v50 }
 0x31f   : > { %2098 = vmatmul.mubr.f32.gmra.mrb[86].mxu0 %v1124_v52  ;;  %v11479_v0 = vpop.f32.mrb[153].mxu1 }
 0x320   : > { %7741 = vmatprep.mubr.msk.f32.mxu0 %vm410_vm0, %v1127_v28  ;;  %v7836_v28 = vld [vmem:[%s14359_s3 + $0x298] sm:$0xff] }
 0x321   : > { %8800 = vmatpush1.bf16.msra.mxu0 %v8799_v31  ;;  %v14586_v31 = vld [vmem:[#allocation25_spill] sm:$0xff]  ;;  %v8805_v29 = vpack.c.bf16 %v7836_v28, %v7835_v27 }
 0x322   : > { %v11486_v43 = vpop.f32.mrb[154].mxu1  ;;  %8801 = vmatprep.subr.bf16.mxu0 %v14480_v32  ;;  %v1128_v17 = vmul.f32 %v10885_v13, %v14586_v31  ;;  %v1133_v13 = vmul.f32 %v10906_v36, %v14589_v23  ;;  %v14590_v27 = vld [vmem:[#allocation29_spill] sm:$0xff]  ;;  %v14591_v31 = vld [vmem:[#allocation32_spill] sm:$0xff]  ;;  %v14592_v36 = vld [vmem:[#allocation31_spill] sm:$0xff] }
 0x323   : > { %2103 = vmatmul.mubr.f32.gmra.mrb[88].mxu0 %v1126_v22  ;;  %v11495_v52 = vpop.f32.mrb[155].mxu1  ;;  %v14588_v22 = vld [vmem:[#allocation27_spill] sm:$0xff]  ;;  %v1132_v28 = vmul.f32 %v10911_v58, %v14590_v27  ;;  %v14593_v23 = vld [vmem:[#allocation72_spill] sm:$0xff] }
 0x324   : > { %7742 = vmatprep.mubr.msk.f32.mxu0 %vm410_vm0, %v1129_v49  ;;  %v1130_v49 = vmul.f32 %v10898_v25, %v14588_v22  ;;  %v1134_v50 = vmul.f32 %v14593_v23, %v14592_v36  ;;  %v14601_v23 = vld [vmem:[#allocation74_spill] sm:$0xff] }
 0x325   : > { %8803 = vmatpush1.bf16.msra.mxu0 %v8802_v30 }
 0x326   : > { %v11502_v20 = vpop.f32.mrb[156].mxu1  ;;  %8804 = vmatprep.subr.bf16.mxu0 %v14480_v32 }
 0x327   : > { %2108 = vmatmul.mubr.f32.gmra.mrb[90].mxu0 %v1128_v17  ;;  %v11505_v62 = vpop.f32.mrb[157].mxu1  ;;  %v1135_v17 = vmul.f32 %v10918_v38, %v14591_v31  ;;  %v14596_v38 = vld [vmem:[#allocation33_spill] sm:$0xff] }
 0x328   : > { %7743 = vmatprep.mubr.msk.f32.mxu0 %vm410_vm0, %v1131_v47  ;;  %v14594_v47 = vld [vmem:[#allocation34_spill] sm:$0xff] }
 0x329   : > { %8806 = vmatpush1.bf16.msra.mxu0 %v8805_v29  ;;  %v1137_v22 = vmul.f32 %v10930_v40, %v14594_v47  ;;  %v14600_v40 = vld [vmem:[#allocation35_spill] sm:$0xff]  ;;  %v14602_v47 = vld [vmem:[#allocation38_spill] sm:$0xff] }
 0x32a   : > { %v11512_v30 = vpop.f32.mrb[158].mxu1  ;;  %8823 = vmatprep.subr.bf16.mxu0 %v14480_v32 }
 0x32b   : > { %2113 = vmatmul.mubr.f32.gmra.mrb[92].mxu0 %v1130_v49  ;;  %v11515_v5 = vpop.f32.mrb[159].mxu1 }
 0x32c   : > { %7744 = vmatprep.mubr.msk.f32.mxu0 %vm410_vm0, %v1133_v13  ;;  %v14597_v13 = vld [vmem:[#allocation73_spill] sm:$0xff] }
 0x32d   : > { %v1136_v27 = vmul.f32 %v14597_v13, %v14596_v38  ;;  %v14605_v13 = vld [vmem:[#allocation75_spill] sm:$0xff] }
 0x32e   : > { %v11522_v25 = vpop.f32.mrb[160].mxu1 }
 0x32f   : > { %2118 = vmatmul.mubr.f32.gmra.mrb[94].mxu0 %v1132_v28  ;;  %v11524_v29 = vpop.f32.mrb[161].mxu1  ;;  %v14598_v28 = vld [vmem:[#allocation36_spill] sm:$0xff] }
 0x330   : > { %7745 = vmatprep.mubr.msk.f32.mxu0 %vm410_vm0, %v1135_v17  ;;  %v1139_v31 = vmul.f32 %v10942_v42, %v14598_v28  ;;  %v14604_v42 = vld [vmem:[#allocation37_spill] sm:$0xff]  ;;  %v14606_v28 = vld [vmem:[#allocation40_spill] sm:$0xff] }
 0x332   : > { %v11531_v49 = vpop.f32.mrb[162].mxu1 }
 0x333   : > { %14595 = vst [vmem:[#allocation65_spill] sm:$0xff] %v11531_v49  ;;  %2123 = vmatmul.mubr.f32.gmra.mrb[96].mxu0 %v1134_v50  ;;  %v11533_v58 = vpop.f32.mrb[163].mxu1  ;;  %v1138_v50 = vmul.f32 %v14601_v23, %v14600_v40  ;;  %v1141_v49 = vmul.f32 %v10954_v44, %v14602_v47  ;;  %v14608_v44 = vld [vmem:[#allocation39_spill] sm:$0xff]  ;;  %v14609_v23 = vld [vmem:[#allocation76_spill] sm:$0xff]  ;;  %v14610_v47 = vld [vmem:[#allocation42_spill] sm:$0xff] }
 0x334   : > { %7746 = vmatprep.mubr.msk.f32.mxu0 %vm410_vm0, %v1137_v22 }
 0x336   : > { %v11540_v17 = vpop.f32.mrb[164].mxu1 }
 0x337   : > { %14599 = vst [vmem:[#allocation14_spill] sm:$0xff] %v11540_v17  ;;  %2128 = vmatmul.mubr.f32.gmra.mrb[98].mxu0 %v1136_v27  ;;  %v11542_v36 = vpop.f32.mrb[165].mxu1  ;;  %v1140_v27 = vmul.f32 %v14605_v13, %v14604_v42  ;;  %v1143_v17 = vmul.f32 %v10966_v46, %v14606_v28  ;;  %v14612_v46 = vld [vmem:[#allocation41_spill] sm:$0xff]  ;;  %v14614_v28 = vld [vmem:[#allocation44_spill] sm:$0xff] }
 0x338   : > { %7747 = vmatprep.mubr.msk.f32.mxu0 %vm410_vm0, %v1139_v31  ;;  %v14613_v13 = vld [vmem:[#allocation77_spill] sm:$0xff] }
 0x33a   : > { %v11549_v22 = vpop.f32.mrb[166].mxu1 }
 0x33b   : > { %14603 = vst [vmem:[#allocation4_spill] sm:$0xff] %v11549_v22  ;;  %2133 = vmatmul.mubr.f32.gmra.mrb[100].mxu0 %v1138_v50  ;;  %v11551_v38 = vpop.f32.mrb[167].mxu1  ;;  %v1142_v50 = vmul.f32 %v14609_v23, %v14608_v44  ;;  %v1145_v22 = vmul.f32 %v10978_v48, %v14610_v47  ;;  %v14616_v48 = vld [vmem:[#allocation43_spill] sm:$0xff]  ;;  %v14617_v23 = vld [vmem:[#allocation78_spill] sm:$0xff] }
 0x33c   : > { %7748 = vmatprep.mubr.msk.f32.mxu0 %vm410_vm0, %v1141_v49  ;;  %v14618_v47 = vld [vmem:[#allocation46_spill] sm:$0xff] }
 0x33e   : > { %v11558_v31 = vpop.f32.mrb[168].mxu1 }
 0x33f   : > { %14607 = vst [vmem:[#allocation13_spill] sm:$0xff] %v11558_v31  ;;  %2138 = vmatmul.mubr.f32.gmra.mrb[102].mxu0 %v1140_v27  ;;  %v11560_v40 = vpop.f32.mrb[169].mxu1  ;;  %v1144_v27 = vmul.f32 %v14613_v13, %v14612_v46  ;;  %v1147_v31 = vmul.f32 %v10990_v51, %v14614_v28  ;;  %v14620_v51 = vld [vmem:[#allocation45_spill] sm:$0xff]  ;;  %v14621_v13 = vld [vmem:[#allocation79_spill] sm:$0xff]  ;;  %v14622_v28 = vld [vmem:[#allocation48_spill] sm:$0xff] }
 0x340   : > { %7749 = vmatprep.mubr.msk.f32.mxu0 %vm410_vm0, %v1143_v17 }
 0x342   : > { %v11567_v49 = vpop.f32.mrb[170].mxu1 }
 0x343   : > { %14611 = vst [vmem:[#allocation66_spill] sm:$0xff] %v11567_v49  ;;  %2143 = vmatmul.mubr.f32.gmra.mrb[104].mxu0 %v1142_v50  ;;  %v11569_v42 = vpop.f32.mrb[171].mxu1  ;;  %v1146_v50 = vmul.f32 %v14617_v23, %v14616_v48  ;;  %v1149_v49 = vmul.f32 %v11002_v53, %v14618_v47  ;;  %v14624_v53 = vld [vmem:[#allocation47_spill] sm:$0xff]  ;;  %v14625_v23 = vld [vmem:[#allocation80_spill] sm:$0xff]  ;;  %v14626_v47 = vld [vmem:[#allocation50_spill] sm:$0xff] }
 0x344   : > { %7750 = vmatprep.mubr.msk.f32.mxu0 %vm410_vm0, %v1145_v22 }
 0x346   : > { %v11576_v17 = vpop.f32.mrb[172].mxu1 }
 0x347   : > { %14615 = vst [vmem:[#allocation16_spill] sm:$0xff] %v11576_v17  ;;  %2148 = vmatmul.mubr.f32.gmra.mrb[106].mxu0 %v1144_v27  ;;  %v11578_v44 = vpop.f32.mrb[173].mxu1  ;;  %v1148_v27 = vmul.f32 %v14621_v13, %v14620_v51  ;;  %v1151_v17 = vmul.f32 %v11014_v55, %v14622_v28  ;;  %v14628_v55 = vld [vmem:[#allocation49_spill] sm:$0xff]  ;;  %v14630_v28 = vld [vmem:[#allocation52_spill] sm:$0xff] }
 0x348   : > { %7751 = vmatprep.mubr.msk.f32.mxu0 %vm410_vm0, %v1147_v31  ;;  %v14629_v13 = vld [vmem:[#allocation81_spill] sm:$0xff] }
 0x34a   : > { %v11585_v22 = vpop.f32.mrb[174].mxu1 }
 0x34b   : > { %14619 = vst [vmem:[#allocation5_spill] sm:$0xff] %v11585_v22  ;;  %2153 = vmatmul.mubr.f32.gmra.mrb[108].mxu0 %v1146_v50  ;;  %v11587_v46 = vpop.f32.mrb[175].mxu1  ;;  %v1150_v50 = vmul.f32 %v14625_v23, %v14624_v53  ;;  %v1153_v22 = vmul.f32 %v11026_v57, %v14626_v47  ;;  %v14632_v57 = vld [vmem:[#allocation51_spill] sm:$0xff]  ;;  %v14633_v23 = vld [vmem:[#allocation82_spill] sm:$0xff] }
 0x34c   : > { %7752 = vmatprep.mubr.msk.f32.mxu0 %vm410_vm0, %v1149_v49  ;;  %v14634_v47 = vld [vmem:[#allocation54_spill] sm:$0xff] }
 0x34e   : > { %v11594_v31 = vpop.f32.mrb[176].mxu1 }
 0x34f   : > { %14623 = vst [vmem:[#allocation15_spill] sm:$0xff] %v11594_v31  ;;  %2158 = vmatmul.mubr.f32.gmra.mrb[110].mxu0 %v1148_v27  ;;  %v11596_v48 = vpop.f32.mrb[177].mxu1  ;;  %v1152_v27 = vmul.f32 %v14629_v13, %v14628_v55  ;;  %v1155_v31 = vmul.f32 %v11038_v59, %v14630_v28  ;;  %v14637_v59 = vld [vmem:[#allocation53_spill] sm:$0xff]  ;;  %v14638_v13 = vld [vmem:[#allocation83_spill] sm:$0xff]  ;;  %v14639_v28 = vld [vmem:[#allocation56_spill] sm:$0xff] }
 0x350   : > { %7753 = vmatprep.mubr.msk.f32.mxu0 %vm410_vm0, %v1151_v17 }
 0x352   : > { %v11603_v49 = vpop.f32.mrb[178].mxu1 }
 0x353   : > { %14627 = vst [vmem:[#allocation67_spill] sm:$0xff] %v11603_v49  ;;  %2163 = vmatmul.mubr.f32.gmra.mrb[112].mxu0 %v1150_v50  ;;  %v11605_v51 = vpop.f32.mrb[179].mxu1  ;;  %v1154_v50 = vmul.f32 %v14633_v23, %v14632_v57  ;;  %v1157_v49 = vmul.f32 %v11050_v61, %v14634_v47  ;;  %v14641_v61 = vld [vmem:[#allocation55_spill] sm:$0xff]  ;;  %v14642_v23 = vld [vmem:[#allocation84_spill] sm:$0xff]  ;;  %v14643_v47 = vld [vmem:[#allocation58_spill] sm:$0xff] }
 0x354   : > { %7754 = vmatprep.mubr.msk.f32.mxu0 %vm410_vm0, %v1153_v22 }
 0x356   : > { %v11612_v17 = vpop.f32.mrb[180].mxu1 }
 0x357   : > { %14631 = vst [vmem:[#allocation18_spill] sm:$0xff] %v11612_v17  ;;  %2168 = vmatmul.mubr.f32.gmra.mrb[114].mxu0 %v1152_v27  ;;  %v11614_v53 = vpop.f32.mrb[181].mxu1  ;;  %v1156_v27 = vmul.f32 %v14638_v13, %v14637_v59  ;;  %v1159_v17 = vmul.f32 %v11062_v63, %v14639_v28  ;;  %v14647_v63 = vld [vmem:[#allocation57_spill] sm:$0xff]  ;;  %v14648_v13 = vld [vmem:[#allocation86_spill] sm:$0xff]  ;;  %v14649_v28 = vld [vmem:[#allocation60_spill] sm:$0xff] }
 0x358   : > { %7755 = vmatprep.mubr.msk.f32.mxu0 %vm410_vm0, %v1155_v31 }
 0x35a   : > { %v11621_v22 = vpop.f32.mrb[182].mxu1 }
 0x35b   : > { %14635 = vst [vmem:[#allocation6_spill] sm:$0xff] %v11621_v22  ;;  %2173 = vmatmul.mubr.f32.gmra.mrb[116].mxu0 %v1154_v50  ;;  %v11623_v55 = vpop.f32.mrb[183].mxu1  ;;  %v1158_v50 = vmul.f32 %v14642_v23, %v14641_v61  ;;  %v14644_v22 = vld [vmem:[#allocation85_spill] sm:$0xff]  ;;  %v14651_v23 = vld [vmem:[#allocation88_spill] sm:$0xff] }
 0x35c   : > { %14636 = vst [vmem:[#allocation17_spill] sm:$0xff] %v11623_v55  ;;  %7756 = vmatprep.mubr.msk.f32.mxu0 %vm410_vm0, %v1157_v49  ;;  %v1161_v55 = vmul.f32 %v14644_v22, %v14643_v47  ;;  %v14650_v22 = vld [vmem:[#allocation59_spill] sm:$0xff]  ;;  %v14652_v47 = vld [vmem:[#allocation62_spill] sm:$0xff] }
 0x35e   : > { %v11630_v31 = vpop.f32.mrb[184].mxu1 }
 0x35f   : > { %14640 = vst [vmem:[#allocation68_spill] sm:$0xff] %v11630_v31  ;;  %2178 = vmatmul.mubr.f32.gmra.mrb[118].mxu0 %v1156_v27  ;;  %v11632_v57 = vpop.f32.mrb[185].mxu1  ;;  %v1160_v27 = vmul.f32 %v14648_v13, %v14647_v63  ;;  %v14655_v13 = vld [vmem:[#allocation91_spill] sm:$0xff] }
 0x360   : > { %7757 = vmatprep.mubr.msk.f32.mxu0 %vm410_vm0, %v1159_v17  ;;  %v1163_v17 = vmul.f32 %v11094_v37, %v14649_v28  ;;  %v14654_v37 = vld [vmem:[#allocation61_spill] sm:$0xff]  ;;  %v11665_v28 = vld [vmem:[%s9709_s23 + $0x8] sm:$0xff] }
 0x362   : > { %v11639_v49 = vpop.f32.mrb[186].mxu1 }
 0x363   : > { %14645 = vst [vmem:[#allocation20_spill] sm:$0xff] %v11639_v49  ;;  %2183 = vmatmul.mubr.f32.gmra.mrb[120].mxu0 %v1158_v50  ;;  %v11641_v59 = vpop.f32.mrb[187].mxu1  ;;  %v1162_v50 = vmul.f32 %v14651_v23, %v14650_v22 }
 0x364   : > { %14646 = vst [vmem:[#allocation7_spill] sm:$0xff] %v11641_v59  ;;  %7758 = vmatprep.mubr.msk.f32.mxu0 %vm410_vm0, %v1161_v55  ;;  %v14653_v55 = vld [vmem:[#allocation90_spill] sm:$0xff] }
 0x365   : > { %v1165_v49 = vmul.f32 %v14653_v55, %v14652_v47  ;;  %v11680_v47 = vld [vmem:[%s9709_s23 + $0x18] sm:$0xff] }
 0x366   : > { %v11648_v31 = vpop.f32.mrb[188].mxu1  ;;  %v2480_v55 = vmul.f32 %v11680_v47, %v11173_v8 }
 0x367   : > { %2188 = vmatmul.mubr.f32.gmra.mrb[122].mxu0 %v1160_v27  ;;  %v11650_v61 = vpop.f32.mrb[189].mxu1  ;;  %v1164_v27 = vmul.f32 %v14655_v13, %v14654_v37  ;;  %v14657_v13 = vld [vmem:[#allocation87_spill] sm:$0xff] }
 0x368   : > { %7759 = vmatprep.mubr.msk.f32.mxu0 %vm410_vm0, %v1163_v17  ;;  %v2478_v17 = vmul.f32 %v11665_v28, %v11145_v24 }
 0x36a   : > { %v11657_v59 = vpop.f32.mrb[190].mxu1 }
 0x36b   : > { %2193 = vmatmul.mubr.f32.gmra.mrb[124].mxu0 %v1162_v50  ;;  %v11659_v63 = vpop.f32.mrb[191].mxu1  ;;  %v11675_v50 = vld [vmem:[%s9709_s23] sm:$0xff] }
 0x36c   : > { %7760 = vmatprep.mubr.msk.f32.mxu0 %vm410_vm0, %v1165_v49  ;;  %v2477_v49 = vmul.f32 %v11675_v50, %v11141_v3 }
 0x36e   : > { %v11669_v22 = vpop.f32.mrb[192].mxu1 }
 0x36f   : > { %2198 = vmatmul.mubr.f32.gmra.mrb[126].mxu0 %v1164_v27  ;;  %v11671_v23 = vpop.f32.mrb[193].mxu1  ;;  %v11691_v27 = vld [vmem:[%s9709_s23 + $0x10] sm:$0xff] }
 0x370   : > { %7837 = vmatprep.mubr.msk.f32.mxu0 %vm410_vm0, %v2478_v17  ;;  %14658 = vst [vmem:[#allocation69_spill] sm:$0xff] %v11691_v27  ;;  %v2479_v3 = vmul.f32 %v11691_v27, %v11162_v6  ;;  %v11697_v17 = vld [vmem:[%s9709_s23 + $0x28] sm:$0xff]  ;;  %v11714_v27 = vld [vmem:[%s9709_s23 + $0x38] sm:$0xff] }
 0x371   : > { %v2482_v8 = vmul.f32 %v11697_v17, %v11201_v41  ;;  %v2484_v41 = vmul.f32 %v11714_v27, %v11230_v39 }
 0x372   : > { %v11684_v24 = vpop.f32.mrb[194].mxu1 }
 0x373   : > { %14656 = vst [vmem:[#allocation19_spill] sm:$0xff] %v11684_v24  ;;  %2731 = vmatmul.mubr.f32.vlgmr.msra.gmra.mrb[64].mxu0 %v2477_v49  ;;  %v11686_v37 = vpop.f32.mrb[195].mxu1 }
 0x374   : > { %8825 = vmatpush1.bf16.msra.mxu0 %v14657_v13  ;;  %7838 = vmatprep.mubr.msk.f32.mxu0 %vm410_vm0, %v2480_v55  ;;  %v14660_v55 = vld [vmem:[#allocation89_spill] sm:$0xff]  ;;  %v11708_v13 = vld [vmem:[%s9709_s23 + $0x20] sm:$0xff] }
 0x375   : > { %8826 = vmatprep.subr.bf16.mxu0 %v14480_v32  ;;  %v2481_v6 = vmul.f32 %v11708_v13, %v11190_v4 }
 0x376   : > { %v11701_v49 = vpop.f32.mrb[196].mxu1 }
 0x377   : > { %14659 = vst [vmem:[#allocation22_spill] sm:$0xff] %v11701_v49  ;;  %2736 = vmatmul.mubr.f32.gmra.mrb[66].mxu0 %v2479_v3  ;;  %v11703_v24 = vpop.f32.mrb[197].mxu1 }
 0x378   : > { %7839 = vmatprep.mubr.msk.f32.mxu0 %vm410_vm0, %v2482_v8  ;;  %8828 = vmatpush1.bf16.msra.mxu0 %v14660_v55  ;;  %v11725_v8 = vld [vmem:[%s9709_s23 + $0x30] sm:$0xff]  ;;  %v11731_v55 = vld [vmem:[%s9709_s23 + $0x48] sm:$0xff] }
 0x379   : > { %8829 = vmatprep.subr.bf16.mxu0 %v14480_v32  ;;  %v2483_v4 = vmul.f32 %v11725_v8, %v11218_v10  ;;  %v2486_v39 = vmul.f32 %v11731_v55, %v11259_v12 }
 0x37a   : > { %v11718_v3 = vpop.f32.mrb[198].mxu1 }
 0x37b   : > { %14661 = vst [vmem:[#allocation21_spill] sm:$0xff] %v11718_v3  ;;  %2741 = vmatmul.mubr.f32.gmra.mrb[68].mxu0 %v2481_v6  ;;  %v11720_v49 = vpop.f32.mrb[199].mxu1 }
 0x37c   : > { %7840 = vmatprep.mubr.msk.f32.mxu0 %vm410_vm0, %v2484_v41  ;;  %8831 = vmatpush1.bf16.msra.mxu0 %v11143_v33  ;;  %v11742_v33 = vld [vmem:[%s9709_s23 + $0x40] sm:$0xff]  ;;  %v11748_v41 = vld [vmem:[%s9709_s23 + $0x58] sm:$0xff] }
 0x37d   : > { %8832 = vmatprep.subr.bf16.mxu0 %v14480_v32  ;;  %v2485_v10 = vmul.f32 %v11742_v33, %v11247_v2  ;;  %v2488_v12 = vmul.f32 %v11748_v41, %v11288_v60 }
 0x37e   : > { %v11735_v6 = vpop.f32.mrb[200].mxu1 }
 0x37f   : > { %14662 = vst [vmem:[#allocation70_spill] sm:$0xff] %v11735_v6  ;;  %2746 = vmatmul.mubr.f32.gmra.mrb[70].mxu0 %v2483_v4  ;;  %v11737_v3 = vpop.f32.mrb[201].mxu1 }
 0x380   : > { %7841 = vmatprep.mubr.msk.f32.mxu0 %vm410_vm0, %v2486_v39  ;;  %8834 = vmatpush1.bf16.msra.mxu0 %v11171_v35  ;;  %v11759_v35 = vld [vmem:[%s9709_s23 + $0x50] sm:$0xff]  ;;  %v11765_v39 = vld [vmem:[%s9709_s23 + $0x68] sm:$0xff] }
 0x381   : > { %8835 = vmatprep.subr.bf16.mxu0 %v14480_v32  ;;  %v2487_v2 = vmul.f32 %v11759_v35, %v11276_v15  ;;  %v2490_v60 = vmul.f32 %v11765_v39, %v11317_v26 }
 0x382   : > { %v11752_v4 = vpop.f32.mrb[202].mxu1 }
 0x383   : > { %14663 = vst [vmem:[#allocation24_spill] sm:$0xff] %v11752_v4  ;;  %2751 = vmatmul.mubr.f32.gmra.mrb[72].mxu0 %v2485_v10  ;;  %v11754_v6 = vpop.f32.mrb[203].mxu1 }
 0x384   : > { %7842 = vmatprep.mubr.msk.f32.mxu0 %vm410_vm0, %v2488_v12  ;;  %8837 = vmatpush1.bf16.msra.mxu0 %v11199_v14  ;;  %v11776_v14 = vld [vmem:[%s9709_s23 + $0x60] sm:$0xff]  ;;  %v11782_v12 = vld [vmem:[%s9709_s23 + $0x78] sm:$0xff] }
 0x385   : > { %8838 = vmatprep.subr.bf16.mxu0 %v14480_v32  ;;  %v2489_v15 = vmul.f32 %v11776_v14, %v11305_v45  ;;  %v2492_v26 = vmul.f32 %v11782_v12, %v11346_v21 }
 0x386   : > { %v11769_v10 = vpop.f32.mrb[204].mxu1 }
 0x387   : > { %14664 = vst [vmem:[#allocation23_spill] sm:$0xff] %v11769_v10  ;;  %2756 = vmatmul.mubr.f32.gmra.mrb[74].mxu0 %v2487_v2  ;;  %v11771_v4 = vpop.f32.mrb[205].mxu1 }
 0x388   : > { %7843 = vmatprep.mubr.msk.f32.mxu0 %vm410_vm0, %v2490_v60  ;;  %8840 = vmatpush1.bf16.msra.mxu0 %v11228_v1  ;;  %v11793_v1 = vld [vmem:[%s9709_s23 + $0x70] sm:$0xff]  ;;  %v11799_v60 = vld [vmem:[%s9709_s23 + $0x88] sm:$0xff] }
 0x389   : > { %8841 = vmatprep.subr.bf16.mxu0 %v14480_v32  ;;  %14666 = vst [vmem:[#allocation26_spill] sm:$0xff] %v11793_v1  ;;  %v2491_v45 = vmul.f32 %v11793_v1, %v11334_v9  ;;  %14667 = vst [vmem:[#allocation25_spill] sm:$0xff] %v11799_v60  ;;  %v2494_v21 = vmul.f32 %v11799_v60, %v11375_v7  ;;  %v11833_v60 = vld [vmem:[%s9709_s23 + $0xa8] sm:$0xff] }
 0x38a   : > { %v11786_v2 = vpop.f32.mrb[206].mxu1  ;;  %14677 = vst [vmem:[#allocation34_spill] sm:$0xff] %v11833_v60 }
 0x38b   : > { %14665 = vst [vmem:[#allocation71_spill] sm:$0xff] %v11786_v2  ;;  %2761 = vmatmul.mubr.f32.gmra.mrb[76].mxu0 %v2489_v15  ;;  %v11788_v10 = vpop.f32.mrb[207].mxu1 }
 0x38c   : > { %7844 = vmatprep.mubr.msk.f32.mxu0 %vm410_vm0, %v2492_v26  ;;  %8843 = vmatpush1.bf16.msra.mxu0 %v11257_v34  ;;  %v11810_v34 = vld [vmem:[%s9709_s23 + $0x80] sm:$0xff]  ;;  %v11816_v26 = vld [vmem:[%s9709_s23 + $0x98] sm:$0xff] }
 0x38d   : > { %8844 = vmatprep.subr.bf16.mxu0 %v14480_v32  ;;  %14670 = vst [vmem:[#allocation30_spill] sm:$0xff] %v11810_v34  ;;  %v2493_v9 = vmul.f32 %v11810_v34, %v11363_v56  ;;  %14671 = vst [vmem:[#allocation29_spill] sm:$0xff] %v11816_v26  ;;  %v2496_v7 = vmul.f32 %v11816_v26, %v11404_v54  ;;  %v14676_v56 = vld [vmem:[#allocation2_spill] sm:$0xff]  ;;  %v14678_v54 = vld [vmem:[#allocation12_spill] sm:$0xff] }
 0x38e   : > { %v11803_v15 = vpop.f32.mrb[208].mxu1 }
 0x38f   : > { %14668 = vst [vmem:[#allocation28_spill] sm:$0xff] %v11803_v15  ;;  %2766 = vmatmul.mubr.f32.gmra.mrb[78].mxu0 %v2491_v45  ;;  %v11805_v2 = vpop.f32.mrb[209].mxu1 }
 0x390   : > { %14669 = vst [vmem:[#allocation27_spill] sm:$0xff] %v11805_v2  ;;  %7845 = vmatprep.mubr.msk.f32.mxu0 %vm410_vm0, %v2494_v21  ;;  %8846 = vmatpush1.bf16.msra.mxu0 %v11286_v16  ;;  %v14674_v16 = vld [vmem:[#allocation8_spill] sm:$0xff] }
 0x391   : > { %8847 = vmatprep.subr.bf16.mxu0 %v14480_v32  ;;  %v11827_v21 = vld [vmem:[%s9709_s23 + $0x90] sm:$0xff] }
 0x392   : > { %v11820_v45 = vpop.f32.mrb[210].mxu1  ;;  %14675 = vst [vmem:[#allocation72_spill] sm:$0xff] %v11827_v21  ;;  %v2495_v34 = vmul.f32 %v11827_v21, %v14676_v56  ;;  %v14683_v56 = vld [vmem:[#allocation64_spill] sm:$0xff] }
 0x393   : > { %14672 = vst [vmem:[#allocation32_spill] sm:$0xff] %v11820_v45  ;;  %2771 = vmatmul.mubr.f32.gmra.mrb[80].mxu0 %v2493_v9  ;;  %v11822_v15 = vpop.f32.mrb[211].mxu1  ;;  %v2498_v45 = vmul.f32 %v11833_v60, %v14678_v54 }
 0x394   : > { %14673 = vst [vmem:[#allocation31_spill] sm:$0xff] %v11822_v15  ;;  %7846 = vmatprep.mubr.msk.f32.mxu0 %vm410_vm0, %v2496_v7  ;;  %8849 = vmatpush1.bf16.msra.mxu0 %v14674_v16  ;;  %v14681_v7 = vld [vmem:[#allocation63_spill] sm:$0xff]  ;;  %v11844_v16 = vld [vmem:[%s9709_s23 + $0xa0] sm:$0xff]  ;;  %v9446_v15 = vld [vmem:[%s9709_s23 + $0xb8] sm:$0xff] }
 0x395   : > { %8850 = vmatprep.subr.bf16.mxu0 %v14480_v32  ;;  %14682 = vst [vmem:[#allocation36_spill] sm:$0xff] %v11844_v16  ;;  %v2497_v21 = vmul.f32 %v11844_v16, %v14683_v56  ;;  %v2500_v54 = vmul.f32 %v9446_v15, %v11461_v18  ;;  %v9448_v56 = vld [vmem:[%s9709_s23 + $0xc8] sm:$0xff] }
 0x396   : > { %v11837_v9 = vpop.f32.mrb[212].mxu1  ;;  %v2502_v16 = vmul.f32 %v9448_v56, %v11479_v0  ;;  %v9450_v0 = vld [vmem:[%s9709_s23 + $0xd8] sm:$0xff] }
 0x397   : > { %14679 = vst [vmem:[#allocation33_spill] sm:$0xff] %v11837_v9  ;;  %2776 = vmatmul.mubr.f32.gmra.mrb[82].mxu0 %v2495_v34  ;;  %v11839_v26 = vpop.f32.mrb[213].mxu1 }
 0x398   : > { %14680 = vst [vmem:[#allocation73_spill] sm:$0xff] %v11839_v26  ;;  %7847 = vmatprep.mubr.msk.f32.mxu0 %vm410_vm0, %v2498_v45  ;;  %8852 = vmatpush1.bf16.msra.mxu0 %v14681_v7  ;;  %v14684_v45 = vld [vmem:[#allocation10_spill] sm:$0xff]  ;;  %v9447_v7 = vld [vmem:[%s9709_s23 + $0xb0] sm:$0xff]  ;;  %v14685_v26 = vld [vmem:[#allocation3_spill] sm:$0xff] }
 0x399   : > { %8853 = vmatprep.subr.bf16.mxu0 %v14480_v32  ;;  %v2499_v2 = vmul.f32 %v9447_v7, %v14685_v26  ;;  %v9449_v26 = vld [vmem:[%s9709_s23 + $0xc0] sm:$0xff] }
 0x39a   : > { %v3072_v9 = vpop.f32.mrb[214].mxu1 }
 0x39b   : > { %2781 = vmatmul.mubr.f32.gmra.mrb[84].mxu0 %v2497_v21  ;;  %v3074_v34 = vpop.f32.mrb[215].mxu1  ;;  %v3219_v1 = vmul.f32 %v9447_v7, %v3072_v9  ;;  %v2501_v9 = vmul.f32 %v9449_v26, %v11469_v11  ;;  %v9451_v11 = vld [vmem:[%s9709_s23 + $0xd0] sm:$0xff] }
 0x39c   : > { %v3220_v60 = vmul.f32 %v9446_v15, %v3074_v34  ;;  %7848 = vmatprep.mubr.msk.f32.mxu0 %vm410_vm0, %v2500_v54  ;;  %8855 = vmatpush1.bf16.msra.mxu0 %v14684_v45  ;;  %v14686_v54 = vld [vmem:[#allocation9_spill] sm:$0xff]  ;;  %v2504_v45 = vmul.f32 %v9450_v0, %v11495_v52  ;;  %v9452_v52 = vld [vmem:[%s9709_s23 + $0xe8] sm:$0xff] }
 0x39d   : > { %8856 = vmatprep.subr.bf16.mxu0 %v14480_v32 }
 0x39e   : > { %v3078_v18 = vpop.f32.mrb[216].mxu1  ;;  %7956 = vmatprep.mubr.msk.f32.mxu1 %vm410_vm0, %v3220_v60 }
 0x39f   : > { %2786 = vmatmul.mubr.f32.gmra.mrb[86].mxu0 %v2499_v2  ;;  %v3080_v15 = vpop.f32.mrb[217].mxu1  ;;  %3506 = vmatmul.mubr.f32.vlgmr.msra.gmra.mrb[0].mxu1 %v3219_v1  ;;  %v3221_v34 = vmul.f32 %v9449_v26, %v3078_v18 }
 0x3a0   : > { %v3222_v21 = vmul.f32 %v9448_v56, %v3080_v15  ;;  %7849 = vmatprep.mubr.msk.f32.mxu0 %vm410_vm0, %v2502_v16  ;;  %8858 = vmatpush1.bf16.msra.mxu0 %v14686_v54  ;;  %v2503_v16 = vmul.f32 %v9451_v11, %v11486_v43  ;;  %v2506_v56 = vmul.f32 %v9452_v52, %v11505_v62  ;;  %v9453_v43 = vld [vmem:[%s9709_s23 + $0xe0] sm:$0xff] }
 0x3a1   : > { %8859 = vmatprep.subr.bf16.mxu0 %v14480_v32  ;;  %v2505_v54 = vmul.f32 %v9453_v43, %v11502_v20  ;;  %v9456_v20 = vld [vmem:[%s9709_s23 + $0x108] sm:$0xff] }
 0x3a2   : > { %v3084_v60 = vpop.f32.mrb[218].mxu1  ;;  %7957 = vmatprep.mubr.msk.f32.mxu1 %vm410_vm0, %v3222_v21 }
 0x3a3   : > { %2791 = vmatmul.mubr.f32.gmra.mrb[88].mxu0 %v2501_v9  ;;  %v3086_v2 = vpop.f32.mrb[219].mxu1  ;;  %3511 = vmatmul.mubr.f32.gmra.mrb[2].mxu1 %v3221_v34  ;;  %v3223_v7 = vmul.f32 %v9451_v11, %v3084_v60  ;;  %v9454_v9 = vld [vmem:[%s9709_s23 + $0xf8] sm:$0xff]  ;;  %v9455_v60 = vld [vmem:[%s9709_s23 + $0xf0] sm:$0xff]  ;;  %v2510_v11 = vmul.f32 %v9456_v20, %v11524_v29 }
 0x3a4   : > { %v3224_v1 = vmul.f32 %v9450_v0, %v3086_v2  ;;  %7850 = vmatprep.mubr.msk.f32.mxu0 %vm410_vm0, %v2504_v45  ;;  %8861 = vmatpush1.bf16.msra.mxu0 %v11431_v19  ;;  %v14687_v19 = vld [vmem:[#allocation11_spill] sm:$0xff]  ;;  %v2508_v62 = vmul.f32 %v9454_v9, %v11515_v5  ;;  %v2507_v2 = vmul.f32 %v9455_v60, %v11512_v30  ;;  %v9458_v30 = vld [vmem:[%s9709_s23 + $0x118] sm:$0xff] }
 0x3a5   : > { %8862 = vmatprep.subr.bf16.mxu0 %v14480_v32 }
 0x3a6   : > { %v3090_v18 = vpop.f32.mrb[220].mxu1  ;;  %7958 = vmatprep.mubr.msk.f32.mxu1 %vm410_vm0, %v3224_v1 }
 0x3a7   : > { %2796 = vmatmul.mubr.f32.gmra.mrb[90].mxu0 %v2503_v16  ;;  %v3092_v15 = vpop.f32.mrb[221].mxu1  ;;  %3516 = vmatmul.mubr.f32.gmra.mrb[4].mxu1 %v3223_v7  ;;  %v3225_v26 = vmul.f32 %v9453_v43, %v3090_v18  ;;  %v9459_v43 = vld [vmem:[%s9709_s23 + $0x110] sm:$0xff] }
 0x3a8   : > { %v3226_v21 = vmul.f32 %v9452_v52, %v3092_v15  ;;  %7851 = vmatprep.mubr.msk.f32.mxu0 %vm410_vm0, %v2506_v56  ;;  %8864 = vmatpush1.bf16.msra.mxu0 %v14687_v19  ;;  %v9457_v52 = vld [vmem:[%s9709_s23 + $0x100] sm:$0xff]  ;;  %v2512_v15 = vmul.f32 %v9458_v30, %v11533_v58 }
 0x3a9   : > { %v2509_v56 = vmul.f32 %v9457_v52, %v11522_v25  ;;  %v9460_v25 = vld [vmem:[%s9709_s23 + $0x128] sm:$0xff] }
 0x3aa   : > { %v3096_v34 = vpop.f32.mrb[222].mxu1  ;;  %7959 = vmatprep.mubr.msk.f32.mxu1 %vm410_vm0, %v3226_v21 }
 0x3ab   : > { %2801 = vmatmul.mubr.f32.gmra.mrb[92].mxu0 %v2505_v54  ;;  %v3098_v0 = vpop.f32.mrb[223].mxu1  ;;  %3521 = vmatmul.mubr.f32.gmra.mrb[6].mxu1 %v3225_v26  ;;  %v3227_v1 = vmul.f32 %v9455_v60, %v3096_v34  ;;  %v14688_v54 = vld [vmem:[#allocation65_spill] sm:$0xff]  ;;  %v14689_v60 = vld [vmem:[#allocation14_spill] sm:$0xff] }
 0x3ac   : > { %v3228_v45 = vmul.f32 %v9454_v9, %v3098_v0  ;;  %7852 = vmatprep.mubr.msk.f32.mxu0 %vm410_vm0, %v2508_v62  ;;  %v2511_v26 = vmul.f32 %v9459_v43, %v14688_v54  ;;  %v2514_v62 = vmul.f32 %v9460_v25, %v11542_v36 }
 0x3ae   : > { %v3102_v16 = vpop.f32.mrb[224].mxu1  ;;  %7960 = vmatprep.mubr.msk.f32.mxu1 %vm410_vm0, %v3228_v45  ;;  %v9461_v45 = vld [vmem:[%s9709_s23 + $0x120] sm:$0xff] }
 0x3af   : > { %2806 = vmatmul.mubr.f32.gmra.mrb[94].mxu0 %v2507_v2  ;;  %v3104_v5 = vpop.f32.mrb[225].mxu1  ;;  %3526 = vmatmul.mubr.f32.gmra.mrb[8].mxu1 %v3227_v1  ;;  %v3229_v18 = vmul.f32 %v9457_v52, %v3102_v16  ;;  %v2513_v2 = vmul.f32 %v9461_v45, %v14689_v60  ;;  %v14690_v52 = vld [vmem:[#allocation4_spill] sm:$0xff] }
 0x3b0   : > { %v3230_v7 = vmul.f32 %v9456_v20, %v3104_v5  ;;  %7853 = vmatprep.mubr.msk.f32.mxu0 %vm410_vm0, %v2510_v11  ;;  %v9462_v20 = vld [vmem:[%s9709_s23 + $0x138] sm:$0xff] }
 0x3b1   : > { %v2516_v11 = vmul.f32 %v9462_v20, %v11551_v38 }
 0x3b2   : > { %v3108_v21 = vpop.f32.mrb[226].mxu1  ;;  %7961 = vmatprep.mubr.msk.f32.mxu1 %vm410_vm0, %v3230_v7  ;;  %v9463_v7 = vld [vmem:[%s9709_s23 + $0x130] sm:$0xff] }
 0x3b3   : > { %2811 = vmatmul.mubr.f32.gmra.mrb[96].mxu0 %v2509_v56  ;;  %v3110_v29 = vpop.f32.mrb[227].mxu1  ;;  %3531 = vmatmul.mubr.f32.gmra.mrb[10].mxu1 %v3229_v18  ;;  %v3231_v9 = vmul.f32 %v9459_v43, %v3108_v21  ;;  %v2515_v56 = vmul.f32 %v9463_v7, %v14690_v52  ;;  %v14691_v43 = vld [vmem:[#allocation13_spill] sm:$0xff] }
 0x3b4   : > { %v3232_v19 = vmul.f32 %v9458_v30, %v3110_v29  ;;  %7854 = vmatprep.mubr.msk.f32.mxu0 %vm410_vm0, %v2512_v15  ;;  %v9464_v30 = vld [vmem:[%s9709_s23 + $0x148] sm:$0xff]  ;;  %v9470_v52 = vld [vmem:[%s9709_s23 + $0x178] sm:$0xff] }
 0x3b5   : > { %v2518_v15 = vmul.f32 %v9464_v30, %v11560_v40 }
 0x3b6   : > { %v3114_v34 = vpop.f32.mrb[228].mxu1  ;;  %7962 = vmatprep.mubr.msk.f32.mxu1 %vm410_vm0, %v3232_v19  ;;  %v9465_v19 = vld [vmem:[%s9709_s23 + $0x140] sm:$0xff] }
 0x3b7   : > { %2816 = vmatmul.mubr.f32.gmra.mrb[98].mxu0 %v2511_v26  ;;  %v3116_v58 = vpop.f32.mrb[229].mxu1  ;;  %3536 = vmatmul.mubr.f32.gmra.mrb[12].mxu1 %v3231_v9  ;;  %v3233_v1 = vmul.f32 %v9461_v45, %v3114_v34  ;;  %v2517_v54 = vmul.f32 %v9465_v19, %v14691_v43  ;;  %v9466_v9 = vld [vmem:[%s9709_s23 + $0x158] sm:$0xff] }
 0x3b8   : > { %v3234_v0 = vmul.f32 %v9460_v25, %v3116_v58  ;;  %7855 = vmatprep.mubr.msk.f32.mxu0 %vm410_vm0, %v2514_v62  ;;  %v2520_v25 = vmul.f32 %v9466_v9, %v11569_v42  ;;  %v9467_v58 = vld [vmem:[%s9709_s23 + $0x150] sm:$0xff] }
 0x3ba   : > { %v3120_v16 = vpop.f32.mrb[230].mxu1  ;;  %7963 = vmatprep.mubr.msk.f32.mxu1 %vm410_vm0, %v3234_v0  ;;  %v14692_v0 = vld [vmem:[#allocation66_spill] sm:$0xff] }
 0x3bb   : > { %2821 = vmatmul.mubr.f32.gmra.mrb[100].mxu0 %v2513_v2  ;;  %v3122_v36 = vpop.f32.mrb[231].mxu1  ;;  %3541 = vmatmul.mubr.f32.gmra.mrb[14].mxu1 %v3233_v1  ;;  %v3235_v18 = vmul.f32 %v9463_v7, %v3120_v16  ;;  %v2519_v45 = vmul.f32 %v9467_v58, %v14692_v0  ;;  %v9468_v2 = vld [vmem:[%s9709_s23 + $0x168] sm:$0xff]  ;;  %v9469_v16 = vld [vmem:[%s9709_s23 + $0x160] sm:$0xff] }
 0x3bc   : > { %v3236_v5 = vmul.f32 %v9462_v20, %v3122_v36  ;;  %7856 = vmatprep.mubr.msk.f32.mxu0 %vm410_vm0, %v2516_v11  ;;  %v2522_v1 = vmul.f32 %v9468_v2, %v11578_v44  ;;  %v14693_v36 = vld [vmem:[#allocation16_spill] sm:$0xff] }
 0x3be   : > { %v3126_v21 = vpop.f32.mrb[232].mxu1  ;;  %7964 = vmatprep.mubr.msk.f32.mxu1 %vm410_vm0, %v3236_v5  ;;  %v2521_v5 = vmul.f32 %v9469_v16, %v14693_v36 }
 0x3bf   : > { %2826 = vmatmul.mubr.f32.gmra.mrb[102].mxu0 %v2515_v56  ;;  %v3128_v38 = vpop.f32.mrb[233].mxu1  ;;  %3546 = vmatmul.mubr.f32.gmra.mrb[16].mxu1 %v3235_v18  ;;  %v3237_v26 = vmul.f32 %v9465_v19, %v3126_v21  ;;  %v2524_v56 = vmul.f32 %v9470_v52, %v11587_v46  ;;  %v14694_v21 = vld [vmem:[#allocation5_spill] sm:$0xff]  ;;  %v9472_v19 = vld [vmem:[%s9709_s23 + $0x188] sm:$0xff] }
 0x3c0   : > { %v3238_v29 = vmul.f32 %v9464_v30, %v3128_v38  ;;  %7857 = vmatprep.mubr.msk.f32.mxu0 %vm410_vm0, %v2518_v15  ;;  %v9471_v15 = vld [vmem:[%s9709_s23 + $0x170] sm:$0xff]  ;;  %v2526_v43 = vmul.f32 %v9472_v19, %v11596_v48 }
 0x3c1   : > { %v2523_v38 = vmul.f32 %v9471_v15, %v14694_v21 }
 0x3c2   : > { %v3132_v62 = vpop.f32.mrb[234].mxu1  ;;  %7965 = vmatprep.mubr.msk.f32.mxu1 %vm410_vm0, %v3238_v29 }
 0x3c3   : > { %2831 = vmatmul.mubr.f32.gmra.mrb[104].mxu0 %v2517_v54  ;;  %v3134_v40 = vpop.f32.mrb[235].mxu1  ;;  %3551 = vmatmul.mubr.f32.gmra.mrb[18].mxu1 %v3237_v26  ;;  %v3239_v60 = vmul.f32 %v9467_v58, %v3132_v62 }
 0x3c4   : > { %v3240_v34 = vmul.f32 %v9466_v9, %v3134_v40  ;;  %7858 = vmatprep.mubr.msk.f32.mxu0 %vm410_vm0, %v2520_v25  ;;  %v9473_v9 = vld [vmem:[%s9709_s23 + $0x180] sm:$0xff]  ;;  %v14695_v25 = vld [vmem:[#allocation15_spill] sm:$0xff] }
 0x3c5   : > { %v2525_v62 = vmul.f32 %v9473_v9, %v14695_v25 }
 0x3c6   : > { %v3138_v20 = vpop.f32.mrb[236].mxu1  ;;  %7966 = vmatprep.mubr.msk.f32.mxu1 %vm410_vm0, %v3240_v34  ;;  %v9474_v34 = vld [vmem:[%s9709_s23 + $0x198] sm:$0xff] }
 0x3c7   : > { %2836 = vmatmul.mubr.f32.gmra.mrb[106].mxu0 %v2519_v45  ;;  %v3140_v42 = vpop.f32.mrb[237].mxu1  ;;  %3556 = vmatmul.mubr.f32.gmra.mrb[20].mxu1 %v3239_v60  ;;  %v3241_v7 = vmul.f32 %v9469_v16, %v3138_v20  ;;  %v2528_v58 = vmul.f32 %v9474_v34, %v11605_v51  ;;  %v9475_v60 = vld [vmem:[%s9709_s23 + $0x190] sm:$0xff] }
 0x3c8   : > { %v3242_v11 = vmul.f32 %v9468_v2, %v3140_v42  ;;  %7859 = vmatprep.mubr.msk.f32.mxu0 %vm410_vm0, %v2522_v1  ;;  %v14696_v2 = vld [vmem:[#allocation67_spill] sm:$0xff] }
 0x3c9   : > { %v2527_v1 = vmul.f32 %v9475_v60, %v14696_v2  ;;  %v9476_v42 = vld [vmem:[%s9709_s23 + $0x1a8] sm:$0xff] }
 0x3ca   : > { %v3144_v18 = vpop.f32.mrb[238].mxu1  ;;  %7967 = vmatprep.mubr.msk.f32.mxu1 %vm410_vm0, %v3242_v11  ;;  %v2530_v11 = vmul.f32 %v9476_v42, %v11614_v53 }
 0x3cb   : > { %2841 = vmatmul.mubr.f32.gmra.mrb[108].mxu0 %v2521_v5  ;;  %v3146_v44 = vpop.f32.mrb[239].mxu1  ;;  %3561 = vmatmul.mubr.f32.gmra.mrb[22].mxu1 %v3241_v7  ;;  %v3243_v29 = vmul.f32 %v9471_v15, %v3144_v18  ;;  %v9477_v5 = vld [vmem:[%s9709_s23 + $0x1a0] sm:$0xff]  ;;  %v9478_v18 = vld [vmem:[%s9709_s23 + $0x1b8] sm:$0xff] }
 0x3cc   : > { %v3244_v30 = vmul.f32 %v9470_v52, %v3146_v44  ;;  %7860 = vmatprep.mubr.msk.f32.mxu0 %vm410_vm0, %v2524_v56  ;;  %v14697_v7 = vld [vmem:[#allocation18_spill] sm:$0xff]  ;;  %v14698_v44 = vld [vmem:[#allocation17_spill] sm:$0xff] }
 0x3cd   : > { %v2529_v52 = vmul.f32 %v9477_v5, %v14697_v7 }
 0x3ce   : > { %v3150_v54 = vpop.f32.mrb[240].mxu1  ;;  %7968 = vmatprep.mubr.msk.f32.mxu1 %vm410_vm0, %v3244_v30  ;;  %v2532_v30 = vmul.f32 %v9478_v18, %v14698_v44  ;;  %v9486_v44 = vld [vmem:[%s9709_s23 + $0x1f8] sm:$0xff] }
 0x3cf   : > { %2846 = vmatmul.mubr.f32.gmra.mrb[110].mxu0 %v2523_v38  ;;  %v3152_v46 = vpop.f32.mrb[241].mxu1  ;;  %3566 = vmatmul.mubr.f32.gmra.mrb[24].mxu1 %v3243_v29  ;;  %v3245_v40 = vmul.f32 %v9473_v9, %v3150_v54  ;;  %v9479_v38 = vld [vmem:[%s9709_s23 + $0x1b0] sm:$0xff]  ;;  %v14699_v29 = vld [vmem:[#allocation6_spill] sm:$0xff]  ;;  %v9480_v54 = vld [vmem:[%s9709_s23 + $0x1c8] sm:$0xff] }
 0x3d0   : > { %v3246_v26 = vmul.f32 %v9472_v19, %v3152_v46  ;;  %7861 = vmatprep.mubr.msk.f32.mxu0 %vm410_vm0, %v2526_v43  ;;  %v2531_v19 = vmul.f32 %v9479_v38, %v14699_v29  ;;  %v2534_v46 = vmul.f32 %v9480_v54, %v11632_v57 }
 0x3d2   : > { %v3156_v0 = vpop.f32.mrb[242].mxu1  ;;  %7969 = vmatprep.mubr.msk.f32.mxu1 %vm410_vm0, %v3246_v26 }
 0x3d3   : > { %2851 = vmatmul.mubr.f32.gmra.mrb[112].mxu0 %v2525_v62  ;;  %v3158_v48 = vpop.f32.mrb[243].mxu1  ;;  %3571 = vmatmul.mubr.f32.gmra.mrb[26].mxu1 %v3245_v40  ;;  %v3247_v20 = vmul.f32 %v9475_v60, %v3156_v0  ;;  %v9481_v62 = vld [vmem:[%s9709_s23 + $0x1c0] sm:$0xff]  ;;  %v14700_v40 = vld [vmem:[#allocation68_spill] sm:$0xff]  ;;  %v9482_v0 = vld [vmem:[%s9709_s23 + $0x1d8] sm:$0xff] }
 0x3d4   : > { %v3248_v45 = vmul.f32 %v9474_v34, %v3158_v48  ;;  %7862 = vmatprep.mubr.msk.f32.mxu0 %vm410_vm0, %v2528_v58  ;;  %v2533_v34 = vmul.f32 %v9481_v62, %v14700_v40  ;;  %v14701_v48 = vld [vmem:[#allocation7_spill] sm:$0xff] }
 0x3d5   : > { %v14716_v40 = vld [vmem:[#allocation31_spill] sm:$0xff] }
 0x3d6   : > { %v3162_v16 = vpop.f32.mrb[244].mxu1  ;;  %7970 = vmatprep.mubr.msk.f32.mxu1 %vm410_vm0, %v3248_v45  ;;  %v2536_v45 = vmul.f32 %v9482_v0, %v14701_v48  ;;  %v14721_v48 = vld [vmem:[#allocation34_spill] sm:$0xff] }
 0x3d7   : > { %2856 = vmatmul.mubr.f32.gmra.mrb[114].mxu0 %v2527_v1  ;;  %v3164_v51 = vpop.f32.mrb[245].mxu1  ;;  %3576 = vmatmul.mubr.f32.gmra.mrb[28].mxu1 %v3247_v20  ;;  %v3249_v56 = vmul.f32 %v9477_v5, %v3162_v16  ;;  %v9483_v1 = vld [vmem:[%s9709_s23 + $0x1d0] sm:$0xff]  ;;  %v9484_v16 = vld [vmem:[%s9709_s23 + $0x1e8] sm:$0xff] }
 0x3d8   : > { %v3250_v36 = vmul.f32 %v9476_v42, %v3164_v51  ;;  %7863 = vmatprep.mubr.msk.f32.mxu0 %vm410_vm0, %v2530_v11  ;;  %v14702_v20 = vld [vmem:[#allocation20_spill] sm:$0xff]  ;;  %v2538_v51 = vmul.f32 %v9484_v16, %v11650_v61 }
 0x3d9   : > { %v2535_v42 = vmul.f32 %v9483_v1, %v14702_v20 }
 0x3da   : > { %v3168_v15 = vpop.f32.mrb[246].mxu1  ;;  %7971 = vmatprep.mubr.msk.f32.mxu1 %vm410_vm0, %v3250_v36 }
 0x3db   : > { %2861 = vmatmul.mubr.f32.gmra.mrb[116].mxu0 %v2529_v52  ;;  %v3170_v53 = vpop.f32.mrb[247].mxu1  ;;  %3581 = vmatmul.mubr.f32.gmra.mrb[30].mxu1 %v3249_v56  ;;  %v3251_v43 = vmul.f32 %v9479_v38, %v3168_v15  ;;  %v9485_v52 = vld [vmem:[%s9709_s23 + $0x1e0] sm:$0xff] }
 0x3dc   : > { %v3252_v21 = vmul.f32 %v9478_v18, %v3170_v53  ;;  %7864 = vmatprep.mubr.msk.f32.mxu0 %vm410_vm0, %v2532_v30  ;;  %v2537_v56 = vmul.f32 %v9485_v52, %v11648_v31  ;;  %v2540_v30 = vmul.f32 %v9486_v44, %v11659_v63  ;;  %v3198_v31 = vmul.f32 %v11665_v28, %v11671_v23  ;;  %v14705_v23 = vld [vmem:[#allocation22_spill] sm:$0xff] }
 0x3dd   : > { %v3197_v63 = vmul.f32 %v11675_v50, %v11669_v22  ;;  %v3202_v28 = vmul.f32 %v11697_v17, %v11703_v24  ;;  %v3204_v22 = vmul.f32 %v11714_v27, %v11720_v49  ;;  %v14706_v50 = vld [vmem:[#allocation21_spill] sm:$0xff]  ;;  %v14707_v24 = vld [vmem:[#allocation70_spill] sm:$0xff]  ;;  %v14708_v27 = vld [vmem:[#allocation24_spill] sm:$0xff] }
 0x3de   : > { %v3174_v26 = vpop.f32.mrb[248].mxu1  ;;  %7972 = vmatprep.mubr.msk.f32.mxu1 %vm410_vm0, %v3252_v21  ;;  %v9487_v21 = vld [vmem:[%s9709_s23 + $0x1f0] sm:$0xff]  ;;  %v3205_v17 = vmul.f32 %v11742_v33, %v14707_v24  ;;  %v3207_v49 = vmul.f32 %v11759_v35, %v14708_v27  ;;  %v3212_v33 = vmul.f32 %v11782_v12, %v11788_v10  ;;  %v14713_v35 = vld [vmem:[#allocation25_spill] sm:$0xff] }
 0x3df   : > { %2866 = vmatmul.mubr.f32.gmra.mrb[118].mxu0 %v2531_v19  ;;  %v3176_v9 = vpop.f32.mrb[249].mxu1  ;;  %3586 = vmatmul.mubr.f32.gmra.mrb[32].mxu1 %v3251_v43  ;;  %v3253_v58 = vmul.f32 %v9481_v62, %v3174_v26  ;;  %v2539_v38 = vmul.f32 %v9487_v21, %v11657_v59  ;;  %v3200_v19 = vmul.f32 %v11680_v47, %v11686_v37  ;;  %v14703_v59 = vld [vmem:[#allocation19_spill] sm:$0xff]  ;;  %v14704_v43 = vld [vmem:[#allocation69_spill] sm:$0xff]  ;;  %v14718_v10 = vld [vmem:[#allocation32_spill] sm:$0xff] }
 0x3e0   : > { %v3254_v25 = vmul.f32 %v9480_v54, %v3176_v9  ;;  %7865 = vmatprep.mubr.msk.f32.mxu0 %vm410_vm0, %v2534_v46  ;;  %v3199_v54 = vmul.f32 %v14704_v43, %v14703_v59  ;;  %v3201_v46 = vmul.f32 %v11708_v13, %v14705_v23  ;;  %v3203_v47 = vmul.f32 %v11725_v8, %v14706_v50  ;;  %v14712_v9 = vld [vmem:[#allocation27_spill] sm:$0xff]  ;;  %v14719_v12 = vld [vmem:[#allocation72_spill] sm:$0xff] }
 0x3e1   : > { %v3206_v37 = vmul.f32 %v11731_v55, %v11737_v3  ;;  %v3208_v13 = vmul.f32 %v11748_v41, %v11754_v6  ;;  %v3210_v8 = vmul.f32 %v11765_v39, %v11771_v4  ;;  %v14709_v3 = vld [vmem:[#allocation23_spill] sm:$0xff]  ;;  %v14711_v41 = vld [vmem:[#allocation26_spill] sm:$0xff]  ;;  %v14714_v4 = vld [vmem:[#allocation28_spill] sm:$0xff] }
 0x3e2   : > { %v3180_v60 = vpop.f32.mrb[250].mxu1  ;;  %7973 = vmatprep.mubr.msk.f32.mxu1 %vm410_vm0, %v3254_v25  ;;  %v3209_v55 = vmul.f32 %v11776_v14, %v14709_v3  ;;  %v14710_v6 = vld [vmem:[#allocation71_spill] sm:$0xff]  ;;  %v3214_v25 = vmul.f32 %v14713_v35, %v14712_v9  ;;  %v14715_v39 = vld [vmem:[#allocation30_spill] sm:$0xff]  ;;  %v14717_v14 = vld [vmem:[#allocation29_spill] sm:$0xff] }
 0x3e3   : > { %2871 = vmatmul.mubr.f32.gmra.mrb[120].mxu0 %v2533_v34  ;;  %v3182_v57 = vpop.f32.mrb[251].mxu1  ;;  %3591 = vmatmul.mubr.f32.gmra.mrb[34].mxu1 %v3253_v58  ;;  %v3255_v11 = vmul.f32 %v9483_v1, %v3180_v60  ;;  %v3211_v26 = vmul.f32 %v14711_v41, %v14710_v6  ;;  %v3213_v62 = vmul.f32 %v14715_v39, %v14714_v4  ;;  %v14722_v60 = vld [vmem:[#allocation33_spill] sm:$0xff] }
 0x3e4   : > { %v3256_v2 = vmul.f32 %v9482_v0, %v3182_v57  ;;  %7866 = vmatprep.mubr.msk.f32.mxu0 %vm410_vm0, %v2536_v45  ;;  %v3216_v34 = vmul.f32 %v14717_v14, %v14716_v40  ;;  %v3215_v58 = vmul.f32 %v14719_v12, %v14718_v10  ;;  %v14720_v0 = vld [vmem:[#allocation73_spill] sm:$0xff]  ;;  %v14723_v57 = vld [vmem:[#allocation36_spill] sm:$0xff] }
 0x3e5   : > { %v3218_v45 = vmul.f32 %v14721_v48, %v14720_v0 }
 0x3e6   : > { %v3186_v36 = vpop.f32.mrb[252].mxu1  ;;  %7974 = vmatprep.mubr.msk.f32.mxu1 %vm410_vm0, %v3256_v2  ;;  %v3217_v2 = vmul.f32 %v14723_v57, %v14722_v60 }
 0x3e7   : > { %2876 = vmatmul.mubr.f32.gmra.mrb[122].mxu0 %v2535_v42  ;;  %v3188_v5 = vpop.f32.mrb[253].mxu1  ;;  %3596 = vmatmul.mubr.f32.gmra.mrb[36].mxu1 %v3255_v11  ;;  %v3257_v18 = vmul.f32 %v9485_v52, %v3186_v36 }
 0x3e8   : > { %v3258_v7 = vmul.f32 %v9484_v16, %v3188_v5  ;;  %7867 = vmatprep.mubr.msk.f32.mxu0 %vm410_vm0, %v2538_v51 }
 0x3ea   : > { %v3192_v15 = vpop.f32.mrb[254].mxu1  ;;  %7975 = vmatprep.mubr.msk.f32.mxu1 %vm410_vm0, %v3258_v7 }
 0x3eb   : > { %2881 = vmatmul.mubr.f32.gmra.mrb[124].mxu0 %v2537_v56  ;;  %v3194_v61 = vpop.f32.mrb[255].mxu1  ;;  %3601 = vmatmul.mubr.f32.gmra.mrb[38].mxu1 %v3257_v18  ;;  %v3259_v29 = vmul.f32 %v9487_v21, %v3192_v15 }
 0x3ec   : > { %v3260_v53 = vmul.f32 %v9486_v44, %v3194_v61  ;;  %7868 = vmatprep.mubr.msk.f32.mxu0 %vm410_vm0, %v2540_v30 }
 0x3ee   : > { %7976 = vmatprep.mubr.msk.f32.mxu1 %vm410_vm0, %v3260_v53 }
 0x3ef   : > { %2886 = vmatmul.mubr.f32.gmra.mrb[126].mxu0 %v2539_v38  ;;  %3606 = vmatmul.mubr.f32.gmra.mrb[40].mxu1 %v3259_v29 }
 0x3f0   : > { %7945 = vmatprep.mubr.msk.f32.mxu0 %vm410_vm0, %v3198_v31 }
 0x3f3   : > { %3451 = vmatmul.mubr.f32.vlgmr.msra.gmra.mrb[64].mxu0 %v3197_v63 }
 0x3f4   : > { %7946 = vmatprep.mubr.msk.f32.mxu0 %vm410_vm0, %v3200_v19 }
 0x3f7   : > { %3456 = vmatmul.mubr.f32.gmra.mrb[66].mxu0 %v3199_v54 }
 0x3f8   : > { %7947 = vmatprep.mubr.msk.f32.mxu0 %vm410_vm0, %v3202_v28 }
 0x3fb   : > { %3461 = vmatmul.mubr.f32.gmra.mrb[68].mxu0 %v3201_v46 }
 0x3fc   : > { %7948 = vmatprep.mubr.msk.f32.mxu0 %vm410_vm0, %v3204_v22 }
 0x3ff   : > { %3466 = vmatmul.mubr.f32.gmra.mrb[70].mxu0 %v3203_v47 }
 0x400   : > { %7949 = vmatprep.mubr.msk.f32.mxu0 %vm410_vm0, %v3206_v37 }
 0x403   : > { %3471 = vmatmul.mubr.f32.gmra.mrb[72].mxu0 %v3205_v17 }
 0x404   : > { %7950 = vmatprep.mubr.msk.f32.mxu0 %vm410_vm0, %v3208_v13 }
 0x407   : > { %3476 = vmatmul.mubr.f32.gmra.mrb[74].mxu0 %v3207_v49 }
 0x408   : > { %7951 = vmatprep.mubr.msk.f32.mxu0 %vm410_vm0, %v3210_v8 }
 0x40b   : > { %3481 = vmatmul.mubr.f32.gmra.mrb[76].mxu0 %v3209_v55 }
 0x40c   : > { %7952 = vmatprep.mubr.msk.f32.mxu0 %vm410_vm0, %v3212_v33 }
 0x40f   : > { %3486 = vmatmul.mubr.f32.gmra.mrb[78].mxu0 %v3211_v26 }
 0x410   : > { %7953 = vmatprep.mubr.msk.f32.mxu0 %vm410_vm0, %v3214_v25 }
 0x413   : > { %3491 = vmatmul.mubr.f32.gmra.mrb[80].mxu0 %v3213_v62 }
 0x414   : > { %7954 = vmatprep.mubr.msk.f32.mxu0 %vm410_vm0, %v3216_v34 }
 0x417   : > { %3496 = vmatmul.mubr.f32.gmra.mrb[82].mxu0 %v3215_v58 }
 0x418   : > { %7955 = vmatprep.mubr.msk.f32.mxu0 %vm410_vm0, %v3218_v45 }
 0x41b   : > { %3501 = vmatmul.mubr.f32.gmra.mrb[84].mxu0 %v3217_v2 }
 0x472   : > { %v2787_v1 = vpop.f32.mrb[86].mxu0  ;;  %v3507_v20 = vpop.f32.mrb[0].mxu1 }
 0x473   : > { %v12037_v42 = vadd.f32 %v3507_v20, %v2787_v1  ;;  %v2789_v11 = vpop.f32.mrb[87].mxu0  ;;  %v3509_v16 = vpop.f32.mrb[1].mxu1 }
 0x476   : > { %v2792_v51 = vpop.f32.mrb[88].mxu0  ;;  %v3512_v36 = vpop.f32.mrb[2].mxu1 }
 0x477   : > { %v12039_v5 = vadd.f32 %v3512_v36, %v2792_v51  ;;  %v2794_v7 = vpop.f32.mrb[89].mxu0  ;;  %v3514_v52 = vpop.f32.mrb[3].mxu1 }
 0x47a   : > { %v2797_v56 = vpop.f32.mrb[90].mxu0  ;;  %v3517_v18 = vpop.f32.mrb[4].mxu1 }
 0x47b   : > { %v12041_v44 = vadd.f32 %v3517_v18, %v2797_v56  ;;  %v2799_v30 = vpop.f32.mrb[91].mxu0  ;;  %v3519_v15 = vpop.f32.mrb[5].mxu1 }
 0x47e   : > { %v2802_v61 = vpop.f32.mrb[92].mxu0  ;;  %v3522_v53 = vpop.f32.mrb[6].mxu1 }
 0x47f   : > { %v12043_v21 = vadd.f32 %v3522_v53, %v2802_v61  ;;  %v2804_v38 = vpop.f32.mrb[93].mxu0  ;;  %v3524_v29 = vpop.f32.mrb[7].mxu1 }
 0x482   : > { %v2807_v31 = vpop.f32.mrb[94].mxu0  ;;  %v3527_v63 = vpop.f32.mrb[8].mxu1 }
 0x483   : > { %v12045_v19 = vadd.f32 %v3527_v63, %v2807_v31  ;;  %v2809_v59 = vpop.f32.mrb[95].mxu0  ;;  %v3529_v43 = vpop.f32.mrb[9].mxu1 }
 0x486   : > { %v2812_v54 = vpop.f32.mrb[96].mxu0  ;;  %v3532_v28 = vpop.f32.mrb[10].mxu1 }
 0x487   : > { %v12047_v23 = vadd.f32 %v3532_v28, %v2812_v54  ;;  %v2814_v46 = vpop.f32.mrb[97].mxu0  ;;  %v3534_v22 = vpop.f32.mrb[11].mxu1 }
 0x48a   : > { %v2817_v50 = vpop.f32.mrb[98].mxu0  ;;  %v3537_v47 = vpop.f32.mrb[12].mxu1 }
 0x48b   : > { %v12049_v37 = vadd.f32 %v3537_v47, %v2817_v50  ;;  %v2819_v24 = vpop.f32.mrb[99].mxu0  ;;  %v3539_v17 = vpop.f32.mrb[13].mxu1 }
 0x48e   : > { %v2822_v13 = vpop.f32.mrb[100].mxu0  ;;  %v3542_v27 = vpop.f32.mrb[14].mxu1 }
 0x48f   : > { %v12051_v49 = vadd.f32 %v3542_v27, %v2822_v13  ;;  %v2824_v8 = vpop.f32.mrb[101].mxu0  ;;  %v3544_v3 = vpop.f32.mrb[15].mxu1 }
 0x492   : > { %v2827_v55 = vpop.f32.mrb[102].mxu0  ;;  %v3547_v33 = vpop.f32.mrb[16].mxu1 }
 0x493   : > { %v12053_v6 = vadd.f32 %v3547_v33, %v2827_v55  ;;  %v2829_v41 = vpop.f32.mrb[103].mxu0  ;;  %v3549_v26 = vpop.f32.mrb[17].mxu1 }
 0x496   : > { %v2832_v9 = vpop.f32.mrb[104].mxu0  ;;  %v3552_v35 = vpop.f32.mrb[18].mxu1 }
 0x497   : > { %v12055_v25 = vadd.f32 %v3552_v35, %v2832_v9  ;;  %v2834_v4 = vpop.f32.mrb[105].mxu0  ;;  %v3554_v39 = vpop.f32.mrb[19].mxu1 }
 0x49a   : > { %v2837_v62 = vpop.f32.mrb[106].mxu0  ;;  %v3557_v40 = vpop.f32.mrb[20].mxu1 }
 0x49b   : > { %v12057_v14 = vadd.f32 %v3557_v40, %v2837_v62  ;;  %v2839_v34 = vpop.f32.mrb[107].mxu0  ;;  %v3559_v10 = vpop.f32.mrb[21].mxu1 }
 0x49e   : > { %v2842_v12 = vpop.f32.mrb[108].mxu0  ;;  %v3562_v58 = vpop.f32.mrb[22].mxu1 }
 0x49f   : > { %v12059_v0 = vadd.f32 %v3562_v58, %v2842_v12  ;;  %v2844_v48 = vpop.f32.mrb[109].mxu0  ;;  %v3564_v45 = vpop.f32.mrb[23].mxu1 }
 0x4a2   : > { %v2847_v60 = vpop.f32.mrb[110].mxu0  ;;  %v3567_v57 = vpop.f32.mrb[24].mxu1 }
 0x4a3   : > { %v12061_v2 = vadd.f32 %v3567_v57, %v2847_v60  ;;  %v2849_v1 = vpop.f32.mrb[111].mxu0  ;;  %v3569_v20 = vpop.f32.mrb[25].mxu1 }
 0x4a6   : > { %v2852_v11 = vpop.f32.mrb[112].mxu0  ;;  %v3572_v16 = vpop.f32.mrb[26].mxu1 }
 0x4a7   : > { %v12063_v51 = vadd.f32 %v3572_v16, %v2852_v11  ;;  %v2854_v36 = vpop.f32.mrb[113].mxu0  ;;  %v3574_v7 = vpop.f32.mrb[27].mxu1 }
 0x4aa   : > { %v2857_v52 = vpop.f32.mrb[114].mxu0  ;;  %v3577_v56 = vpop.f32.mrb[28].mxu1 }
 0x4ab   : > { %v12065_v18 = vadd.f32 %v3577_v56, %v2857_v52  ;;  %v2859_v30 = vpop.f32.mrb[115].mxu0  ;;  %v3579_v15 = vpop.f32.mrb[29].mxu1 }
 0x4ae   : > { %v2862_v61 = vpop.f32.mrb[116].mxu0  ;;  %v3582_v53 = vpop.f32.mrb[30].mxu1 }
 0x4af   : > { %v12067_v38 = vadd.f32 %v3582_v53, %v2862_v61  ;;  %v2864_v29 = vpop.f32.mrb[117].mxu0  ;;  %v3584_v31 = vpop.f32.mrb[31].mxu1 }
 0x4b2   : > { %v2867_v63 = vpop.f32.mrb[118].mxu0  ;;  %v3587_v59 = vpop.f32.mrb[32].mxu1 }
 0x4b3   : > { %v12069_v43 = vadd.f32 %v3587_v59, %v2867_v63  ;;  %v2869_v54 = vpop.f32.mrb[119].mxu0  ;;  %v3589_v28 = vpop.f32.mrb[33].mxu1 }
 0x4b6   : > { %v2872_v46 = vpop.f32.mrb[120].mxu0  ;;  %v3592_v22 = vpop.f32.mrb[34].mxu1 }
 0x4b7   : > { %v12071_v50 = vadd.f32 %v3592_v22, %v2872_v46  ;;  %v2874_v47 = vpop.f32.mrb[121].mxu0  ;;  %v3594_v24 = vpop.f32.mrb[35].mxu1 }
 0x4ba   : > { %v2877_v17 = vpop.f32.mrb[122].mxu0  ;;  %v3597_v13 = vpop.f32.mrb[36].mxu1 }
 0x4bb   : > { %v12073_v27 = vadd.f32 %v3597_v13, %v2877_v17  ;;  %v2879_v8 = vpop.f32.mrb[123].mxu0  ;;  %v3599_v3 = vpop.f32.mrb[37].mxu1 }
 0x4bc   : > { %v3699_v8 = vsel %vm3665_vm2, %v12037_v42, 0.0 }
 0x4be   : > { %v2882_v55 = vpop.f32.mrb[124].mxu0  ;;  %v3602_v33 = vpop.f32.mrb[38].mxu1 }
 0x4bf   : > { %v12075_v41 = vadd.f32 %v3602_v33, %v2882_v55  ;;  %v2884_v26 = vpop.f32.mrb[125].mxu0  ;;  %v3604_v9 = vpop.f32.mrb[39].mxu1  ;;  %v3705_v55 = vsel %vm3665_vm2, %v12041_v44, 0.0  ;;  %v3702_v33 = vsel %vm3665_vm2, %v12039_v5, 0.0 }
 0x4c0   : > { %v3711_v26 = vsel %vm3665_vm2, %v12045_v19, 0.0  ;;  %v3708_v9 = vsel %vm3665_vm2, %v12043_v21, 0.0 }
 0x4c2   : > { %v2887_v35 = vpop.f32.mrb[126].mxu0  ;;  %v3607_v4 = vpop.f32.mrb[40].mxu1 }
 0x4c3   : > { %v12077_v39 = vadd.f32 %v3607_v4, %v2887_v35  ;;  %v2889_v62 = vpop.f32.mrb[127].mxu0  ;;  %v3609_v40 = vpop.f32.mrb[41].mxu1  ;;  %v3717_v35 = vsel %vm3665_vm2, %v12049_v37, 0.0  ;;  %v3714_v4 = vsel %vm3665_vm2, %v12047_v23, 0.0 }
 0x4c4   : > { %v3723_v62 = vsel %vm3665_vm2, %v12053_v6, 0.0  ;;  %v3720_v40 = vsel %vm3665_vm2, %v12051_v49, 0.0 }
 0x4c6   : > { %v12079_v34 = vpop.f32.mrb[64].mxu0 }
 0x4c7   : > { %v3454_v10 = vpop.f32.mrb[65].mxu0  ;;  %v3666_v12 = vsel %vm3665_vm2, %v12079_v34, 0.0 }
 0x4c8   : > { %3667 = vadd.xlane.f32.xlu0 %v3666_v12  ;;  %v3729_v10 = vsel %vm3665_vm2, %v12057_v14, 0.0  ;;  %v3726_v12 = vsel %vm3665_vm2, %v12055_v25, 0.0 }
 0x4ca   : > { %v12083_v58 = vpop.f32.mrb[66].mxu0 }
 0x4cb   : > { %v3459_v48 = vpop.f32.mrb[67].mxu0  ;;  %v3669_v45 = vsel %vm3665_vm2, %v12083_v58, 0.0 }
 0x4cc   : > { %3670 = vadd.xlane.f32.xlu0 %v3669_v45  ;;  %v3735_v48 = vsel %vm3665_vm2, %v12061_v2, 0.0  ;;  %v3732_v45 = vsel %vm3665_vm2, %v12059_v0, 0.0 }
 0x4ce   : > { %v12087_v60 = vpop.f32.mrb[68].mxu0 }
 0x4cf   : > { %v3464_v57 = vpop.f32.mrb[69].mxu0  ;;  %v3672_v1 = vsel %vm3665_vm2, %v12087_v60, 0.0 }
 0x4d0   : > { %3673 = vadd.xlane.f32.xlu1 %v3672_v1  ;;  %v3741_v57 = vsel %vm3665_vm2, %v12065_v18, 0.0  ;;  %v3738_v1 = vsel %vm3665_vm2, %v12063_v51, 0.0 }
 0x4d2   : > { %v12091_v20 = vpop.f32.mrb[70].mxu0 }
 0x4d3   : > { %v3469_v11 = vpop.f32.mrb[71].mxu0  ;;  %v3675_v16 = vsel %vm3665_vm2, %v12091_v20, 0.0 }
 0x4d4   : > { %3676 = vadd.xlane.f32.xlu1 %v3675_v16  ;;  %v3747_v11 = vsel %vm3665_vm2, %v12069_v43, 0.0  ;;  %v3744_v16 = vsel %vm3665_vm2, %v12067_v38, 0.0 }
 0x4d6   : > { %v12095_v36 = vpop.f32.mrb[72].mxu0 }
 0x4d7   : > { %v3474_v7 = vpop.f32.mrb[73].mxu0  ;;  %v3678_v52 = vsel %vm3665_vm2, %v12095_v36, 0.0 }
 0x4d8   : > { %3679 = vadd.xlane.f32.xlu0 %v3678_v52  ;;  %v3753_v7 = vsel %vm3665_vm2, %v12073_v27, 0.0  ;;  %v3750_v52 = vsel %vm3665_vm2, %v12071_v50, 0.0 }
 0x4da   : > { %v12099_v56 = vpop.f32.mrb[74].mxu0 }
 0x4db   : > { %v3479_v30 = vpop.f32.mrb[75].mxu0  ;;  %v3681_v15 = vsel %vm3665_vm2, %v12099_v56, 0.0 }
 0x4dc   : > { %3682 = vadd.xlane.f32.xlu1 %v3681_v15 }
 0x4de   : > { %v12103_v61 = vpop.f32.mrb[76].mxu0 }
 0x4df   : > { %v3484_v53 = vpop.f32.mrb[77].mxu0  ;;  %v3684_v29 = vsel %vm3665_vm2, %v12103_v61, 0.0 }
 0x4e0   : > { %3685 = vadd.xlane.f32.xlu0 %v3684_v29 }
 0x4e2   : > { %v12107_v31 = vpop.f32.mrb[78].mxu0 }
 0x4e3   : > { %v3489_v63 = vpop.f32.mrb[79].mxu0  ;;  %v3687_v59 = vsel %vm3665_vm2, %v12107_v31, 0.0 }
 0x4e4   : > { %3688 = vadd.xlane.f32.xlu1 %v3687_v59 }
 0x4e6   : > { %v12111_v54 = vpop.f32.mrb[80].mxu0 }
 0x4e7   : > { %v3494_v28 = vpop.f32.mrb[81].mxu0  ;;  %v3690_v46 = vsel %vm3665_vm2, %v12111_v54, 0.0 }
 0x4e8   : > { %3691 = vadd.xlane.f32.xlu0 %v3690_v46 }
 0x4ea   : > { %v12115_v22 = vpop.f32.mrb[82].mxu0 }
 0x4eb   : > { %v3499_v47 = vpop.f32.mrb[83].mxu0  ;;  %v3693_v24 = vsel %vm3665_vm2, %v12115_v22, 0.0 }
 0x4ec   : > { %3694 = vadd.xlane.f32.xlu1 %v3693_v24 }
 0x4ee   : > { %v12119_v17 = vpop.f32.mrb[84].mxu0 }
 0x4ef   : > { %v3504_v13 = vpop.f32.mrb[85].mxu0  ;;  %v3696_v3 = vsel %vm3665_vm2, %v12119_v17, 0.0 }
 0x4f0   : > { %3700 = vadd.xlane.f32.xlu1 %v3699_v8  ;;  %3697 = vadd.xlane.f32.xlu0 %v3696_v3  ;;  %v3756_v3 = vsel %vm3665_vm2, %v12075_v41, 0.0 }
 0x4f4   : > { %3706 = vadd.xlane.f32.xlu1 %v3705_v55  ;;  %3703 = vadd.xlane.f32.xlu0 %v3702_v33 }
 0x4f8   : > { %3712 = vadd.xlane.f32.xlu1 %v3711_v26  ;;  %3709 = vadd.xlane.f32.xlu0 %v3708_v9  ;;  %v3759_v9 = vsel %vm3665_vm2, %v12077_v39, 0.0 }
 0x4fc   : > { %3718 = vadd.xlane.f32.xlu1 %v3717_v35  ;;  %3715 = vadd.xlane.f32.xlu0 %v3714_v4 }
 0x500   : > { %3724 = vadd.xlane.f32.xlu1 %v3723_v62  ;;  %3721 = vadd.xlane.f32.xlu0 %v3720_v40 }
 0x504   : > { %3730 = vadd.xlane.f32.xlu1 %v3729_v10  ;;  %3727 = vadd.xlane.f32.xlu0 %v3726_v12 }
 0x508   : > { %3736 = vadd.xlane.f32.xlu1 %v3735_v48  ;;  %3733 = vadd.xlane.f32.xlu0 %v3732_v45 }
 0x50c   : > { %3742 = vadd.xlane.f32.xlu1 %v3741_v57  ;;  %3739 = vadd.xlane.f32.xlu0 %v3738_v1 }
 0x510   : > { %3748 = vadd.xlane.f32.xlu1 %v3747_v11  ;;  %3745 = vadd.xlane.f32.xlu0 %v3744_v16 }
 0x514   : > { %3754 = vadd.xlane.f32.xlu1 %v3753_v7  ;;  %3751 = vadd.xlane.f32.xlu0 %v3750_v52 }
 0x555   : > { %v3668_v30 = vpop.xlane.xlu0 %3667 }
 0x556   : > { %v3763_v15 = vmul.f32 0.017857144, %v3668_v30 }
 0x558   : > { %v12162_v53 = vsub.f32 %v12079_v34, %v3763_v15  ;;  %v3643_v15 = vld [vmem:[%s14360_s4] sm:$0xff] }
 0x559   : > { %v3671_v29 = vpop.xlane.xlu0 %3670 }
 0x55a   : > { %v3764_v63 = vmul.f32 0.017857144, %v3671_v29  ;;  %v3827_v59 = vmul.f32 %v12162_v53, %v12162_v53  ;;  %v3644_v29 = vld [vmem:[%s14360_s4 + $0x8] sm:$0xff] }
 0x55c   : > { %v12167_v28 = vsub.f32 %v12083_v58, %v3764_v63  ;;  %v3859_v46 = vsel %vm3665_vm2, %v3827_v59, 0.0  ;;  %v8865_v59 = vpack.c.bf16 %v3644_v29, %v3643_v15 }
 0x55d   : > { %v3674_v47 = vpop.xlane.xlu1 %3673  ;;  %3860 = vadd.xlane.f32.xlu0 %v3859_v46 }
 0x55e   : > { %v3765_v24 = vmul.f32 0.017857144, %v3674_v47  ;;  %v3828_v13 = vmul.f32 %v12167_v28, %v12167_v28  ;;  %8866 = vmatprep.subr.bf16.mxu1 %v8865_v59 }
 0x55f   : > { %8868 = vmatpush3.bf16.msra.mxu1 %v8865_v59 }
 0x560   : > { %v12173_v8 = vsub.f32 %v12087_v60, %v3765_v24  ;;  %v3862_v34 = vsel %vm3665_vm2, %v3828_v13, 0.0  ;;  %v3645_v13 = vld [vmem:[%s14360_s4 + $0x10] sm:$0xff] }
 0x561   : > { %v3677_v55 = vpop.xlane.xlu1 %3676  ;;  %3863 = vadd.xlane.f32.xlu1 %v3862_v34  ;;  %3757 = vadd.xlane.f32.xlu0 %v3756_v3 }
 0x562   : > { %v3766_v58 = vmul.f32 0.017857144, %v3677_v55  ;;  %v3829_v33 = vmul.f32 %v12173_v8, %v12173_v8 }
 0x564   : > { %v12181_v26 = vsub.f32 %v12091_v20, %v3766_v58  ;;  %v3865_v60 = vsel %vm3665_vm2, %v3829_v33, 0.0 }
 0x565   : > { %v3680_v35 = vpop.xlane.xlu0 %3679  ;;  %3760 = vadd.xlane.f32.xlu1 %v3759_v9  ;;  %3866 = vadd.xlane.f32.xlu0 %v3865_v60  ;;  %v3647_v60 = vld [vmem:[%s14360_s4 + $0x20] sm:$0xff] }
 0x566   : > { %v3767_v4 = vmul.f32 0.017857144, %v3680_v35  ;;  %v3830_v62 = vmul.f32 %v12181_v26, %v12181_v26 }
 0x568   : > { %v12189_v40 = vsub.f32 %v12095_v36, %v3767_v4  ;;  %v3868_v10 = vsel %vm3665_vm2, %v3830_v62, 0.0 }
 0x569   : > { %v3683_v12 = vpop.xlane.xlu1 %3682  ;;  %3869 = vadd.xlane.f32.xlu1 %v3868_v10 }
 0x56a   : > { %v3768_v20 = vmul.f32 0.017857144, %v3683_v12  ;;  %v3831_v48 = vmul.f32 %v12189_v40, %v12189_v40 }
 0x56c   : > { %v12195_v45 = vsub.f32 %v12099_v56, %v3768_v20  ;;  %v3871_v57 = vsel %vm3665_vm2, %v3831_v48, 0.0 }
 0x56d   : > { %v3686_v1 = vpop.xlane.xlu0 %3685  ;;  %3872 = vadd.xlane.f32.xlu0 %v3871_v57 }
 0x56e   : > { %v3769_v11 = vmul.f32 0.017857144, %v3686_v1  ;;  %v3832_v36 = vmul.f32 %v12195_v45, %v12195_v45 }
 0x570   : > { %v12201_v16 = vsub.f32 %v12103_v61, %v3769_v11  ;;  %v3874_v7 = vsel %vm3665_vm2, %v3832_v36, 0.0 }
 0x571   : > { %v3689_v52 = vpop.xlane.xlu1 %3688  ;;  %3875 = vadd.xlane.f32.xlu1 %v3874_v7 }
 0x572   : > { %v3770_v30 = vmul.f32 0.017857144, %v3689_v52  ;;  %v3833_v56 = vmul.f32 %v12201_v16, %v12201_v16  ;;  %v3649_v52 = vld [vmem:[%s14360_s4 + $0x30] sm:$0xff] }
 0x574   : > { %v12213_v63 = vsub.f32 %v12107_v31, %v3770_v30  ;;  %v3877_v61 = vsel %vm3665_vm2, %v3833_v56, 0.0  ;;  %v3646_v31 = vld [vmem:[%s14360_s4 + $0x18] sm:$0xff] }
 0x575   : > { %v3692_v46 = vpop.xlane.xlu0 %3691  ;;  %3878 = vadd.xlane.f32.xlu0 %v3877_v61  ;;  %v8869_v55 = vpack.c.bf16 %v3646_v31, %v3645_v13 }
 0x576   : > { %v3771_v47 = vmul.f32 0.017857144, %v3692_v46  ;;  %v3834_v24 = vmul.f32 %v12213_v63, %v12213_v63 }
 0x577   : > { %8870 = vmatprep.subr.bf16.mxu1 %v8869_v55 }
 0x578   : > { %v12225_v34 = vsub.f32 %v12111_v54, %v3771_v47  ;;  %v3880_v3 = vsel %vm3665_vm2, %v3834_v24, 0.0  ;;  %8872 = vmatpush3.bf16.msra.mxu1 %v8869_v55  ;;  %v3648_v54 = vld [vmem:[%s14360_s4 + $0x28] sm:$0xff] }
 0x579   : > { %3881 = vadd.xlane.f32.xlu1 %v3880_v3  ;;  %v3695_v58 = vpop.xlane.xlu1 %3694  ;;  %v8873_v62 = vpack.c.bf16 %v3648_v54, %v3647_v60 }
 0x57a   : > { %v3772_v33 = vmul.f32 0.017857144, %v3695_v58  ;;  %v3835_v9 = vmul.f32 %v12225_v34, %v12225_v34 }
 0x57b   : > { %8874 = vmatprep.subr.bf16.mxu1 %v8873_v62 }
 0x57c   : > { %v12237_v35 = vsub.f32 %v12115_v22, %v3772_v33  ;;  %v3883_v4 = vsel %vm3665_vm2, %v3835_v9, 0.0  ;;  %8876 = vmatpush3.bf16.msra.mxu1 %v8873_v62 }
 0x57d   : > { %v3701_v10 = vpop.xlane.xlu1 %3700  ;;  %3884 = vadd.xlane.f32.xlu0 %v3883_v4  ;;  %v3698_v12 = vpop.xlane.xlu0 %3697  ;;  %8367 = vmatprep.subr.mxu1 %v3649_v52 }
 0x57e   : > { %v3774_v20 = vmul.f32 0.017857144, %v3701_v10  ;;  %v3773_v48 = vmul.f32 0.017857144, %v3698_v12  ;;  %v3836_v57 = vmul.f32 %v12237_v35, %v12237_v35 }
 0x580   : > { %v12243_v1 = vsub.f32 %v12037_v42, %v3774_v20  ;;  %v12246_v11 = vsub.f32 %v12119_v17, %v3773_v48  ;;  %v3886_v22 = vsel %vm3665_vm2, %v3836_v57, 0.0  ;;  %8368 = vmatpush3.msra.mxu1 %v3649_v52 }
 0x581   : > { %3887 = vadd.xlane.f32.xlu1 %v3886_v22  ;;  %v3707_v36 = vpop.xlane.xlu1 %3706  ;;  %v3704_v7 = vpop.xlane.xlu0 %3703 }
 0x582   : > { %v3776_v30 = vmul.f32 0.017857144, %v3707_v36  ;;  %v3775_v56 = vmul.f32 0.017857144, %v3704_v7  ;;  %v3838_v15 = vmul.f32 %v12243_v1, %v12243_v1  ;;  %v3837_v42 = vmul.f32 %v12246_v11, %v12246_v11 }
 0x584   : > { %v12257_v17 = vsub.f32 %v12041_v44, %v3776_v30  ;;  %v12260_v29 = vsub.f32 %v12039_v5, %v3775_v56  ;;  %v3892_v61 = vsel %vm3665_vm2, %v3838_v15, 0.0  ;;  %v3889_v59 = vsel %vm3665_vm2, %v3837_v42, 0.0 }
 0x585   : > { %3893 = vadd.xlane.f32.xlu1 %v3892_v61  ;;  %v3713_v46 = vpop.xlane.xlu1 %3712  ;;  %3890 = vadd.xlane.f32.xlu0 %v3889_v59  ;;  %v3710_v47 = vpop.xlane.xlu0 %3709 }
 0x586   : > { %v3778_v24 = vmul.f32 0.017857144, %v3713_v46  ;;  %v3777_v13 = vmul.f32 0.017857144, %v3710_v47  ;;  %v3840_v31 = vmul.f32 %v12257_v17, %v12257_v17  ;;  %v3839_v44 = vmul.f32 %v12260_v29, %v12260_v29 }
 0x588   : > { %v12269_v3 = vsub.f32 %v12045_v19, %v3778_v24  ;;  %v12272_v5 = vsub.f32 %v12043_v21, %v3777_v13  ;;  %v3898_v55 = vsel %vm3665_vm2, %v3840_v31, 0.0  ;;  %v3895_v58 = vsel %vm3665_vm2, %v3839_v44, 0.0 }
 0x589   : > { %3899 = vadd.xlane.f32.xlu1 %v3898_v55  ;;  %v3719_v33 = vpop.xlane.xlu1 %3718  ;;  %3896 = vadd.xlane.f32.xlu0 %v3895_v58  ;;  %v3716_v9 = vpop.xlane.xlu0 %3715 }
 0x58a   : > { %v3780_v60 = vmul.f32 0.017857144, %v3719_v33  ;;  %v3779_v54 = vmul.f32 0.017857144, %v3716_v9  ;;  %v3842_v4 = vmul.f32 %v12269_v3, %v12269_v3  ;;  %v3841_v19 = vmul.f32 %v12272_v5, %v12272_v5 }
 0x58c   : > { %v12281_v62 = vsub.f32 %v12049_v37, %v3780_v60  ;;  %v12284_v21 = vsub.f32 %v12047_v23, %v3779_v54  ;;  %v3904_v10 = vsel %vm3665_vm2, %v3842_v4, 0.0  ;;  %v3901_v12 = vsel %vm3665_vm2, %v3841_v19, 0.0 }
 0x58d   : > { %3905 = vadd.xlane.f32.xlu1 %v3904_v10  ;;  %v3725_v20 = vpop.xlane.xlu1 %3724  ;;  %3902 = vadd.xlane.f32.xlu0 %v3901_v12  ;;  %v3722_v48 = vpop.xlane.xlu0 %3721 }
 0x58e   : > { %v3782_v57 = vmul.f32 0.017857144, %v3725_v20  ;;  %v3781_v22 = vmul.f32 0.017857144, %v3722_v48  ;;  %v3844_v36 = vmul.f32 %v12281_v62, %v12281_v62  ;;  %v3843_v37 = vmul.f32 %v12284_v21, %v12284_v21 }
 0x590   : > { %v12293_v7 = vsub.f32 %v12053_v6, %v3782_v57  ;;  %v12296_v23 = vsub.f32 %v12051_v49, %v3781_v22  ;;  %v3910_v52 = vsel %vm3665_vm2, %v3844_v36, 0.0  ;;  %v3907_v30 = vsel %vm3665_vm2, %v3843_v37, 0.0 }
 0x591   : > { %3911 = vadd.xlane.f32.xlu1 %v3910_v52  ;;  %v3731_v56 = vpop.xlane.xlu1 %3730  ;;  %3908 = vadd.xlane.f32.xlu0 %v3907_v30  ;;  %v3728_v15 = vpop.xlane.xlu0 %3727 }
 0x592   : > { %v3784_v42 = vmul.f32 0.017857144, %v3731_v56  ;;  %v3783_v61 = vmul.f32 0.017857144, %v3728_v15  ;;  %v3846_v59 = vmul.f32 %v12293_v7, %v12293_v7  ;;  %v3845_v6 = vmul.f32 %v12296_v23, %v12296_v23 }
 0x594   : > { %v12305_v46 = vsub.f32 %v12057_v14, %v3784_v42  ;;  %v12308_v49 = vsub.f32 %v12055_v25, %v3783_v61  ;;  %v3916_v47 = vsel %vm3665_vm2, %v3846_v59, 0.0  ;;  %v3913_v24 = vsel %vm3665_vm2, %v3845_v6, 0.0 }
 0x595   : > { %3917 = vadd.xlane.f32.xlu1 %v3916_v47  ;;  %v3737_v13 = vpop.xlane.xlu1 %3736  ;;  %3914 = vadd.xlane.f32.xlu0 %v3913_v24  ;;  %v3734_v31 = vpop.xlane.xlu0 %3733 }
 0x596   : > { %v3786_v44 = vmul.f32 0.017857144, %v3737_v13  ;;  %v3785_v55 = vmul.f32 0.017857144, %v3734_v31  ;;  %v3848_v58 = vmul.f32 %v12305_v46, %v12305_v46  ;;  %v3847_v14 = vmul.f32 %v12308_v49, %v12308_v49 }
 0x598   : > { %v12317_v33 = vsub.f32 %v12061_v2, %v3786_v44  ;;  %v12320_v25 = vsub.f32 %v12059_v0, %v3785_v55  ;;  %v3922_v9 = vsel %vm3665_vm2, %v3848_v58, 0.0  ;;  %v3919_v60 = vsel %vm3665_vm2, %v3847_v14, 0.0 }
 0x599   : > { %3923 = vadd.xlane.f32.xlu1 %v3922_v9  ;;  %v3743_v54 = vpop.xlane.xlu1 %3742  ;;  %3920 = vadd.xlane.f32.xlu0 %v3919_v60  ;;  %v3740_v4 = vpop.xlane.xlu0 %3739  ;;  %v4083_v60 = vlaneseq }
 0x59a   : > { %v3788_v19 = vmul.f32 0.017857144, %v3743_v54  ;;  %v3787_v10 = vmul.f32 0.017857144, %v3740_v4  ;;  %v3850_v12 = vmul.f32 %v12317_v33, %v12317_v33  ;;  %v3849_v2 = vmul.f32 %v12320_v25, %v12320_v25 }
 0x59c   : > { %v12329_v20 = vsub.f32 %v12065_v18, %v3788_v19  ;;  %v12332_v0 = vsub.f32 %v12063_v51, %v3787_v10  ;;  %v3928_v48 = vsel %vm3665_vm2, %v3850_v12, 0.0  ;;  %v3925_v57 = vsel %vm3665_vm2, %v3849_v2, 0.0 }
 0x59d   : > { %3929 = vadd.xlane.f32.xlu1 %v3928_v48  ;;  %v3749_v22 = vpop.xlane.xlu1 %3748  ;;  %3926 = vadd.xlane.f32.xlu0 %v3925_v57  ;;  %v3746_v36 = vpop.xlane.xlu0 %3745  ;;  %v12366_v2 = vshrl.u32 %v4083_v60, 7 }
 0x59e   : > { %v3790_v37 = vmul.f32 0.017857144, %v3749_v22  ;;  %v3789_v52 = vmul.f32 0.017857144, %v3746_v36  ;;  %v3852_v30 = vmul.f32 %v12329_v20, %v12329_v20  ;;  %v3851_v18 = vmul.f32 %v12332_v0, %v12332_v0 }
 0x5a0   : > { %v12341_v56 = vsub.f32 %v12069_v43, %v3790_v37  ;;  %v12344_v51 = vsub.f32 %v12067_v38, %v3789_v52  ;;  %v3934_v15 = vsel %vm3665_vm2, %v3852_v30, 0.0  ;;  %v3931_v42 = vsel %vm3665_vm2, %v3851_v18, 0.0 }
 0x5a1   : > { %3935 = vadd.xlane.f32.xlu1 %v3934_v15  ;;  %v3755_v61 = vpop.xlane.xlu1 %3754  ;;  %3932 = vadd.xlane.f32.xlu0 %v3931_v42  ;;  %v3752_v59 = vpop.xlane.xlu0 %3751  ;;  %v12374_v18 = vsub.s32 0, %v12366_v2  ;;  %v12379_v15 = vld [vmem:[%s14363_s7] sm:$0xff] }
 0x5a2   : > { %v3792_v6 = vmul.f32 0.017857144, %v3755_v61  ;;  %v3791_v47 = vmul.f32 0.017857144, %v3752_v59  ;;  %v3854_v24 = vmul.f32 %v12341_v56, %v12341_v56  ;;  %v3853_v43 = vmul.f32 %v12344_v51, %v12344_v51 }
 0x5a3   : > { %14724 = vst [vmem:[#allocation35_spill] sm:$0xff] %v12374_v18  ;;  %v12386_v59 = vsub.s32 1, %v12366_v2 }
 0x5a4   : > { %v12353_v13 = vsub.f32 %v12073_v27, %v3792_v6  ;;  %v12356_v38 = vsub.f32 %v12071_v50, %v3791_v47  ;;  %v3940_v31 = vsel %vm3665_vm2, %v3854_v24, 0.0  ;;  %v3937_v44 = vsel %vm3665_vm2, %v3853_v43, 0.0 }
 0x5a5   : > { %3941 = vadd.xlane.f32.xlu1 %v3940_v31  ;;  %3938 = vadd.xlane.f32.xlu0 %v3937_v44  ;;  %14725 = vst [vmem:[#allocation74_spill] sm:$0xff] %v12386_v59  ;;  %v12392_v43 = vrot.slane %v12379_v15, %v12374_v18  ;;  %v9604_v18 = vld [vmem:[%s9709_s23 + $0x198] sm:$0xff] }
 0x5a6   : > { %v3856_v55 = vmul.f32 %v12353_v13, %v12353_v13  ;;  %v3855_v58 = vmul.f32 %v12356_v38, %v12356_v38 }
 0x5a8   : > { %v3946_v14 = vsel %vm3665_vm2, %v3856_v55, 0.0  ;;  %v3943_v27 = vsel %vm3665_vm2, %v3855_v58, 0.0  ;;  %v12397_v55 = vrot.slane %v12379_v15, %v12386_v59  ;;  %v9603_v59 = vld [vmem:[%s9709_s23 + $0x180] sm:$0xff] }
 0x5a9   : > { %3947 = vadd.xlane.f32.xlu1 %v3946_v14  ;;  %3944 = vadd.xlane.f32.xlu0 %v3943_v27 }
 0x5ea   : > { %v3861_v50 = vpop.xlane.xlu0 %3860 }
 0x5eb   : > { %v3955_v9 = vmul.f32 0.017857144, %v3861_v50 }
 0x5ed   : > { %v3987_v54 = vadd.f32 1e-05, %v3955_v9 }
 0x5ee   : > { %v3864_v4 = vpop.xlane.xlu1 %3863  ;;  %v3758_v19 = vpop.xlane.xlu0 %3757 }
 0x5ef   : > { %9232 = vrsqrt.f32 %v3987_v54  ;;  %v3956_v10 = vmul.f32 0.017857144, %v3864_v4  ;;  %v3793_v12 = vmul.f32 0.017857144, %v3758_v19 }
 0x5f1   : > { %v3988_v48 = vadd.f32 1e-05, %v3956_v10  ;;  %v12369_v57 = vsub.f32 %v12075_v41, %v3793_v12 }
 0x5f2   : > { %v3761_v22 = vpop.xlane.xlu1 %3760  ;;  %v3867_v36 = vpop.xlane.xlu0 %3866 }
 0x5f3   : > { %9234 = vrsqrt.f32 %v3988_v48  ;;  %v3794_v37 = vmul.f32 0.017857144, %v3761_v22  ;;  %v3957_v52 = vmul.f32 0.017857144, %v3867_v36  ;;  %v3857_v30 = vmul.f32 %v12369_v57, %v12369_v57 }
 0x5f5   : > { %v12382_v42 = vsub.f32 %v12077_v39, %v3794_v37  ;;  %v3989_v41 = vadd.f32 1e-05, %v3957_v52  ;;  %v3949_v61 = vsel %vm3665_vm2, %v3857_v30, 0.0 }
 0x5f6   : > { %v3870_v6 = vpop.xlane.xlu1 %3869  ;;  %3950 = vadd.xlane.f32.xlu0 %v3949_v61 }
 0x5f7   : > { %9236 = vrsqrt.f32 %v3989_v41  ;;  %v3958_v47 = vmul.f32 0.017857144, %v3870_v6  ;;  %v3858_v24 = vmul.f32 %v12382_v42, %v12382_v42 }
 0x5f9   : > { %v9233_v31 = vpop.eup %9232  ;;  %v3990_v39 = vadd.f32 1e-05, %v3958_v47  ;;  %v3952_v44 = vsel %vm3665_vm2, %v3858_v24, 0.0 }
 0x5fa   : > { %3953 = vadd.xlane.f32.xlu1 %v3952_v44  ;;  %v3873_v58 = vpop.xlane.xlu0 %3872  ;;  %v4051_v14 = vmul.f32 %v9233_v31, %v12162_v53 }
 0x5fb   : > { %9238 = vrsqrt.f32 %v3990_v39  ;;  %v3959_v27 = vmul.f32 0.017857144, %v3873_v58 }
 0x5fc   : > { %v4087_v50 = vmul.f32 %v12392_v43, %v4051_v14 }
 0x5fd   : > { %v9235_v9 = vpop.eup %9234  ;;  %v3991_v60 = vadd.f32 1e-05, %v3959_v27 }
 0x5fe   : > { %v4052_v54 = vmul.f32 %v9235_v9, %v12167_v28  ;;  %v3876_v4 = vpop.xlane.xlu1 %3875  ;;  %v4123_v19 = vadd.f32 %v12397_v55, %v4087_v50 }
 0x5ff   : > { %9240 = vrsqrt.f32 %v3991_v60  ;;  %v3960_v10 = vmul.f32 0.017857144, %v3876_v4 }
 0x600   : > { %v4088_v12 = vmul.f32 %v12392_v43, %v4052_v54  ;;  %8369 = vmatprep.mubr.msk.f32.mxu1 %vm3665_vm2, %v4123_v19 }
 0x601   : > { %v9237_v48 = vpop.eup %9236  ;;  %v3992_v22 = vadd.f32 1e-05, %v3960_v10 }
 0x602   : > { %v4124_v53 = vadd.f32 %v12397_v55, %v4088_v12  ;;  %v3879_v36 = vpop.xlane.xlu0 %3878  ;;  %v4053_v37 = vmul.f32 %v9237_v48, %v12173_v8 }
 0x603   : > { %9242 = vrsqrt.f32 %v3992_v22  ;;  %v3961_v52 = vmul.f32 0.017857144, %v3879_v36 }
 0x604   : > { %8370 = vmatmul.mubr.msk.f32.vlgmr.msra.gmra.mrb[42].mxu1 %vm3665_vm2, %v4124_v53  ;;  %v4089_v28 = vmul.f32 %v12392_v43, %v4053_v37 }
 0x605   : > { %v9239_v30 = vpop.eup %9238  ;;  %v3993_v41 = vadd.f32 1e-05, %v3961_v52 }
 0x606   : > { %v4054_v61 = vmul.f32 %v9239_v30, %v12181_v26  ;;  %v3882_v6 = vpop.xlane.xlu1 %3881  ;;  %v4125_v47 = vadd.f32 %v12397_v55, %v4089_v28 }
 0x607   : > { %9244 = vrsqrt.f32 %v3993_v41  ;;  %v3962_v24 = vmul.f32 0.017857144, %v3882_v6 }
 0x608   : > { %v4090_v31 = vmul.f32 %v12392_v43, %v4054_v61  ;;  %8372 = vmatprep.mubr.msk.f32.mxu1 %vm3665_vm2, %v4125_v47 }
 0x609   : > { %v9241_v8 = vpop.eup %9240  ;;  %v3994_v39 = vadd.f32 1e-05, %v3962_v24 }
 0x60a   : > { %v4126_v44 = vadd.f32 %v12397_v55, %v4090_v31  ;;  %v3885_v58 = vpop.xlane.xlu0 %3884  ;;  %v4055_v14 = vmul.f32 %v9241_v8, %v12189_v40 }
 0x60b   : > { %9246 = vrsqrt.f32 %v3994_v39  ;;  %v3963_v27 = vmul.f32 0.017857144, %v3885_v58 }
 0x60c   : > { %8373 = vmatmul.mubr.msk.f32.gmra.mrb[44].mxu1 %vm3665_vm2, %v4126_v44  ;;  %v4091_v26 = vmul.f32 %v12392_v43, %v4055_v14 }
 0x60d   : > { %v9243_v50 = vpop.eup %9242  ;;  %v3995_v9 = vadd.f32 1e-05, %v3963_v27 }
 0x60e   : > { %v4056_v60 = vmul.f32 %v9243_v50, %v12195_v45  ;;  %v3888_v54 = vpop.xlane.xlu1 %3887  ;;  %v4127_v4 = vadd.f32 %v12397_v55, %v4091_v26 }
 0x60f   : > { %9248 = vrsqrt.f32 %v3995_v9  ;;  %v3964_v19 = vmul.f32 0.017857144, %v3888_v54 }
 0x610   : > { %v4092_v10 = vmul.f32 %v12392_v43, %v4056_v60  ;;  %8375 = vmatprep.mubr.msk.f32.mxu1 %vm3665_vm2, %v4127_v4 }
 0x611   : > { %v9245_v40 = vpop.eup %9244  ;;  %v3996_v12 = vadd.f32 1e-05, %v3964_v19 }
 0x612   : > { %v4128_v48 = vadd.f32 %v12397_v55, %v4092_v10  ;;  %v3894_v22 = vpop.xlane.xlu1 %3893  ;;  %v3891_v53 = vpop.xlane.xlu0 %3890  ;;  %v4057_v36 = vmul.f32 %v9245_v40, %v12201_v16  ;;  %v3650_v10 = vld [vmem:[%s14360_s4 + $0x38] sm:$0xff]  ;;  %v3651_v40 = vld [vmem:[%s14360_s4 + $0x40] sm:$0xff] }
 0x613   : > { %9250 = vrsqrt.f32 %v3996_v12  ;;  %v3966_v37 = vmul.f32 0.017857144, %v3894_v22  ;;  %v3965_v45 = vmul.f32 0.017857144, %v3891_v53  ;;  %v8877_v53 = vpack.c.bf16 %v3651_v40, %v3650_v10 }
 0x614   : > { %8376 = vmatmul.mubr.msk.f32.gmra.mrb[46].mxu1 %vm3665_vm2, %v4128_v48  ;;  %v4093_v52 = vmul.f32 %v12392_v43, %v4057_v36 }
 0x615   : > { %v9247_v28 = vpop.eup %9246  ;;  %v3998_v30 = vadd.f32 1e-05, %v3966_v37  ;;  %v3997_v41 = vadd.f32 1e-05, %v3965_v45  ;;  %8878 = vmatprep.subr.bf16.mxu1 %v8877_v53 }
 0x616   : > { %v4058_v61 = vmul.f32 %v9247_v28, %v12213_v63  ;;  %v3900_v6 = vpop.xlane.xlu1 %3899  ;;  %v3897_v47 = vpop.xlane.xlu0 %3896  ;;  %v4129_v24 = vadd.f32 %v12397_v55, %v4093_v52  ;;  %8880 = vmatpush3.bf16.msra.mxu1 %v8877_v53 }
 0x617   : > { %9252 = vrsqrt.f32 %v3998_v30  ;;  %v3968_v31 = vmul.f32 0.017857144, %v3900_v6  ;;  %v3967_v8 = vmul.f32 0.017857144, %v3897_v47 }
 0x618   : > { %v4094_v16 = vmul.f32 %v12392_v43, %v4058_v61  ;;  %9254 = vrsqrt.f32 %v3997_v41  ;;  %8378 = vmatprep.mubr.msk.f32.mxu1 %vm3665_vm2, %v4129_v24 }
 0x619   : > { %v9249_v39 = vpop.eup %9248  ;;  %v4000_v44 = vadd.f32 1e-05, %v3968_v31  ;;  %v3999_v58 = vadd.f32 1e-05, %v3967_v8 }
 0x61a   : > { %v4130_v14 = vadd.f32 %v12397_v55, %v4094_v16  ;;  %v3906_v27 = vpop.xlane.xlu1 %3905  ;;  %v3903_v26 = vpop.xlane.xlu0 %3902  ;;  %v4059_v63 = vmul.f32 %v9249_v39, %v12225_v34 }
 0x61b   : > { %9256 = vrsqrt.f32 %v4000_v44  ;;  %v3970_v50 = vmul.f32 0.017857144, %v3906_v27  ;;  %v3969_v9 = vmul.f32 0.017857144, %v3903_v26 }
 0x61c   : > { %9258 = vrsqrt.f32 %v3999_v58  ;;  %8379 = vmatmul.mubr.msk.f32.gmra.mrb[48].mxu1 %vm3665_vm2, %v4130_v14  ;;  %v4095_v60 = vmul.f32 %v12392_v43, %v4059_v63 }
 0x61d   : > { %v9251_v54 = vpop.eup %9250  ;;  %v4002_v4 = vadd.f32 1e-05, %v3970_v50  ;;  %v4001_v19 = vadd.f32 1e-05, %v3969_v9 }
 0x61e   : > { %v4060_v34 = vmul.f32 %v9251_v54, %v12237_v35  ;;  %v3912_v12 = vpop.xlane.xlu1 %3911  ;;  %v3909_v48 = vpop.xlane.xlu0 %3908  ;;  %v4131_v22 = vadd.f32 %v12397_v55, %v4095_v60 }
 0x61f   : > { %9260 = vrsqrt.f32 %v4002_v4  ;;  %v3972_v36 = vmul.f32 0.017857144, %v3912_v12  ;;  %v3971_v37 = vmul.f32 0.017857144, %v3909_v48 }
 0x620   : > { %v4096_v45 = vmul.f32 %v12392_v43, %v4060_v34  ;;  %9262 = vrsqrt.f32 %v4001_v19  ;;  %8381 = vmatprep.mubr.msk.f32.mxu1 %vm3665_vm2, %v4131_v22 }
 0x621   : > { %v9253_v52 = vpop.eup %9252  ;;  %v4004_v28 = vadd.f32 1e-05, %v3972_v36  ;;  %v4003_v30 = vadd.f32 1e-05, %v3971_v37 }
 0x622   : > { %v9255_v41 = vpop.eup %9254  ;;  %v4132_v35 = vadd.f32 %v12397_v55, %v4096_v45  ;;  %v4062_v61 = vmul.f32 %v9253_v52, %v12243_v1  ;;  %v3918_v6 = vpop.xlane.xlu1 %3917 }
 0x623   : > { %v3915_v47 = vpop.xlane.xlu0 %3914  ;;  %9264 = vrsqrt.f32 %v4004_v28  ;;  %v3974_v24 = vmul.f32 0.017857144, %v3918_v6  ;;  %v4061_v8 = vmul.f32 %v9255_v41, %v12246_v11 }
 0x624   : > { %v3973_v31 = vmul.f32 0.017857144, %v3915_v47  ;;  %v4098_v16 = vmul.f32 %v12392_v43, %v4062_v61  ;;  %9266 = vrsqrt.f32 %v4003_v30  ;;  %8382 = vmatmul.mubr.msk.f32.gmra.mrb[50].mxu1 %vm3665_vm2, %v4132_v35 }
 0x625   : > { %v9257_v39 = vpop.eup %9256  ;;  %v4006_v44 = vadd.f32 1e-05, %v3974_v24  ;;  %v4097_v14 = vmul.f32 %v12392_v43, %v4061_v8 }
 0x626   : > { %v4005_v58 = vadd.f32 1e-05, %v3973_v31  ;;  %v9259_v27 = vpop.eup %9258  ;;  %v4134_v1 = vadd.f32 %v12397_v55, %v4098_v16  ;;  %v4064_v26 = vmul.f32 %v9257_v39, %v12257_v17  ;;  %v3924_v63 = vpop.xlane.xlu1 %3923 }
 0x627   : > { %v3921_v50 = vpop.xlane.xlu0 %3920  ;;  %9268 = vrsqrt.f32 %v4006_v44  ;;  %v3976_v9 = vmul.f32 0.017857144, %v3924_v63  ;;  %v4133_v60 = vadd.f32 %v12397_v55, %v4097_v14  ;;  %v4063_v4 = vmul.f32 %v9259_v27, %v12260_v29 }
 0x628   : > { %v3975_v11 = vmul.f32 0.017857144, %v3921_v50  ;;  %v4100_v54 = vmul.f32 %v12392_v43, %v4064_v26  ;;  %9270 = vrsqrt.f32 %v4005_v58 }
 0x629   : > { %v9261_v19 = vpop.eup %9260  ;;  %v4008_v10 = vadd.f32 1e-05, %v3976_v9  ;;  %8384 = vmatprep.mubr.msk.f32.mxu1 %vm3665_vm2, %v4133_v60  ;;  %v4099_v53 = vmul.f32 %v12392_v43, %v4063_v4 }
 0x62a   : > { %v4007_v40 = vadd.f32 1e-05, %v3975_v11  ;;  %v9263_v34 = vpop.eup %9262  ;;  %v4136_v17 = vadd.f32 %v12397_v55, %v4100_v54  ;;  %v4066_v12 = vmul.f32 %v9261_v19, %v12269_v3  ;;  %8385 = vmatmul.mubr.msk.f32.gmra.mrb[52].mxu1 %vm3665_vm2, %v4134_v1  ;;  %v3930_v48 = vpop.xlane.xlu1 %3929 }
 0x62b   : > { %v3927_v22 = vpop.xlane.xlu0 %3926  ;;  %9272 = vrsqrt.f32 %v4008_v10  ;;  %v3978_v36 = vmul.f32 0.017857144, %v3930_v48  ;;  %v4065_v29 = vmul.f32 %v9263_v34, %v12272_v5  ;;  %v4135_v52 = vadd.f32 %v12397_v55, %v4099_v53 }
 0x62c   : > { %v3977_v37 = vmul.f32 0.017857144, %v3927_v22  ;;  %v4102_v45 = vmul.f32 %v12392_v43, %v4066_v12  ;;  %9274 = vrsqrt.f32 %v4007_v40 }
 0x62d   : > { %v9265_v28 = vpop.eup %9264  ;;  %v4010_v30 = vadd.f32 1e-05, %v3978_v36  ;;  %v4101_v3 = vmul.f32 %v12392_v43, %v4065_v29  ;;  %8387 = vmatprep.mubr.msk.f32.mxu1 %vm3665_vm2, %v4135_v52 }
 0x62e   : > { %v4009_v41 = vadd.f32 1e-05, %v3977_v37  ;;  %v9267_v35 = vpop.eup %9266  ;;  %v4138_v61 = vadd.f32 %v12397_v55, %v4102_v45  ;;  %v4068_v6 = vmul.f32 %v9265_v28, %v12281_v62  ;;  %v3936_v47 = vpop.xlane.xlu1 %3935  ;;  %8388 = vmatmul.mubr.msk.f32.gmra.mrb[54].mxu1 %vm3665_vm2, %v4136_v17 }
 0x62f   : > { %v3933_v24 = vpop.xlane.xlu0 %3932  ;;  %9276 = vrsqrt.f32 %v4010_v30  ;;  %v3980_v5 = vmul.f32 0.017857144, %v3936_v47  ;;  %v4137_v8 = vadd.f32 %v12397_v55, %v4101_v3  ;;  %v4067_v39 = vmul.f32 %v9267_v35, %v12284_v21 }
 0x630   : > { %v3979_v31 = vmul.f32 0.017857144, %v3933_v24  ;;  %v4104_v16 = vmul.f32 %v12392_v43, %v4068_v6  ;;  %9278 = vrsqrt.f32 %v4009_v41 }
 0x631   : > { %v9269_v44 = vpop.eup %9268  ;;  %v4012_v58 = vadd.f32 1e-05, %v3980_v5  ;;  %8390 = vmatprep.mubr.msk.f32.mxu1 %vm3665_vm2, %v4137_v8  ;;  %v4103_v50 = vmul.f32 %v12392_v43, %v4067_v39 }
 0x632   : > { %v4011_v14 = vadd.f32 1e-05, %v3979_v31  ;;  %v9271_v62 = vpop.eup %9270  ;;  %v4140_v27 = vadd.f32 %v12397_v55, %v4104_v16  ;;  %v4070_v1 = vmul.f32 %v9269_v44, %v12293_v7  ;;  %v3942_v26 = vpop.xlane.xlu1 %3941  ;;  %8391 = vmatmul.mubr.msk.f32.gmra.mrb[56].mxu1 %vm3665_vm2, %v4138_v61 }
 0x633   : > { %v3939_v63 = vpop.xlane.xlu0 %3938  ;;  %9280 = vrsqrt.f32 %v4012_v58  ;;  %v3982_v9 = vmul.f32 0.017857144, %v3942_v26  ;;  %v4069_v21 = vmul.f32 %v9271_v62, %v12296_v23  ;;  %v4139_v54 = vadd.f32 %v12397_v55, %v4103_v50 }
 0x634   : > { %v3981_v11 = vmul.f32 0.017857144, %v3939_v63  ;;  %v4106_v60 = vmul.f32 %v12392_v43, %v4070_v1  ;;  %9282 = vrsqrt.f32 %v4011_v14 }
 0x635   : > { %v9273_v4 = vpop.eup %9272  ;;  %v4014_v19 = vadd.f32 1e-05, %v3982_v9  ;;  %v4105_v7 = vmul.f32 %v12392_v43, %v4069_v21  ;;  %8393 = vmatprep.mubr.msk.f32.mxu1 %vm3665_vm2, %v4139_v54  ;;  %v3653_v21 = vld [vmem:[%s14360_s4 + $0x50] sm:$0xff]  ;;  %v3654_v54 = vld [vmem:[%s14360_s4 + $0x58] sm:$0xff] }
 0x636   : > { %v4013_v10 = vadd.f32 1e-05, %v3981_v11  ;;  %v9275_v40 = vpop.eup %9274  ;;  %v4142_v34 = vadd.f32 %v12397_v55, %v4106_v60  ;;  %v4072_v17 = vmul.f32 %v9273_v4, %v12305_v46  ;;  %v3948_v12 = vpop.xlane.xlu1 %3947  ;;  %8394 = vmatmul.mubr.msk.f32.gmra.mrb[58].mxu1 %vm3665_vm2, %v4140_v27 }
 0x637   : > { %v3945_v48 = vpop.xlane.xlu0 %3944  ;;  %9284 = vrsqrt.f32 %v4014_v19  ;;  %v3984_v23 = vmul.f32 0.017857144, %v3948_v12  ;;  %v4141_v53 = vadd.f32 %v12397_v55, %v4105_v7  ;;  %v4071_v37 = vmul.f32 %v9275_v40, %v12308_v49 }
 0x638   : > { %v3983_v22 = vmul.f32 0.017857144, %v3945_v48  ;;  %v4108_v36 = vmul.f32 %v12392_v43, %v4072_v17  ;;  %9286 = vrsqrt.f32 %v4013_v10 }
 0x639   : > { %v9277_v29 = vpop.eup %9276  ;;  %v4016_v45 = vadd.f32 1e-05, %v3984_v23  ;;  %8396 = vmatprep.mubr.msk.f32.mxu1 %vm3665_vm2, %v4141_v53  ;;  %v4107_v30 = vmul.f32 %v12392_v43, %v4071_v37 }
 0x63a   : > { %v4015_v52 = vadd.f32 1e-05, %v3983_v22  ;;  %v9279_v46 = vpop.eup %9278  ;;  %v4074_v28 = vmul.f32 %v9277_v29, %v12317_v33  ;;  %v4144_v41 = vadd.f32 %v12397_v55, %v4108_v36  ;;  %8397 = vmatmul.mubr.msk.f32.gmra.mrb[60].mxu1 %vm3665_vm2, %v4142_v34  ;;  %v4157_v29 = vsub.s32 2, %v12366_v2 }
 0x63b   : > { %9288 = vrsqrt.f32 %v4016_v45  ;;  %v4073_v3 = vmul.f32 %v9279_v46, %v12320_v25  ;;  %v4143_v49 = vadd.f32 %v12397_v55, %v4107_v30 }
 0x63c   : > { %v4110_v35 = vmul.f32 %v12392_v43, %v4074_v28  ;;  %9290 = vrsqrt.f32 %v4015_v52  ;;  %v12544_v45 = vrot.slane %v12379_v15, %v4157_v29 }
 0x63d   : > { %v9281_v61 = vpop.eup %9280  ;;  %v4109_v6 = vmul.f32 %v12392_v43, %v4073_v3  ;;  %8399 = vmatprep.mubr.msk.f32.mxu1 %vm3665_vm2, %v4143_v49 }
 0x63e   : > { %v9283_v47 = vpop.eup %9282  ;;  %v4076_v33 = vmul.f32 %v9281_v61, %v12329_v20  ;;  %v4146_v24 = vadd.f32 %v12397_v55, %v4110_v35  ;;  %8400 = vmatmul.mubr.msk.f32.gmra.mrb[62].mxu1 %vm3665_vm2, %v4144_v41 }
 0x63f   : > { %v4145_v5 = vadd.f32 %v12397_v55, %v4109_v6  ;;  %v4075_v25 = vmul.f32 %v9283_v47, %v12332_v0 }
 0x640   : > { %v4112_v31 = vmul.f32 %v12392_v43, %v4076_v33 }
 0x641   : > { %v9285_v8 = vpop.eup %9284  ;;  %8402 = vmatprep.mubr.msk.f32.mxu1 %vm3665_vm2, %v4145_v5  ;;  %v4111_v16 = vmul.f32 %v12392_v43, %v4075_v25 }
 0x642   : > { %v9287_v39 = vpop.eup %9286  ;;  %v4078_v20 = vmul.f32 %v9285_v8, %v12341_v56  ;;  %v4148_v44 = vadd.f32 %v12397_v55, %v4112_v31  ;;  %8403 = vmatmul.mubr.msk.f32.gmra.mrb[64].mxu1 %vm3665_vm2, %v4146_v24 }
 0x643   : > { %v4147_v58 = vadd.f32 %v12397_v55, %v4111_v16  ;;  %v4077_v14 = vmul.f32 %v9287_v39, %v12344_v51 }
 0x644   : > { %v4114_v0 = vmul.f32 %v12392_v43, %v4078_v20 }
 0x645   : > { %v9289_v62 = vpop.eup %9288  ;;  %8405 = vmatprep.mubr.msk.f32.mxu1 %vm3665_vm2, %v4147_v58  ;;  %v4113_v27 = vmul.f32 %v12392_v43, %v4077_v14  ;;  %v3655_v58 = vld [vmem:[%s14360_s4 + $0x70] sm:$0xff]  ;;  %v3656_v14 = vld [vmem:[%s14360_s4 + $0x78] sm:$0xff] }
 0x646   : > { %v9291_v1 = vpop.eup %9290  ;;  %v4080_v26 = vmul.f32 %v9289_v62, %v12353_v13  ;;  %v4150_v56 = vadd.f32 %v12397_v55, %v4114_v0  ;;  %8406 = vmatmul.mubr.msk.f32.gmra.mrb[66].mxu1 %vm3665_vm2, %v4148_v44 }
 0x647   : > { %v4149_v63 = vadd.f32 %v12397_v55, %v4113_v27  ;;  %v4079_v50 = vmul.f32 %v9291_v1, %v12356_v38  ;;  %v3652_v38 = vld [vmem:[%s14360_s4 + $0x48] sm:$0xff]  ;;  %v8885_v27 = vpack.c.bf16 %v3656_v14, %v3655_v58 }
 0x648   : > { %v4116_v51 = vmul.f32 %v12392_v43, %v4080_v26  ;;  %v8881_v60 = vpack.c.bf16 %v3653_v21, %v3652_v38 }
 0x649   : > { %8408 = vmatprep.mubr.msk.f32.mxu1 %vm3665_vm2, %v4149_v63  ;;  %v4115_v9 = vmul.f32 %v12392_v43, %v4079_v50 }
 0x64a   : > { %v4152_v11 = vadd.f32 %v12397_v55, %v4116_v51  ;;  %8409 = vmatmul.mubr.msk.f32.gmra.mrb[68].mxu1 %vm3665_vm2, %v4150_v56  ;;  %8882 = vmatprep.subr.bf16.mxu1 %v8881_v60 }
 0x64b   : > { %v4151_v13 = vadd.f32 %v12397_v55, %v4115_v9  ;;  %8884 = vmatpush3.bf16.msra.mxu1 %v8881_v60 }
 0x64c   : > { %8425 = vmatprep.subr.mxu1 %v3654_v54 }
 0x64d   : > { %8411 = vmatprep.mubr.msk.f32.mxu1 %vm3665_vm2, %v4151_v13 }
 0x64e   : > { %8412 = vmatmul.mubr.msk.f32.gmra.mrb[70].mxu1 %vm3665_vm2, %v4152_v11 }
 0x64f   : > { %8426 = vmatpush3.msra.mxu1 %v3654_v54 }
 0x650   : > { %8886 = vmatprep.subr.bf16.mxu1 %v8885_v27 }
 0x683   : > { %v3951_v4 = vpop.xlane.xlu0 %3950 }
 0x684   : > { %v3985_v19 = vmul.f32 0.017857144, %v3951_v4 }
 0x686   : > { %v4017_v10 = vadd.f32 1e-05, %v3985_v19 }
 0x687   : > { %v3954_v7 = vpop.xlane.xlu1 %3953 }
 0x688   : > { %9292 = vrsqrt.f32 %v4017_v10  ;;  %v3986_v40 = vmul.f32 0.017857144, %v3954_v7 }
 0x68a   : > { %v4018_v34 = vadd.f32 1e-05, %v3986_v40 }
 0x68c   : > { %9294 = vrsqrt.f32 %v4018_v34 }
 0x692   : > { %v9293_v17 = vpop.eup %9292 }
 0x693   : > { %v4081_v12 = vmul.f32 %v9293_v17, %v12369_v57 }
 0x695   : > { %v4117_v48 = vmul.f32 %v12392_v43, %v4081_v12 }
 0x696   : > { %v9295_v23 = vpop.eup %9294 }
 0x697   : > { %v4082_v22 = vmul.f32 %v9295_v23, %v12382_v42  ;;  %v4153_v53 = vadd.f32 %v12397_v55, %v4117_v48 }
 0x699   : > { %v4118_v36 = vmul.f32 %v12392_v43, %v4082_v22  ;;  %8414 = vmatprep.mubr.msk.f32.mxu1 %vm3665_vm2, %v4153_v53 }
 0x69b   : > { %v4154_v37 = vadd.f32 %v12397_v55, %v4118_v36 }
 0x69d   : > { %8415 = vmatmul.mubr.msk.f32.gmra.mrb[72].mxu1 %vm3665_vm2, %v4154_v37 }
 0x6d7   : > { %v8371_v57 = vpop.f32.mrb[42].mxu1 }
 0x6d8   : > { %v4327_v52 = vadd.f32 %v8371_v57, %v12544_v45  ;;  %v4321_v46 = vpop.f32.mrb[43].mxu1 }
 0x6d9   : > { %v4322_v42 = vadd.f32 %v4321_v46, %v12544_v45 }
 0x6da   : > { %v4481_v43 = vmax.f32 %v4327_v52, 0.0 }
 0x6db   : > { %v4480_v28 = vmax.f32 %v4322_v42, 0.0 }
 0x6dd   : > { %8427 = vmatprep.mubr.msk.f32.mxu1 %vm4516_vm3, %v4480_v28 }
 0x6de   : > { %8428 = vmatmul.mubr.msk.f32.vlgmr.msra.gmra.mrb[74].mxu1 %vm4516_vm3, %v4481_v43 }
 0x6df   : > { %v8374_v55 = vpop.f32.mrb[44].mxu1  ;;  %8888 = vmatpush3.bf16.msra.mxu1 %v8885_v27 }
 0x6e0   : > { %v4337_v30 = vadd.f32 %v8374_v55, %v12544_v45  ;;  %v4331_v41 = vpop.f32.mrb[45].mxu1 }
 0x6e1   : > { %v4332_v3 = vadd.f32 %v4331_v41, %v12544_v45 }
 0x6e2   : > { %v4483_v49 = vmax.f32 %v4337_v30, 0.0 }
 0x6e3   : > { %v4482_v35 = vmax.f32 %v4332_v3, 0.0 }
 0x6e5   : > { %8430 = vmatprep.mubr.msk.f32.mxu1 %vm4516_vm3, %v4482_v35 }
 0x6e6   : > { %8431 = vmatmul.mubr.msk.f32.gmra.mrb[76].mxu1 %vm4516_vm3, %v4483_v49 }
 0x6e7   : > { %v8377_v61 = vpop.f32.mrb[46].mxu1 }
 0x6e8   : > { %v4347_v6 = vadd.f32 %v8377_v61, %v12544_v45  ;;  %v4341_v47 = vpop.f32.mrb[47].mxu1 }
 0x6e9   : > { %v4342_v33 = vadd.f32 %v4341_v47, %v12544_v45 }
 0x6ea   : > { %v4485_v5 = vmax.f32 %v4347_v6, 0.0 }
 0x6eb   : > { %v4484_v24 = vmax.f32 %v4342_v33, 0.0 }
 0x6ed   : > { %8433 = vmatprep.mubr.msk.f32.mxu1 %vm4516_vm3, %v4484_v24 }
 0x6ee   : > { %8434 = vmatmul.mubr.msk.f32.gmra.mrb[78].mxu1 %vm4516_vm3, %v4485_v5 }
 0x6ef   : > { %v8380_v25 = vpop.f32.mrb[48].mxu1 }
 0x6f0   : > { %v4357_v31 = vadd.f32 %v8380_v25, %v12544_v45  ;;  %v4351_v8 = vpop.f32.mrb[49].mxu1 }
 0x6f1   : > { %v4352_v16 = vadd.f32 %v4351_v8, %v12544_v45 }
 0x6f2   : > { %v4487_v20 = vmax.f32 %v4357_v31, 0.0 }
 0x6f3   : > { %v4486_v39 = vmax.f32 %v4352_v16, 0.0 }
 0x6f5   : > { %8436 = vmatprep.mubr.msk.f32.mxu1 %vm4516_vm3, %v4486_v39 }
 0x6f6   : > { %8437 = vmatmul.mubr.msk.f32.gmra.mrb[80].mxu1 %vm4516_vm3, %v4487_v20 }
 0x6f7   : > { %v8383_v44 = vpop.f32.mrb[50].mxu1 }
 0x6f8   : > { %v4367_v0 = vadd.f32 %v8383_v44, %v12544_v45  ;;  %v4361_v62 = vpop.f32.mrb[51].mxu1 }
 0x6f9   : > { %v4362_v1 = vadd.f32 %v4361_v62, %v12544_v45 }
 0x6fa   : > { %v4489_v56 = vmax.f32 %v4367_v0, 0.0 }
 0x6fb   : > { %v4488_v26 = vmax.f32 %v4362_v1, 0.0 }
 0x6fd   : > { %v8386_v63 = vpop.f32.mrb[52].mxu1  ;;  %8439 = vmatprep.mubr.msk.f32.mxu1 %vm4516_vm3, %v4488_v26 }
 0x6fe   : > { %v4377_v50 = vadd.f32 %v8386_v63, %v12544_v45  ;;  %v4371_v51 = vpop.f32.mrb[53].mxu1  ;;  %8440 = vmatmul.mubr.msk.f32.gmra.mrb[82].mxu1 %vm4516_vm3, %v4489_v56 }
 0x6ff   : > { %v4372_v9 = vadd.f32 %v4371_v51, %v12544_v45  ;;  %v3657_v51 = vld [vmem:[%s14360_s4 + $0x80] sm:$0xff] }
 0x700   : > { %v4491_v13 = vmax.f32 %v4377_v50, 0.0 }
 0x701   : > { %v4490_v11 = vmax.f32 %v4372_v9, 0.0  ;;  %v8389_v38 = vpop.f32.mrb[54].mxu1  ;;  %v3658_v9 = vld [vmem:[%s14360_s4 + $0x88] sm:$0xff] }
 0x702   : > { %v4387_v21 = vadd.f32 %v8389_v38, %v12544_v45  ;;  %v4381_v60 = vpop.f32.mrb[55].mxu1 }
 0x703   : > { %8442 = vmatprep.mubr.msk.f32.mxu1 %vm4516_vm3, %v4490_v11  ;;  %v4382_v54 = vadd.f32 %v4381_v60, %v12544_v45  ;;  %v8889_v11 = vpack.c.bf16 %v3658_v9, %v3657_v51 }
 0x704   : > { %8443 = vmatmul.mubr.msk.f32.gmra.mrb[84].mxu1 %vm4516_vm3, %v4491_v13  ;;  %v4493_v10 = vmax.f32 %v4387_v21, 0.0  ;;  %v3659_v13 = vld [vmem:[%s14360_s4 + $0x90] sm:$0xff] }
 0x705   : > { %v4492_v4 = vmax.f32 %v4382_v54, 0.0  ;;  %v8392_v19 = vpop.f32.mrb[56].mxu1  ;;  %8890 = vmatprep.subr.bf16.mxu1 %v8889_v11 }
 0x706   : > { %v4397_v7 = vadd.f32 %v8392_v19, %v12544_v45  ;;  %v4391_v40 = vpop.f32.mrb[57].mxu1  ;;  %8892 = vmatpush3.bf16.msra.mxu1 %v8889_v11 }
 0x707   : > { %v4392_v34 = vadd.f32 %v4391_v40, %v12544_v45  ;;  %8445 = vmatprep.mubr.msk.f32.mxu1 %vm4516_vm3, %v4492_v4  ;;  %8483 = vmatprep.subr.mxu1 %v3659_v13 }
 0x708   : > { %8446 = vmatmul.mubr.msk.f32.gmra.mrb[86].mxu1 %vm4516_vm3, %v4493_v10  ;;  %v4495_v48 = vmax.f32 %v4397_v7, 0.0  ;;  %v4514_v10 = vsub.s32 3, %v12366_v2 }
 0x709   : > { %v4494_v17 = vmax.f32 %v4392_v34, 0.0  ;;  %v8395_v12 = vpop.f32.mrb[58].mxu1 }
 0x70a   : > { %v4407_v23 = vadd.f32 %v8395_v12, %v12544_v45  ;;  %v4401_v22 = vpop.f32.mrb[59].mxu1  ;;  %8484 = vmatpush3.msra.mxu1 %v3659_v13  ;;  %v12628_v7 = vrot.slane %v12379_v15, %v4514_v10  ;;  %v5584_v12 = vld [vmem:[%s14361_s5] sm:$0xff]  ;;  %v5586_v15 = vld [vmem:[%s14361_s5 + $0x10] sm:$0xff]  ;;  %v5603_v10 = vld [vmem:[%s14361_s5 + $0x98] sm:$0xff] }
 0x70b   : > { %v4402_v53 = vadd.f32 %v4401_v22, %v12544_v45  ;;  %8448 = vmatprep.mubr.msk.f32.mxu1 %vm4516_vm3, %v4494_v17  ;;  %8901 = vmatprep.subr.bf16.mxu1 %v14480_v32  ;;  %v5600_v13 = vld [vmem:[%s14361_s5 + $0x80] sm:$0xff] }
 0x70c   : > { %8449 = vmatmul.mubr.msk.f32.gmra.mrb[88].mxu1 %vm4516_vm3, %v4495_v48  ;;  %v4497_v29 = vmax.f32 %v4407_v23, 0.0 }
 0x70d   : > { %v4496_v36 = vmax.f32 %v4402_v53, 0.0  ;;  %v8398_v37 = vpop.f32.mrb[60].mxu1 }
 0x70e   : > { %v4417_v57 = vadd.f32 %v8398_v37, %v12544_v45  ;;  %v4411_v52 = vpop.f32.mrb[61].mxu1 }
 0x70f   : > { %v4412_v46 = vadd.f32 %v4411_v52, %v12544_v45  ;;  %8451 = vmatprep.mubr.msk.f32.mxu1 %vm4516_vm3, %v4496_v36  ;;  %v5587_v36 = vld [vmem:[%s14361_s5 + $0x18] sm:$0xff] }
 0x710   : > { %8452 = vmatmul.mubr.msk.f32.gmra.mrb[90].mxu1 %vm4516_vm3, %v4497_v29  ;;  %v4499_v43 = vmax.f32 %v4417_v57, 0.0  ;;  %v8905_v29 = vpack.c.bf16 %v5587_v36, %v5586_v15 }
 0x711   : > { %v4498_v42 = vmax.f32 %v4412_v46, 0.0  ;;  %v8401_v28 = vpop.f32.mrb[62].mxu1  ;;  %v5588_v46 = vld [vmem:[%s14361_s5 + $0x20] sm:$0xff] }
 0x712   : > { %v4427_v55 = vadd.f32 %v8401_v28, %v12544_v45  ;;  %v4421_v30 = vpop.f32.mrb[63].mxu1 }
 0x713   : > { %v4422_v41 = vadd.f32 %v4421_v30, %v12544_v45  ;;  %8454 = vmatprep.mubr.msk.f32.mxu1 %vm4516_vm3, %v4498_v42  ;;  %v5589_v42 = vld [vmem:[%s14361_s5 + $0x28] sm:$0xff] }
 0x714   : > { %8455 = vmatmul.mubr.msk.f32.gmra.mrb[92].mxu1 %vm4516_vm3, %v4499_v43  ;;  %v4501_v49 = vmax.f32 %v4427_v55, 0.0  ;;  %v8908_v55 = vpack.c.bf16 %v5589_v42, %v5588_v46  ;;  %v5607_v46 = vld [vmem:[%s14361_s5 + $0xb8] sm:$0xff] }
 0x715   : > { %v4500_v3 = vmax.f32 %v4422_v41, 0.0  ;;  %v8404_v35 = vpop.f32.mrb[64].mxu1  ;;  %v5590_v41 = vld [vmem:[%s14361_s5 + $0x30] sm:$0xff] }
 0x716   : > { %v4437_v61 = vadd.f32 %v8404_v35, %v12544_v45  ;;  %v4431_v6 = vpop.f32.mrb[65].mxu1 }
 0x717   : > { %v4432_v47 = vadd.f32 %v4431_v6, %v12544_v45  ;;  %8457 = vmatprep.mubr.msk.f32.mxu1 %vm4516_vm3, %v4500_v3  ;;  %v5591_v3 = vld [vmem:[%s14361_s5 + $0x38] sm:$0xff] }
 0x718   : > { %8458 = vmatmul.mubr.msk.f32.gmra.mrb[94].mxu1 %vm4516_vm3, %v4501_v49  ;;  %v4503_v5 = vmax.f32 %v4437_v61, 0.0  ;;  %v8911_v49 = vpack.c.bf16 %v5591_v3, %v5590_v41 }
 0x719   : > { %v4502_v33 = vmax.f32 %v4432_v47, 0.0  ;;  %v8407_v24 = vpop.f32.mrb[66].mxu1  ;;  %v5592_v47 = vld [vmem:[%s14361_s5 + $0x40] sm:$0xff] }
 0x71a   : > { %v4447_v25 = vadd.f32 %v8407_v24, %v12544_v45  ;;  %v4441_v31 = vpop.f32.mrb[67].mxu1 }
 0x71b   : > { %v4442_v8 = vadd.f32 %v4441_v31, %v12544_v45  ;;  %8460 = vmatprep.mubr.msk.f32.mxu1 %vm4516_vm3, %v4502_v33  ;;  %v5593_v33 = vld [vmem:[%s14361_s5 + $0x48] sm:$0xff] }
 0x71c   : > { %8461 = vmatmul.mubr.msk.f32.gmra.mrb[96].mxu1 %vm4516_vm3, %v4503_v5  ;;  %v4505_v20 = vmax.f32 %v4447_v25, 0.0  ;;  %v8914_v25 = vpack.c.bf16 %v5593_v33, %v5592_v47 }
 0x71d   : > { %v4504_v16 = vmax.f32 %v4442_v8, 0.0  ;;  %v8410_v39 = vpop.f32.mrb[68].mxu1  ;;  %v5594_v8 = vld [vmem:[%s14361_s5 + $0x50] sm:$0xff] }
 0x71e   : > { %v4457_v44 = vadd.f32 %v8410_v39, %v12544_v45  ;;  %v4451_v58 = vpop.f32.mrb[69].mxu1 }
 0x71f   : > { %v4452_v14 = vadd.f32 %v4451_v58, %v12544_v45  ;;  %8463 = vmatprep.mubr.msk.f32.mxu1 %vm4516_vm3, %v4504_v16  ;;  %v5595_v16 = vld [vmem:[%s14361_s5 + $0x58] sm:$0xff] }
 0x720   : > { %8464 = vmatmul.mubr.msk.f32.gmra.mrb[98].mxu1 %vm4516_vm3, %v4505_v20  ;;  %v4507_v27 = vmax.f32 %v4457_v44, 0.0  ;;  %v8917_v20 = vpack.c.bf16 %v5595_v16, %v5594_v8  ;;  %v5611_v8 = vld [vmem:[%s14361_s5 + $0xd8] sm:$0xff] }
 0x721   : > { %v4506_v0 = vmax.f32 %v4452_v14, 0.0  ;;  %v8413_v62 = vpop.f32.mrb[70].mxu1  ;;  %v5596_v14 = vld [vmem:[%s14361_s5 + $0x60] sm:$0xff] }
 0x722   : > { %v4467_v1 = vadd.f32 %v8413_v62, %v12544_v45  ;;  %v4461_v26 = vpop.f32.mrb[71].mxu1 }
 0x723   : > { %v4462_v56 = vadd.f32 %v4461_v26, %v12544_v45  ;;  %8466 = vmatprep.mubr.msk.f32.mxu1 %vm4516_vm3, %v4506_v0  ;;  %v5597_v0 = vld [vmem:[%s14361_s5 + $0x68] sm:$0xff] }
 0x724   : > { %8467 = vmatmul.mubr.msk.f32.gmra.mrb[100].mxu1 %vm4516_vm3, %v4507_v27  ;;  %v4509_v50 = vmax.f32 %v4467_v1, 0.0  ;;  %v8920_v1 = vpack.c.bf16 %v5597_v0, %v5596_v14 }
 0x725   : > { %v4508_v63 = vmax.f32 %v4462_v56, 0.0  ;;  %v5598_v56 = vld [vmem:[%s14361_s5 + $0x70] sm:$0xff] }
 0x727   : > { %8469 = vmatprep.mubr.msk.f32.mxu1 %vm4516_vm3, %v4508_v63  ;;  %v5599_v63 = vld [vmem:[%s14361_s5 + $0x78] sm:$0xff] }
 0x728   : > { %8470 = vmatmul.mubr.msk.f32.gmra.mrb[102].mxu1 %vm4516_vm3, %v4509_v50  ;;  %v8923_v51 = vpack.c.bf16 %v5599_v63, %v5598_v56 }
 0x770   : > { %v8416_v38 = vpop.f32.mrb[72].mxu1 }
 0x771   : > { %v4477_v21 = vadd.f32 %v8416_v38, %v12544_v45  ;;  %v4471_v60 = vpop.f32.mrb[73].mxu1  ;;  %v5601_v38 = vld [vmem:[%s14361_s5 + $0x88] sm:$0xff] }
 0x772   : > { %v4472_v54 = vadd.f32 %v4471_v60, %v12544_v45  ;;  %v5585_v45 = vld [vmem:[%s14361_s5 + $0x8] sm:$0xff] }
 0x773   : > { %v4511_v19 = vmax.f32 %v4477_v21, 0.0  ;;  %v8902_v22 = vpack.c.bf16 %v5585_v45, %v5584_v12 }
 0x774   : > { %v4510_v4 = vmax.f32 %v4472_v54, 0.0  ;;  %v8926_v54 = vpack.c.bf16 %v5601_v38, %v5600_v13 }
 0x776   : > { %8472 = vmatprep.mubr.msk.f32.mxu1 %vm4516_vm3, %v4510_v4 }
 0x777   : > { %8473 = vmatmul.mubr.msk.f32.gmra.mrb[104].mxu1 %vm4516_vm3, %v4511_v19  ;;  %v5602_v19 = vld [vmem:[%s14361_s5 + $0x90] sm:$0xff] }
 0x778   : > { %v8929_v45 = vpack.c.bf16 %v5603_v10, %v5602_v19 }
 0x7b1   : > { %v8429_v40 = vpop.f32.mrb[74].mxu1 }
 0x7b2   : > { %v4685_v34 = vadd.f32 %v8429_v40, %v12628_v7  ;;  %v4679_v17 = vpop.f32.mrb[75].mxu1 }
 0x7b3   : > { %v4680_v48 = vadd.f32 %v4679_v17, %v12628_v7 }
 0x7b4   : > { %v4839_v53 = vmax.f32 %v4685_v34, 0.0 }
 0x7b5   : > { %v4838_v23 = vmax.f32 %v4680_v48, 0.0  ;;  %v5604_v48 = vld [vmem:[%s14361_s5 + $0xa0] sm:$0xff] }
 0x7b7   : > { %8485 = vmatprep.mubr.msk.f32.mxu1 %vm4516_vm3, %v4838_v23  ;;  %v5605_v23 = vld [vmem:[%s14361_s5 + $0xa8] sm:$0xff] }
 0x7b8   : > { %8486 = vmatmul.mubr.msk.f32.vlgmr.msra.gmra.mrb[106].mxu1 %vm4516_vm3, %v4839_v53 }
 0x7b9   : > { %v8432_v37 = vpop.f32.mrb[76].mxu1  ;;  %8903 = vmatpush1.bf16.msra.mxu1 %v8902_v22 }
 0x7ba   : > { %v4695_v57 = vadd.f32 %v8432_v37, %v12628_v7  ;;  %v4689_v52 = vpop.f32.mrb[77].mxu1  ;;  %8904 = vmatprep.subr.bf16.mxu1 %v14480_v32 }
 0x7bb   : > { %v4690_v28 = vadd.f32 %v4689_v52, %v12628_v7  ;;  %v5606_v52 = vld [vmem:[%s14361_s5 + $0xb0] sm:$0xff] }
 0x7bc   : > { %v4841_v30 = vmax.f32 %v4695_v57, 0.0  ;;  %v8935_v41 = vpack.c.bf16 %v5607_v46, %v5606_v52  ;;  %v3661_v52 = vld [vmem:[%s14360_s4 + $0xb0] sm:$0xff] }
 0x7bd   : > { %v4840_v43 = vmax.f32 %v4690_v28, 0.0  ;;  %8906 = vmatpush1.bf16.msra.mxu1 %v8905_v29  ;;  %v8932_v29 = vpack.c.bf16 %v5605_v23, %v5604_v48 }
 0x7be   : > { %8907 = vmatprep.subr.bf16.mxu1 %v14480_v32 }
 0x7bf   : > { %8488 = vmatprep.mubr.msk.f32.mxu1 %vm4516_vm3, %v4840_v43 }
 0x7c0   : > { %8489 = vmatmul.mubr.msk.f32.gmra.mrb[108].mxu1 %vm4516_vm3, %v4841_v30 }
 0x7c1   : > { %v8435_v35 = vpop.f32.mrb[78].mxu1  ;;  %8909 = vmatpush1.bf16.msra.mxu1 %v8908_v55 }
 0x7c2   : > { %v4705_v61 = vadd.f32 %v8435_v35, %v12628_v7  ;;  %v4699_v6 = vpop.f32.mrb[79].mxu1  ;;  %8910 = vmatprep.subr.bf16.mxu1 %v14480_v32  ;;  %v5608_v35 = vld [vmem:[%s14361_s5 + $0xc0] sm:$0xff] }
 0x7c3   : > { %v4700_v24 = vadd.f32 %v4699_v6, %v12628_v7 }
 0x7c4   : > { %v4843_v31 = vmax.f32 %v4705_v61, 0.0 }
 0x7c5   : > { %v4842_v5 = vmax.f32 %v4700_v24, 0.0  ;;  %8912 = vmatpush1.bf16.msra.mxu1 %v8911_v49  ;;  %v5609_v49 = vld [vmem:[%s14361_s5 + $0xc8] sm:$0xff] }
 0x7c6   : > { %8913 = vmatprep.subr.bf16.mxu1 %v14480_v32 }
 0x7c7   : > { %8491 = vmatprep.mubr.msk.f32.mxu1 %vm4516_vm3, %v4842_v5  ;;  %v8938_v5 = vpack.c.bf16 %v5609_v49, %v5608_v35 }
 0x7c8   : > { %8492 = vmatmul.mubr.msk.f32.gmra.mrb[110].mxu1 %vm4516_vm3, %v4843_v31  ;;  %v5610_v31 = vld [vmem:[%s14361_s5 + $0xd0] sm:$0xff] }
 0x7c9   : > { %v8438_v39 = vpop.f32.mrb[80].mxu1  ;;  %8915 = vmatpush1.bf16.msra.mxu1 %v8914_v25  ;;  %v8941_v14 = vpack.c.bf16 %v5611_v8, %v5610_v31  ;;  %v5854_v31 = vld [vmem:[%s14362_s6 + $0x68] sm:$0xff]  ;;  %v9494_v8 = vld [vmem:[%s9709_s23 + $0x38] sm:$0xff] }
 0x7ca   : > { %v4715_v44 = vadd.f32 %v8438_v39, %v12628_v7  ;;  %v4709_v58 = vpop.f32.mrb[81].mxu1  ;;  %8916 = vmatprep.subr.bf16.mxu1 %v14480_v32 }
 0x7cb   : > { %v4710_v62 = vadd.f32 %v4709_v58, %v12628_v7 }
 0x7cc   : > { %v4845_v26 = vmax.f32 %v4715_v44, 0.0 }
 0x7cd   : > { %v4844_v27 = vmax.f32 %v4710_v62, 0.0  ;;  %8918 = vmatpush1.bf16.msra.mxu1 %v8917_v20 }
 0x7ce   : > { %8919 = vmatprep.subr.bf16.mxu1 %v14480_v32 }
 0x7cf   : > { %8494 = vmatprep.mubr.msk.f32.mxu1 %vm4516_vm3, %v4844_v27 }
 0x7d0   : > { %8495 = vmatmul.mubr.msk.f32.gmra.mrb[112].mxu1 %vm4516_vm3, %v4845_v26 }
 0x7d1   : > { %v8441_v50 = vpop.f32.mrb[82].mxu1  ;;  %8921 = vmatpush1.bf16.msra.mxu1 %v8920_v1 }
 0x7d2   : > { %v4725_v9 = vadd.f32 %v8441_v50, %v12628_v7  ;;  %v4719_v11 = vpop.f32.mrb[83].mxu1  ;;  %8922 = vmatprep.subr.bf16.mxu1 %v14480_v32 }
 0x7d3   : > { %v4720_v21 = vadd.f32 %v4719_v11, %v12628_v7 }
 0x7d4   : > { %v4847_v4 = vmax.f32 %v4725_v9, 0.0 }
 0x7d5   : > { %v4846_v60 = vmax.f32 %v4720_v21, 0.0  ;;  %8924 = vmatpush1.bf16.msra.mxu1 %v8923_v51 }
 0x7d6   : > { %8925 = vmatprep.subr.bf16.mxu1 %v14480_v32 }
 0x7d7   : > { %v8444_v40 = vpop.f32.mrb[84].mxu1  ;;  %8497 = vmatprep.mubr.msk.f32.mxu1 %vm4516_vm3, %v4846_v60 }
 0x7d8   : > { %v4735_v34 = vadd.f32 %v8444_v40, %v12628_v7  ;;  %v4729_v17 = vpop.f32.mrb[85].mxu1  ;;  %8498 = vmatmul.mubr.msk.f32.gmra.mrb[114].mxu1 %vm4516_vm3, %v4847_v4 }
 0x7d9   : > { %v4730_v12 = vadd.f32 %v4729_v17, %v12628_v7  ;;  %8927 = vmatpush1.bf16.msra.mxu1 %v8926_v54 }
 0x7da   : > { %8928 = vmatprep.subr.bf16.mxu1 %v14480_v32  ;;  %v4849_v53 = vmax.f32 %v4735_v34, 0.0 }
 0x7db   : > { %v4848_v22 = vmax.f32 %v4730_v12, 0.0  ;;  %v8447_v15 = vpop.f32.mrb[86].mxu1 }
 0x7dc   : > { %v4745_v36 = vadd.f32 %v8447_v15, %v12628_v7  ;;  %v4739_v37 = vpop.f32.mrb[87].mxu1 }
 0x7dd   : > { %8500 = vmatprep.mubr.msk.f32.mxu1 %vm4516_vm3, %v4848_v22  ;;  %8930 = vmatpush1.bf16.msra.mxu1 %v8929_v45  ;;  %v4740_v57 = vadd.f32 %v4739_v37, %v12628_v7 }
 0x7de   : > { %8501 = vmatmul.mubr.msk.f32.gmra.mrb[116].mxu1 %vm4516_vm3, %v4849_v53  ;;  %8931 = vmatprep.subr.bf16.mxu1 %v14480_v32  ;;  %v4851_v43 = vmax.f32 %v4745_v36, 0.0 }
 0x7df   : > { %v4850_v42 = vmax.f32 %v4740_v57, 0.0  ;;  %v8450_v28 = vpop.f32.mrb[88].mxu1  ;;  %v3660_v57 = vld [vmem:[%s14360_s4 + $0xa8] sm:$0xff] }
 0x7e0   : > { %v4755_v55 = vadd.f32 %v8450_v28, %v12628_v7  ;;  %v4749_v30 = vpop.f32.mrb[89].mxu1  ;;  %v8893_v46 = vpack.c.bf16 %v3661_v52, %v3660_v57  ;;  %v3663_v28 = vld [vmem:[%s14360_s4 + $0xc0] sm:$0xff]  ;;  %v5855_v52 = vld [vmem:[%s14362_s6 + $0x70] sm:$0xff] }
 0x7e1   : > { %8933 = vmatpush1.bf16.msra.mxu1 %v8932_v29  ;;  %v4750_v3 = vadd.f32 %v4749_v30, %v12628_v7  ;;  %8503 = vmatprep.mubr.msk.f32.mxu1 %vm4516_vm3, %v4850_v42  ;;  %v3662_v42 = vld [vmem:[%s14360_s4 + $0xb8] sm:$0xff] }
 0x7e2   : > { %8934 = vmatprep.subr.bf16.mxu1 %v14480_v32  ;;  %8504 = vmatmul.mubr.msk.f32.gmra.mrb[118].mxu1 %vm4516_vm3, %v4851_v43  ;;  %v4853_v47 = vmax.f32 %v4755_v55, 0.0  ;;  %v8897_v43 = vpack.c.bf16 %v3663_v28, %v3662_v42  ;;  %v3664_v55 = vld [vmem:[%s14360_s4 + $0xc8] sm:$0xff]  ;;  %v9520_v42 = vld [vmem:[%s9709_s23 + $0xf0] sm:$0xff] }
 0x7e3   : > { %v4852_v61 = vmax.f32 %v4750_v3, 0.0  ;;  %v8453_v6 = vpop.f32.mrb[90].mxu1  ;;  %8894 = vmatprep.subr.bf16.mxu0 %v8893_v46  ;;  %v9521_v28 = vld [vmem:[%s9709_s23 + $0x108] sm:$0xff] }
 0x7e4   : > { %v4765_v33 = vadd.f32 %v8453_v6, %v12628_v7  ;;  %v4759_v24 = vpop.f32.mrb[91].mxu1  ;;  %8896 = vmatpush3.bf16.msra.mxu0 %v8893_v46  ;;  %v9488_v6 = vld [vmem:[%s9709_s23 + $0x8] sm:$0xff]  ;;  %v5857_v46 = vld [vmem:[%s14362_s6 + $0x80] sm:$0xff] }
 0x7e5   : > { %8936 = vmatpush1.bf16.msra.mxu1 %v8935_v41  ;;  %v4760_v25 = vadd.f32 %v4759_v24, %v12628_v7  ;;  %8506 = vmatprep.mubr.msk.f32.mxu1 %vm4516_vm3, %v4852_v61  ;;  %v9491_v24 = vld [vmem:[%s9709_s23 + $0x10] sm:$0xff] }
 0x7e6   : > { %8937 = vmatprep.subr.bf16.mxu1 %v14480_v32  ;;  %8507 = vmatmul.mubr.msk.f32.gmra.mrb[120].mxu1 %vm4516_vm3, %v4853_v47  ;;  %v4855_v20 = vmax.f32 %v4765_v33, 0.0  ;;  %v9489_v47 = vld [vmem:[%s9709_s23] sm:$0xff]  ;;  %v9490_v33 = vld [vmem:[%s9709_s23 + $0x18] sm:$0xff] }
 0x7e7   : > { %v4854_v16 = vmax.f32 %v4760_v25, 0.0  ;;  %v8456_v39 = vpop.f32.mrb[92].mxu1  ;;  %8898 = vmatprep.subr.bf16.mxu0 %v8897_v43  ;;  %v5852_v25 = vld [vmem:[%s14362_s6 + $0x58] sm:$0xff] }
 0x7e8   : > { %v4775_v44 = vadd.f32 %v8456_v39, %v12628_v7  ;;  %v4769_v58 = vpop.f32.mrb[93].mxu1  ;;  %8900 = vmatpush3.bf16.msra.mxu0 %v8897_v43  ;;  %v9495_v39 = vld [vmem:[%s9709_s23 + $0x30] sm:$0xff] }
 0x7e9   : > { %8939 = vmatpush1.bf16.msra.mxu1 %v8938_v5  ;;  %v4770_v0 = vadd.f32 %v4769_v58, %v12628_v7  ;;  %8509 = vmatprep.mubr.msk.f32.mxu1 %vm4516_vm3, %v4854_v16  ;;  %v9493_v5 = vld [vmem:[%s9709_s23 + $0x20] sm:$0xff]  ;;  %v8943_v16 = vpack.c.bf16 %v5854_v31, %v5852_v25  ;;  %v9498_v58 = vld [vmem:[%s9709_s23 + $0x58] sm:$0xff] }
 0x7ea   : > { %8940 = vmatprep.subr.bf16.mxu1 %v14480_v32  ;;  %8510 = vmatmul.mubr.msk.f32.gmra.mrb[122].mxu1 %vm4516_vm3, %v4855_v20  ;;  %v4857_v1 = vmax.f32 %v4775_v44, 0.0  ;;  %v9496_v20 = vld [vmem:[%s9709_s23 + $0x48] sm:$0xff]  ;;  %v9497_v44 = vld [vmem:[%s9709_s23 + $0x40] sm:$0xff] }
 0x7eb   : > { %v4856_v62 = vmax.f32 %v4770_v0, 0.0  ;;  %v8459_v27 = vpop.f32.mrb[94].mxu1  ;;  %8541 = vmatprep.subr.mxu0 %v3664_v55  ;;  %v9500_v0 = vld [vmem:[%s9709_s23 + $0x68] sm:$0xff] }
 0x7ec   : > { %v4785_v26 = vadd.f32 %v8459_v27, %v12628_v7  ;;  %v4779_v56 = vpop.f32.mrb[95].mxu1  ;;  %8542 = vmatpush3.msra.mxu0 %v3664_v55  ;;  %v9502_v27 = vld [vmem:[%s9709_s23 + $0x78] sm:$0xff]  ;;  %v8949_v55 = vpack.c.bf16 %v5857_v46, %v5855_v52 }
 0x7ed   : > { %8942 = vmatpush1.bf16.msra.mxu1 %v8941_v14  ;;  %v4780_v63 = vadd.f32 %v4779_v56, %v12628_v7  ;;  %8512 = vmatprep.mubr.msk.f32.mxu1 %vm4516_vm3, %v4856_v62  ;;  %v9499_v14 = vld [vmem:[%s9709_s23 + $0x50] sm:$0xff]  ;;  %v9501_v62 = vld [vmem:[%s9709_s23 + $0x60] sm:$0xff] }
 0x7ee   : > { %8513 = vmatmul.mubr.msk.f32.gmra.mrb[124].mxu1 %vm4516_vm3, %v4857_v1  ;;  %v4859_v9 = vmax.f32 %v4785_v26, 0.0  ;;  %8944 = vmatprep.subr.bf16.mxu0 %v8943_v16  ;;  %v9503_v1 = vld [vmem:[%s9709_s23 + $0x70] sm:$0xff]  ;;  %v9504_v26 = vld [vmem:[%s9709_s23 + $0x88] sm:$0xff]  ;;  %v9505_v56 = vld [vmem:[%s9709_s23 + $0x80] sm:$0xff] }
 0x7ef   : > { %v4858_v50 = vmax.f32 %v4780_v63, 0.0  ;;  %v8462_v51 = vpop.f32.mrb[96].mxu1  ;;  %v9506_v63 = vld [vmem:[%s9709_s23 + $0x98] sm:$0xff]  ;;  %v9526_v16 = vld [vmem:[%s9709_s23 + $0x120] sm:$0xff] }
 0x7f0   : > { %v4795_v32 = vadd.f32 %v8462_v51, %v12628_v7  ;;  %v4789_v11 = vpop.f32.mrb[97].mxu1  ;;  %v9508_v51 = vld [vmem:[%s9709_s23 + $0xa8] sm:$0xff] }
 0x7f1   : > { %v4790_v13 = vadd.f32 %v4789_v11, %v12628_v7  ;;  %8515 = vmatprep.mubr.msk.f32.mxu1 %vm4516_vm3, %v4858_v50  ;;  %v9507_v50 = vld [vmem:[%s9709_s23 + $0x90] sm:$0xff] }
 0x7f2   : > { %8516 = vmatmul.mubr.msk.f32.gmra.mrb[126].mxu1 %vm4516_vm3, %v4859_v9  ;;  %v4861_v60 = vmax.f32 %v4795_v32, 0.0  ;;  %v9509_v9 = vld [vmem:[%s9709_s23 + $0xa0] sm:$0xff]  ;;  %v9510_v32 = vld [vmem:[%s9709_s23 + $0xb8] sm:$0xff]  ;;  %v9511_v11 = vld [vmem:[%s9709_s23 + $0xb0] sm:$0xff] }
 0x7f3   : > { %v4860_v38 = vmax.f32 %v4790_v13, 0.0  ;;  %v8465_v21 = vpop.f32.mrb[98].mxu1  ;;  %v9512_v13 = vld [vmem:[%s9709_s23 + $0xc8] sm:$0xff] }
 0x7f4   : > { %v4805_v54 = vadd.f32 %v8465_v21, %v12628_v7  ;;  %v4799_v4 = vpop.f32.mrb[99].mxu1  ;;  %v9513_v21 = vld [vmem:[%s9709_s23 + $0xc0] sm:$0xff] }
 0x7f5   : > { %v4800_v19 = vadd.f32 %v4799_v4, %v12628_v7  ;;  %8518 = vmatprep.mubr.msk.f32.mxu1 %vm4516_vm3, %v4860_v38  ;;  %v4872_v38 = vsub.s32 4, %v12366_v2 }
 0x7f6   : > { %8519 = vmatmul.mubr.msk.f32.gmra.mrb[128].mxu1 %vm4516_vm3, %v4861_v60  ;;  %v4863_v34 = vmax.f32 %v4805_v54, 0.0  ;;  %v9514_v60 = vld [vmem:[%s9709_s23 + $0xd8] sm:$0xff]  ;;  %v12857_v54 = vld [vmem:[%s14363_s7] sm:$0xff] }
 0x7f7   : > { %v4862_v10 = vmax.f32 %v4800_v19, 0.0  ;;  %v8468_v40 = vpop.f32.mrb[100].mxu1  ;;  %v12860_v4 = vrot.slane %v12857_v54, %v4872_v38  ;;  %v9516_v19 = vld [vmem:[%s9709_s23 + $0xd0] sm:$0xff]  ;;  %v5842_v38 = vld [vmem:[%s14362_s6 + $0x8] sm:$0xff] }
 0x7f8   : > { %v4815_v17 = vadd.f32 %v8468_v40, %v12628_v7  ;;  %v4809_v12 = vpop.f32.mrb[101].mxu1 }
 0x7f9   : > { %v4810_v45 = vadd.f32 %v4809_v12, %v12628_v7  ;;  %8521 = vmatprep.mubr.msk.f32.mxu1 %vm4516_vm3, %v4862_v10  ;;  %v9517_v10 = vld [vmem:[%s9709_s23 + $0xe8] sm:$0xff]  ;;  %v5851_v12 = vld [vmem:[%s14362_s6 + $0x50] sm:$0xff] }
 0x7fa   : > { %8522 = vmatmul.mubr.msk.f32.gmra.mrb[130].mxu1 %vm4516_vm3, %v4863_v34  ;;  %v4865_v22 = vmax.f32 %v4815_v17, 0.0 }
 0x7fb   : > { %v4864_v48 = vmax.f32 %v4810_v45, 0.0  ;;  %v8471_v23 = vpop.f32.mrb[102].mxu1  ;;  %v5853_v45 = vld [vmem:[%s14362_s6 + $0x60] sm:$0xff] }
 0x7fc   : > { %v4825_v53 = vadd.f32 %v8471_v23, %v12628_v7  ;;  %v4819_v15 = vpop.f32.mrb[103].mxu1  ;;  %v9518_v23 = vld [vmem:[%s9709_s23 + $0xe0] sm:$0xff] }
 0x7fd   : > { %v4820_v36 = vadd.f32 %v4819_v15, %v12628_v7  ;;  %8524 = vmatprep.mubr.msk.f32.mxu1 %vm4516_vm3, %v4864_v48  ;;  %v9519_v15 = vld [vmem:[%s9709_s23 + $0xf8] sm:$0xff] }
 0x7fe   : > { %8525 = vmatmul.mubr.msk.f32.gmra.mrb[132].mxu1 %vm4516_vm3, %v4865_v22  ;;  %v4867_v29 = vmax.f32 %v4825_v53, 0.0  ;;  %v5856_v22 = vld [vmem:[%s14362_s6 + $0x78] sm:$0xff]  ;;  %v5858_v53 = vld [vmem:[%s14362_s6 + $0x88] sm:$0xff] }
 0x7ff   : > { %v4866_v37 = vmax.f32 %v4820_v36, 0.0  ;;  %v8947_v57 = vpack.c.bf16 %v5858_v53, %v5856_v22  ;;  %v9537_v22 = vld [vmem:[%s9709_s23 + $0x188] sm:$0xff] }
 0x801   : > { %8527 = vmatprep.mubr.msk.f32.mxu1 %vm4516_vm3, %v4866_v37  ;;  %v8945_v37 = vpack.c.bf16 %v5853_v45, %v5851_v12  ;;  %v9536_v45 = vld [vmem:[%s9709_s23 + $0x170] sm:$0xff] }
 0x802   : > { %8528 = vmatmul.mubr.msk.f32.gmra.mrb[134].mxu1 %vm4516_vm3, %v4867_v29 }
 0x84a   : > { %v8474_v30 = vpop.f32.mrb[104].mxu1 }
 0x84b   : > { %v4835_v41 = vadd.f32 %v8474_v30, %v12628_v7  ;;  %v4829_v3 = vpop.f32.mrb[105].mxu1 }
 0x84c   : > { %v4830_v35 = vadd.f32 %v4829_v3, %v12628_v7  ;;  %v9492_v7 = vld [vmem:[%s9709_s23 + $0x28] sm:$0xff] }
 0x84d   : > { %v4869_v61 = vmax.f32 %v4835_v41, 0.0 }
 0x84e   : > { %v4868_v49 = vmax.f32 %v4830_v35, 0.0  ;;  %v9522_v35 = vld [vmem:[%s9709_s23 + $0x100] sm:$0xff] }
 0x850   : > { %8530 = vmatprep.mubr.msk.f32.mxu1 %vm4516_vm3, %v4868_v49  ;;  %v5860_v49 = vld [vmem:[%s14362_s6 + $0x98] sm:$0xff] }
 0x851   : > { %8531 = vmatmul.mubr.msk.f32.gmra.mrb[136].mxu1 %vm4516_vm3, %v4869_v61  ;;  %v9523_v61 = vld [vmem:[%s9709_s23 + $0x118] sm:$0xff] }
 0x852   : > { %8105 = vmatprep.mubr.msk.f32.mxu1 %vm410_vm0, %v9488_v6 }
 0x855   : > { %5681 = vmatmul.mubr.f32.vlgmr.msra.gmra.mrb[138].mxu1 %v9489_v47 }
 0x856   : > { %8106 = vmatprep.mubr.msk.f32.mxu1 %vm410_vm0, %v9490_v33  ;;  %v5859_v33 = vld [vmem:[%s14362_s6 + $0x90] sm:$0xff] }
 0x859   : > { %5686 = vmatmul.mubr.f32.gmra.mrb[140].mxu1 %v9491_v24  ;;  %v9524_v24 = vld [vmem:[%s9709_s23 + $0x110] sm:$0xff] }
 0x85a   : > { %8107 = vmatprep.mubr.msk.f32.mxu1 %vm410_vm0, %v9492_v7  ;;  %v9525_v7 = vld [vmem:[%s9709_s23 + $0x128] sm:$0xff] }
 0x85d   : > { %5691 = vmatmul.mubr.f32.gmra.mrb[142].mxu1 %v9493_v5 }
 0x85e   : > { %8108 = vmatprep.mubr.msk.f32.mxu1 %vm410_vm0, %v9494_v8 }
 0x861   : > { %5696 = vmatmul.mubr.f32.gmra.mrb[144].mxu1 %v9495_v39  ;;  %v9527_v39 = vld [vmem:[%s9709_s23 + $0x138] sm:$0xff] }
 0x862   : > { %8109 = vmatprep.mubr.msk.f32.mxu1 %vm410_vm0, %v9496_v20 }
 0x865   : > { %5701 = vmatmul.mubr.f32.gmra.mrb[146].mxu1 %v9497_v44 }
 0x866   : > { %8110 = vmatprep.mubr.msk.f32.mxu1 %vm410_vm0, %v9498_v58  ;;  %v9528_v58 = vld [vmem:[%s9709_s23 + $0x130] sm:$0xff] }
 0x869   : > { %5706 = vmatmul.mubr.f32.gmra.mrb[148].mxu1 %v9499_v14  ;;  %v9529_v14 = vld [vmem:[%s9709_s23 + $0x148] sm:$0xff] }
 0x86a   : > { %8111 = vmatprep.mubr.msk.f32.mxu1 %vm410_vm0, %v9500_v0 }
 0x86d   : > { %5711 = vmatmul.mubr.f32.gmra.mrb[150].mxu1 %v9501_v62 }
 0x86e   : > { %8112 = vmatprep.mubr.msk.f32.mxu1 %vm410_vm0, %v9502_v27 }
 0x871   : > { %5716 = vmatmul.mubr.f32.gmra.mrb[152].mxu1 %v9503_v1 }
 0x872   : > { %8113 = vmatprep.mubr.msk.f32.mxu1 %vm410_vm0, %v9504_v26  ;;  %v9530_v26 = vld [vmem:[%s9709_s23 + $0x140] sm:$0xff] }
 0x875   : > { %5721 = vmatmul.mubr.f32.gmra.mrb[154].mxu1 %v9505_v56  ;;  %v9531_v56 = vld [vmem:[%s9709_s23 + $0x158] sm:$0xff] }
 0x876   : > { %8114 = vmatprep.mubr.msk.f32.mxu1 %vm410_vm0, %v9506_v63 }
 0x879   : > { %5726 = vmatmul.mubr.f32.gmra.mrb[156].mxu1 %v9507_v50 }
 0x87a   : > { %8115 = vmatprep.mubr.msk.f32.mxu1 %vm410_vm0, %v9508_v51  ;;  %v9532_v51 = vld [vmem:[%s9709_s23 + $0x150] sm:$0xff] }
 0x87d   : > { %5731 = vmatmul.mubr.f32.gmra.mrb[158].mxu1 %v9509_v9  ;;  %v9533_v9 = vld [vmem:[%s9709_s23 + $0x168] sm:$0xff] }
 0x87e   : > { %8116 = vmatprep.mubr.msk.f32.mxu1 %vm410_vm0, %v9510_v32 }
 0x881   : > { %5736 = vmatmul.mubr.f32.gmra.mrb[160].mxu1 %v9511_v11 }
 0x882   : > { %8117 = vmatprep.mubr.msk.f32.mxu1 %vm410_vm0, %v9512_v13 }
 0x885   : > { %5741 = vmatmul.mubr.f32.gmra.mrb[162].mxu1 %v9513_v21  ;;  %v5844_v21 = vld [vmem:[%s14362_s6 + $0x18] sm:$0xff] }
 0x886   : > { %8118 = vmatprep.mubr.msk.f32.mxu1 %vm410_vm0, %v9514_v60 }
 0x889   : > { %5746 = vmatmul.mubr.f32.gmra.mrb[164].mxu1 %v9516_v19  ;;  %v9534_v19 = vld [vmem:[%s9709_s23 + $0x160] sm:$0xff] }
 0x88a   : > { %8119 = vmatprep.mubr.msk.f32.mxu1 %vm410_vm0, %v9517_v10  ;;  %v8951_v10 = vpack.c.bf16 %v5844_v21, %v5842_v38 }
 0x88b   : > { %v8487_v40 = vpop.f32.mrb[106].mxu1 }
 0x88c   : > { %v5042_v34 = vadd.f32 %v8487_v40, %v12860_v4  ;;  %v5036_v17 = vpop.f32.mrb[107].mxu1  ;;  %v9535_v40 = vld [vmem:[%s9709_s23 + $0x178] sm:$0xff] }
 0x88d   : > { %v5037_v48 = vadd.f32 %v5036_v17, %v12860_v4  ;;  %5751 = vmatmul.mubr.f32.gmra.mrb[166].mxu1 %v9518_v23 }
 0x88e   : > { %8120 = vmatprep.mubr.msk.f32.mxu1 %vm410_vm0, %v9519_v15  ;;  %v5196_v29 = vmax.f32 %v5042_v34, 0.0 }
 0x88f   : > { %v5195_v36 = vmax.f32 %v5037_v48, 0.0 }
 0x891   : > { %8543 = vmatprep.mubr.msk.f32.mxu0 %vm4516_vm3, %v5195_v36  ;;  %5756 = vmatmul.mubr.f32.gmra.mrb[168].mxu1 %v9520_v42  ;;  %v9538_v36 = vld [vmem:[%s9709_s23 + $0x180] sm:$0xff] }
 0x892   : > { %8544 = vmatmul.mubr.msk.f32.vlgmr.msra.gmra.mrb[128].mxu0 %vm4516_vm3, %v5196_v29  ;;  %8121 = vmatprep.mubr.msk.f32.mxu1 %vm410_vm0, %v9521_v28  ;;  %v9540_v28 = vld [vmem:[%s9709_s23 + $0x190] sm:$0xff] }
 0x893   : > { %v8490_v43 = vpop.f32.mrb[108].mxu1  ;;  %8946 = vmatpush1.bf16.msra.mxu0 %v8945_v37 }
 0x894   : > { %v5052_v30 = vadd.f32 %v8490_v43, %v12860_v4  ;;  %v5046_v41 = vpop.f32.mrb[109].mxu1  ;;  %8948 = vmatprep.subr.bf16.mxu0 %v8947_v57  ;;  %v9539_v57 = vld [vmem:[%s9709_s23 + $0x198] sm:$0xff] }
 0x895   : > { %v5047_v3 = vadd.f32 %v5046_v41, %v12860_v4  ;;  %5761 = vmatmul.mubr.f32.gmra.mrb[170].mxu1 %v9522_v35 }
 0x896   : > { %8122 = vmatprep.mubr.msk.f32.mxu1 %vm410_vm0, %v9523_v61  ;;  %v5198_v47 = vmax.f32 %v5052_v30, 0.0  ;;  %v9541_v30 = vld [vmem:[%s9709_s23 + $0x1a8] sm:$0xff]  ;;  %v9542_v61 = vld [vmem:[%s9709_s23 + $0x1a0] sm:$0xff] }
 0x897   : > { %v5197_v6 = vmax.f32 %v5047_v3, 0.0  ;;  %8950 = vmatpush1.bf16.msra.mxu0 %v8949_v55 }
 0x898   : > { %5965 = vmatprep.subr.mxu0 %v5860_v49 }
 0x899   : > { %8546 = vmatprep.mubr.msk.f32.mxu0 %vm4516_vm3, %v5197_v6  ;;  %5766 = vmatmul.mubr.f32.gmra.mrb[172].mxu1 %v9524_v24 }
 0x89a   : > { %8547 = vmatmul.mubr.msk.f32.gmra.mrb[130].mxu0 %vm4516_vm3, %v5198_v47  ;;  %8123 = vmatprep.mubr.msk.f32.mxu1 %vm410_vm0, %v9525_v7 }
 0x89b   : > { %v8493_v5 = vpop.f32.mrb[110].mxu1  ;;  %5966 = vmatpush1.msra.mxu0 %v5859_v33  ;;  %v9543_v33 = vld [vmem:[%s9709_s23 + $0x1b8] sm:$0xff] }
 0x89c   : > { %v5062_v25 = vadd.f32 %v8493_v5, %v12860_v4  ;;  %v5056_v31 = vpop.f32.mrb[111].mxu1  ;;  %8952 = vmatprep.subr.bf16.mxu0 %v8951_v10 }
 0x89d   : > { %v5057_v8 = vadd.f32 %v5056_v31, %v12860_v4  ;;  %5771 = vmatmul.mubr.f32.gmra.mrb[174].mxu1 %v9526_v16  ;;  %v9544_v31 = vld [vmem:[%s9709_s23 + $0x1b0] sm:$0xff] }
 0x89e   : > { %8124 = vmatprep.mubr.msk.f32.mxu1 %vm410_vm0, %v9527_v39  ;;  %v5200_v44 = vmax.f32 %v5062_v25, 0.0  ;;  %v9545_v39 = vld [vmem:[%s9709_s23 + $0x1c8] sm:$0xff] }
 0x89f   : > { %v5199_v20 = vmax.f32 %v5057_v8, 0.0 }
 0x8a1   : > { %8549 = vmatprep.mubr.msk.f32.mxu0 %vm4516_vm3, %v5199_v20  ;;  %5776 = vmatmul.mubr.f32.gmra.mrb[176].mxu1 %v9528_v58 }
 0x8a2   : > { %8550 = vmatmul.mubr.msk.f32.gmra.mrb[132].mxu0 %vm4516_vm3, %v5200_v44  ;;  %8125 = vmatprep.mubr.msk.f32.mxu1 %vm410_vm0, %v9529_v14 }
 0x8a3   : > { %v8496_v0 = vpop.f32.mrb[112].mxu1 }
 0x8a4   : > { %v5072_v62 = vadd.f32 %v8496_v0, %v12860_v4  ;;  %v5066_v27 = vpop.f32.mrb[113].mxu1  ;;  %v9546_v0 = vld [vmem:[%s9709_s23 + $0x1c0] sm:$0xff] }
 0x8a5   : > { %v5067_v1 = vadd.f32 %v5066_v27, %v12860_v4  ;;  %5781 = vmatmul.mubr.f32.gmra.mrb[178].mxu1 %v9530_v26 }
 0x8a6   : > { %8126 = vmatprep.mubr.msk.f32.mxu1 %vm410_vm0, %v9531_v56  ;;  %v5202_v50 = vmax.f32 %v5072_v62, 0.0 }
 0x8a7   : > { %v5201_v63 = vmax.f32 %v5067_v1, 0.0  ;;  %v9547_v1 = vld [vmem:[%s9709_s23 + $0x1d8] sm:$0xff] }
 0x8a9   : > { %8552 = vmatprep.mubr.msk.f32.mxu0 %vm4516_vm3, %v5201_v63  ;;  %5786 = vmatmul.mubr.f32.gmra.mrb[180].mxu1 %v9532_v51  ;;  %v9548_v51 = vld [vmem:[%s9709_s23 + $0x1d0] sm:$0xff] }
 0x8aa   : > { %8553 = vmatmul.mubr.msk.f32.gmra.mrb[134].mxu0 %vm4516_vm3, %v5202_v50  ;;  %8127 = vmatprep.mubr.msk.f32.mxu1 %vm410_vm0, %v9533_v9 }
 0x8ab   : > { %v8499_v32 = vpop.f32.mrb[114].mxu1 }
 0x8ac   : > { %v5082_v11 = vadd.f32 %v8499_v32, %v12860_v4  ;;  %v5076_v13 = vpop.f32.mrb[115].mxu1 }
 0x8ad   : > { %v5077_v60 = vadd.f32 %v5076_v13, %v12860_v4  ;;  %5791 = vmatmul.mubr.f32.gmra.mrb[182].mxu1 %v9534_v19  ;;  %v9550_v19 = vld [vmem:[%s9709_s23 + $0x1e0] sm:$0xff] }
 0x8ae   : > { %8128 = vmatprep.mubr.msk.f32.mxu1 %vm410_vm0, %v9535_v40  ;;  %v5204_v17 = vmax.f32 %v5082_v11, 0.0  ;;  %v9549_v11 = vld [vmem:[%s9709_s23 + $0x1e8] sm:$0xff] }
 0x8af   : > { %v5203_v34 = vmax.f32 %v5077_v60, 0.0 }
 0x8b1   : > { %v8502_v12 = vpop.f32.mrb[116].mxu1  ;;  %8555 = vmatprep.mubr.msk.f32.mxu0 %vm4516_vm3, %v5203_v34  ;;  %5796 = vmatmul.mubr.f32.gmra.mrb[184].mxu1 %v9536_v45  ;;  %v9551_v34 = vld [vmem:[%s9709_s23 + $0x1f8] sm:$0xff] }
 0x8b2   : > { %v5092_v48 = vadd.f32 %v8502_v12, %v12860_v4  ;;  %v5086_v23 = vpop.f32.mrb[117].mxu1  ;;  %8556 = vmatmul.mubr.msk.f32.gmra.mrb[136].mxu0 %vm4516_vm3, %v5204_v17  ;;  %8129 = vmatprep.mubr.msk.f32.mxu1 %vm410_vm0, %v9537_v22 }
 0x8b3   : > { %v5087_v53 = vadd.f32 %v5086_v23, %v12860_v4  ;;  %v9552_v23 = vld [vmem:[%s9709_s23 + $0x1f0] sm:$0xff] }
 0x8b4   : > { %v5206_v37 = vmax.f32 %v5092_v48, 0.0 }
 0x8b5   : > { %v5205_v15 = vmax.f32 %v5087_v53, 0.0  ;;  %5801 = vmatmul.mubr.f32.gmra.mrb[186].mxu1 %v9538_v36  ;;  %v8505_v29 = vpop.f32.mrb[118].mxu1 }
 0x8b6   : > { %8130 = vmatprep.mubr.msk.f32.mxu1 %vm410_vm0, %v9539_v57  ;;  %v5102_v52 = vadd.f32 %v8505_v29, %v12860_v4  ;;  %v5096_v46 = vpop.f32.mrb[119].mxu1 }
 0x8b7   : > { %8558 = vmatprep.mubr.msk.f32.mxu0 %vm4516_vm3, %v5205_v15  ;;  %v5097_v42 = vadd.f32 %v5096_v46, %v12860_v4 }
 0x8b8   : > { %8559 = vmatmul.mubr.msk.f32.gmra.mrb[138].mxu0 %vm4516_vm3, %v5206_v37  ;;  %v5208_v41 = vmax.f32 %v5102_v52, 0.0 }
 0x8b9   : > { %5806 = vmatmul.mubr.f32.gmra.mrb[188].mxu1 %v9540_v28  ;;  %v5207_v43 = vmax.f32 %v5097_v42, 0.0  ;;  %v8508_v55 = vpop.f32.mrb[120].mxu1 }
 0x8ba   : > { %8131 = vmatprep.mubr.msk.f32.mxu1 %vm410_vm0, %v9541_v30  ;;  %v5112_v3 = vadd.f32 %v8508_v55, %v12860_v4  ;;  %v5106_v35 = vpop.f32.mrb[121].mxu1 }
 0x8bb   : > { %v5107_v49 = vadd.f32 %v5106_v35, %v12860_v4  ;;  %8561 = vmatprep.mubr.msk.f32.mxu0 %vm4516_vm3, %v5207_v43 }
 0x8bc   : > { %8562 = vmatmul.mubr.msk.f32.gmra.mrb[140].mxu0 %vm4516_vm3, %v5208_v41  ;;  %v5210_v24 = vmax.f32 %v5112_v3, 0.0  ;;  %v5614_v41 = vsub.s32 6, %v12366_v2 }
 0x8bd   : > { %5811 = vmatmul.mubr.f32.gmra.mrb[190].mxu1 %v9542_v61  ;;  %v5209_v6 = vmax.f32 %v5107_v49, 0.0  ;;  %v8511_v47 = vpop.f32.mrb[122].mxu1 }
 0x8be   : > { %8132 = vmatprep.mubr.msk.f32.mxu1 %vm410_vm0, %v9543_v33  ;;  %v5122_v7 = vadd.f32 %v8511_v47, %v12860_v4  ;;  %v5116_v5 = vpop.f32.mrb[123].mxu1 }
 0x8bf   : > { %v5117_v25 = vadd.f32 %v5116_v5, %v12860_v4  ;;  %8564 = vmatprep.mubr.msk.f32.mxu0 %vm4516_vm3, %v5209_v6  ;;  %v13011_v6 = vrot.slane %v12857_v54, %v5614_v41  ;;  %v5841_v5 = vld [vmem:[%s14362_s6] sm:$0xff] }
 0x8c0   : > { %8565 = vmatmul.mubr.msk.f32.gmra.mrb[142].mxu0 %vm4516_vm3, %v5210_v24  ;;  %v5212_v20 = vmax.f32 %v5122_v7, 0.0 }
 0x8c1   : > { %5816 = vmatmul.mubr.f32.gmra.mrb[192].mxu1 %v9544_v31  ;;  %v5211_v8 = vmax.f32 %v5117_v25, 0.0  ;;  %v8514_v16 = vpop.f32.mrb[124].mxu1  ;;  %v5843_v25 = vld [vmem:[%s14362_s6 + $0x10] sm:$0xff]  ;;  %v5848_v31 = vld [vmem:[%s14362_s6 + $0x38] sm:$0xff] }
 0x8c2   : > { %8133 = vmatprep.mubr.msk.f32.mxu1 %vm410_vm0, %v9545_v39  ;;  %v5132_v44 = vadd.f32 %v8514_v16, %v12860_v4  ;;  %v5126_v58 = vpop.f32.mrb[125].mxu1  ;;  %v14726_v16 = vmov 0.0  }
 0x8c3   : > { %v5127_v14 = vadd.f32 %v5126_v58, %v12860_v4  ;;  %8567 = vmatprep.mubr.msk.f32.mxu0 %vm4516_vm3, %v5211_v8 }
 0x8c4   : > { %8568 = vmatmul.mubr.msk.f32.gmra.mrb[144].mxu0 %vm4516_vm3, %v5212_v20  ;;  %v5214_v26 = vmax.f32 %v5132_v44, 0.0  ;;  %v8953_v20 = vpack.c.bf16 %v5843_v25, %v5841_v5 }
 0x8c5   : > { %5821 = vmatmul.mubr.f32.gmra.mrb[194].mxu1 %v9546_v0  ;;  %v5213_v62 = vmax.f32 %v5127_v14, 0.0  ;;  %v8517_v27 = vpop.f32.mrb[126].mxu1  ;;  %v5845_v14 = vld [vmem:[%s14362_s6 + $0x20] sm:$0xff]  ;;  %v5847_v0 = vld [vmem:[%s14362_s6 + $0x30] sm:$0xff] }
 0x8c6   : > { %8134 = vmatprep.mubr.msk.f32.mxu1 %vm410_vm0, %v9547_v1  ;;  %v5142_v56 = vadd.f32 %v8517_v27, %v12860_v4  ;;  %v5136_v63 = vpop.f32.mrb[127].mxu1  ;;  %v8957_v1 = vpack.c.bf16 %v5847_v0, %v5845_v14 }
 0x8c7   : > { %v5137_v50 = vadd.f32 %v5136_v63, %v12860_v4  ;;  %8570 = vmatprep.mubr.msk.f32.mxu0 %vm4516_vm3, %v5213_v62 }
 0x8c8   : > { %8571 = vmatmul.mubr.msk.f32.gmra.mrb[146].mxu0 %vm4516_vm3, %v5214_v26  ;;  %v5216_v13 = vmax.f32 %v5142_v56, 0.0  ;;  %v5850_v56 = vld [vmem:[%s14362_s6 + $0x48] sm:$0xff] }
 0x8c9   : > { %5826 = vmatmul.mubr.f32.gmra.mrb[196].mxu1 %v9548_v51  ;;  %v5215_v9 = vmax.f32 %v5137_v50, 0.0  ;;  %v8520_v32 = vpop.f32.mrb[128].mxu1 }
 0x8ca   : > { %8135 = vmatprep.mubr.msk.f32.mxu1 %vm410_vm0, %v9549_v11  ;;  %v5152_v38 = vadd.f32 %v8520_v32, %v12860_v4  ;;  %v5146_v21 = vpop.f32.mrb[129].mxu1 }
 0x8cb   : > { %v5147_v60 = vadd.f32 %v5146_v21, %v12860_v4  ;;  %8573 = vmatprep.mubr.msk.f32.mxu0 %vm4516_vm3, %v5215_v9  ;;  %v5849_v9 = vld [vmem:[%s14362_s6 + $0x40] sm:$0xff] }
 0x8cc   : > { %8574 = vmatmul.mubr.msk.f32.gmra.mrb[148].mxu0 %vm4516_vm3, %v5216_v13  ;;  %v5218_v17 = vmax.f32 %v5152_v38, 0.0 }
 0x8cd   : > { %5831 = vmatmul.mubr.f32.gmra.mrb[198].mxu1 %v9550_v19  ;;  %v5217_v10 = vmax.f32 %v5147_v60, 0.0  ;;  %v8523_v40 = vpop.f32.mrb[130].mxu1 }
 0x8ce   : > { %8136 = vmatprep.mubr.msk.f32.mxu1 %vm410_vm0, %v9551_v34  ;;  %v5162_v12 = vadd.f32 %v8523_v40, %v12860_v4  ;;  %v5156_v45 = vpop.f32.mrb[131].mxu1 }
 0x8cf   : > { %v5157_v48 = vadd.f32 %v5156_v45, %v12860_v4  ;;  %8576 = vmatprep.mubr.msk.f32.mxu0 %vm4516_vm3, %v5217_v10 }
 0x8d0   : > { %8577 = vmatmul.mubr.msk.f32.gmra.mrb[150].mxu0 %vm4516_vm3, %v5218_v17  ;;  %v5220_v15 = vmax.f32 %v5162_v12, 0.0 }
 0x8d1   : > { %5836 = vmatmul.mubr.f32.gmra.mrb[200].mxu1 %v9552_v23  ;;  %v5219_v22 = vmax.f32 %v5157_v48, 0.0  ;;  %v8526_v53 = vpop.f32.mrb[132].mxu1 }
 0x8d2   : > { %v5172_v36 = vadd.f32 %v8526_v53, %v12860_v4  ;;  %v5166_v37 = vpop.f32.mrb[133].mxu1 }
 0x8d3   : > { %v5167_v29 = vadd.f32 %v5166_v37, %v12860_v4  ;;  %8579 = vmatprep.mubr.msk.f32.mxu0 %vm4516_vm3, %v5219_v22 }
 0x8d4   : > { %8580 = vmatmul.mubr.msk.f32.gmra.mrb[152].mxu0 %vm4516_vm3, %v5220_v15  ;;  %v5222_v46 = vmax.f32 %v5172_v36, 0.0 }
 0x8d5   : > { %v5221_v57 = vmax.f32 %v5167_v29, 0.0  ;;  %v8529_v52 = vpop.f32.mrb[134].mxu1 }
 0x8d6   : > { %v5182_v42 = vadd.f32 %v8529_v52, %v12860_v4  ;;  %v5176_v28 = vpop.f32.mrb[135].mxu1 }
 0x8d7   : > { %v5177_v43 = vadd.f32 %v5176_v28, %v12860_v4  ;;  %8582 = vmatprep.mubr.msk.f32.mxu0 %vm4516_vm3, %v5221_v57 }
 0x8d8   : > { %8583 = vmatmul.mubr.msk.f32.gmra.mrb[154].mxu0 %vm4516_vm3, %v5222_v46  ;;  %v5224_v30 = vmax.f32 %v5182_v42, 0.0 }
 0x8d9   : > { %v5223_v55 = vmax.f32 %v5177_v43, 0.0 }
 0x8db   : > { %8585 = vmatprep.mubr.msk.f32.mxu0 %vm4516_vm3, %v5223_v55 }
 0x8dc   : > { %8586 = vmatmul.mubr.msk.f32.gmra.mrb[156].mxu0 %vm4516_vm3, %v5224_v30 }
 0x924   : > { %v8532_v3 = vpop.f32.mrb[136].mxu1 }
 0x925   : > { %v5192_v35 = vadd.f32 %v8532_v3, %v12860_v4  ;;  %v5186_v49 = vpop.f32.mrb[137].mxu1 }
 0x926   : > { %v5187_v61 = vadd.f32 %v5186_v49, %v12860_v4  ;;  %v5846_v4 = vld [vmem:[%s14362_s6 + $0x28] sm:$0xff] }
 0x927   : > { %v5226_v24 = vmax.f32 %v5192_v35, 0.0  ;;  %v8955_v58 = vpack.c.bf16 %v5848_v31, %v5846_v4 }
 0x928   : > { %v5225_v47 = vmax.f32 %v5187_v61, 0.0  ;;  %v5682_v33 = vpop.f32.mrb[138].mxu1 }
 0x929   : > { %v5684_v7 = vpop.f32.mrb[139].mxu1  ;;  %v5683_v8 = vadd.f32 %v5682_v33, %v13011_v6 }
 0x92a   : > { %8588 = vmatprep.mubr.msk.f32.mxu0 %vm4516_vm3, %v5225_v47 }
 0x92b   : > { %8589 = vmatmul.mubr.msk.f32.gmra.mrb[158].mxu0 %vm4516_vm3, %v5226_v24 }
 0x92c   : > { %6021 = vmatprep.mubr.f32.mxu0 %v14726_v16  ;;  %v5687_v39 = vpop.f32.mrb[140].mxu1 }
 0x92d   : > { %v5689_v44 = vpop.f32.mrb[141].mxu1  ;;  %v5688_v62 = vadd.f32 %v5687_v39, %v13011_v6 }
 0x92f   : > { %8137 = vmatmul.mubr.msk.f32.vlgmr.msra.gmra.mrb[160].mxu0 %vm4516_vm3, %v5683_v8 }
 0x930   : > { %8954 = vmatpush1.bf16.msra.mxu0 %v8953_v20  ;;  %6027 = vmatprep.mubr.f32.mxu0 %v14726_v16  ;;  %v5692_v27 = vpop.f32.mrb[142].mxu1 }
 0x931   : > { %v5694_v26 = vpop.f32.mrb[143].mxu1  ;;  %8956 = vmatprep.subr.bf16.mxu0 %v8955_v58  ;;  %v5693_v63 = vadd.f32 %v5692_v27, %v13011_v6 }
 0x933   : > { %8138 = vmatmul.mubr.msk.f32.gmra.mrb[162].mxu0 %vm4516_vm3, %v5688_v62 }
 0x934   : > { %6033 = vmatprep.mubr.f32.mxu0 %v14726_v16  ;;  %v5697_v50 = vpop.f32.mrb[144].mxu1  ;;  %8958 = vmatpush1.bf16.msra.mxu0 %v8957_v1 }
 0x935   : > { %v5699_v51 = vpop.f32.mrb[145].mxu1  ;;  %6318 = vmatprep.subr.mxu0 %v5850_v56  ;;  %v5698_v32 = vadd.f32 %v5697_v50, %v13011_v6 }
 0x937   : > { %8139 = vmatmul.mubr.msk.f32.gmra.mrb[164].mxu0 %vm4516_vm3, %v5693_v63 }
 0x938   : > { %6039 = vmatprep.mubr.f32.mxu0 %v14726_v16  ;;  %v5702_v11 = vpop.f32.mrb[146].mxu1  ;;  %6319 = vmatpush1.msra.mxu0 %v5849_v9 }
 0x939   : > { %v5704_v13 = vpop.f32.mrb[147].mxu1  ;;  %v5703_v38 = vadd.f32 %v5702_v11, %v13011_v6 }
 0x93b   : > { %8140 = vmatmul.mubr.msk.f32.gmra.mrb[166].mxu0 %vm4516_vm3, %v5698_v32 }
 0x93c   : > { %6045 = vmatprep.mubr.f32.mxu0 %v14726_v16  ;;  %v5707_v21 = vpop.f32.mrb[148].mxu1 }
 0x93d   : > { %v5709_v60 = vpop.f32.mrb[149].mxu1  ;;  %v5708_v19 = vadd.f32 %v5707_v21, %v13011_v6 }
 0x93f   : > { %8141 = vmatmul.mubr.msk.f32.gmra.mrb[168].mxu0 %vm4516_vm3, %v5703_v38 }
 0x940   : > { %6051 = vmatprep.mubr.f32.mxu0 %v14726_v16  ;;  %v5712_v10 = vpop.f32.mrb[150].mxu1 }
 0x941   : > { %v5714_v40 = vpop.f32.mrb[151].mxu1  ;;  %v5713_v34 = vadd.f32 %v5712_v10, %v13011_v6 }
 0x943   : > { %8142 = vmatmul.mubr.msk.f32.gmra.mrb[170].mxu0 %vm4516_vm3, %v5708_v19 }
 0x944   : > { %6057 = vmatprep.mubr.f32.mxu0 %v14726_v16  ;;  %v5717_v17 = vpop.f32.mrb[152].mxu1 }
 0x945   : > { %v5719_v12 = vpop.f32.mrb[153].mxu1  ;;  %v5718_v45 = vadd.f32 %v5717_v17, %v13011_v6 }
 0x947   : > { %8143 = vmatmul.mubr.msk.f32.gmra.mrb[172].mxu0 %vm4516_vm3, %v5713_v34 }
 0x948   : > { %6063 = vmatprep.mubr.f32.mxu0 %v14726_v16  ;;  %v5722_v48 = vpop.f32.mrb[154].mxu1 }
 0x949   : > { %v5724_v23 = vpop.f32.mrb[155].mxu1  ;;  %v5723_v22 = vadd.f32 %v5722_v48, %v13011_v6 }
 0x94b   : > { %8144 = vmatmul.mubr.msk.f32.gmra.mrb[174].mxu0 %vm4516_vm3, %v5718_v45 }
 0x94c   : > { %6069 = vmatprep.mubr.f32.mxu0 %v14726_v16  ;;  %v5727_v53 = vpop.f32.mrb[156].mxu1 }
 0x94d   : > { %v5729_v15 = vpop.f32.mrb[157].mxu1  ;;  %v5728_v36 = vadd.f32 %v5727_v53, %v13011_v6 }
 0x94f   : > { %8145 = vmatmul.mubr.msk.f32.gmra.mrb[176].mxu0 %vm4516_vm3, %v5723_v22 }
 0x950   : > { %6075 = vmatprep.mubr.f32.mxu0 %v14726_v16  ;;  %v5732_v37 = vpop.f32.mrb[158].mxu1 }
 0x951   : > { %v5734_v29 = vpop.f32.mrb[159].mxu1  ;;  %v5733_v57 = vadd.f32 %v5732_v37, %v13011_v6 }
 0x953   : > { %8146 = vmatmul.mubr.msk.f32.gmra.mrb[178].mxu0 %vm4516_vm3, %v5728_v36 }
 0x954   : > { %6081 = vmatprep.mubr.f32.mxu0 %v14726_v16  ;;  %v5737_v52 = vpop.f32.mrb[160].mxu1 }
 0x955   : > { %v5739_v46 = vpop.f32.mrb[161].mxu1  ;;  %v5738_v42 = vadd.f32 %v5737_v52, %v13011_v6 }
 0x957   : > { %8147 = vmatmul.mubr.msk.f32.gmra.mrb[180].mxu0 %vm4516_vm3, %v5733_v57 }
 0x958   : > { %6087 = vmatprep.mubr.f32.mxu0 %v14726_v16  ;;  %v5742_v28 = vpop.f32.mrb[162].mxu1 }
 0x959   : > { %v5744_v43 = vpop.f32.mrb[163].mxu1  ;;  %v5743_v55 = vadd.f32 %v5742_v28, %v13011_v6 }
 0x95b   : > { %8148 = vmatmul.mubr.msk.f32.gmra.mrb[182].mxu0 %vm4516_vm3, %v5738_v42 }
 0x95c   : > { %6093 = vmatprep.mubr.f32.mxu0 %v14726_v16  ;;  %v5747_v30 = vpop.f32.mrb[164].mxu1 }
 0x95d   : > { %v5749_v41 = vpop.f32.mrb[165].mxu1  ;;  %v5748_v3 = vadd.f32 %v5747_v30, %v13011_v6 }
 0x95f   : > { %8149 = vmatmul.mubr.msk.f32.gmra.mrb[184].mxu0 %vm4516_vm3, %v5743_v55 }
 0x960   : > { %6099 = vmatprep.mubr.f32.mxu0 %v14726_v16  ;;  %v5752_v35 = vpop.f32.mrb[166].mxu1 }
 0x961   : > { %v5754_v49 = vpop.f32.mrb[167].mxu1  ;;  %v5753_v61 = vadd.f32 %v5752_v35, %v13011_v6 }
 0x963   : > { %8150 = vmatmul.mubr.msk.f32.gmra.mrb[186].mxu0 %vm4516_vm3, %v5748_v3 }
 0x964   : > { %6105 = vmatprep.mubr.f32.mxu0 %v14726_v16  ;;  %v5757_v47 = vpop.f32.mrb[168].mxu1 }
 0x965   : > { %v13083_v33 = vpop.f32.mrb[128].mxu0  ;;  %v5759_v24 = vpop.f32.mrb[169].mxu1  ;;  %v5758_v5 = vadd.f32 %v5757_v47, %v13011_v6 }
 0x966   : > { %v13085_v7 = vpop.f32.mrb[129].mxu0 }
 0x967   : > { %8151 = vmatmul.mubr.msk.f32.gmra.mrb[188].mxu0 %vm4516_vm3, %v5753_v61 }
 0x968   : > { %6111 = vmatprep.mubr.f32.mxu0 %v14726_v16  ;;  %v5762_v25 = vpop.f32.mrb[170].mxu1 }
 0x969   : > { %v5764_v4 = vpop.f32.mrb[171].mxu1  ;;  %v5763_v31 = vadd.f32 %v5762_v25, %v13011_v6 }
 0x96b   : > { %8152 = vmatmul.mubr.msk.f32.gmra.mrb[190].mxu0 %vm4516_vm3, %v5758_v5 }
 0x96c   : > { %6117 = vmatprep.mubr.f32.mxu0 %v14726_v16  ;;  %v5767_v8 = vpop.f32.mrb[172].mxu1 }
 0x96d   : > { %v13093_v39 = vpop.f32.mrb[130].mxu0  ;;  %v5769_v20 = vpop.f32.mrb[173].mxu1  ;;  %v5768_v58 = vadd.f32 %v5767_v8, %v13011_v6 }
 0x96e   : > { %v13095_v44 = vpop.f32.mrb[131].mxu0 }
 0x96f   : > { %8153 = vmatmul.mubr.msk.f32.gmra.mrb[192].mxu0 %vm4516_vm3, %v5763_v31 }
 0x970   : > { %6123 = vmatprep.mubr.f32.mxu0 %v14726_v16  ;;  %v5772_v14 = vpop.f32.mrb[174].mxu1 }
 0x971   : > { %v5774_v0 = vpop.f32.mrb[175].mxu1  ;;  %v5773_v62 = vadd.f32 %v5772_v14, %v13011_v6  ;;  %v5229_v14 = vsub.s32 5, %v12366_v2 }
 0x973   : > { %8154 = vmatmul.mubr.msk.f32.gmra.mrb[194].mxu0 %vm4516_vm3, %v5768_v58 }
 0x974   : > { %6129 = vmatprep.mubr.f32.mxu0 %v14726_v16  ;;  %v5777_v27 = vpop.f32.mrb[176].mxu1 }
 0x975   : > { %v13103_v1 = vpop.f32.mrb[132].mxu0  ;;  %v5779_v26 = vpop.f32.mrb[177].mxu1  ;;  %v5778_v63 = vadd.f32 %v5777_v27, %v13011_v6 }
 0x976   : > { %v13105_v56 = vpop.f32.mrb[133].mxu0 }
 0x977   : > { %8155 = vmatmul.mubr.msk.f32.gmra.mrb[196].mxu0 %vm4516_vm3, %v5773_v62 }
 0x978   : > { %6135 = vmatprep.mubr.f32.mxu0 %v14726_v16  ;;  %v5782_v50 = vpop.f32.mrb[178].mxu1 }
 0x979   : > { %v5784_v51 = vpop.f32.mrb[179].mxu1  ;;  %v5783_v9 = vadd.f32 %v5782_v50, %v13011_v6  ;;  %v13179_v50 = vrot.slane %v12857_v54, %v5229_v14 }
 0x97b   : > { %8156 = vmatmul.mubr.msk.f32.gmra.mrb[198].mxu0 %vm4516_vm3, %v5778_v63 }
 0x97c   : > { %6141 = vmatprep.mubr.f32.mxu0 %v14726_v16  ;;  %v5787_v32 = vpop.f32.mrb[180].mxu1 }
 0x97d   : > { %v13113_v11 = vpop.f32.mrb[134].mxu0  ;;  %v5789_v13 = vpop.f32.mrb[181].mxu1  ;;  %v5788_v21 = vadd.f32 %v5787_v32, %v13011_v6 }
 0x97e   : > { %v13115_v38 = vpop.f32.mrb[135].mxu0 }
 0x97f   : > { %8157 = vmatmul.mubr.msk.f32.gmra.mrb[200].mxu0 %vm4516_vm3, %v5783_v9 }
 0x980   : > { %6147 = vmatprep.mubr.f32.mxu0 %v14726_v16  ;;  %v5792_v60 = vpop.f32.mrb[182].mxu1 }
 0x981   : > { %v5794_v19 = vpop.f32.mrb[183].mxu1  ;;  %v5793_v10 = vadd.f32 %v5792_v60, %v13011_v6 }
 0x983   : > { %8158 = vmatmul.mubr.msk.f32.gmra.mrb[202].mxu0 %vm4516_vm3, %v5788_v21  ;;  %v5394_v21 = vadd.f32 %v13085_v7, %v13179_v50 }
 0x984   : > { %6153 = vmatprep.mubr.f32.mxu0 %v14726_v16  ;;  %v5797_v40 = vpop.f32.mrb[184].mxu1 }
 0x985   : > { %v13123_v34 = vpop.f32.mrb[136].mxu0  ;;  %v5799_v17 = vpop.f32.mrb[185].mxu1  ;;  %v5798_v45 = vadd.f32 %v5797_v40, %v13011_v6  ;;  %v5552_v19 = vmax.f32 %v5394_v21, 0.0 }
 0x986   : > { %v13125_v12 = vpop.f32.mrb[137].mxu0  ;;  %v5404_v17 = vadd.f32 %v13095_v44, %v13179_v50  ;;  %v5419_v44 = vadd.f32 %v13103_v1, %v13179_v50 }
 0x987   : > { %8159 = vmatmul.mubr.msk.f32.gmra.mrb[204].mxu0 %vm4516_vm3, %v5793_v10 }
 0x988   : > { %6159 = vmatprep.mubr.f32.mxu0 %v14726_v16  ;;  %v5802_v48 = vpop.f32.mrb[186].mxu1 }
 0x989   : > { %v5804_v23 = vpop.f32.mrb[187].mxu1  ;;  %v5803_v53 = vadd.f32 %v5802_v48, %v13011_v6  ;;  %v5554_v48 = vmax.f32 %v5404_v17, 0.0 }
 0x98b   : > { %v13130_v22 = vpop.f32.mrb[138].mxu0  ;;  %8160 = vmatmul.mubr.msk.f32.gmra.mrb[206].mxu0 %vm4516_vm3, %v5798_v45 }
 0x98c   : > { %v13134_v15 = vpop.f32.mrb[139].mxu0  ;;  %6165 = vmatprep.mubr.f32.mxu0 %v14726_v16  ;;  %v5807_v36 = vpop.f32.mrb[188].mxu1 }
 0x98d   : > { %v5809_v37 = vpop.f32.mrb[189].mxu1  ;;  %v5808_v29 = vadd.f32 %v5807_v36, %v13011_v6 }
 0x98e   : > { %v5424_v37 = vadd.f32 %v13115_v38, %v13179_v50  ;;  %v5439_v38 = vadd.f32 %v13123_v34, %v13179_v50 }
 0x98f   : > { %8161 = vmatmul.mubr.msk.f32.gmra.mrb[208].mxu0 %vm4516_vm3, %v5803_v53  ;;  %v13139_v57 = vpop.f32.mrb[140].mxu0  ;;  %v5414_v53 = vadd.f32 %v13105_v56, %v13179_v50  ;;  %v5429_v56 = vadd.f32 %v13113_v11, %v13179_v50 }
 0x990   : > { %6171 = vmatprep.mubr.f32.mxu0 %v14726_v16  ;;  %v5812_v52 = vpop.f32.mrb[190].mxu1  ;;  %v13142_v46 = vpop.f32.mrb[141].mxu0  ;;  %v5561_v11 = vmax.f32 %v5439_v38, 0.0 }
 0x991   : > { %v5814_v42 = vpop.f32.mrb[191].mxu1  ;;  %v5813_v28 = vadd.f32 %v5812_v52, %v13011_v6  ;;  %v5556_v36 = vmax.f32 %v5414_v53, 0.0  ;;  %v5559_v1 = vmax.f32 %v5429_v56, 0.0  ;;  %v5434_v52 = vadd.f32 %v13125_v12, %v13179_v50  ;;  %v379_v53 = vld [vmem:[%s14363_s7 + $0x8] sm:$0xff] }
 0x992   : > { %v5449_v12 = vadd.f32 %v13130_v22, %v13179_v50  ;;  %v9554_v56 = vld [vmem:[%s9709_s23 + $0x8] sm:$0xff] }
 0x993   : > { %8162 = vmatmul.mubr.msk.f32.gmra.mrb[210].mxu0 %vm4516_vm3, %v5808_v29  ;;  %v13146_v43 = vpop.f32.mrb[142].mxu0  ;;  %v5558_v29 = vmax.f32 %v5424_v37, 0.0  ;;  %v5560_v42 = vmax.f32 %v5434_v52, 0.0  ;;  %v9555_v52 = vld [vmem:[%s9709_s23] sm:$0xff] }
 0x994   : > { %6177 = vmatprep.mubr.f32.mxu0 %v14726_v16  ;;  %v5817_v55 = vpop.f32.mrb[192].mxu1  ;;  %v13149_v30 = vpop.f32.mrb[143].mxu0  ;;  %v5563_v34 = vmax.f32 %v5449_v12, 0.0 }
 0x995   : > { %v5819_v41 = vpop.f32.mrb[193].mxu1  ;;  %v5818_v3 = vadd.f32 %v5817_v55, %v13011_v6 }
 0x996   : > { %v5454_v41 = vadd.f32 %v13142_v46, %v13179_v50  ;;  %v5469_v46 = vadd.f32 %v13146_v43, %v13179_v50 }
 0x997   : > { %8163 = vmatmul.mubr.msk.f32.gmra.mrb[212].mxu0 %vm4516_vm3, %v5813_v28  ;;  %v13153_v35 = vpop.f32.mrb[144].mxu0  ;;  %v5444_v28 = vadd.f32 %v13134_v15, %v13179_v50  ;;  %v5459_v15 = vadd.f32 %v13139_v57, %v13179_v50 }
 0x998   : > { %6183 = vmatprep.mubr.f32.mxu0 %v14726_v16  ;;  %v5822_v49 = vpop.f32.mrb[194].mxu1  ;;  %v13156_v61 = vpop.f32.mrb[145].mxu0  ;;  %v5567_v57 = vmax.f32 %v5469_v46, 0.0 }
 0x999   : > { %v5824_v47 = vpop.f32.mrb[195].mxu1  ;;  %v5823_v24 = vadd.f32 %v5822_v49, %v13011_v6  ;;  %v5562_v55 = vmax.f32 %v5444_v28, 0.0  ;;  %v5565_v22 = vmax.f32 %v5459_v15, 0.0  ;;  %v5464_v49 = vadd.f32 %v13149_v30, %v13179_v50 }
 0x99a   : > { %v5479_v30 = vadd.f32 %v13153_v35, %v13179_v50 }
 0x99b   : > { %8164 = vmatmul.mubr.msk.f32.gmra.mrb[214].mxu0 %vm4516_vm3, %v5818_v3  ;;  %v13160_v5 = vpop.f32.mrb[146].mxu0  ;;  %v5564_v3 = vmax.f32 %v5454_v41, 0.0  ;;  %v5566_v47 = vmax.f32 %v5464_v49, 0.0 }
 0x99c   : > { %6189 = vmatprep.mubr.f32.mxu0 %v14726_v16  ;;  %v5827_v25 = vpop.f32.mrb[196].mxu1  ;;  %v13163_v4 = vpop.f32.mrb[147].mxu0  ;;  %v5569_v43 = vmax.f32 %v5479_v30, 0.0  ;;  %v9558_v30 = vld [vmem:[%s9709_s23 + $0x28] sm:$0xff] }
 0x99d   : > { %v5829_v31 = vpop.f32.mrb[197].mxu1  ;;  %v5828_v8 = vadd.f32 %v5827_v25, %v13011_v6 }
 0x99e   : > { %v5484_v31 = vadd.f32 %v13163_v4, %v13179_v50 }
 0x99f   : > { %8165 = vmatmul.mubr.msk.f32.gmra.mrb[216].mxu0 %vm4516_vm3, %v5823_v24  ;;  %v13167_v20 = vpop.f32.mrb[148].mxu0  ;;  %v5474_v24 = vadd.f32 %v13156_v61, %v13179_v50  ;;  %v5489_v61 = vadd.f32 %v13160_v5, %v13179_v50 }
 0x9a0   : > { %6195 = vmatprep.mubr.f32.mxu0 %v14726_v16  ;;  %v5832_v58 = vpop.f32.mrb[198].mxu1  ;;  %v13171_v0 = vpop.f32.mrb[149].mxu0  ;;  %v5499_v4 = vadd.f32 %v13167_v20, %v13179_v50 }
 0x9a1   : > { %v5834_v62 = vpop.f32.mrb[199].mxu1  ;;  %v5833_v27 = vadd.f32 %v5832_v58, %v13011_v6  ;;  %v5568_v25 = vmax.f32 %v5474_v24, 0.0  ;;  %v5571_v35 = vmax.f32 %v5489_v61, 0.0  ;;  %v5494_v58 = vadd.f32 %v13171_v0, %v13179_v50 }
 0x9a2   : > { %v5573_v5 = vmax.f32 %v5499_v4, 0.0 }
 0x9a3   : > { %8166 = vmatmul.mubr.msk.f32.gmra.mrb[218].mxu0 %vm4516_vm3, %v5828_v8  ;;  %v13175_v26 = vpop.f32.mrb[150].mxu0  ;;  %v5570_v8 = vmax.f32 %v5484_v31, 0.0  ;;  %v5572_v14 = vmax.f32 %v5494_v58, 0.0  ;;  %v9559_v31 = vld [vmem:[%s9709_s23 + $0x20] sm:$0xff] }
 0x9a4   : > { %6201 = vmatprep.mubr.f32.mxu0 %v14726_v16  ;;  %v5837_v63 = vpop.f32.mrb[200].mxu1  ;;  %v13181_v51 = vpop.f32.mrb[151].mxu0  ;;  %v5509_v0 = vadd.f32 %v13175_v26, %v13179_v50 }
 0x9a5   : > { %v5839_v9 = vpop.f32.mrb[201].mxu1  ;;  %v5838_v32 = vadd.f32 %v5837_v63, %v13011_v6  ;;  %v5399_v6 = vadd.f32 %v13083_v33, %v13179_v50  ;;  %v5409_v33 = vadd.f32 %v13093_v39, %v13179_v50  ;;  %v5557_v39 = vmax.f32 %v5419_v44, 0.0  ;;  %v9553_v44 = vld [vmem:[%s14363_s7] sm:$0xff] }
 0x9a6   : > { %v5504_v63 = vadd.f32 %v13181_v51, %v13179_v50  ;;  %v5575_v20 = vmax.f32 %v5509_v0, 0.0 }
 0x9a7   : > { %8167 = vmatmul.mubr.msk.f32.gmra.mrb[220].mxu0 %vm4516_vm3, %v5833_v27  ;;  %v13185_v13 = vpop.f32.mrb[152].mxu0  ;;  %v5553_v7 = vmax.f32 %v5399_v6, 0.0  ;;  %v5555_v23 = vmax.f32 %v5409_v33, 0.0 }
 0x9a8   : > { %6207 = vmatprep.mubr.f32.mxu0 %v14726_v16  ;;  %v13190_v60 = vpop.f32.mrb[153].mxu0  ;;  %v5574_v9 = vmax.f32 %v5504_v63, 0.0  ;;  %v5519_v51 = vadd.f32 %v13185_v13, %v13179_v50  ;;  %v9561_v63 = vld [vmem:[%s9709_s23 + $0x30] sm:$0xff] }
 0x9aa   : > { %v5577_v26 = vmax.f32 %v5519_v51, 0.0 }
 0x9ab   : > { %8168 = vmatmul.mubr.msk.f32.gmra.mrb[222].mxu0 %vm4516_vm3, %v5838_v32  ;;  %v13193_v54 = vpop.f32.mrb[154].mxu0  ;;  %v5514_v32 = vadd.f32 %v13190_v60, %v13179_v50 }
 0x9ac   : > { %6374 = vmatprep.mubr.f32.mxu0 %v14726_v16  ;;  %v13198_v10 = vpop.f32.mrb[155].mxu0  ;;  %v5529_v60 = vadd.f32 %v13193_v54, %v13179_v50 }
 0x9ad   : > { %v5576_v21 = vmax.f32 %v5514_v32, 0.0  ;;  %v5524_v6 = vadd.f32 %v13198_v10, %v13179_v50 }
 0x9ae   : > { %v5579_v13 = vmax.f32 %v5529_v60, 0.0 }
 0x9af   : > { %8169 = vmatmul.mubr.msk.f32.vlgmr.msra.gmra.mrb[160].mxu0 %vm4516_vm3, %v5552_v19  ;;  %v13201_v40 = vpop.f32.mrb[156].mxu0  ;;  %v5578_v19 = vmax.f32 %v5524_v6, 0.0 }
 0x9b0   : > { %6380 = vmatprep.mubr.f32.mxu0 %v14726_v16  ;;  %v13206_v45 = vpop.f32.mrb[157].mxu0  ;;  %v5539_v10 = vadd.f32 %v13201_v40, %v13179_v50 }
 0x9b2   : > { %v5581_v54 = vmax.f32 %v5539_v10, 0.0 }
 0x9b3   : > { %8170 = vmatmul.mubr.msk.f32.gmra.mrb[162].mxu0 %vm4516_vm3, %v5553_v7  ;;  %v5534_v7 = vadd.f32 %v13206_v45, %v13179_v50 }
 0x9b4   : > { %6386 = vmatprep.mubr.f32.mxu0 %v14726_v16 }
 0x9b5   : > { %v5580_v17 = vmax.f32 %v5534_v7, 0.0 }
 0x9b7   : > { %8171 = vmatmul.mubr.msk.f32.gmra.mrb[164].mxu0 %vm4516_vm3, %v5554_v48 }
 0x9b8   : > { %6392 = vmatprep.mubr.f32.mxu0 %v14726_v16 }
 0x9bb   : > { %8172 = vmatmul.mubr.msk.f32.gmra.mrb[166].mxu0 %vm4516_vm3, %v5555_v23  ;;  %v6569_v23 = vsub.s32 7, %v12366_v2 }
 0x9bc   : > { %6398 = vmatprep.mubr.f32.mxu0 %v14726_v16 }
 0x9bf   : > { %8173 = vmatmul.mubr.msk.f32.gmra.mrb[168].mxu0 %vm4516_vm3, %v5556_v36  ;;  %v13334_v36 = vrot.slane %v379_v53, %v6569_v23 }
 0x9c0   : > { %6404 = vmatprep.mubr.f32.mxu0 %v14726_v16 }
 0x9c3   : > { %8174 = vmatmul.mubr.msk.f32.gmra.mrb[170].mxu0 %vm4516_vm3, %v5557_v39 }
 0x9c4   : > { %6410 = vmatprep.mubr.f32.mxu0 %v14726_v16 }
 0x9c7   : > { %8175 = vmatmul.mubr.msk.f32.gmra.mrb[172].mxu0 %vm4516_vm3, %v5558_v29 }
 0x9c8   : > { %6416 = vmatprep.mubr.f32.mxu0 %v14726_v16 }
 0x9cb   : > { %8176 = vmatmul.mubr.msk.f32.gmra.mrb[174].mxu0 %vm4516_vm3, %v5559_v1 }
 0x9cc   : > { %6422 = vmatprep.mubr.f32.mxu0 %v14726_v16 }
 0x9cf   : > { %8177 = vmatmul.mubr.msk.f32.gmra.mrb[176].mxu0 %vm4516_vm3, %v5560_v42 }
 0x9d0   : > { %6428 = vmatprep.mubr.f32.mxu0 %v14726_v16 }
 0x9d3   : > { %8178 = vmatmul.mubr.msk.f32.gmra.mrb[178].mxu0 %vm4516_vm3, %v5561_v11 }
 0x9d4   : > { %6434 = vmatprep.mubr.f32.mxu0 %v14726_v16 }
 0x9d7   : > { %8179 = vmatmul.mubr.msk.f32.gmra.mrb[180].mxu0 %vm4516_vm3, %v5562_v55 }
 0x9d8   : > { %6440 = vmatprep.mubr.f32.mxu0 %v14726_v16 }
 0x9db   : > { %8180 = vmatmul.mubr.msk.f32.gmra.mrb[182].mxu0 %vm4516_vm3, %v5563_v34  ;;  %v9556_v34 = vld [vmem:[%s9709_s23 + $0x18] sm:$0xff] }
 0x9dc   : > { %6446 = vmatprep.mubr.f32.mxu0 %v14726_v16 }
 0x9df   : > { %8181 = vmatmul.mubr.msk.f32.gmra.mrb[184].mxu0 %vm4516_vm3, %v5564_v3  ;;  %v9557_v3 = vld [vmem:[%s9709_s23 + $0x10] sm:$0xff] }
 0x9e0   : > { %6452 = vmatprep.mubr.f32.mxu0 %v14726_v16 }
 0x9e3   : > { %8182 = vmatmul.mubr.msk.f32.gmra.mrb[186].mxu0 %vm4516_vm3, %v5565_v22 }
 0x9e4   : > { %6458 = vmatprep.mubr.f32.mxu0 %v14726_v16 }
 0x9e7   : > { %8183 = vmatmul.mubr.msk.f32.gmra.mrb[188].mxu0 %vm4516_vm3, %v5566_v47 }
 0x9e8   : > { %6464 = vmatprep.mubr.f32.mxu0 %v14726_v16 }
 0x9eb   : > { %8184 = vmatmul.mubr.msk.f32.gmra.mrb[190].mxu0 %vm4516_vm3, %v5567_v57 }
 0x9ec   : > { %6470 = vmatprep.mubr.f32.mxu0 %v14726_v16 }
 0x9ef   : > { %8185 = vmatmul.mubr.msk.f32.gmra.mrb[192].mxu0 %vm4516_vm3, %v5568_v25 }
 0x9f0   : > { %6476 = vmatprep.mubr.f32.mxu0 %v14726_v16 }
 0x9f3   : > { %8186 = vmatmul.mubr.msk.f32.gmra.mrb[194].mxu0 %vm4516_vm3, %v5569_v43 }
 0x9f4   : > { %6482 = vmatprep.mubr.f32.mxu0 %v14726_v16 }
 0x9f7   : > { %8187 = vmatmul.mubr.msk.f32.gmra.mrb[196].mxu0 %vm4516_vm3, %v5570_v8 }
 0x9f8   : > { %6488 = vmatprep.mubr.f32.mxu0 %v14726_v16 }
 0x9fb   : > { %8188 = vmatmul.mubr.msk.f32.gmra.mrb[198].mxu0 %vm4516_vm3, %v5571_v35 }
 0x9fc   : > { %6494 = vmatprep.mubr.f32.mxu0 %v14726_v16 }
 0x9fe   : > { %v8590_v62 = vpop.f32.mrb[158].mxu0 }
 0x9ff   : > { %v5543_v27 = vpop.f32.mrb[159].mxu0  ;;  %8189 = vmatmul.mubr.msk.f32.gmra.mrb[200].mxu0 %vm4516_vm3, %v5572_v14  ;;  %v5549_v45 = vadd.f32 %v8590_v62, %v13179_v50  ;;  %v9560_v62 = vld [vmem:[%s9709_s23 + $0x38] sm:$0xff] }
 0xa00   : > { %6500 = vmatprep.mubr.f32.mxu0 %v14726_v16  ;;  %v5544_v33 = vadd.f32 %v5543_v27, %v13179_v50  ;;  %v13332_v50 = vrot.slane %v9553_v44, %v6569_v23  ;;  %v9565_v23 = vld [vmem:[%s9709_s23 + $0x50] sm:$0xff] }
 0xa01   : > { %v5583_v40 = vmax.f32 %v5549_v45, 0.0  ;;  %v9564_v45 = vld [vmem:[%s9709_s23 + $0x58] sm:$0xff] }
 0xa02   : > { %v5582_v48 = vmax.f32 %v5544_v33, 0.0 }
 0xa03   : > { %8190 = vmatmul.mubr.msk.f32.gmra.mrb[202].mxu0 %vm4516_vm3, %v5573_v5 }
 0xa04   : > { %6506 = vmatprep.mubr.f32.mxu0 %v14726_v16 }
 0xa07   : > { %8191 = vmatmul.mubr.msk.f32.gmra.mrb[204].mxu0 %vm4516_vm3, %v5574_v9 }
 0xa08   : > { %6512 = vmatprep.mubr.f32.mxu0 %v14726_v16 }
 0xa0b   : > { %8192 = vmatmul.mubr.msk.f32.gmra.mrb[206].mxu0 %vm4516_vm3, %v5575_v20 }
 0xa0c   : > { %6518 = vmatprep.mubr.f32.mxu0 %v14726_v16 }
 0xa0f   : > { %8193 = vmatmul.mubr.msk.f32.gmra.mrb[208].mxu0 %vm4516_vm3, %v5576_v21 }
 0xa10   : > { %6524 = vmatprep.mubr.f32.mxu0 %v14726_v16 }
 0xa13   : > { %8194 = vmatmul.mubr.msk.f32.gmra.mrb[210].mxu0 %vm4516_vm3, %v5577_v26  ;;  %v9562_v26 = vld [vmem:[%s9709_s23 + $0x48] sm:$0xff] }
 0xa14   : > { %6530 = vmatprep.mubr.f32.mxu0 %v14726_v16 }
 0xa17   : > { %8195 = vmatmul.mubr.msk.f32.gmra.mrb[212].mxu0 %vm4516_vm3, %v5578_v19  ;;  %v9563_v19 = vld [vmem:[%s9709_s23 + $0x40] sm:$0xff] }
 0xa18   : > { %6536 = vmatprep.mubr.f32.mxu0 %v14726_v16 }
 0xa1b   : > { %8196 = vmatmul.mubr.msk.f32.gmra.mrb[214].mxu0 %vm4516_vm3, %v5579_v13 }
 0xa1c   : > { %6542 = vmatprep.mubr.f32.mxu0 %v14726_v16 }
 0xa1f   : > { %8197 = vmatmul.mubr.msk.f32.gmra.mrb[216].mxu0 %vm4516_vm3, %v5580_v17 }
 0xa20   : > { %6548 = vmatprep.mubr.f32.mxu0 %v14726_v16 }
 0xa23   : > { %8198 = vmatmul.mubr.msk.f32.gmra.mrb[218].mxu0 %vm4516_vm3, %v5581_v54 }
 0xa24   : > { %6554 = vmatprep.mubr.f32.mxu0 %v14726_v16 }
 0xa27   : > { %8199 = vmatmul.mubr.msk.f32.gmra.mrb[220].mxu0 %vm4516_vm3, %v5582_v48 }
 0xa28   : > { %6560 = vmatprep.mubr.f32.mxu0 %v14726_v16 }
 0xa2b   : > { %8200 = vmatmul.mubr.msk.f32.gmra.mrb[222].mxu0 %vm4516_vm3, %v5583_v40 }
 0xa82   : > { %v6376_v39 = vpop.f32.mrb[160].mxu0 }
 0xa83   : > { %v6575_v16 = vadd.f32 %v13332_v50, %v6376_v39  ;;  %v6378_v37 = vpop.f32.mrb[161].mxu0 }
 0xa84   : > { %v6576_v2 = vadd.f32 %v13334_v36, %v6378_v37 }
 0xa85   : > { %v13342_v38 = vadd.f32 %v9555_v52, %v6575_v16 }
 0xa86   : > { %v13339_v29 = vadd.f32 %v9554_v56, %v6576_v2  ;;  %v6382_v1 = vpop.f32.mrb[162].mxu0  ;;  %v9566_v56 = vld [vmem:[%s9709_s23 + $0x68] sm:$0xff] }
 0xa87   : > { %v6577_v42 = vadd.f32 %v13332_v50, %v6382_v1  ;;  %v6384_v11 = vpop.f32.mrb[163].mxu0 }
 0xa88   : > { %v6578_v28 = vadd.f32 %v13334_v36, %v6384_v11  ;;  %v6703_v12 = vsel %vm410_vm0, %v13339_v29, 0.0 }
 0xa89   : > { %v6704_v55 = vadd.f32 %v6703_v12, %v13342_v38  ;;  %v13353_v22 = vadd.f32 %v9557_v3, %v6577_v42  ;;  %v9567_v42 = vld [vmem:[%s9709_s23 + $0x60] sm:$0xff]  ;;  %v9568_v3 = vld [vmem:[%s9709_s23 + $0x78] sm:$0xff] }
 0xa8a   : > { %v13350_v41 = vadd.f32 %v9556_v34, %v6578_v28  ;;  %v6388_v15 = vpop.f32.mrb[164].mxu0 }
 0xa8b   : > { %v6579_v49 = vadd.f32 %v13332_v50, %v6388_v15  ;;  %6705 = vadd.xlane.f32.xlu0 %v6704_v55  ;;  %v6390_v46 = vpop.f32.mrb[165].mxu0 }
 0xa8c   : > { %v6580_v47 = vadd.f32 %v13334_v36, %v6390_v46  ;;  %v6707_v57 = vsel %vm410_vm0, %v13350_v41, 0.0 }
 0xa8d   : > { %v6708_v24 = vadd.f32 %v6707_v57, %v13353_v22  ;;  %v13364_v61 = vadd.f32 %v9559_v31, %v6579_v49 }
 0xa8e   : > { %v13361_v25 = vadd.f32 %v9558_v30, %v6580_v47  ;;  %v6394_v43 = vpop.f32.mrb[166].mxu0  ;;  %v9569_v47 = vld [vmem:[%s9709_s23 + $0x70] sm:$0xff] }
 0xa8f   : > { %v6581_v8 = vadd.f32 %v13332_v50, %v6394_v43  ;;  %6709 = vadd.xlane.f32.xlu1 %v6708_v24  ;;  %v6396_v35 = vpop.f32.mrb[167].mxu0 }
 0xa90   : > { %v6582_v58 = vadd.f32 %v13334_v36, %v6396_v35  ;;  %v6711_v4 = vsel %vm410_vm0, %v13361_v25, 0.0  ;;  %v9570_v35 = vld [vmem:[%s9709_s23 + $0x88] sm:$0xff] }
 0xa91   : > { %v6712_v14 = vadd.f32 %v6711_v4, %v13364_v61  ;;  %v13375_v0 = vadd.f32 %v9561_v63, %v6581_v8 }
 0xa92   : > { %v13372_v27 = vadd.f32 %v9560_v62, %v6582_v58  ;;  %v6400_v5 = vpop.f32.mrb[168].mxu0 }
 0xa93   : > { %v6583_v9 = vadd.f32 %v13332_v50, %v6400_v5  ;;  %6713 = vadd.xlane.f32.xlu0 %v6712_v14  ;;  %v6402_v20 = vpop.f32.mrb[169].mxu0  ;;  %v9571_v14 = vld [vmem:[%s9709_s23 + $0x80] sm:$0xff] }
 0xa94   : > { %v6584_v32 = vadd.f32 %v13334_v36, %v6402_v20  ;;  %v6715_v51 = vsel %vm410_vm0, %v13372_v27, 0.0 }
 0xa95   : > { %v6716_v21 = vadd.f32 %v6715_v51, %v13375_v0  ;;  %v13386_v13 = vadd.f32 %v9563_v19, %v6583_v9  ;;  %v9572_v51 = vld [vmem:[%s9709_s23 + $0x98] sm:$0xff] }
 0xa96   : > { %v13383_v6 = vadd.f32 %v9562_v26, %v6584_v32  ;;  %v6406_v60 = vpop.f32.mrb[170].mxu0 }
 0xa97   : > { %v6585_v7 = vadd.f32 %v13332_v50, %v6406_v60  ;;  %6717 = vadd.xlane.f32.xlu1 %v6716_v21  ;;  %v6408_v10 = vpop.f32.mrb[171].mxu0  ;;  %v9573_v60 = vld [vmem:[%s9709_s23 + $0x90] sm:$0xff] }
 0xa98   : > { %v6586_v17 = vadd.f32 %v13334_v36, %v6408_v10  ;;  %v6719_v54 = vsel %vm410_vm0, %v13383_v6, 0.0 }
 0xa99   : > { %v6720_v33 = vadd.f32 %v6719_v54, %v13386_v13  ;;  %v13397_v53 = vadd.f32 %v9565_v23, %v6585_v7 }
 0xa9a   : > { %v13394_v48 = vadd.f32 %v9564_v45, %v6586_v17  ;;  %v6412_v40 = vpop.f32.mrb[172].mxu0  ;;  %v9574_v45 = vld [vmem:[%s9709_s23 + $0xa8] sm:$0xff] }
 0xa9b   : > { %v6587_v44 = vadd.f32 %v13332_v50, %v6412_v40  ;;  %6721 = vadd.xlane.f32.xlu0 %v6720_v33  ;;  %v6414_v39 = vpop.f32.mrb[173].mxu0 }
 0xa9c   : > { %v6588_v16 = vadd.f32 %v13334_v36, %v6414_v39  ;;  %v6723_v37 = vsel %vm410_vm0, %v13394_v48, 0.0 }
 0xa9d   : > { %v6724_v2 = vadd.f32 %v6723_v37, %v13397_v53  ;;  %v13408_v11 = vadd.f32 %v9567_v42, %v6587_v44  ;;  %v9575_v44 = vld [vmem:[%s9709_s23 + $0xa0] sm:$0xff]  ;;  %v9576_v42 = vld [vmem:[%s9709_s23 + $0xb8] sm:$0xff] }
 0xa9e   : > { %v13405_v1 = vadd.f32 %v9566_v56, %v6588_v16  ;;  %v6418_v52 = vpop.f32.mrb[174].mxu0 }
 0xa9f   : > { %v6589_v28 = vadd.f32 %v13332_v50, %v6418_v52  ;;  %6725 = vadd.xlane.f32.xlu1 %v6724_v2  ;;  %v6420_v12 = vpop.f32.mrb[175].mxu0 }
 0xaa0   : > { %v6590_v55 = vadd.f32 %v13334_v36, %v6420_v12  ;;  %v6727_v34 = vsel %vm410_vm0, %v13405_v1, 0.0 }
 0xaa1   : > { %v6728_v15 = vadd.f32 %v6727_v34, %v13408_v11  ;;  %v13419_v57 = vadd.f32 %v9569_v47, %v6589_v28 }
 0xaa2   : > { %v13416_v49 = vadd.f32 %v9568_v3, %v6590_v55  ;;  %v6424_v46 = vpop.f32.mrb[176].mxu0  ;;  %v9577_v55 = vld [vmem:[%s9709_s23 + $0xb0] sm:$0xff] }
 0xaa3   : > { %v6591_v24 = vadd.f32 %v13332_v50, %v6424_v46  ;;  %6729 = vadd.xlane.f32.xlu0 %v6728_v15  ;;  %v6426_v30 = vpop.f32.mrb[177].mxu0 }
 0xaa4   : > { %v6592_v43 = vadd.f32 %v13334_v36, %v6426_v30  ;;  %v6731_v31 = vsel %vm410_vm0, %v13416_v49, 0.0  ;;  %v9578_v30 = vld [vmem:[%s9709_s23 + $0xc8] sm:$0xff] }
 0xaa5   : > { %v6732_v8 = vadd.f32 %v6731_v31, %v13419_v57  ;;  %v13430_v62 = vadd.f32 %v9571_v14, %v6591_v24 }
 0xaa6   : > { %v13427_v58 = vadd.f32 %v9570_v35, %v6592_v43  ;;  %v6430_v4 = vpop.f32.mrb[178].mxu0 }
 0xaa7   : > { %v6593_v5 = vadd.f32 %v13332_v50, %v6430_v4  ;;  %6733 = vadd.xlane.f32.xlu1 %v6732_v8  ;;  %v6432_v63 = vpop.f32.mrb[179].mxu0  ;;  %v9579_v8 = vld [vmem:[%s9709_s23 + $0xc0] sm:$0xff] }
 0xaa8   : > { %v6594_v9 = vadd.f32 %v13334_v36, %v6432_v63  ;;  %v6735_v20 = vsel %vm410_vm0, %v13427_v58, 0.0 }
 0xaa9   : > { %v6736_v32 = vadd.f32 %v6735_v20, %v13430_v62  ;;  %v13441_v19 = vadd.f32 %v9573_v60, %v6593_v5  ;;  %v9580_v20 = vld [vmem:[%s9709_s23 + $0xd8] sm:$0xff] }
 0xaaa   : > { %v13438_v21 = vadd.f32 %v9572_v51, %v6594_v9  ;;  %v6436_v26 = vpop.f32.mrb[180].mxu0 }
 0xaab   : > { %v6595_v7 = vadd.f32 %v13332_v50, %v6436_v26  ;;  %6737 = vadd.xlane.f32.xlu0 %v6736_v32  ;;  %v6438_v10 = vpop.f32.mrb[181].mxu0  ;;  %v9581_v26 = vld [vmem:[%s9709_s23 + $0xd0] sm:$0xff] }
 0xaac   : > { %v6596_v17 = vadd.f32 %v13334_v36, %v6438_v10  ;;  %v6739_v54 = vsel %vm410_vm0, %v13438_v21, 0.0 }
 0xaad   : > { %v6740_v33 = vadd.f32 %v6739_v54, %v13441_v19  ;;  %v13452_v39 = vadd.f32 %v9575_v44, %v6595_v7 }
 0xaae   : > { %v13449_v40 = vadd.f32 %v9574_v45, %v6596_v17  ;;  %v6442_v23 = vpop.f32.mrb[182].mxu0  ;;  %v9582_v45 = vld [vmem:[%s9709_s23 + $0xe8] sm:$0xff] }
 0xaaf   : > { %v6597_v16 = vadd.f32 %v13332_v50, %v6442_v23  ;;  %6741 = vadd.xlane.f32.xlu1 %v6740_v33  ;;  %v6444_v37 = vpop.f32.mrb[183].mxu0 }
 0xab0   : > { %v6598_v2 = vadd.f32 %v13334_v36, %v6444_v37  ;;  %v6743_v56 = vsel %vm410_vm0, %v13449_v40, 0.0 }
 0xab1   : > { %v6744_v52 = vadd.f32 %v6743_v56, %v13452_v39  ;;  %v13463_v34 = vadd.f32 %v9577_v55, %v6597_v16  ;;  %v9583_v16 = vld [vmem:[%s9709_s23 + $0xe0] sm:$0xff]  ;;  %v9584_v55 = vld [vmem:[%s9709_s23 + $0xf8] sm:$0xff] }
 0xab2   : > { %v13460_v28 = vadd.f32 %v9576_v42, %v6598_v2  ;;  %v6448_v12 = vpop.f32.mrb[184].mxu0 }
 0xab3   : > { %v6599_v15 = vadd.f32 %v13332_v50, %v6448_v12  ;;  %6745 = vadd.xlane.f32.xlu0 %v6744_v52  ;;  %v6450_v3 = vpop.f32.mrb[185].mxu0 }
 0xab4   : > { %v6600_v46 = vadd.f32 %v13334_v36, %v6450_v3  ;;  %v6747_v47 = vsel %vm410_vm0, %v13460_v28, 0.0 }
 0xab5   : > { %v6748_v24 = vadd.f32 %v6747_v47, %v13463_v34  ;;  %v13474_v35 = vadd.f32 %v9579_v8, %v6599_v15 }
 0xab6   : > { %v13471_v43 = vadd.f32 %v9578_v30, %v6600_v46  ;;  %v6454_v31 = vpop.f32.mrb[186].mxu0  ;;  %v9585_v46 = vld [vmem:[%s9709_s23 + $0xf0] sm:$0xff] }
 0xab7   : > { %v6601_v4 = vadd.f32 %v13332_v50, %v6454_v31  ;;  %6749 = vadd.xlane.f32.xlu1 %v6748_v24  ;;  %v6456_v14 = vpop.f32.mrb[187].mxu0 }
 0xab8   : > { %v6602_v5 = vadd.f32 %v13334_v36, %v6456_v14  ;;  %v6751_v63 = vsel %vm410_vm0, %v13471_v43, 0.0  ;;  %v9586_v14 = vld [vmem:[%s9709_s23 + $0x108] sm:$0xff] }
 0xab9   : > { %v6752_v9 = vadd.f32 %v6751_v63, %v13474_v35  ;;  %v13485_v60 = vadd.f32 %v9581_v26, %v6601_v4 }
 0xaba   : > { %v13482_v32 = vadd.f32 %v9580_v20, %v6602_v5  ;;  %v6460_v51 = vpop.f32.mrb[188].mxu0 }
 0xabb   : > { %v6603_v7 = vadd.f32 %v13332_v50, %v6460_v51  ;;  %6753 = vadd.xlane.f32.xlu0 %v6752_v9  ;;  %v6462_v10 = vpop.f32.mrb[189].mxu0  ;;  %v9587_v9 = vld [vmem:[%s9709_s23 + $0x100] sm:$0xff] }
 0xabc   : > { %v6604_v17 = vadd.f32 %v13334_v36, %v6462_v10  ;;  %v6755_v54 = vsel %vm410_vm0, %v13482_v32, 0.0 }
 0xabd   : > { %v6756_v33 = vadd.f32 %v6755_v54, %v13485_v60  ;;  %v13496_v37 = vadd.f32 %v9583_v16, %v6603_v7  ;;  %v9588_v54 = vld [vmem:[%s9709_s23 + $0x118] sm:$0xff] }
 0xabe   : > { %v13493_v23 = vadd.f32 %v9582_v45, %v6604_v17  ;;  %v6466_v44 = vpop.f32.mrb[190].mxu0 }
 0xabf   : > { %v6605_v2 = vadd.f32 %v13332_v50, %v6466_v44  ;;  %6757 = vadd.xlane.f32.xlu1 %v6756_v33  ;;  %v6468_v56 = vpop.f32.mrb[191].mxu0  ;;  %v9589_v44 = vld [vmem:[%s9709_s23 + $0x110] sm:$0xff] }
 0xac0   : > { %v6606_v52 = vadd.f32 %v13334_v36, %v6468_v56  ;;  %v6759_v42 = vsel %vm410_vm0, %v13493_v23, 0.0 }
 0xac1   : > { %v6760_v12 = vadd.f32 %v6759_v42, %v13496_v37  ;;  %v13507_v47 = vadd.f32 %v9585_v46, %v6605_v2 }
 0xac2   : > { %v13504_v15 = vadd.f32 %v9584_v55, %v6606_v52  ;;  %v6472_v3 = vpop.f32.mrb[192].mxu0  ;;  %v9590_v55 = vld [vmem:[%s9709_s23 + $0x128] sm:$0xff] }
 0xac3   : > { %v6607_v24 = vadd.f32 %v13332_v50, %v6472_v3  ;;  %6761 = vadd.xlane.f32.xlu0 %v6760_v12  ;;  %v6474_v30 = vpop.f32.mrb[193].mxu0 }
 0xac4   : > { %v6608_v31 = vadd.f32 %v13334_v36, %v6474_v30  ;;  %v6763_v8 = vsel %vm410_vm0, %v13504_v15, 0.0 }
 0xac5   : > { %v6764_v4 = vadd.f32 %v6763_v8, %v13507_v47  ;;  %v13518_v20 = vadd.f32 %v9587_v9, %v6607_v24  ;;  %v9591_v24 = vld [vmem:[%s9709_s23 + $0x120] sm:$0xff]  ;;  %v9592_v9 = vld [vmem:[%s9709_s23 + $0x138] sm:$0xff] }
 0xac6   : > { %v13515_v5 = vadd.f32 %v9586_v14, %v6608_v31  ;;  %v6478_v63 = vpop.f32.mrb[194].mxu0 }
 0xac7   : > { %v6609_v51 = vadd.f32 %v13332_v50, %v6478_v63  ;;  %6765 = vadd.xlane.f32.xlu1 %v6764_v4  ;;  %v6480_v26 = vpop.f32.mrb[195].mxu0 }
 0xac8   : > { %v6610_v7 = vadd.f32 %v13334_v36, %v6480_v26  ;;  %v6767_v10 = vsel %vm410_vm0, %v13515_v5, 0.0 }
 0xac9   : > { %v6768_v17 = vadd.f32 %v6767_v10, %v13518_v20  ;;  %v13529_v16 = vadd.f32 %v9589_v44, %v6609_v51 }
 0xaca   : > { %v13526_v33 = vadd.f32 %v9588_v54, %v6610_v7  ;;  %v6484_v45 = vpop.f32.mrb[196].mxu0  ;;  %v9593_v7 = vld [vmem:[%s9709_s23 + $0x130] sm:$0xff] }
 0xacb   : > { %v6611_v2 = vadd.f32 %v13332_v50, %v6484_v45  ;;  %6769 = vadd.xlane.f32.xlu0 %v6768_v17  ;;  %v6486_v56 = vpop.f32.mrb[197].mxu0 }
 0xacc   : > { %v6612_v52 = vadd.f32 %v13334_v36, %v6486_v56  ;;  %v6771_v42 = vsel %vm410_vm0, %v13526_v33, 0.0  ;;  %v9594_v56 = vld [vmem:[%s9709_s23 + $0x148] sm:$0xff] }
 0xacd   : > { %v6772_v12 = vadd.f32 %v6771_v42, %v13529_v16  ;;  %v13540_v30 = vadd.f32 %v9591_v24, %v6611_v2 }
 0xace   : > { %v13537_v3 = vadd.f32 %v9590_v55, %v6612_v52  ;;  %v6490_v46 = vpop.f32.mrb[198].mxu0 }
 0xacf   : > { %v6613_v31 = vadd.f32 %v13332_v50, %v6490_v46  ;;  %6773 = vadd.xlane.f32.xlu1 %v6772_v12  ;;  %v6492_v8 = vpop.f32.mrb[199].mxu0  ;;  %v9595_v12 = vld [vmem:[%s9709_s23 + $0x140] sm:$0xff] }
 0xad0   : > { %v6614_v4 = vadd.f32 %v13334_v36, %v6492_v8  ;;  %v6775_v14 = vsel %vm410_vm0, %v13537_v3, 0.0 }
 0xad1   : > { %v6776_v63 = vadd.f32 %v6775_v14, %v13540_v30  ;;  %v13551_v10 = vadd.f32 %v9593_v7, %v6613_v31  ;;  %v9596_v14 = vld [vmem:[%s9709_s23 + $0x158] sm:$0xff] }
 0xad2   : > { %v13548_v51 = vadd.f32 %v9592_v9, %v6614_v4  ;;  %v6496_v26 = vpop.f32.mrb[200].mxu0 }
 0xad3   : > { %v6615_v17 = vadd.f32 %v13332_v50, %v6496_v26  ;;  %6777 = vadd.xlane.f32.xlu0 %v6776_v63  ;;  %v6498_v54 = vpop.f32.mrb[201].mxu0  ;;  %v9597_v26 = vld [vmem:[%s9709_s23 + $0x150] sm:$0xff] }
 0xad4   : > { %v6616_v45 = vadd.f32 %v13334_v36, %v6498_v54  ;;  %v6779_v44 = vsel %vm410_vm0, %v13548_v51, 0.0 }
 0xad5   : > { %v6780_v2 = vadd.f32 %v6779_v44, %v13551_v10  ;;  %v13562_v55 = vadd.f32 %v9595_v12, %v6615_v17 }
 0xad6   : > { %v13559_v52 = vadd.f32 %v9594_v56, %v6616_v45  ;;  %v6502_v42 = vpop.f32.mrb[202].mxu0  ;;  %v9598_v56 = vld [vmem:[%s9709_s23 + $0x168] sm:$0xff] }
 0xad7   : > { %v6617_v46 = vadd.f32 %v13332_v50, %v6502_v42  ;;  %6781 = vadd.xlane.f32.xlu1 %v6780_v2  ;;  %v6504_v24 = vpop.f32.mrb[203].mxu0 }
 0xad8   : > { %v6618_v31 = vadd.f32 %v13334_v36, %v6504_v24  ;;  %v6783_v8 = vsel %vm410_vm0, %v13559_v52, 0.0  ;;  %v9599_v24 = vld [vmem:[%s9709_s23 + $0x160] sm:$0xff] }
 0xad9   : > { %v6784_v4 = vadd.f32 %v6783_v8, %v13562_v55  ;;  %v13573_v7 = vadd.f32 %v9597_v26, %v6617_v46  ;;  %v9600_v26 = vld [vmem:[%s9709_s23 + $0x178] sm:$0xff] }
 0xada   : > { %v13570_v63 = vadd.f32 %v9596_v14, %v6618_v31  ;;  %v6508_v9 = vpop.f32.mrb[204].mxu0 }
 0xadb   : > { %v6619_v17 = vadd.f32 %v13332_v50, %v6508_v9  ;;  %6785 = vadd.xlane.f32.xlu0 %v6784_v4  ;;  %v6510_v54 = vpop.f32.mrb[205].mxu0 }
 0xadc   : > { %v6620_v45 = vadd.f32 %v13334_v36, %v6510_v54  ;;  %v6787_v44 = vsel %vm410_vm0, %v13570_v63, 0.0 }
 0xadd   : > { %v6788_v2 = vadd.f32 %v6787_v44, %v13573_v7  ;;  %v13584_v46 = vadd.f32 %v9599_v24, %v6619_v17  ;;  %v9601_v44 = vld [vmem:[%s9709_s23 + $0x170] sm:$0xff] }
 0xade   : > { %v13581_v42 = vadd.f32 %v9598_v56, %v6620_v45  ;;  %v6514_v12 = vpop.f32.mrb[206].mxu0 }
 0xadf   : > { %v6621_v31 = vadd.f32 %v13332_v50, %v6514_v12  ;;  %6789 = vadd.xlane.f32.xlu1 %v6788_v2  ;;  %v6516_v8 = vpop.f32.mrb[207].mxu0 }
 0xae0   : > { %v6622_v4 = vadd.f32 %v13334_v36, %v6516_v8  ;;  %v6791_v14 = vsel %vm410_vm0, %v13581_v42, 0.0 }
 0xae1   : > { %v6792_v9 = vadd.f32 %v6791_v14, %v13584_v46  ;;  %v13595_v17 = vadd.f32 %v9601_v44, %v6621_v31  ;;  %v9602_v14 = vld [vmem:[%s9709_s23 + $0x188] sm:$0xff] }
 0xae2   : > { %v13592_v54 = vadd.f32 %v9600_v26, %v6622_v4  ;;  %v6520_v45 = vpop.f32.mrb[208].mxu0 }
 0xae3   : > { %14728 = vst [vmem:[#allocation37_spill] sm:$0xff] %v13595_v17  ;;  %v6623_v56 = vadd.f32 %v13332_v50, %v6520_v45  ;;  %6793 = vadd.xlane.f32.xlu0 %v6792_v9  ;;  %v6522_v2 = vpop.f32.mrb[209].mxu0 }
 0xae4   : > { %14727 = vst [vmem:[#allocation38_spill] sm:$0xff] %v13592_v54  ;;  %v6624_v12 = vadd.f32 %v13334_v36, %v6522_v2  ;;  %v6795_v24 = vsel %vm410_vm0, %v13592_v54, 0.0  ;;  %v9605_v54 = vld [vmem:[%s9709_s23 + $0x190] sm:$0xff] }
 0xae5   : > { %v6796_v8 = vadd.f32 %v6795_v24, %v13595_v17  ;;  %v13606_v31 = vadd.f32 %v9603_v59, %v6623_v56  ;;  %v9616_v17 = vld [vmem:[%s9709_s23 + $0x1f8] sm:$0xff] }
 0xae6   : > { %v13603_v4 = vadd.f32 %v9602_v14, %v6624_v12  ;;  %v6526_v26 = vpop.f32.mrb[210].mxu0 }
 0xae7   : > { %14730 = vst [vmem:[#allocation40_spill] sm:$0xff] %v13606_v31  ;;  %v6625_v45 = vadd.f32 %v13332_v50, %v6526_v26  ;;  %6797 = vadd.xlane.f32.xlu1 %v6796_v8  ;;  %v6528_v9 = vpop.f32.mrb[211].mxu0 }
 0xae8   : > { %14729 = vst [vmem:[#allocation75_spill] sm:$0xff] %v13603_v4  ;;  %v6626_v44 = vadd.f32 %v13334_v36, %v6528_v9  ;;  %v6799_v2 = vsel %vm410_vm0, %v13603_v4, 0.0  ;;  %v9606_v4 = vld [vmem:[%s9709_s23 + $0x1a8] sm:$0xff] }
 0xae9   : > { %v6800_v24 = vadd.f32 %v6799_v2, %v13606_v31  ;;  %v13617_v59 = vadd.f32 %v9605_v54, %v6625_v45  ;;  %v9607_v31 = vld [vmem:[%s9709_s23 + $0x1a0] sm:$0xff] }
 0xaea   : > { %v13614_v12 = vadd.f32 %v9604_v18, %v6626_v44  ;;  %v6532_v14 = vpop.f32.mrb[212].mxu0 }
 0xaeb   : > { %14732 = vst [vmem:[#allocation76_spill] sm:$0xff] %v13617_v59  ;;  %v6627_v56 = vadd.f32 %v13332_v50, %v6532_v14  ;;  %6801 = vadd.xlane.f32.xlu0 %v6800_v24  ;;  %v6534_v8 = vpop.f32.mrb[213].mxu0 }
 0xaec   : > { %14731 = vst [vmem:[#allocation39_spill] sm:$0xff] %v13614_v12  ;;  %v6628_v26 = vadd.f32 %v13334_v36, %v6534_v8  ;;  %v6803_v9 = vsel %vm410_vm0, %v13614_v12, 0.0  ;;  %v9608_v12 = vld [vmem:[%s9709_s23 + $0x1b8] sm:$0xff] }
 0xaed   : > { %v6804_v2 = vadd.f32 %v6803_v9, %v13617_v59  ;;  %v13628_v54 = vadd.f32 %v9607_v31, %v6627_v56  ;;  %v9609_v59 = vld [vmem:[%s9709_s23 + $0x1b0] sm:$0xff] }
 0xaee   : > { %v13625_v18 = vadd.f32 %v9606_v4, %v6628_v26  ;;  %v6538_v44 = vpop.f32.mrb[214].mxu0 }
 0xaef   : > { %14734 = vst [vmem:[#allocation41_spill] sm:$0xff] %v13628_v54  ;;  %v6629_v45 = vadd.f32 %v13332_v50, %v6538_v44  ;;  %6805 = vadd.xlane.f32.xlu1 %v6804_v2  ;;  %v6540_v24 = vpop.f32.mrb[215].mxu0 }
 0xaf0   : > { %14733 = vst [vmem:[#allocation42_spill] sm:$0xff] %v13625_v18  ;;  %v6630_v14 = vadd.f32 %v13334_v36, %v6540_v24  ;;  %v6807_v8 = vsel %vm410_vm0, %v13625_v18, 0.0  ;;  %v9610_v18 = vld [vmem:[%s9709_s23 + $0x1c8] sm:$0xff] }
 0xaf1   : > { %v6808_v9 = vadd.f32 %v6807_v8, %v13628_v54  ;;  %v13639_v31 = vadd.f32 %v9609_v59, %v6629_v45  ;;  %v9611_v54 = vld [vmem:[%s9709_s23 + $0x1c0] sm:$0xff] }
 0xaf2   : > { %v13636_v4 = vadd.f32 %v9608_v12, %v6630_v14  ;;  %v6544_v26 = vpop.f32.mrb[216].mxu0 }
 0xaf3   : > { %14736 = vst [vmem:[#allocation44_spill] sm:$0xff] %v13639_v31  ;;  %v6631_v56 = vadd.f32 %v13332_v50, %v6544_v26  ;;  %6809 = vadd.xlane.f32.xlu0 %v6808_v9  ;;  %v6546_v2 = vpop.f32.mrb[217].mxu0 }
 0xaf4   : > { %14735 = vst [vmem:[#allocation77_spill] sm:$0xff] %v13636_v4  ;;  %v6632_v44 = vadd.f32 %v13334_v36, %v6546_v2  ;;  %v6811_v24 = vsel %vm410_vm0, %v13636_v4, 0.0  ;;  %v9612_v4 = vld [vmem:[%s9709_s23 + $0x1d8] sm:$0xff] }
 0xaf5   : > { %v6812_v8 = vadd.f32 %v6811_v24, %v13639_v31  ;;  %v13650_v59 = vadd.f32 %v9611_v54, %v6631_v56  ;;  %v9613_v31 = vld [vmem:[%s9709_s23 + $0x1d0] sm:$0xff] }
 0xaf6   : > { %v13647_v12 = vadd.f32 %v9610_v18, %v6632_v44  ;;  %v6550_v14 = vpop.f32.mrb[218].mxu0 }
 0xaf7   : > { %14738 = vst [vmem:[#allocation78_spill] sm:$0xff] %v13650_v59  ;;  %v6633_v45 = vadd.f32 %v13332_v50, %v6550_v14  ;;  %6813 = vadd.xlane.f32.xlu1 %v6812_v8  ;;  %v6552_v9 = vpop.f32.mrb[219].mxu0 }
 0xaf8   : > { %14737 = vst [vmem:[#allocation43_spill] sm:$0xff] %v13647_v12  ;;  %v6634_v26 = vadd.f32 %v13334_v36, %v6552_v9  ;;  %v6815_v2 = vsel %vm410_vm0, %v13647_v12, 0.0  ;;  %v9614_v12 = vld [vmem:[%s9709_s23 + $0x1e8] sm:$0xff] }
 0xaf9   : > { %v6816_v24 = vadd.f32 %v6815_v2, %v13650_v59  ;;  %v13661_v54 = vadd.f32 %v9613_v31, %v6633_v45  ;;  %v9615_v59 = vld [vmem:[%s9709_s23 + $0x1e0] sm:$0xff] }
 0xafa   : > { %v13658_v18 = vadd.f32 %v9612_v4, %v6634_v26  ;;  %v6556_v44 = vpop.f32.mrb[220].mxu0 }
 0xafb   : > { %v6635_v56 = vadd.f32 %v13332_v50, %v6556_v44  ;;  %6817 = vadd.xlane.f32.xlu0 %v6816_v24  ;;  %v6558_v8 = vpop.f32.mrb[221].mxu0 }
 0xafc   : > { %14739 = vst [vmem:[#allocation46_spill] sm:$0xff] %v13658_v18  ;;  %v6636_v14 = vadd.f32 %v13334_v36, %v6558_v8  ;;  %v6819_v9 = vsel %vm410_vm0, %v13658_v18, 0.0 }
 0xafd   : > { %v6820_v2 = vadd.f32 %v6819_v9, %v13661_v54  ;;  %v13672_v31 = vadd.f32 %v9615_v59, %v6635_v56 }
 0xafe   : > { %v13669_v4 = vadd.f32 %v9614_v12, %v6636_v14  ;;  %v6562_v26 = vpop.f32.mrb[222].mxu0  ;;  %v9617_v12 = vld [vmem:[%s9709_s23 + $0x1f0] sm:$0xff] }
 0xaff   : > { %v6637_v45 = vadd.f32 %v13332_v50, %v6562_v26  ;;  %6821 = vadd.xlane.f32.xlu1 %v6820_v2  ;;  %v6564_v24 = vpop.f32.mrb[223].mxu0 }
 0xb00   : > { %v6638_v44 = vadd.f32 %v13334_v36, %v6564_v24  ;;  %v6823_v8 = vsel %vm410_vm0, %v13669_v4, 0.0 }
 0xb01   : > { %v6824_v18 = vadd.f32 %v6823_v8, %v13672_v31  ;;  %v13683_v14 = vadd.f32 %v9617_v12, %v6637_v45 }
 0xb02   : > { %v13680_v9 = vadd.f32 %v9616_v17, %v6638_v44 }
 0xb03   : > { %6825 = vadd.xlane.f32.xlu0 %v6824_v18 }
 0xb04   : > { %v6827_v59 = vsel %vm410_vm0, %v13680_v9, 0.0 }
 0xb05   : > { %v6828_v50 = vadd.f32 %v6827_v59, %v13683_v14 }
 0xb07   : > { %6829 = vadd.xlane.f32.xlu1 %v6828_v50 }
 0xb18   : > { %v6706_v56 = vpop.xlane.xlu0 %6705 }
 0xb19   : > { %v6832_v36 = vmul.f32 0.004464286, %v6706_v56 }
 0xb1b   : > { %v13689_v2 = vsub.f32 %v13342_v38, %v6832_v36  ;;  %v13692_v26 = vsub.f32 %v13339_v29, %v6832_v36 }
 0xb1c   : > { %v6710_v17 = vpop.xlane.xlu1 %6709 }
 0xb1d   : > { %v6833_v24 = vmul.f32 0.004464286, %v6710_v17  ;;  %v6928_v45 = vmul.f32 %v13689_v2, %v13689_v2  ;;  %v6929_v18 = vmul.f32 %v13692_v26, %v13692_v26 }
 0xb1f   : > { %v13699_v44 = vsub.f32 %v13353_v22, %v6833_v24  ;;  %v13702_v8 = vsub.f32 %v13350_v41, %v6833_v24  ;;  %v6992_v38 = vsel %vm410_vm0, %v6929_v18, 0.0 }
 0xb20   : > { %v6714_v12 = vpop.xlane.xlu0 %6713  ;;  %v6993_v59 = vadd.f32 %v6992_v38, %v6928_v45 }
 0xb21   : > { %v6834_v29 = vmul.f32 0.004464286, %v6714_v12  ;;  %v6930_v50 = vmul.f32 %v13699_v44, %v13699_v44  ;;  %v6931_v56 = vmul.f32 %v13702_v8, %v13702_v8 }
 0xb22   : > { %6994 = vadd.xlane.f32.xlu0 %v6993_v59 }
 0xb23   : > { %v13710_v36 = vsub.f32 %v13364_v61, %v6834_v29  ;;  %v13713_v22 = vsub.f32 %v13361_v25, %v6834_v29  ;;  %v6996_v41 = vsel %vm410_vm0, %v6931_v56, 0.0 }
 0xb24   : > { %v6718_v17 = vpop.xlane.xlu1 %6717  ;;  %v6997_v24 = vadd.f32 %v6996_v41, %v6930_v50 }
 0xb25   : > { %v6932_v45 = vmul.f32 %v13710_v36, %v13710_v36  ;;  %v6933_v18 = vmul.f32 %v13713_v22, %v13713_v22  ;;  %v6835_v38 = vmul.f32 0.004464286, %v6718_v17 }
 0xb26   : > { %6998 = vadd.xlane.f32.xlu1 %v6997_v24 }
 0xb27   : > { %v13721_v12 = vsub.f32 %v13375_v0, %v6835_v38  ;;  %v13724_v61 = vsub.f32 %v13372_v27, %v6835_v38  ;;  %v7000_v25 = vsel %vm410_vm0, %v6933_v18, 0.0 }
 0xb28   : > { %v6722_v59 = vpop.xlane.xlu0 %6721  ;;  %v7001_v29 = vadd.f32 %v7000_v25, %v6932_v45 }
 0xb29   : > { %v6934_v50 = vmul.f32 %v13721_v12, %v13721_v12  ;;  %v6935_v56 = vmul.f32 %v13724_v61, %v13724_v61  ;;  %v6836_v41 = vmul.f32 0.004464286, %v6722_v59 }
 0xb2a   : > { %7002 = vadd.xlane.f32.xlu0 %v7001_v29 }
 0xb2b   : > { %v13732_v17 = vsub.f32 %v13386_v13, %v6836_v41  ;;  %v13735_v0 = vsub.f32 %v13383_v6, %v6836_v41  ;;  %v7004_v27 = vsel %vm410_vm0, %v6935_v56, 0.0 }
 0xb2c   : > { %v6726_v24 = vpop.xlane.xlu1 %6725  ;;  %v7005_v18 = vadd.f32 %v7004_v27, %v6934_v50 }
 0xb2d   : > { %v6936_v45 = vmul.f32 %v13732_v17, %v13732_v17  ;;  %v6937_v38 = vmul.f32 %v13735_v0, %v13735_v0  ;;  %v6837_v25 = vmul.f32 0.004464286, %v6726_v24 }
 0xb2e   : > { %7006 = vadd.xlane.f32.xlu1 %v7005_v18 }
 0xb2f   : > { %v13743_v59 = vsub.f32 %v13397_v53, %v6837_v25  ;;  %v13746_v13 = vsub.f32 %v13394_v48, %v6837_v25  ;;  %v7008_v6 = vsel %vm410_vm0, %v6937_v38, 0.0 }
 0xb30   : > { %v6730_v29 = vpop.xlane.xlu0 %6729  ;;  %v7009_v56 = vadd.f32 %v7008_v6, %v6936_v45 }
 0xb31   : > { %v6938_v50 = vmul.f32 %v13743_v59, %v13743_v59  ;;  %v6939_v41 = vmul.f32 %v13746_v13, %v13746_v13  ;;  %v6838_v27 = vmul.f32 0.004464286, %v6730_v29 }
 0xb32   : > { %7010 = vadd.xlane.f32.xlu0 %v7009_v56 }
 0xb33   : > { %v13754_v24 = vsub.f32 %v13408_v11, %v6838_v27  ;;  %v13757_v53 = vsub.f32 %v13405_v1, %v6838_v27  ;;  %v7012_v48 = vsel %vm410_vm0, %v6939_v41, 0.0 }
 0xb34   : > { %v6734_v18 = vpop.xlane.xlu1 %6733  ;;  %v7013_v38 = vadd.f32 %v7012_v48, %v6938_v50 }
 0xb35   : > { %v6940_v45 = vmul.f32 %v13754_v24, %v13754_v24  ;;  %v6941_v25 = vmul.f32 %v13757_v53, %v13757_v53  ;;  %v6839_v6 = vmul.f32 0.004464286, %v6734_v18 }
 0xb36   : > { %7014 = vadd.xlane.f32.xlu1 %v7013_v38 }
 0xb37   : > { %v13765_v29 = vsub.f32 %v13419_v57, %v6839_v6  ;;  %v13768_v11 = vsub.f32 %v13416_v49, %v6839_v6  ;;  %v7016_v1 = vsel %vm410_vm0, %v6941_v25, 0.0 }
 0xb38   : > { %v6738_v56 = vpop.xlane.xlu0 %6737  ;;  %v7017_v41 = vadd.f32 %v7016_v1, %v6940_v45 }
 0xb39   : > { %v6942_v50 = vmul.f32 %v13765_v29, %v13765_v29  ;;  %v6943_v27 = vmul.f32 %v13768_v11, %v13768_v11  ;;  %v6840_v48 = vmul.f32 0.004464286, %v6738_v56 }
 0xb3a   : > { %7018 = vadd.xlane.f32.xlu0 %v7017_v41 }
 0xb3b   : > { %v13776_v18 = vsub.f32 %v13430_v62, %v6840_v48  ;;  %v13779_v57 = vsub.f32 %v13427_v58, %v6840_v48  ;;  %v7020_v49 = vsel %vm410_vm0, %v6943_v27, 0.0 }
 0xb3c   : > { %v6742_v38 = vpop.xlane.xlu1 %6741  ;;  %v7021_v25 = vadd.f32 %v7020_v49, %v6942_v50 }
 0xb3d   : > { %v6944_v45 = vmul.f32 %v13776_v18, %v13776_v18  ;;  %v6945_v6 = vmul.f32 %v13779_v57, %v13779_v57  ;;  %v6841_v1 = vmul.f32 0.004464286, %v6742_v38 }
 0xb3e   : > { %7022 = vadd.xlane.f32.xlu1 %v7021_v25 }
 0xb3f   : > { %v13787_v56 = vsub.f32 %v13441_v19, %v6841_v1  ;;  %v13790_v62 = vsub.f32 %v13438_v21, %v6841_v1  ;;  %v7024_v58 = vsel %vm410_vm0, %v6945_v6, 0.0 }
 0xb40   : > { %v6746_v41 = vpop.xlane.xlu0 %6745  ;;  %v7025_v27 = vadd.f32 %v7024_v58, %v6944_v45 }
 0xb41   : > { %v6946_v50 = vmul.f32 %v13787_v56, %v13787_v56  ;;  %v6947_v48 = vmul.f32 %v13790_v62, %v13790_v62  ;;  %v6842_v49 = vmul.f32 0.004464286, %v6746_v41 }
 0xb42   : > { %7026 = vadd.xlane.f32.xlu0 %v7025_v27 }
 0xb43   : > { %v13798_v38 = vsub.f32 %v13452_v39, %v6842_v49  ;;  %v13801_v19 = vsub.f32 %v13449_v40, %v6842_v49  ;;  %v7028_v21 = vsel %vm410_vm0, %v6947_v48, 0.0 }
 0xb44   : > { %v6750_v25 = vpop.xlane.xlu1 %6749  ;;  %v7029_v6 = vadd.f32 %v7028_v21, %v6946_v50 }
 0xb45   : > { %v6948_v45 = vmul.f32 %v13798_v38, %v13798_v38  ;;  %v6949_v1 = vmul.f32 %v13801_v19, %v13801_v19  ;;  %v6843_v58 = vmul.f32 0.004464286, %v6750_v25 }
 0xb46   : > { %7030 = vadd.xlane.f32.xlu1 %v7029_v6 }
 0xb47   : > { %v13809_v41 = vsub.f32 %v13463_v34, %v6843_v58  ;;  %v13812_v39 = vsub.f32 %v13460_v28, %v6843_v58  ;;  %v7032_v40 = vsel %vm410_vm0, %v6949_v1, 0.0 }
 0xb48   : > { %v6754_v27 = vpop.xlane.xlu0 %6753  ;;  %v7033_v48 = vadd.f32 %v7032_v40, %v6948_v45 }
 0xb49   : > { %v6950_v50 = vmul.f32 %v13809_v41, %v13809_v41  ;;  %v6951_v49 = vmul.f32 %v13812_v39, %v13812_v39  ;;  %v6844_v21 = vmul.f32 0.004464286, %v6754_v27 }
 0xb4a   : > { %7034 = vadd.xlane.f32.xlu0 %v7033_v48 }
 0xb4b   : > { %v13820_v25 = vsub.f32 %v13474_v35, %v6844_v21  ;;  %v13823_v34 = vsub.f32 %v13471_v43, %v6844_v21  ;;  %v7036_v28 = vsel %vm410_vm0, %v6951_v49, 0.0 }
 0xb4c   : > { %v6758_v6 = vpop.xlane.xlu1 %6757  ;;  %v7037_v1 = vadd.f32 %v7036_v28, %v6950_v50 }
 0xb4d   : > { %v6952_v45 = vmul.f32 %v13820_v25, %v13820_v25  ;;  %v6953_v58 = vmul.f32 %v13823_v34, %v13823_v34  ;;  %v6845_v40 = vmul.f32 0.004464286, %v6758_v6 }
 0xb4e   : > { %7038 = vadd.xlane.f32.xlu1 %v7037_v1 }
 0xb4f   : > { %v13831_v27 = vsub.f32 %v13485_v60, %v6845_v40  ;;  %v13834_v35 = vsub.f32 %v13482_v32, %v6845_v40  ;;  %v7040_v43 = vsel %vm410_vm0, %v6953_v58, 0.0 }
 0xb50   : > { %v6762_v48 = vpop.xlane.xlu0 %6761  ;;  %v7041_v49 = vadd.f32 %v7040_v43, %v6952_v45 }
 0xb51   : > { %v6954_v50 = vmul.f32 %v13831_v27, %v13831_v27  ;;  %v6955_v21 = vmul.f32 %v13834_v35, %v13834_v35  ;;  %v6846_v28 = vmul.f32 0.004464286, %v6762_v48 }
 0xb52   : > { %7042 = vadd.xlane.f32.xlu0 %v7041_v49 }
 0xb53   : > { %v13842_v6 = vsub.f32 %v13496_v37, %v6846_v28  ;;  %v13845_v60 = vsub.f32 %v13493_v23, %v6846_v28  ;;  %v7044_v32 = vsel %vm410_vm0, %v6955_v21, 0.0 }
 0xb54   : > { %v6766_v1 = vpop.xlane.xlu1 %6765  ;;  %v7045_v58 = vadd.f32 %v7044_v32, %v6954_v50 }
 0xb55   : > { %v6956_v45 = vmul.f32 %v13842_v6, %v13842_v6  ;;  %v6957_v40 = vmul.f32 %v13845_v60, %v13845_v60  ;;  %v6847_v43 = vmul.f32 0.004464286, %v6766_v1 }
 0xb56   : > { %7046 = vadd.xlane.f32.xlu1 %v7045_v58 }
 0xb57   : > { %v13853_v48 = vsub.f32 %v13507_v47, %v6847_v43  ;;  %v13856_v37 = vsub.f32 %v13504_v15, %v6847_v43  ;;  %v7048_v23 = vsel %vm410_vm0, %v6957_v40, 0.0 }
 0xb58   : > { %v6770_v49 = vpop.xlane.xlu0 %6769  ;;  %v7049_v21 = vadd.f32 %v7048_v23, %v6956_v45 }
 0xb59   : > { %v6958_v50 = vmul.f32 %v13853_v48, %v13853_v48  ;;  %v6959_v28 = vmul.f32 %v13856_v37, %v13856_v37  ;;  %v6848_v32 = vmul.f32 0.004464286, %v6770_v49 }
 0xb5a   : > { %7050 = vadd.xlane.f32.xlu0 %v7049_v21 }
 0xb5b   : > { %v13864_v1 = vsub.f32 %v13518_v20, %v6848_v32  ;;  %v13867_v47 = vsub.f32 %v13515_v5, %v6848_v32  ;;  %v7052_v15 = vsel %vm410_vm0, %v6959_v28, 0.0 }
 0xb5c   : > { %v6774_v58 = vpop.xlane.xlu1 %6773  ;;  %v7053_v40 = vadd.f32 %v7052_v15, %v6958_v50 }
 0xb5d   : > { %v6960_v45 = vmul.f32 %v13864_v1, %v13864_v1  ;;  %v6961_v43 = vmul.f32 %v13867_v47, %v13867_v47  ;;  %v6849_v23 = vmul.f32 0.004464286, %v6774_v58 }
 0xb5e   : > { %7054 = vadd.xlane.f32.xlu1 %v7053_v40 }
 0xb5f   : > { %v13875_v49 = vsub.f32 %v13529_v16, %v6849_v23  ;;  %v13878_v20 = vsub.f32 %v13526_v33, %v6849_v23  ;;  %v7056_v5 = vsel %vm410_vm0, %v6961_v43, 0.0 }
 0xb60   : > { %v6778_v21 = vpop.xlane.xlu0 %6777  ;;  %v7057_v28 = vadd.f32 %v7056_v5, %v6960_v45 }
 0xb61   : > { %v6962_v50 = vmul.f32 %v13875_v49, %v13875_v49  ;;  %v6963_v32 = vmul.f32 %v13878_v20, %v13878_v20  ;;  %v6850_v15 = vmul.f32 0.004464286, %v6778_v21 }
 0xb62   : > { %7058 = vadd.xlane.f32.xlu0 %v7057_v28 }
 0xb63   : > { %v13886_v58 = vsub.f32 %v13540_v30, %v6850_v15  ;;  %v13889_v16 = vsub.f32 %v13537_v3, %v6850_v15  ;;  %v7060_v33 = vsel %vm410_vm0, %v6963_v32, 0.0 }
 0xb64   : > { %v6782_v40 = vpop.xlane.xlu1 %6781  ;;  %v7061_v43 = vadd.f32 %v7060_v33, %v6962_v50 }
 0xb65   : > { %v6964_v45 = vmul.f32 %v13886_v58, %v13886_v58  ;;  %v6965_v23 = vmul.f32 %v13889_v16, %v13889_v16  ;;  %v6851_v5 = vmul.f32 0.004464286, %v6782_v40 }
 0xb66   : > { %7062 = vadd.xlane.f32.xlu1 %v7061_v43 }
 0xb67   : > { %v13897_v21 = vsub.f32 %v13551_v10, %v6851_v5  ;;  %v13900_v30 = vsub.f32 %v13548_v51, %v6851_v5  ;;  %v7064_v3 = vsel %vm410_vm0, %v6965_v23, 0.0 }
 0xb68   : > { %v6786_v28 = vpop.xlane.xlu0 %6785  ;;  %v7065_v32 = vadd.f32 %v7064_v3, %v6964_v45 }
 0xb69   : > { %v6966_v50 = vmul.f32 %v13897_v21, %v13897_v21  ;;  %v6967_v15 = vmul.f32 %v13900_v30, %v13900_v30  ;;  %v6852_v33 = vmul.f32 0.004464286, %v6786_v28 }
 0xb6a   : > { %7066 = vadd.xlane.f32.xlu0 %v7065_v32 }
 0xb6b   : > { %v13908_v40 = vsub.f32 %v13562_v55, %v6852_v33  ;;  %v13911_v10 = vsub.f32 %v13559_v52, %v6852_v33  ;;  %v7068_v51 = vsel %vm410_vm0, %v6967_v15, 0.0 }
 0xb6c   : > { %v6790_v43 = vpop.xlane.xlu1 %6789  ;;  %v7069_v23 = vadd.f32 %v7068_v51, %v6966_v50 }
 0xb6d   : > { %v6968_v45 = vmul.f32 %v13908_v40, %v13908_v40  ;;  %v6969_v5 = vmul.f32 %v13911_v10, %v13911_v10  ;;  %v6853_v3 = vmul.f32 0.004464286, %v6790_v43 }
 0xb6e   : > { %7070 = vadd.xlane.f32.xlu1 %v7069_v23 }
 0xb6f   : > { %v13919_v28 = vsub.f32 %v13573_v7, %v6853_v3  ;;  %v13922_v55 = vsub.f32 %v13570_v63, %v6853_v3  ;;  %v7072_v52 = vsel %vm410_vm0, %v6969_v5, 0.0 }
 0xb70   : > { %v6794_v32 = vpop.xlane.xlu0 %6793  ;;  %v7073_v15 = vadd.f32 %v7072_v52, %v6968_v45 }
 0xb71   : > { %14740 = vst [vmem:[#allocation45_spill] sm:$0xff] %v13922_v55  ;;  %v6970_v50 = vmul.f32 %v13919_v28, %v13919_v28  ;;  %v6971_v33 = vmul.f32 %v13922_v55, %v13922_v55  ;;  %v6854_v51 = vmul.f32 0.004464286, %v6794_v32  ;;  %v14743_v32 = vld [vmem:[#allocation37_spill] sm:$0xff] }
 0xb72   : > { %7074 = vadd.xlane.f32.xlu0 %v7073_v15 }
 0xb73   : > { %v13930_v43 = vsub.f32 %v13584_v46, %v6854_v51  ;;  %v13933_v7 = vsub.f32 %v13581_v42, %v6854_v51  ;;  %v7076_v63 = vsel %vm410_vm0, %v6971_v33, 0.0  ;;  %v14745_v46 = vld [vmem:[#allocation38_spill] sm:$0xff] }
 0xb74   : > { %v6798_v23 = vpop.xlane.xlu1 %6797  ;;  %v7077_v5 = vadd.f32 %v7076_v63, %v6970_v50 }
 0xb75   : > { %14741 = vst [vmem:[#allocation79_spill] sm:$0xff] %v13930_v43  ;;  %14742 = vst [vmem:[#allocation48_spill] sm:$0xff] %v13933_v7  ;;  %v6972_v45 = vmul.f32 %v13930_v43, %v13930_v43  ;;  %v6973_v3 = vmul.f32 %v13933_v7, %v13933_v7  ;;  %v6855_v52 = vmul.f32 0.004464286, %v6798_v23  ;;  %v14747_v23 = vld [vmem:[#allocation40_spill] sm:$0xff] }
 0xb76   : > { %7078 = vadd.xlane.f32.xlu1 %v7077_v5 }
 0xb77   : > { %v13941_v15 = vsub.f32 %v14743_v32, %v6855_v52  ;;  %v13944_v55 = vsub.f32 %v14745_v46, %v6855_v52  ;;  %v7080_v42 = vsel %vm410_vm0, %v6973_v3, 0.0  ;;  %v14749_v32 = vld [vmem:[#allocation75_spill] sm:$0xff] }
 0xb78   : > { %v6802_v51 = vpop.xlane.xlu0 %6801  ;;  %v7081_v33 = vadd.f32 %v7080_v42, %v6972_v45 }
 0xb79   : > { %14744 = vst [vmem:[#allocation47_spill] sm:$0xff] %v13941_v15  ;;  %14746 = vst [vmem:[#allocation80_spill] sm:$0xff] %v13944_v55  ;;  %v6974_v50 = vmul.f32 %v13941_v15, %v13941_v15  ;;  %v6975_v63 = vmul.f32 %v13944_v55, %v13944_v55  ;;  %v6856_v43 = vmul.f32 0.004464286, %v6802_v51  ;;  %v14751_v51 = vld [vmem:[#allocation76_spill] sm:$0xff] }
 0xb7a   : > { %7082 = vadd.xlane.f32.xlu0 %v7081_v33 }
 0xb7b   : > { %v13952_v5 = vsub.f32 %v14747_v23, %v6856_v43  ;;  %v13955_v7 = vsub.f32 %v14749_v32, %v6856_v43  ;;  %v7084_v52 = vsel %vm410_vm0, %v6975_v63, 0.0  ;;  %v14753_v23 = vld [vmem:[#allocation39_spill] sm:$0xff] }
 0xb7c   : > { %v6806_v46 = vpop.xlane.xlu1 %6805  ;;  %v7085_v3 = vadd.f32 %v7084_v52, %v6974_v50 }
 0xb7d   : > { %14748 = vst [vmem:[#allocation50_spill] sm:$0xff] %v13952_v5  ;;  %14750 = vst [vmem:[#allocation49_spill] sm:$0xff] %v13955_v7  ;;  %v6976_v45 = vmul.f32 %v13952_v5, %v13952_v5  ;;  %v6977_v42 = vmul.f32 %v13955_v7, %v13955_v7  ;;  %v6857_v15 = vmul.f32 0.004464286, %v6806_v46  ;;  %v14755_v46 = vld [vmem:[#allocation41_spill] sm:$0xff] }
 0xb7e   : > { %7086 = vadd.xlane.f32.xlu1 %v7085_v3 }
 0xb7f   : > { %v13963_v33 = vsub.f32 %v14751_v51, %v6857_v15  ;;  %v13966_v55 = vsub.f32 %v14753_v23, %v6857_v15  ;;  %v7088_v43 = vsel %vm410_vm0, %v6977_v42, 0.0  ;;  %v14757_v51 = vld [vmem:[#allocation42_spill] sm:$0xff] }
 0xb80   : > { %v6810_v32 = vpop.xlane.xlu0 %6809  ;;  %v7089_v63 = vadd.f32 %v7088_v43, %v6976_v45 }
 0xb81   : > { %14752 = vst [vmem:[#allocation81_spill] sm:$0xff] %v13963_v33  ;;  %14754 = vst [vmem:[#allocation52_spill] sm:$0xff] %v13966_v55  ;;  %v6978_v50 = vmul.f32 %v13963_v33, %v13963_v33  ;;  %v6979_v52 = vmul.f32 %v13966_v55, %v13966_v55  ;;  %v6858_v5 = vmul.f32 0.004464286, %v6810_v32  ;;  %v14759_v32 = vld [vmem:[#allocation44_spill] sm:$0xff] }
 0xb82   : > { %7090 = vadd.xlane.f32.xlu0 %v7089_v63 }
 0xb83   : > { %v13974_v3 = vsub.f32 %v14755_v46, %v6858_v5  ;;  %v13977_v7 = vsub.f32 %v14757_v51, %v6858_v5  ;;  %v7092_v15 = vsel %vm410_vm0, %v6979_v52, 0.0  ;;  %v14761_v46 = vld [vmem:[#allocation77_spill] sm:$0xff] }
 0xb84   : > { %v6814_v23 = vpop.xlane.xlu1 %6813  ;;  %v7093_v42 = vadd.f32 %v7092_v15, %v6978_v50 }
 0xb85   : > { %14756 = vst [vmem:[#allocation51_spill] sm:$0xff] %v13974_v3  ;;  %14758 = vst [vmem:[#allocation82_spill] sm:$0xff] %v13977_v7  ;;  %v6980_v45 = vmul.f32 %v13974_v3, %v13974_v3  ;;  %v6981_v43 = vmul.f32 %v13977_v7, %v13977_v7  ;;  %v6859_v33 = vmul.f32 0.004464286, %v6814_v23  ;;  %v14762_v23 = vld [vmem:[#allocation78_spill] sm:$0xff] }
 0xb86   : > { %7094 = vadd.xlane.f32.xlu1 %v7093_v42 }
 0xb87   : > { %v13985_v63 = vsub.f32 %v14759_v32, %v6859_v33  ;;  %v13988_v55 = vsub.f32 %v14761_v46, %v6859_v33  ;;  %v7096_v5 = vsel %vm410_vm0, %v6981_v43, 0.0  ;;  %v14764_v32 = vld [vmem:[#allocation43_spill] sm:$0xff] }
 0xb88   : > { %v6818_v51 = vpop.xlane.xlu0 %6817  ;;  %v7097_v52 = vadd.f32 %v7096_v5, %v6980_v45 }
 0xb89   : > { %14760 = vst [vmem:[#allocation54_spill] sm:$0xff] %v13985_v63  ;;  %v6982_v50 = vmul.f32 %v13985_v63, %v13985_v63  ;;  %v6983_v15 = vmul.f32 %v13988_v55, %v13988_v55  ;;  %v6860_v3 = vmul.f32 0.004464286, %v6818_v51 }
 0xb8a   : > { %7098 = vadd.xlane.f32.xlu0 %v7097_v52  ;;  %v14765_v52 = vld [vmem:[#allocation46_spill] sm:$0xff] }
 0xb8b   : > { %v13996_v42 = vsub.f32 %v14762_v23, %v6860_v3  ;;  %v13999_v7 = vsub.f32 %v14764_v32, %v6860_v3  ;;  %v7100_v33 = vsel %vm410_vm0, %v6983_v15, 0.0 }
 0xb8c   : > { %v6822_v46 = vpop.xlane.xlu1 %6821  ;;  %v7101_v43 = vadd.f32 %v7100_v33, %v6982_v50 }
 0xb8d   : > { %14763 = vst [vmem:[#allocation53_spill] sm:$0xff] %v13996_v42  ;;  %v6984_v45 = vmul.f32 %v13996_v42, %v13996_v42  ;;  %v6985_v5 = vmul.f32 %v13999_v7, %v13999_v7  ;;  %v6861_v63 = vmul.f32 0.004464286, %v6822_v46 }
 0xb8e   : > { %7102 = vadd.xlane.f32.xlu1 %v7101_v43 }
 0xb8f   : > { %v14007_v51 = vsub.f32 %v13661_v54, %v6861_v63  ;;  %v14010_v23 = vsub.f32 %v14765_v52, %v6861_v63  ;;  %v7104_v3 = vsel %vm410_vm0, %v6985_v5, 0.0 }
 0xb90   : > { %v6826_v32 = vpop.xlane.xlu0 %6825  ;;  %v7105_v15 = vadd.f32 %v7104_v3, %v6984_v45 }
 0xb91   : > { %v6986_v50 = vmul.f32 %v14007_v51, %v14007_v51  ;;  %v6987_v33 = vmul.f32 %v14010_v23, %v14010_v23  ;;  %v6862_v42 = vmul.f32 0.004464286, %v6826_v32 }
 0xb92   : > { %7106 = vadd.xlane.f32.xlu0 %v7105_v15 }
 0xb93   : > { %v14018_v46 = vsub.f32 %v13672_v31, %v6862_v42  ;;  %v14021_v54 = vsub.f32 %v13669_v4, %v6862_v42  ;;  %v7108_v63 = vsel %vm410_vm0, %v6987_v33, 0.0 }
 0xb94   : > { %v6830_v43 = vpop.xlane.xlu1 %6829  ;;  %v7109_v5 = vadd.f32 %v7108_v63, %v6986_v50 }
 0xb95   : > { %14766 = vst [vmem:[#allocation83_spill] sm:$0xff] %v14018_v46  ;;  %14767 = vst [vmem:[#allocation56_spill] sm:$0xff] %v14021_v54  ;;  %v6988_v45 = vmul.f32 %v14018_v46, %v14018_v46  ;;  %v6989_v52 = vmul.f32 %v14021_v54, %v14021_v54  ;;  %v6863_v3 = vmul.f32 0.004464286, %v6830_v43 }
 0xb96   : > { %7110 = vadd.xlane.f32.xlu1 %v7109_v5 }
 0xb97   : > { %v14029_v32 = vsub.f32 %v13683_v14, %v6863_v3  ;;  %v14032_v31 = vsub.f32 %v13680_v9, %v6863_v3  ;;  %v7112_v4 = vsel %vm410_vm0, %v6989_v52, 0.0 }
 0xb98   : > { %v7113_v42 = vadd.f32 %v7112_v4, %v6988_v45  ;;  %v380_v4 = vld [vmem:[%s14363_s7 + $0x10] sm:$0x3] }
 0xb99   : > { %14768 = vst [vmem:[#allocation55_spill] sm:$0xff] %v14029_v32  ;;  %14769 = vst [vmem:[#allocation84_spill] sm:$0xff] %v14032_v31  ;;  %v6990_v15 = vmul.f32 %v14029_v32, %v14029_v32  ;;  %v6991_v50 = vmul.f32 %v14032_v31, %v14032_v31 }
 0xb9a   : > { %7114 = vadd.xlane.f32.xlu0 %v7113_v42  ;;  %v381_v42 = vld [vmem:[%s14363_s7 + $0x18] sm:$0x3] }
 0xb9b   : > { %v7116_v33 = vsel %vm410_vm0, %v6991_v50, 0.0 }
 0xb9c   : > { %v7117_v63 = vadd.f32 %v7116_v33, %v6990_v15 }
 0xb9e   : > { %7118 = vadd.xlane.f32.xlu1 %v7117_v63  ;;  %v14770_v63 = vld [vmem:[#allocation35_spill] sm:$0xff] }
 0xbaf   : > { %v6995_v43 = vpop.xlane.xlu0 %6994 }
 0xbb0   : > { %v7120_v14 = vmul.f32 0.004464286, %v6995_v43  ;;  %v14047_v43 = vrot.slane %v380_v4, %v14770_v63 }
 0xbb2   : > { %v7152_v5 = vadd.f32 1e-05, %v7120_v14 }
 0xbb3   : > { %v6999_v54 = vpop.xlane.xlu1 %6998 }
 0xbb4   : > { %9296 = vrsqrt.f32 %v7152_v5  ;;  %v7121_v9 = vmul.f32 0.004464286, %v6999_v54  ;;  %v14050_v54 = vrot.slane %v381_v42, %v14770_v63 }
 0xbb6   : > { %v7153_v3 = vadd.f32 1e-05, %v7121_v9  ;;  %v14771_v9 = vld [vmem:[#allocation74_spill] sm:$0xff] }
 0xbb7   : > { %v7003_v52 = vpop.xlane.xlu0 %7002 }
 0xbb8   : > { %9298 = vrsqrt.f32 %v7153_v3  ;;  %v7122_v45 = vmul.f32 0.004464286, %v7003_v52  ;;  %v14053_v3 = vrot.slane %v380_v4, %v14771_v9  ;;  %v14056_v52 = vrot.slane %v381_v42, %v14771_v9 }
 0xbba   : > { %v7154_v15 = vadd.f32 1e-05, %v7122_v45 }
 0xbbb   : > { %v7007_v50 = vpop.xlane.xlu1 %7006 }
 0xbbc   : > { %9300 = vrsqrt.f32 %v7154_v15  ;;  %v7123_v33 = vmul.f32 0.004464286, %v7007_v50 }
 0xbbe   : > { %v9297_v14 = vpop.eup %9296  ;;  %v7155_v5 = vadd.f32 1e-05, %v7123_v33 }
 0xbbf   : > { %v7216_v45 = vmul.f32 %v9297_v14, %v13689_v2  ;;  %v7217_v15 = vmul.f32 %v9297_v14, %v13692_v26  ;;  %v7011_v31 = vpop.xlane.xlu0 %7010 }
 0xbc0   : > { %9302 = vrsqrt.f32 %v7155_v5  ;;  %v7124_v50 = vmul.f32 0.004464286, %v7011_v31 }
 0xbc1   : > { %v7288_v32 = vmul.f32 %v14047_v43, %v7216_v45  ;;  %v7289_v63 = vmul.f32 %v14050_v54, %v7217_v15 }
 0xbc2   : > { %v9299_v46 = vpop.eup %9298  ;;  %v7156_v4 = vadd.f32 1e-05, %v7124_v50 }
 0xbc3   : > { %v7360_v2 = vadd.f32 %v14053_v3, %v7288_v32  ;;  %v7361_v26 = vadd.f32 %v14056_v52, %v7289_v63  ;;  %v7218_v31 = vmul.f32 %v9299_v46, %v13699_v44  ;;  %v7219_v42 = vmul.f32 %v9299_v46, %v13702_v8  ;;  %v7015_v33 = vpop.xlane.xlu1 %7014 }
 0xbc4   : > { %9304 = vrsqrt.f32 %v7156_v4  ;;  %v7125_v14 = vmul.f32 0.004464286, %v7015_v33 }
 0xbc5   : > { %7424 = vst [vmem:[%s14067_s12] sm:$0xff] %v7360_v2  ;;  %7425 = vst.msk [vmem:[%s14067_s12 + $0x8] sm:$0xff] %vm410_vm0, %v7361_v26  ;;  %v7290_v5 = vmul.f32 %v14047_v43, %v7218_v31  ;;  %v7291_v9 = vmul.f32 %v14050_v54, %v7219_v42 }
 0xbc6   : > { %v9301_v45 = vpop.eup %9300  ;;  %v7157_v32 = vadd.f32 1e-05, %v7125_v14 }
 0xbc7   : > { %v7362_v15 = vadd.f32 %v14053_v3, %v7290_v5  ;;  %v7363_v44 = vadd.f32 %v14056_v52, %v7291_v9  ;;  %v7220_v8 = vmul.f32 %v9301_v45, %v13710_v36  ;;  %v7221_v46 = vmul.f32 %v9301_v45, %v13713_v22  ;;  %v7019_v50 = vpop.xlane.xlu0 %7018 }
 0xbc8   : > { %9306 = vrsqrt.f32 %v7157_v32  ;;  %v7126_v63 = vmul.f32 0.004464286, %v7019_v50 }
 0xbc9   : > { %7426 = vst [vmem:[%s14067_s12 + $0x10] sm:$0xff] %v7362_v15  ;;  %7427 = vst.msk [vmem:[%s14067_s12 + $0x18] sm:$0xff] %vm410_vm0, %v7363_v44  ;;  %v7292_v4 = vmul.f32 %v14047_v43, %v7220_v8  ;;  %v7293_v2 = vmul.f32 %v14050_v54, %v7221_v46 }
 0xbca   : > { %v9303_v26 = vpop.eup %9302  ;;  %v7158_v31 = vadd.f32 1e-05, %v7126_v63 }
 0xbcb   : > { %v7364_v42 = vadd.f32 %v14053_v3, %v7292_v4  ;;  %v7365_v36 = vadd.f32 %v14056_v52, %v7293_v2  ;;  %v7222_v22 = vmul.f32 %v9303_v26, %v13721_v12  ;;  %v7223_v33 = vmul.f32 %v9303_v26, %v13724_v61  ;;  %v7023_v14 = vpop.xlane.xlu1 %7022 }
 0xbcc   : > { %9308 = vrsqrt.f32 %v7158_v31  ;;  %v7127_v5 = vmul.f32 0.004464286, %v7023_v14 }
 0xbcd   : > { %7428 = vst [vmem:[%s14067_s12 + $0x20] sm:$0xff] %v7364_v42  ;;  %7429 = vst.msk [vmem:[%s14067_s12 + $0x28] sm:$0xff] %vm410_vm0, %v7365_v36  ;;  %v7294_v9 = vmul.f32 %v14047_v43, %v7222_v22  ;;  %v7295_v45 = vmul.f32 %v14050_v54, %v7223_v33 }
 0xbce   : > { %v9305_v32 = vpop.eup %9304  ;;  %v7159_v15 = vadd.f32 1e-05, %v7127_v5 }
 0xbcf   : > { %v7366_v44 = vadd.f32 %v14053_v3, %v7294_v9  ;;  %v7367_v12 = vadd.f32 %v14056_v52, %v7295_v45  ;;  %v7224_v61 = vmul.f32 %v9305_v32, %v13732_v17  ;;  %v7225_v8 = vmul.f32 %v9305_v32, %v13735_v0  ;;  %v7027_v46 = vpop.xlane.xlu0 %7026 }
 0xbd0   : > { %9310 = vrsqrt.f32 %v7159_v15  ;;  %v7128_v50 = vmul.f32 0.004464286, %v7027_v46 }
 0xbd1   : > { %7430 = vst [vmem:[%s14067_s12 + $0x30] sm:$0xff] %v7366_v44  ;;  %7431 = vst.msk [vmem:[%s14067_s12 + $0x38] sm:$0xff] %vm410_vm0, %v7367_v12  ;;  %v7296_v63 = vmul.f32 %v14047_v43, %v7224_v61  ;;  %v7297_v4 = vmul.f32 %v14050_v54, %v7225_v8 }
 0xbd2   : > { %v9307_v2 = vpop.eup %9306  ;;  %v7160_v26 = vadd.f32 1e-05, %v7128_v50 }
 0xbd3   : > { %v7368_v31 = vadd.f32 %v14053_v3, %v7296_v63  ;;  %v7369_v17 = vadd.f32 %v14056_v52, %v7297_v4  ;;  %v7226_v0 = vmul.f32 %v9307_v2, %v13743_v59  ;;  %v7227_v42 = vmul.f32 %v9307_v2, %v13746_v13  ;;  %v7031_v36 = vpop.xlane.xlu1 %7030 }
 0xbd4   : > { %9312 = vrsqrt.f32 %v7160_v26  ;;  %v7129_v22 = vmul.f32 0.004464286, %v7031_v36 }
 0xbd5   : > { %7432 = vst [vmem:[%s14067_s12 + $0x40] sm:$0xff] %v7368_v31  ;;  %7433 = vst.msk [vmem:[%s14067_s12 + $0x48] sm:$0xff] %vm410_vm0, %v7369_v17  ;;  %v7298_v33 = vmul.f32 %v14047_v43, %v7226_v0  ;;  %v7299_v14 = vmul.f32 %v14050_v54, %v7227_v42 }
 0xbd6   : > { %v9309_v5 = vpop.eup %9308  ;;  %v7161_v9 = vadd.f32 1e-05, %v7129_v22 }
 0xbd7   : > { %v7370_v45 = vadd.f32 %v14053_v3, %v7298_v33  ;;  %v7371_v59 = vadd.f32 %v14056_v52, %v7299_v14  ;;  %v7228_v13 = vmul.f32 %v9309_v5, %v13754_v24  ;;  %v7229_v32 = vmul.f32 %v9309_v5, %v13757_v53  ;;  %v7035_v15 = vpop.xlane.xlu0 %7034 }
 0xbd8   : > { %9314 = vrsqrt.f32 %v7161_v9  ;;  %v7130_v44 = vmul.f32 0.004464286, %v7035_v15 }
 0xbd9   : > { %7434 = vst [vmem:[%s14067_s12 + $0x50] sm:$0xff] %v7370_v45  ;;  %7435 = vst.msk [vmem:[%s14067_s12 + $0x58] sm:$0xff] %vm410_vm0, %v7371_v59  ;;  %v7300_v12 = vmul.f32 %v14047_v43, %v7228_v13  ;;  %v7301_v61 = vmul.f32 %v14050_v54, %v7229_v32 }
 0xbda   : > { %v9311_v8 = vpop.eup %9310  ;;  %v7162_v46 = vadd.f32 1e-05, %v7130_v44 }
 0xbdb   : > { %v7372_v50 = vadd.f32 %v14053_v3, %v7300_v12  ;;  %v7373_v24 = vadd.f32 %v14056_v52, %v7301_v61  ;;  %v7230_v53 = vmul.f32 %v9311_v8, %v13765_v29  ;;  %v7231_v63 = vmul.f32 %v9311_v8, %v13768_v11  ;;  %v7039_v4 = vpop.xlane.xlu1 %7038 }
 0xbdc   : > { %9316 = vrsqrt.f32 %v7162_v46  ;;  %v7131_v2 = vmul.f32 0.004464286, %v7039_v4 }
 0xbdd   : > { %7436 = vst [vmem:[%s14067_s12 + $0x60] sm:$0xff] %v7372_v50  ;;  %7437 = vst.msk [vmem:[%s14067_s12 + $0x68] sm:$0xff] %vm410_vm0, %v7373_v24  ;;  %v7302_v26 = vmul.f32 %v14047_v43, %v7230_v53  ;;  %v7303_v31 = vmul.f32 %v14050_v54, %v7231_v63 }
 0xbde   : > { %v9313_v17 = vpop.eup %9312  ;;  %v7163_v0 = vadd.f32 1e-05, %v7131_v2 }
 0xbdf   : > { %v7374_v42 = vadd.f32 %v14053_v3, %v7302_v26  ;;  %v7375_v29 = vadd.f32 %v14056_v52, %v7303_v31  ;;  %v7232_v11 = vmul.f32 %v9313_v17, %v13776_v18  ;;  %v7233_v36 = vmul.f32 %v9313_v17, %v13779_v57  ;;  %v7043_v22 = vpop.xlane.xlu0 %7042 }
 0xbe0   : > { %9318 = vrsqrt.f32 %v7163_v0  ;;  %v7132_v33 = vmul.f32 0.004464286, %v7043_v22 }
 0xbe1   : > { %7438 = vst [vmem:[%s14067_s12 + $0x70] sm:$0xff] %v7374_v42  ;;  %7439 = vst.msk [vmem:[%s14067_s12 + $0x78] sm:$0xff] %vm410_vm0, %v7375_v29  ;;  %v7304_v14 = vmul.f32 %v14047_v43, %v7232_v11  ;;  %v7305_v5 = vmul.f32 %v14050_v54, %v7233_v36 }
 0xbe2   : > { %v9315_v9 = vpop.eup %9314  ;;  %v7164_v45 = vadd.f32 1e-05, %v7132_v33 }
 0xbe3   : > { %v7376_v59 = vadd.f32 %v14053_v3, %v7304_v14  ;;  %v7377_v18 = vadd.f32 %v14056_v52, %v7305_v5  ;;  %v7234_v57 = vmul.f32 %v9315_v9, %v13787_v56  ;;  %v7235_v13 = vmul.f32 %v9315_v9, %v13790_v62  ;;  %v7047_v32 = vpop.xlane.xlu1 %7046 }
 0xbe4   : > { %9320 = vrsqrt.f32 %v7164_v45  ;;  %v7133_v15 = vmul.f32 0.004464286, %v7047_v32 }
 0xbe5   : > { %7440 = vst [vmem:[%s14067_s12 + $0x80] sm:$0xff] %v7376_v59  ;;  %7441 = vst.msk [vmem:[%s14067_s12 + $0x88] sm:$0xff] %vm410_vm0, %v7377_v18  ;;  %v7306_v44 = vmul.f32 %v14047_v43, %v7234_v57  ;;  %v7307_v12 = vmul.f32 %v14050_v54, %v7235_v13 }
 0xbe6   : > { %v9317_v61 = vpop.eup %9316  ;;  %v7165_v8 = vadd.f32 1e-05, %v7133_v15 }
 0xbe7   : > { %v7378_v46 = vadd.f32 %v14053_v3, %v7306_v44  ;;  %v7379_v56 = vadd.f32 %v14056_v52, %v7307_v12  ;;  %v7236_v62 = vmul.f32 %v9317_v61, %v13798_v38  ;;  %v7237_v50 = vmul.f32 %v9317_v61, %v13801_v19  ;;  %v7051_v24 = vpop.xlane.xlu0 %7050 }
 0xbe8   : > { %9322 = vrsqrt.f32 %v7165_v8  ;;  %v7134_v53 = vmul.f32 0.004464286, %v7051_v24 }
 0xbe9   : > { %7442 = vst [vmem:[%s14067_s12 + $0x90] sm:$0xff] %v7378_v46  ;;  %7443 = vst.msk [vmem:[%s14067_s12 + $0x98] sm:$0xff] %vm410_vm0, %v7379_v56  ;;  %v7308_v63 = vmul.f32 %v14047_v43, %v7236_v62  ;;  %v7309_v4 = vmul.f32 %v14050_v54, %v7237_v50 }
 0xbea   : > { %v9319_v2 = vpop.eup %9318  ;;  %v7166_v26 = vadd.f32 1e-05, %v7134_v53 }
 0xbeb   : > { %v7380_v31 = vadd.f32 %v14053_v3, %v7308_v63  ;;  %v7381_v38 = vadd.f32 %v14056_v52, %v7309_v4  ;;  %v7238_v19 = vmul.f32 %v9319_v2, %v13809_v41  ;;  %v7239_v17 = vmul.f32 %v9319_v2, %v13812_v39  ;;  %v7055_v0 = vpop.xlane.xlu1 %7054 }
 0xbec   : > { %9324 = vrsqrt.f32 %v7166_v26  ;;  %v7135_v42 = vmul.f32 0.004464286, %v7055_v0 }
 0xbed   : > { %7444 = vst [vmem:[%s14067_s12 + $0xa0] sm:$0xff] %v7380_v31  ;;  %7445 = vst.msk [vmem:[%s14067_s12 + $0xa8] sm:$0xff] %vm410_vm0, %v7381_v38  ;;  %v7310_v29 = vmul.f32 %v14047_v43, %v7238_v19  ;;  %v7311_v11 = vmul.f32 %v14050_v54, %v7239_v17 }
 0xbee   : > { %v9321_v36 = vpop.eup %9320  ;;  %v7167_v22 = vadd.f32 1e-05, %v7135_v42 }
 0xbef   : > { %v7382_v33 = vadd.f32 %v14053_v3, %v7310_v29  ;;  %v7383_v41 = vadd.f32 %v14056_v52, %v7311_v11  ;;  %v7240_v39 = vmul.f32 %v9321_v36, %v13820_v25  ;;  %v7241_v14 = vmul.f32 %v9321_v36, %v13823_v34  ;;  %v7059_v5 = vpop.xlane.xlu0 %7058 }
 0xbf0   : > { %9326 = vrsqrt.f32 %v7167_v22  ;;  %v7136_v9 = vmul.f32 0.004464286, %v7059_v5 }
 0xbf1   : > { %7446 = vst [vmem:[%s14067_s12 + $0xb0] sm:$0xff] %v7382_v33  ;;  %7447 = vst.msk [vmem:[%s14067_s12 + $0xb8] sm:$0xff] %vm410_vm0, %v7383_v41  ;;  %v7312_v45 = vmul.f32 %v14047_v43, %v7240_v39  ;;  %v7313_v59 = vmul.f32 %v14050_v54, %v7241_v14 }
 0xbf2   : > { %v9323_v18 = vpop.eup %9322  ;;  %v7168_v57 = vadd.f32 1e-05, %v7136_v9 }
 0xbf3   : > { %v7384_v13 = vadd.f32 %v14053_v3, %v7312_v45  ;;  %v7385_v25 = vadd.f32 %v14056_v52, %v7313_v59  ;;  %v7242_v34 = vmul.f32 %v9323_v18, %v13831_v27  ;;  %v7243_v32 = vmul.f32 %v9323_v18, %v13834_v35  ;;  %v7063_v15 = vpop.xlane.xlu1 %7062 }
 0xbf4   : > { %9328 = vrsqrt.f32 %v7168_v57  ;;  %v7137_v44 = vmul.f32 0.004464286, %v7063_v15 }
 0xbf5   : > { %7448 = vst [vmem:[%s14067_s12 + $0xc0] sm:$0xff] %v7384_v13  ;;  %7449 = vst.msk [vmem:[%s14067_s12 + $0xc8] sm:$0xff] %vm410_vm0, %v7385_v25  ;;  %v7314_v12 = vmul.f32 %v14047_v43, %v7242_v34  ;;  %v7315_v61 = vmul.f32 %v14050_v54, %v7243_v32 }
 0xbf6   : > { %v9325_v8 = vpop.eup %9324  ;;  %v7169_v46 = vadd.f32 1e-05, %v7137_v44 }
 0xbf7   : > { %v7386_v56 = vadd.f32 %v14053_v3, %v7314_v12  ;;  %v7387_v27 = vadd.f32 %v14056_v52, %v7315_v61  ;;  %v7244_v35 = vmul.f32 %v9325_v8, %v13842_v6  ;;  %v7245_v62 = vmul.f32 %v9325_v8, %v13845_v60  ;;  %v7067_v50 = vpop.xlane.xlu0 %7066 }
 0xbf8   : > { %9330 = vrsqrt.f32 %v7169_v46  ;;  %v7138_v24 = vmul.f32 0.004464286, %v7067_v50 }
 0xbf9   : > { %7450 = vst [vmem:[%s14067_s12 + $0xd0] sm:$0xff] %v7386_v56  ;;  %7451 = vst.msk [vmem:[%s14067_s12 + $0xd8] sm:$0xff] %vm410_vm0, %v7387_v27  ;;  %v7316_v53 = vmul.f32 %v14047_v43, %v7244_v35  ;;  %v7317_v63 = vmul.f32 %v14050_v54, %v7245_v62 }
 0xbfa   : > { %v9327_v4 = vpop.eup %9326  ;;  %v7170_v2 = vadd.f32 1e-05, %v7138_v24 }
 0xbfb   : > { %v7388_v26 = vadd.f32 %v14053_v3, %v7316_v53  ;;  %v7389_v6 = vadd.f32 %v14056_v52, %v7317_v63  ;;  %v7246_v60 = vmul.f32 %v9327_v4, %v13853_v48  ;;  %v7247_v31 = vmul.f32 %v9327_v4, %v13856_v37  ;;  %v7071_v38 = vpop.xlane.xlu1 %7070 }
 0xbfc   : > { %9332 = vrsqrt.f32 %v7170_v2  ;;  %v7139_v19 = vmul.f32 0.004464286, %v7071_v38 }
 0xbfd   : > { %7452 = vst [vmem:[%s14067_s12 + $0xe0] sm:$0xff] %v7388_v26  ;;  %7453 = vst.msk [vmem:[%s14067_s12 + $0xe8] sm:$0xff] %vm410_vm0, %v7389_v6  ;;  %v7318_v17 = vmul.f32 %v14047_v43, %v7246_v60  ;;  %v7319_v0 = vmul.f32 %v14050_v54, %v7247_v31 }
 0xbfe   : > { %v9329_v42 = vpop.eup %9328  ;;  %v7171_v29 = vadd.f32 1e-05, %v7139_v19 }
 0xbff   : > { %v7390_v11 = vadd.f32 %v14053_v3, %v7318_v17  ;;  %v7391_v48 = vadd.f32 %v14056_v52, %v7319_v0  ;;  %v7248_v37 = vmul.f32 %v9329_v42, %v13864_v1  ;;  %v7249_v36 = vmul.f32 %v9329_v42, %v13867_v47  ;;  %v7075_v22 = vpop.xlane.xlu0 %7074  ;;  %v14772_v42 = vld [vmem:[#allocation45_spill] sm:$0xff] }
 0xc00   : > { %9334 = vrsqrt.f32 %v7171_v29  ;;  %v7140_v33 = vmul.f32 0.004464286, %v7075_v22 }
 0xc01   : > { %7454 = vst [vmem:[%s14067_s12 + $0xf0] sm:$0xff] %v7390_v11  ;;  %7455 = vst.msk [vmem:[%s14067_s12 + $0xf8] sm:$0xff] %vm410_vm0, %v7391_v48  ;;  %v7320_v41 = vmul.f32 %v14047_v43, %v7248_v37  ;;  %v7321_v39 = vmul.f32 %v14050_v54, %v7249_v36 }
 0xc02   : > { %v9331_v14 = vpop.eup %9330  ;;  %v7172_v5 = vadd.f32 1e-05, %v7140_v33 }
 0xc03   : > { %v7392_v9 = vadd.f32 %v14053_v3, %v7320_v41  ;;  %v7393_v1 = vadd.f32 %v14056_v52, %v7321_v39  ;;  %v7250_v47 = vmul.f32 %v9331_v14, %v13875_v49  ;;  %v7251_v45 = vmul.f32 %v9331_v14, %v13878_v20  ;;  %v7079_v59 = vpop.xlane.xlu1 %7078  ;;  %v14773_v39 = vld [vmem:[#allocation79_spill] sm:$0xff] }
 0xc04   : > { %9336 = vrsqrt.f32 %v7172_v5  ;;  %v7141_v18 = vmul.f32 0.004464286, %v7079_v59  ;;  %v14774_v5 = vld [vmem:[#allocation48_spill] sm:$0xff] }
 0xc05   : > { %7456 = vst [vmem:[%s14067_s12 + $0x100] sm:$0xff] %v7392_v9  ;;  %7457 = vst.msk [vmem:[%s14067_s12 + $0x108] sm:$0xff] %vm410_vm0, %v7393_v1  ;;  %v7322_v57 = vmul.f32 %v14047_v43, %v7250_v47  ;;  %v7323_v13 = vmul.f32 %v14050_v54, %v7251_v45 }
 0xc06   : > { %v9333_v25 = vpop.eup %9332  ;;  %v7173_v34 = vadd.f32 1e-05, %v7141_v18 }
 0xc07   : > { %v7394_v32 = vadd.f32 %v14053_v3, %v7322_v57  ;;  %v7395_v49 = vadd.f32 %v14056_v52, %v7323_v13  ;;  %v7252_v20 = vmul.f32 %v9333_v25, %v13886_v58  ;;  %v7253_v15 = vmul.f32 %v9333_v25, %v13889_v16  ;;  %v7083_v44 = vpop.xlane.xlu0 %7082 }
 0xc08   : > { %9338 = vrsqrt.f32 %v7173_v34  ;;  %v7142_v12 = vmul.f32 0.004464286, %v7083_v44  ;;  %v14775_v34 = vld [vmem:[#allocation47_spill] sm:$0xff] }
 0xc09   : > { %7458 = vst [vmem:[%s14067_s12 + $0x110] sm:$0xff] %v7394_v32  ;;  %7459 = vst.msk [vmem:[%s14067_s12 + $0x118] sm:$0xff] %vm410_vm0, %v7395_v49  ;;  %v7324_v61 = vmul.f32 %v14047_v43, %v7252_v20  ;;  %v7325_v8 = vmul.f32 %v14050_v54, %v7253_v15  ;;  %v14776_v49 = vld [vmem:[#allocation80_spill] sm:$0xff] }
 0xc0a   : > { %v9335_v46 = vpop.eup %9334  ;;  %v7174_v56 = vadd.f32 1e-05, %v7142_v12 }
 0xc0b   : > { %v7396_v27 = vadd.f32 %v14053_v3, %v7324_v61  ;;  %v7397_v58 = vadd.f32 %v14056_v52, %v7325_v8  ;;  %v7254_v16 = vmul.f32 %v9335_v46, %v13897_v21  ;;  %v7255_v35 = vmul.f32 %v9335_v46, %v13900_v30  ;;  %v7087_v62 = vpop.xlane.xlu1 %7086 }
 0xc0c   : > { %9340 = vrsqrt.f32 %v7174_v56  ;;  %v7143_v50 = vmul.f32 0.004464286, %v7087_v62 }
 0xc0d   : > { %7460 = vst [vmem:[%s14067_s12 + $0x120] sm:$0xff] %v7396_v27  ;;  %7461 = vst.msk [vmem:[%s14067_s12 + $0x128] sm:$0xff] %vm410_vm0, %v7397_v58  ;;  %v7326_v24 = vmul.f32 %v14047_v43, %v7254_v16  ;;  %v7327_v53 = vmul.f32 %v14050_v54, %v7255_v35  ;;  %v14777_v58 = vld [vmem:[#allocation50_spill] sm:$0xff]  ;;  %v14778_v35 = vld [vmem:[#allocation49_spill] sm:$0xff] }
 0xc0e   : > { %v9337_v63 = vpop.eup %9336  ;;  %v7175_v4 = vadd.f32 1e-05, %v7143_v50 }
 0xc0f   : > { %v7398_v2 = vadd.f32 %v14053_v3, %v7326_v24  ;;  %v7399_v21 = vadd.f32 %v14056_v52, %v7327_v53  ;;  %v7256_v30 = vmul.f32 %v9337_v63, %v13908_v40  ;;  %v7257_v26 = vmul.f32 %v9337_v63, %v13911_v10  ;;  %v7091_v6 = vpop.xlane.xlu0 %7090 }
 0xc10   : > { %9342 = vrsqrt.f32 %v7175_v4  ;;  %v7144_v60 = vmul.f32 0.004464286, %v7091_v6 }
 0xc11   : > { %7462 = vst [vmem:[%s14067_s12 + $0x130] sm:$0xff] %v7398_v2  ;;  %7463 = vst.msk [vmem:[%s14067_s12 + $0x138] sm:$0xff] %vm410_vm0, %v7399_v21  ;;  %v7328_v31 = vmul.f32 %v14047_v43, %v7256_v30  ;;  %v7329_v38 = vmul.f32 %v14050_v54, %v7257_v26  ;;  %v14779_v26 = vld [vmem:[#allocation81_spill] sm:$0xff] }
 0xc12   : > { %v9339_v19 = vpop.eup %9338  ;;  %v7176_v17 = vadd.f32 1e-05, %v7144_v60  ;;  %v14780_v60 = vld [vmem:[#allocation52_spill] sm:$0xff] }
 0xc13   : > { %v7400_v0 = vadd.f32 %v14053_v3, %v7328_v31  ;;  %v7401_v40 = vadd.f32 %v14056_v52, %v7329_v38  ;;  %v7258_v10 = vmul.f32 %v9339_v19, %v13919_v28  ;;  %v7259_v29 = vmul.f32 %v9339_v19, %v14772_v42  ;;  %v7095_v11 = vpop.xlane.xlu1 %7094 }
 0xc14   : > { %9344 = vrsqrt.f32 %v7176_v17  ;;  %v7145_v48 = vmul.f32 0.004464286, %v7095_v11  ;;  %v14781_v11 = vld [vmem:[#allocation51_spill] sm:$0xff] }
 0xc15   : > { %7464 = vst [vmem:[%s14067_s12 + $0x140] sm:$0xff] %v7400_v0  ;;  %7465 = vst.msk [vmem:[%s14067_s12 + $0x148] sm:$0xff] %vm410_vm0, %v7401_v40  ;;  %v7330_v37 = vmul.f32 %v14047_v43, %v7258_v10  ;;  %v7331_v36 = vmul.f32 %v14050_v54, %v7259_v29 }
 0xc16   : > { %v9341_v22 = vpop.eup %9340  ;;  %v7177_v33 = vadd.f32 1e-05, %v7145_v48 }
 0xc17   : > { %v7402_v41 = vadd.f32 %v14053_v3, %v7330_v37  ;;  %v7403_v28 = vadd.f32 %v14056_v52, %v7331_v36  ;;  %v7260_v14 = vmul.f32 %v9341_v22, %v14773_v39  ;;  %v7261_v9 = vmul.f32 %v9341_v22, %v14774_v5  ;;  %v7099_v1 = vpop.xlane.xlu0 %7098  ;;  %v14782_v37 = vld [vmem:[#allocation82_spill] sm:$0xff] }
 0xc18   : > { %9346 = vrsqrt.f32 %v7177_v33  ;;  %v7146_v47 = vmul.f32 0.004464286, %v7099_v1  ;;  %v14783_v1 = vld [vmem:[#allocation54_spill] sm:$0xff] }
 0xc19   : > { %7466 = vst [vmem:[%s14067_s12 + $0x150] sm:$0xff] %v7402_v41  ;;  %7467 = vst.msk [vmem:[%s14067_s12 + $0x158] sm:$0xff] %vm410_vm0, %v7403_v28  ;;  %v7332_v45 = vmul.f32 %v14047_v43, %v7260_v14  ;;  %v7333_v59 = vmul.f32 %v14050_v54, %v7261_v9 }
 0xc1a   : > { %v9343_v18 = vpop.eup %9342  ;;  %v7178_v57 = vadd.f32 1e-05, %v7146_v47 }
 0xc1b   : > { %v7404_v13 = vadd.f32 %v14053_v3, %v7332_v45  ;;  %v7405_v25 = vadd.f32 %v14056_v52, %v7333_v59  ;;  %v7262_v32 = vmul.f32 %v9343_v18, %v14775_v34  ;;  %v7263_v20 = vmul.f32 %v9343_v18, %v14776_v49  ;;  %v7103_v15 = vpop.xlane.xlu1 %7102 }
 0xc1c   : > { %9348 = vrsqrt.f32 %v7178_v57  ;;  %v7147_v44 = vmul.f32 0.004464286, %v7103_v15 }
 0xc1d   : > { %7468 = vst [vmem:[%s14067_s12 + $0x160] sm:$0xff] %v7404_v13  ;;  %7469 = vst.msk [vmem:[%s14067_s12 + $0x168] sm:$0xff] %vm410_vm0, %v7405_v25  ;;  %v7334_v12 = vmul.f32 %v14047_v43, %v7262_v32  ;;  %v7335_v61 = vmul.f32 %v14050_v54, %v7263_v20 }
 0xc1e   : > { %v9345_v8 = vpop.eup %9344  ;;  %v7179_v46 = vadd.f32 1e-05, %v7147_v44 }
 0xc1f   : > { %v7406_v56 = vadd.f32 %v14053_v3, %v7334_v12  ;;  %v7407_v27 = vadd.f32 %v14056_v52, %v7335_v61  ;;  %v7264_v16 = vmul.f32 %v9345_v8, %v14777_v58  ;;  %v7265_v62 = vmul.f32 %v9345_v8, %v14778_v35  ;;  %v7107_v50 = vpop.xlane.xlu0 %7106 }
 0xc20   : > { %9350 = vrsqrt.f32 %v7179_v46  ;;  %v7148_v24 = vmul.f32 0.004464286, %v7107_v50  ;;  %v14785_v50 = vld [vmem:[#allocation83_spill] sm:$0xff] }
 0xc21   : > { %7470 = vst [vmem:[%s14067_s12 + $0x170] sm:$0xff] %v7406_v56  ;;  %7471 = vst.msk [vmem:[%s14067_s12 + $0x178] sm:$0xff] %vm410_vm0, %v7407_v27  ;;  %v7336_v53 = vmul.f32 %v14047_v43, %v7264_v16  ;;  %v7337_v63 = vmul.f32 %v14050_v54, %v7265_v62 }
 0xc22   : > { %v9347_v4 = vpop.eup %9346  ;;  %v7180_v2 = vadd.f32 1e-05, %v7148_v24 }
 0xc23   : > { %v7408_v21 = vadd.f32 %v14053_v3, %v7336_v53  ;;  %v7409_v30 = vadd.f32 %v14056_v52, %v7337_v63  ;;  %v7266_v6 = vmul.f32 %v9347_v4, %v14779_v26  ;;  %v7267_v31 = vmul.f32 %v9347_v4, %v14780_v60  ;;  %v7111_v38 = vpop.xlane.xlu1 %7110  ;;  %v14786_v53 = vld [vmem:[#allocation56_spill] sm:$0xff] }
 0xc24   : > { %9352 = vrsqrt.f32 %v7180_v2  ;;  %v7149_v19 = vmul.f32 0.004464286, %v7111_v38 }
 0xc25   : > { %7472 = vst [vmem:[%s14067_s12 + $0x180] sm:$0xff] %v7408_v21  ;;  %7473 = vst.msk [vmem:[%s14067_s12 + $0x188] sm:$0xff] %vm410_vm0, %v7409_v30  ;;  %v7338_v17 = vmul.f32 %v14047_v43, %v7266_v6  ;;  %v7339_v0 = vmul.f32 %v14050_v54, %v7267_v31  ;;  %v14787_v30 = vld [vmem:[#allocation55_spill] sm:$0xff]  ;;  %v14788_v6 = vld [vmem:[#allocation84_spill] sm:$0xff] }
 0xc26   : > { %v9349_v40 = vpop.eup %9348  ;;  %v7181_v10 = vadd.f32 1e-05, %v7149_v19 }
 0xc27   : > { %v7410_v42 = vadd.f32 %v14053_v3, %v7338_v17  ;;  %v7411_v29 = vadd.f32 %v14056_v52, %v7339_v0  ;;  %v7268_v48 = vmul.f32 %v9349_v40, %v14781_v11  ;;  %v7269_v36 = vmul.f32 %v9349_v40, %v14782_v37  ;;  %v7115_v22 = vpop.xlane.xlu0 %7114 }
 0xc28   : > { %9354 = vrsqrt.f32 %v7181_v10  ;;  %v7150_v33 = vmul.f32 0.004464286, %v7115_v22 }
 0xc29   : > { %7474 = vst [vmem:[%s14067_s12 + $0x190] sm:$0xff] %v7410_v42  ;;  %7475 = vst.msk [vmem:[%s14067_s12 + $0x198] sm:$0xff] %vm410_vm0, %v7411_v29  ;;  %v7340_v41 = vmul.f32 %v14047_v43, %v7268_v48  ;;  %v7341_v28 = vmul.f32 %v14050_v54, %v7269_v36 }
 0xc2a   : > { %v9351_v39 = vpop.eup %9350  ;;  %v7182_v14 = vadd.f32 1e-05, %v7150_v33 }
 0xc2b   : > { %v7412_v5 = vadd.f32 %v14053_v3, %v7340_v41  ;;  %v7413_v9 = vadd.f32 %v14056_v52, %v7341_v28  ;;  %v7270_v47 = vmul.f32 %v9351_v39, %v14783_v1  ;;  %v7271_v45 = vmul.f32 %v9351_v39, %v13988_v55  ;;  %v7119_v59 = vpop.xlane.xlu1 %7118  ;;  %v14784_v55 = vld [vmem:[#allocation53_spill] sm:$0xff] }
 0xc2c   : > { %9356 = vrsqrt.f32 %v7182_v14  ;;  %v7151_v18 = vmul.f32 0.004464286, %v7119_v59 }
 0xc2d   : > { %7476 = vst [vmem:[%s14067_s12 + $0x1a0] sm:$0xff] %v7412_v5  ;;  %7477 = vst.msk [vmem:[%s14067_s12 + $0x1a8] sm:$0xff] %vm410_vm0, %v7413_v9  ;;  %v7342_v57 = vmul.f32 %v14047_v43, %v7270_v47  ;;  %v7343_v13 = vmul.f32 %v14050_v54, %v7271_v45 }
 0xc2e   : > { %v9353_v25 = vpop.eup %9352  ;;  %v7183_v34 = vadd.f32 1e-05, %v7151_v18 }
 0xc2f   : > { %v7414_v32 = vadd.f32 %v14053_v3, %v7342_v57  ;;  %v7415_v49 = vadd.f32 %v14056_v52, %v7343_v13  ;;  %v7272_v20 = vmul.f32 %v9353_v25, %v14784_v55  ;;  %v7273_v15 = vmul.f32 %v9353_v25, %v13999_v7 }
 0xc30   : > { %9358 = vrsqrt.f32 %v7183_v34 }
 0xc31   : > { %7478 = vst [vmem:[%s14067_s12 + $0x1b0] sm:$0xff] %v7414_v32  ;;  %7479 = vst.msk [vmem:[%s14067_s12 + $0x1b8] sm:$0xff] %vm410_vm0, %v7415_v49  ;;  %v7344_v44 = vmul.f32 %v14047_v43, %v7272_v20  ;;  %v7345_v12 = vmul.f32 %v14050_v54, %v7273_v15 }
 0xc32   : > { %v9355_v61 = vpop.eup %9354 }
 0xc33   : > { %v7416_v8 = vadd.f32 %v14053_v3, %v7344_v44  ;;  %v7417_v46 = vadd.f32 %v14056_v52, %v7345_v12  ;;  %v7274_v56 = vmul.f32 %v9355_v61, %v14007_v51  ;;  %v7275_v27 = vmul.f32 %v9355_v61, %v14010_v23 }
 0xc35   : > { %7480 = vst [vmem:[%s14067_s12 + $0x1c0] sm:$0xff] %v7416_v8  ;;  %7481 = vst.msk [vmem:[%s14067_s12 + $0x1c8] sm:$0xff] %vm410_vm0, %v7417_v46  ;;  %v7346_v7 = vmul.f32 %v14047_v43, %v7274_v56  ;;  %v7347_v58 = vmul.f32 %v14050_v54, %v7275_v27 }
 0xc36   : > { %v9357_v16 = vpop.eup %9356 }
 0xc37   : > { %v7418_v35 = vadd.f32 %v14053_v3, %v7346_v7  ;;  %v7419_v62 = vadd.f32 %v14056_v52, %v7347_v58  ;;  %v7276_v24 = vmul.f32 %v9357_v16, %v14785_v50  ;;  %v7277_v51 = vmul.f32 %v9357_v16, %v14786_v53 }
 0xc39   : > { %7482 = vst [vmem:[%s14067_s12 + $0x1d0] sm:$0xff] %v7418_v35  ;;  %7483 = vst.msk [vmem:[%s14067_s12 + $0x1d8] sm:$0xff] %vm410_vm0, %v7419_v62  ;;  %v7348_v23 = vmul.f32 %v14047_v43, %v7276_v24  ;;  %v7349_v63 = vmul.f32 %v14050_v54, %v7277_v51 }
 0xc3a   : > { %v9359_v4 = vpop.eup %9358 }
 0xc3b   : > { %v7420_v2 = vadd.f32 %v14053_v3, %v7348_v23  ;;  %v7421_v21 = vadd.f32 %v14056_v52, %v7349_v63  ;;  %v7278_v26 = vmul.f32 %v9359_v4, %v14787_v30  ;;  %v7279_v60 = vmul.f32 %v9359_v4, %v14788_v6 }
 0xc3d   : > { %7484 = vst [vmem:[%s14067_s12 + $0x1e0] sm:$0xff] %v7420_v2  ;;  %7485 = vst.msk [vmem:[%s14067_s12 + $0x1e8] sm:$0xff] %vm410_vm0, %v7421_v21  ;;  %v7350_v31 = vmul.f32 %v14047_v43, %v7278_v26  ;;  %v7351_v38 = vmul.f32 %v14050_v54, %v7279_v60 }
 0xc3f   : > { %v7422_v19 = vadd.f32 %v14053_v3, %v7350_v31  ;;  %v7423_v17 = vadd.f32 %v14056_v52, %v7351_v38 }
 0xc41   : > { %7486 = vst [vmem:[%s14067_s12 + $0x1f0] sm:$0xff] %v7422_v19  ;;  %7487 = vst.msk [vmem:[%s14067_s12 + $0x1f8] sm:$0xff] %vm410_vm0, %v7423_v17 }
 0xc42 PF: > { %s18_s27 = sadd.s32 1, %s9624_s27  }
 0xc43   : > { %p15_p4 = scmp.ge.s32.totalorder %s18_s27, 4  }
 0xc45   :  { %17 = sbr.rel (!%p15_p4) target bundleno = 1 (0x1), region = 88 }

</bundles_post_ra>
